<compile_context>
chip_gen: v6e
topology: v6e:2x2x1
jax: 0.10.0
libtpu: 0.0.40
codegen_flags: <defaults>
</compile_context>

<pallas_src>
import numpy as np
import jax
import jax.numpy as jnp
from jax.experimental import pallas as pl
from jax.experimental.pallas import tpu as pltpu  # noqa: F401  (TPU backend)

_LANE = 128


def _pad_to_lane(c):
    return ((c + _LANE - 1) // _LANE) * _LANE


# ----------------------------------------------------------------------------
# Fused Pallas kernel (data_bn + every ST_GCN block, single invocation)
# ----------------------------------------------------------------------------
def _build_fused_kernel(metas, V):
    """metas: list of dicts {'mode', 'mix_first', 'n_refs'} per ST_GCN block."""
    n_fixed = 5  # x, dbn_scale, dbn_shift, mask_prev, mask_next

    def kernel(*refs):
        f32 = jnp.float32
        bf16 = jnp.bfloat16
        in_refs, o_ref = refs[:-1], refs[-1]
        x_ref, s_ref, b_ref, mprev_ref, mnext_ref = in_refs[:n_fixed]

        # data_bn (BatchNorm1d over flattened (camera, channel)), eval mode,
        # folded to a per-(row, channel) scale/shift.
        x = x_ref[...] * s_ref[...] + b_ref[...]
        m_prev = mprev_ref[...]   # (R, 1): 0.0 where t == 0   else 1.0
        m_next = mnext_ref[...]   # (R, 1): 0.0 where t == T-1 else 1.0

        idx = n_fixed
        for meta in metas:
            blk = in_refs[idx: idx + meta["n_refs"]]
            idx += meta["n_refs"]
            it = iter(blk)
            S = next(it)[...]                       # (R, R) kron(I, A_eff^T)
            gw = next(it)[...]                      # bf16 (Cin_p, Cout_p)
            gb = next(it)[...]                      # f32  (1, Cout_p)
            b1s = next(it)[...]; b1b = next(it)[...]
            tw0 = next(it)[...]; tw1 = next(it)[...]; tw2 = next(it)[...]
            tb = next(it)[...]
            b2s = next(it)[...]; b2b = next(it)[...]
            smix = next(it)[...] if meta["mix_first"] else None
            if meta["mode"] == "conv":
                rw = next(it)[...]; rb = next(it)[...]
                rbs = next(it)[...]; rbb = next(it)[...]

            # --- ConvTemporalGraphical: 1x1 conv + adjacency row-mix --------
            if meta["mix_first"]:
                # Mix on the narrow-channel side; gb is added before the mix
                # in the reference, so correct the bias with (S @ 1) * gb.
                xm = jnp.dot(S, x, preferred_element_type=f32)
                y = jnp.dot(xm.astype(bf16), gw, preferred_element_type=f32)
                y = y + smix * gb
            else:
                y = jnp.dot(x.astype(bf16), gw, preferred_element_type=f32) + gb
                y = jnp.dot(S, y, preferred_element_type=f32)

            # --- tcn: BN (folded) -> ReLU -> (3,1) temporal conv -> BN -------
            h = jnp.maximum(y * b1s + b1b, 0.0)
            C = h.shape[1]
            z = jnp.zeros((V, C), f32)
            # +/-1 frame shift = +/-V row shift; boundary frames zeroed so
            # nothing leaks across the t=0 / t=T-1 edges or across batches.
            h_prev = jnp.concatenate([z, h[:-V, :]], axis=0) * m_prev
            h_next = jnp.concatenate([h[V:, :], z], axis=0) * m_next
            t = (jnp.dot(h_prev.astype(bf16), tw0, preferred_element_type=f32)
                 + jnp.dot(h.astype(bf16), tw1, preferred_element_type=f32)
                 + jnp.dot(h_next.astype(bf16), tw2, preferred_element_type=f32)
                 + tb)
            t = t * b2s + b2b
            # Dropout: eval mode -> identity.

            # --- residual + ReLU ---------------------------------------------
            if meta["mode"] == "identity":
                t = t + x
            elif meta["mode"] == "conv":
                r = jnp.dot(x.astype(bf16), rw, preferred_element_type=f32) + rb
                t = t + (r * rbs + rbb)
            x = jnp.maximum(t, 0.0)

        o_ref[...] = x

    return kernel


# ----------------------------------------------------------------------------
# Model wrapper (reshapes / parameter prep / padding in plain JAX)
# ----------------------------------------------------------------------------
def camera_st_gcn_forward(x, batch_sz, A, dbn_s, dbn_b, blocks, window, num_cameras):
    N, V, T = batch_sz, num_cameras, window
    x = x.reshape(N, V, T, -1)                                # (B, V, T, F)
    F = x.shape[-1]
    R = N * T * V
    Fp = _pad_to_lane(F)

    # -> kernel layout (R, Fp), rows ordered (n, t, v), lane-padded channels
    x2d = jnp.transpose(x, (0, 2, 1, 3)).reshape(R, F).astype(jnp.float32)
    x2d = jnp.pad(x2d, ((0, 0), (0, Fp - F)))

    # data_bn (eval): per-(camera, channel) affine, broadcast to rows
    s_vc = jnp.pad(dbn_s.reshape(V, F).astype(jnp.float32), ((0, 0), (0, Fp - F)))
    b_vc = jnp.pad(dbn_b.reshape(V, F).astype(jnp.float32), ((0, 0), (0, Fp - F)))
    s_full = jnp.tile(s_vc, (N * T, 1))
    b_full = jnp.tile(b_vc, (N * T, 1))

    # Temporal boundary masks for the +/-1 frame shift (zero the frame that
    # would otherwise wrap across the sequence edge or leak between batches).
    t_idx = (np.arange(R) % (T * V)) // V
    mask_prev = jnp.asarray((t_idx != 0).astype(np.float32).reshape(R, 1))
    mask_next = jnp.asarray((t_idx != T - 1).astype(np.float32).reshape(R, 1))

    eye_nt = np.eye(N * T, dtype=np.float32)

    inputs = [x2d, s_full, b_full, mask_prev, mask_next]
    metas = []
    Cin, Cin_p = F, Fp
    for p in blocks:
        Cout = p["gw"].shape[1]
        Cout_p = _pad_to_lane(Cout)
        mode = p["mode"]
        mix_first = Cout > Cin          # apply adjacency mix on the narrow side

        A_eff = A * p["importance"]
        S = jnp.kron(jnp.asarray(eye_nt), A_eff.T)            # (R, R) block-diag

        def row(v):
            return jnp.pad(v.reshape(1, Cout).astype(jnp.float32),
                           ((0, 0), (0, Cout_p - Cout)))

        def pad_w(w):   # (Cin, Cout) -> bf16 (Cin_p, Cout_p)
            return jnp.pad(w, ((0, Cin_p - w.shape[0]),
                               (0, Cout_p - w.shape[1]))).astype(jnp.bfloat16)

        def pad_t(w):   # (Cout, Cout) -> bf16 (Cout_p, Cout_p)
            return jnp.pad(w, ((0, Cout_p - w.shape[0]),
                               (0, Cout_p - w.shape[1]))).astype(jnp.bfloat16)

        blk_in = [S,
                  pad_w(p["gw"]), row(p["gb"]),
                  row(p["bn1_s"]), row(p["bn1_b"]),
                  pad_t(p["tw"][0]), pad_t(p["tw"][1]), pad_t(p["tw"][2]),
                  row(p["tb"]),
                  row(p["bn2_s"]), row(p["bn2_b"])]
        if mix_first:
            colsum = jnp.sum(A_eff, axis=0)                   # S @ 1 per camera
            blk_in.append(jnp.tile(colsum.reshape(V, 1), (N * T, 1)))  # (R, 1)
        if mode == "conv":
            blk_in += [pad_w(p["rw"]), row(p["rb"]),
                       row(p["rbn_s"]), row(p["rbn_b"])]

        metas.append({"mode": mode, "mix_first": mix_first, "n_refs": len(blk_in)})
        inputs += blk_in
        Cin, Cin_p = Cout, Cout_p

    out2d = pl.pallas_call(
        _build_fused_kernel(metas, V),
        out_shape=jax.ShapeDtypeStruct((R, Cin_p), jnp.float32),
        # No grid / no BlockSpecs: single invocation, all operands (~4 MB) and
        # intermediates resident in VMEM (fits default scoped VMEM on v5e/v6e/v7x).
    )(*inputs)

    out2d = out2d[:, :Cin]                                    # drop lane padding
    out = out2d.reshape(N, T, V, Cin)
    out = jnp.transpose(out, (0, 2, 1, 3))                    # (N, V, T, C)
    return out.reshape(-1, 3, 14, 14)


# ----------------------------------------------------------------------------
# Pure-JAX NCHW reference (mirrors the PyTorch forward, eval mode)
# ----------------------------------------------------------------------------
def reference_forward(x_in, A, dbn_s, dbn_b, blocks):
    hi = jax.lax.Precision.HIGHEST
    x = jnp.transpose(x_in, (0, 3, 2, 1))[..., None]          # (B, C, T, V, 1)
    N, C, T, V, M = x.shape
    x = jnp.transpose(x, (0, 4, 3, 1, 2)).reshape(N * M, V * C, T)
    x = x * dbn_s[None, :, None] + dbn_b[None, :, None]
    x = x.reshape(N, M, V, C, T)
    x = jnp.transpose(x, (0, 1, 3, 4, 2)).reshape(N * M, C, T, V)
    for p in blocks:
        A_eff = A * p["importance"]
        if p["mode"] == "none":
            res = 0.0
        elif p["mode"] == "identity":
            res = x
        else:
            r = jnp.einsum("nctv,cd->ndtv", x, p["rw"], precision=hi) \
                + p["rb"][None, :, None, None]
            res = r * p["rbn_s"][None, :, None, None] + p["rbn_b"][None, :, None, None]
        y = jnp.einsum("nctv,cd->ndtv", x, p["gw"], precision=hi) \
            + p["gb"][None, :, None, None]
        y = jnp.einsum("nctv,vw->nctw", y, A_eff, precision=hi)
        h = jnp.maximum(y * p["bn1_s"][None, :, None, None]
                        + p["bn1_b"][None, :, None, None], 0.0)
        hpad = jnp.pad(h, ((0, 0), (0, 0), (1, 1), (0, 0)))
        t = sum(jnp.einsum("nctv,cd->ndtv", hpad[:, :, k:k + T, :], p["tw"][k],
                           precision=hi) for k in range(3))
        t = t + p["tb"][None, :, None, None]
        t = t * p["bn2_s"][None, :, None, None] + p["bn2_b"][None, :, None, None]
        x = jnp.maximum(t + res, 0.0)
    Cend = x.shape[1]
    x = x.reshape(N, M, Cend, T, V)[:, 0]
    x = jnp.transpose(x, (0, 3, 2, 1))
    return x.reshape(-1, 3, 14, 14)


# ----------------------------------------------------------------------------
# Deterministic parameter construction
# ----------------------------------------------------------------------------
def build_camera_spatial_graph(num_cameras):
    # TODO(synk): build_camera_spatial_graph is not provided in the reference;
    # use a deterministic self-loop + ring adjacency, column-normalized.
    v = num_cameras
    adj = np.eye(v) + np.eye(v, k=1) + np.eye(v, k=-1)
    adj[0, v - 1] = 1.0
    adj[v - 1, 0] = 1.0
    adj = adj / adj.sum(axis=0, keepdims=True)
    return jnp.asarray(adj, dtype=jnp.float32)


def fold_bn(key, c, eps=1e-5):
    k1, k2, k3, k4 = jax.random.split(key, 4)
    gamma = 1.0 + 0.1 * jax.random.normal(k1, (c,), jnp.float32)
    beta = 0.1 * jax.random.normal(k2, (c,), jnp.float32)
    mean = 0.1 * jax.random.normal(k3, (c,), jnp.float32)
    var = 1.0 + 0.1 * jnp.abs(jax.random.normal(k4, (c,), jnp.float32))
    scale = gamma * jax.lax.rsqrt(var + eps)
    shift = beta - mean * scale
    return scale, shift


def init_block(key, cin, cout, mode, num_cameras):
    ks = jax.random.split(key, 10)
    p = {"mode": mode}
    p["gw"] = jax.random.normal(ks[0], (cin, cout), jnp.float32) / np.sqrt(cin)
    p["gb"] = 0.1 * jax.random.normal(ks[1], (cout,), jnp.float32)
    p["bn1_s"], p["bn1_b"] = fold_bn(ks[2], cout)
    p["tw"] = jax.random.normal(ks[3], (3, cout, cout), jnp.float32) / np.sqrt(3 * cout)
    p["tb"] = 0.1 * jax.random.normal(ks[4], (cout,), jnp.float32)
    p["bn2_s"], p["bn2_b"] = fold_bn(ks[5], cout)
    p["importance"] = 1.0 + 0.05 * jax.random.normal(
        ks[6], (num_cameras, num_cameras), jnp.float32)
    if mode == "conv":
        p["rw"] = jax.random.normal(ks[7], (cin, cout), jnp.float32) / np.sqrt(cin)
        p["rb"] = 0.1 * jax.random.normal(ks[8], (cout,), jnp.float32)
        p["rbn_s"], p["rbn_b"] = fold_bn(ks[9], cout)
    return p


# ----------------------------------------------------------------------------
if __name__ == "__main__":
    key = jax.random.PRNGKey(0)
    B = 2
    num_cameras = 6
    window = 6
    in_channels = 588          # 3*14*14 -> required by final view(-1, 3, 14, 14)
    base_channels = 32         # reduced from default 64 to keep shapes small
    num_layers = 2             # reduced from default 3

    A = build_camera_spatial_graph(num_cameras)

    keys = jax.random.split(key, 4)
    dbn_s, dbn_b = fold_bn(keys[0], in_channels * num_cameras)

    # Block plan mirroring CameraST_GCN.__init__ (num_layers=2):
    #   588->32 (residual=False), 32->32 (identity residual), 32->588 (conv residual)
    plan = [(in_channels, base_channels, "none")]
    cur = base_channels
    for _ in range(1, num_layers):
        plan.append((cur, base_channels, "identity"))
        cur = base_channels
    plan.append((cur, in_channels, "conv"))

    bkeys = jax.random.split(keys[1], len(plan))
    blocks = [init_block(bk, cin, cout, mode, num_cameras)
              for bk, (cin, cout, mode) in zip(bkeys, plan)]

    x = jax.random.normal(keys[2], (B, num_cameras, window, in_channels), jnp.float32)

    out = jax.block_until_ready(
        camera_st_gcn_forward(x, B, A, dbn_s, dbn_b, blocks, window, num_cameras))
    ref = jax.block_until_ready(reference_forward(x, A, dbn_s, dbn_b, blocks))

    assert out.shape == (B * num_cameras * window, 3, 14, 14), out.shape
    out_np, ref_np = np.asarray(out), np.asarray(ref)
    # bf16 weights/activations in the matmuls (f32 accumulation) -> loosen tol.
    if not np.allclose(out_np, ref_np, rtol=5e-2, atol=5e-2):
        raise AssertionError("kernel/reference mismatch, max abs err = %g"
                             % float(np.max(np.abs(out_np - ref_np))))
    print("KERNEL_OK")
</pallas_src>

<mosaic_0001>
module attributes {stable_mosaic.version = 11 : i64} {
  func.func @kernel(%arg0: memref<72x640xf32, #tpu.memory_space<vmem>>, %arg1: memref<72x640xf32, #tpu.memory_space<vmem>>, %arg2: memref<72x640xf32, #tpu.memory_space<vmem>>, %arg3: memref<72x1xf32, #tpu.memory_space<vmem>>, %arg4: memref<72x1xf32, #tpu.memory_space<vmem>>, %arg5: memref<72x72xf32, #tpu.memory_space<vmem>>, %arg6: memref<640x128xbf16, #tpu.memory_space<vmem>>, %arg7: memref<1x128xf32, #tpu.memory_space<vmem>>, %arg8: memref<1x128xf32, #tpu.memory_space<vmem>>, %arg9: memref<1x128xf32, #tpu.memory_space<vmem>>, %arg10: memref<128x128xbf16, #tpu.memory_space<vmem>>, %arg11: memref<128x128xbf16, #tpu.memory_space<vmem>>, %arg12: memref<128x128xbf16, #tpu.memory_space<vmem>>, %arg13: memref<1x128xf32, #tpu.memory_space<vmem>>, %arg14: memref<1x128xf32, #tpu.memory_space<vmem>>, %arg15: memref<1x128xf32, #tpu.memory_space<vmem>>, %arg16: memref<72x72xf32, #tpu.memory_space<vmem>>, %arg17: memref<128x128xbf16, #tpu.memory_space<vmem>>, %arg18: memref<1x128xf32, #tpu.memory_space<vmem>>, %arg19: memref<1x128xf32, #tpu.memory_space<vmem>>, %arg20: memref<1x128xf32, #tpu.memory_space<vmem>>, %arg21: memref<128x128xbf16, #tpu.memory_space<vmem>>, %arg22: memref<128x128xbf16, #tpu.memory_space<vmem>>, %arg23: memref<128x128xbf16, #tpu.memory_space<vmem>>, %arg24: memref<1x128xf32, #tpu.memory_space<vmem>>, %arg25: memref<1x128xf32, #tpu.memory_space<vmem>>, %arg26: memref<1x128xf32, #tpu.memory_space<vmem>>, %arg27: memref<72x72xf32, #tpu.memory_space<vmem>>, %arg28: memref<128x640xbf16, #tpu.memory_space<vmem>>, %arg29: memref<1x640xf32, #tpu.memory_space<vmem>>, %arg30: memref<1x640xf32, #tpu.memory_space<vmem>>, %arg31: memref<1x640xf32, #tpu.memory_space<vmem>>, %arg32: memref<640x640xbf16, #tpu.memory_space<vmem>>, %arg33: memref<640x640xbf16, #tpu.memory_space<vmem>>, %arg34: memref<640x640xbf16, #tpu.memory_space<vmem>>, %arg35: memref<1x640xf32, #tpu.memory_space<vmem>>, %arg36: memref<1x640xf32, #tpu.memory_space<vmem>>, %arg37: memref<1x640xf32, #tpu.memory_space<vmem>>, %arg38: memref<72x1xf32, #tpu.memory_space<vmem>>, %arg39: memref<128x640xbf16, #tpu.memory_space<vmem>>, %arg40: memref<1x640xf32, #tpu.memory_space<vmem>>, %arg41: memref<1x640xf32, #tpu.memory_space<vmem>>, %arg42: memref<1x640xf32, #tpu.memory_space<vmem>>, %arg43: memref<72x640xf32, #tpu.memory_space<vmem>>) attributes {dimension_semantics = [], scalar_prefetch = 0 : i64, scratch_operands = 0 : i64, tpu.core_type = #tpu.core_type<tc>} {
    %c0 = arith.constant 0 : index
    %c0_0 = arith.constant 0 : index
    %0 = vector.load %arg0[%c0, %c0_0] : memref<72x640xf32, #tpu.memory_space<vmem>>, vector<72x640xf32>
    %c0_1 = arith.constant 0 : index
    %c0_2 = arith.constant 0 : index
    %1 = vector.load %arg1[%c0_1, %c0_2] : memref<72x640xf32, #tpu.memory_space<vmem>>, vector<72x640xf32>
    %2 = arith.mulf %0, %1 : vector<72x640xf32>
    %c0_3 = arith.constant 0 : index
    %c0_4 = arith.constant 0 : index
    %3 = vector.load %arg2[%c0_3, %c0_4] : memref<72x640xf32, #tpu.memory_space<vmem>>, vector<72x640xf32>
    %4 = arith.addf %2, %3 : vector<72x640xf32>
    %c0_5 = arith.constant 0 : index
    %c0_6 = arith.constant 0 : index
    %5 = vector.load %arg3[%c0_5, %c0_6] : memref<72x1xf32, #tpu.memory_space<vmem>>, vector<72x1xf32>
    %c0_7 = arith.constant 0 : index
    %c0_8 = arith.constant 0 : index
    %6 = vector.load %arg4[%c0_7, %c0_8] : memref<72x1xf32, #tpu.memory_space<vmem>>, vector<72x1xf32>
    %c0_9 = arith.constant 0 : index
    %c0_10 = arith.constant 0 : index
    %7 = vector.load %arg5[%c0_9, %c0_10] : memref<72x72xf32, #tpu.memory_space<vmem>>, vector<72x72xf32>
    %c0_11 = arith.constant 0 : index
    %c0_12 = arith.constant 0 : index
    %8 = vector.load %arg6[%c0_11, %c0_12] : memref<640x128xbf16, #tpu.memory_space<vmem>>, vector<640x128xbf16>
    %c0_13 = arith.constant 0 : index
    %c0_14 = arith.constant 0 : index
    %9 = vector.load %arg7[%c0_13, %c0_14] : memref<1x128xf32, #tpu.memory_space<vmem>>, vector<1x128xf32>
    %c0_15 = arith.constant 0 : index
    %c0_16 = arith.constant 0 : index
    %10 = vector.load %arg8[%c0_15, %c0_16] : memref<1x128xf32, #tpu.memory_space<vmem>>, vector<1x128xf32>
    %c0_17 = arith.constant 0 : index
    %c0_18 = arith.constant 0 : index
    %11 = vector.load %arg9[%c0_17, %c0_18] : memref<1x128xf32, #tpu.memory_space<vmem>>, vector<1x128xf32>
    %c0_19 = arith.constant 0 : index
    %c0_20 = arith.constant 0 : index
    %12 = vector.load %arg10[%c0_19, %c0_20] : memref<128x128xbf16, #tpu.memory_space<vmem>>, vector<128x128xbf16>
    %c0_21 = arith.constant 0 : index
    %c0_22 = arith.constant 0 : index
    %13 = vector.load %arg11[%c0_21, %c0_22] : memref<128x128xbf16, #tpu.memory_space<vmem>>, vector<128x128xbf16>
    %c0_23 = arith.constant 0 : index
    %c0_24 = arith.constant 0 : index
    %14 = vector.load %arg12[%c0_23, %c0_24] : memref<128x128xbf16, #tpu.memory_space<vmem>>, vector<128x128xbf16>
    %c0_25 = arith.constant 0 : index
    %c0_26 = arith.constant 0 : index
    %15 = vector.load %arg13[%c0_25, %c0_26] : memref<1x128xf32, #tpu.memory_space<vmem>>, vector<1x128xf32>
    %c0_27 = arith.constant 0 : index
    %c0_28 = arith.constant 0 : index
    %16 = vector.load %arg14[%c0_27, %c0_28] : memref<1x128xf32, #tpu.memory_space<vmem>>, vector<1x128xf32>
    %c0_29 = arith.constant 0 : index
    %c0_30 = arith.constant 0 : index
    %17 = vector.load %arg15[%c0_29, %c0_30] : memref<1x128xf32, #tpu.memory_space<vmem>>, vector<1x128xf32>
    %18 = arith.truncf %4 : vector<72x640xf32> to vector<72x640xbf16>
    %cst = arith.constant dense<0.000000e+00> : vector<72x128xf32>
    %19 = tpu.matmul %18, %8, %cst {dimension_numbers = #tpu.dot_dimension_numbers<[1], [0], [0], [1], [0, 0, 1, 1], [], []>} : vector<72x640xbf16>, vector<640x128xbf16>, vector<72x128xf32> -> vector<72x128xf32>
    %20 = vector.broadcast %9 : vector<1x128xf32> to vector<72x128xf32>
    %21 = arith.addf %19, %20 : vector<72x128xf32>
    %cst_31 = arith.constant dense<0.000000e+00> : vector<72x128xf32>
    %22 = tpu.matmul %7, %21, %cst_31 {dimension_numbers = #tpu.dot_dimension_numbers<[1], [0], [0], [1], [0, 0, 1, 1], [], []>} : vector<72x72xf32>, vector<72x128xf32>, vector<72x128xf32> -> vector<72x128xf32>
    %23 = vector.broadcast %10 : vector<1x128xf32> to vector<72x128xf32>
    %24 = arith.mulf %22, %23 : vector<72x128xf32>
    %25 = vector.broadcast %11 : vector<1x128xf32> to vector<72x128xf32>
    %26 = arith.addf %24, %25 : vector<72x128xf32>
    %cst_32 = arith.constant 0.000000e+00 : f32
    %27 = vector.broadcast %cst_32 : f32 to vector<72x128xf32>
    %28 = arith.maximumf %26, %27 : vector<72x128xf32>
    %cst_33 = arith.constant 0.000000e+00 : f32
    %29 = vector.broadcast %cst_33 : f32 to vector<6x128xf32>
    %30 = vector.extract_strided_slice %28 {offsets = [0, 0], sizes = [66, 128], strides = [1, 1]} : vector<72x128xf32> to vector<66x128xf32>
    %31 = tpu.concatenate %29, %30 in 0 : vector<6x128xf32>, vector<66x128xf32> -> vector<72x128xf32>
    %32 = vector.broadcast %5 : vector<72x1xf32> to vector<72x128xf32>
    %33 = arith.mulf %31, %32 : vector<72x128xf32>
    %34 = vector.extract_strided_slice %28 {offsets = [6, 0], sizes = [66, 128], strides = [1, 1]} : vector<72x128xf32> to vector<66x128xf32>
    %35 = tpu.concatenate %34, %29 in 0 : vector<66x128xf32>, vector<6x128xf32> -> vector<72x128xf32>
    %36 = vector.broadcast %6 : vector<72x1xf32> to vector<72x128xf32>
    %37 = arith.mulf %35, %36 : vector<72x128xf32>
    %38 = arith.truncf %33 : vector<72x128xf32> to vector<72x128xbf16>
    %cst_34 = arith.constant dense<0.000000e+00> : vector<72x128xf32>
    %39 = tpu.matmul %38, %12, %cst_34 {dimension_numbers = #tpu.dot_dimension_numbers<[1], [0], [0], [1], [0, 0, 1, 1], [], []>} : vector<72x128xbf16>, vector<128x128xbf16>, vector<72x128xf32> -> vector<72x128xf32>
    %40 = arith.truncf %28 : vector<72x128xf32> to vector<72x128xbf16>
    %cst_35 = arith.constant dense<0.000000e+00> : vector<72x128xf32>
    %41 = tpu.matmul %40, %13, %cst_35 {dimension_numbers = #tpu.dot_dimension_numbers<[1], [0], [0], [1], [0, 0, 1, 1], [], []>} : vector<72x128xbf16>, vector<128x128xbf16>, vector<72x128xf32> -> vector<72x128xf32>
    %42 = arith.addf %39, %41 : vector<72x128xf32>
    %43 = arith.truncf %37 : vector<72x128xf32> to vector<72x128xbf16>
    %cst_36 = arith.constant dense<0.000000e+00> : vector<72x128xf32>
    %44 = tpu.matmul %43, %14, %cst_36 {dimension_numbers = #tpu.dot_dimension_numbers<[1], [0], [0], [1], [0, 0, 1, 1], [], []>} : vector<72x128xbf16>, vector<128x128xbf16>, vector<72x128xf32> -> vector<72x128xf32>
    %45 = arith.addf %42, %44 : vector<72x128xf32>
    %46 = vector.broadcast %15 : vector<1x128xf32> to vector<72x128xf32>
    %47 = arith.addf %45, %46 : vector<72x128xf32>
    %48 = vector.broadcast %16 : vector<1x128xf32> to vector<72x128xf32>
    %49 = arith.mulf %47, %48 : vector<72x128xf32>
    %50 = vector.broadcast %17 : vector<1x128xf32> to vector<72x128xf32>
    %51 = arith.addf %49, %50 : vector<72x128xf32>
    %cst_37 = arith.constant 0.000000e+00 : f32
    %52 = vector.broadcast %cst_37 : f32 to vector<72x128xf32>
    %53 = arith.maximumf %51, %52 : vector<72x128xf32>
    %c0_38 = arith.constant 0 : index
    %c0_39 = arith.constant 0 : index
    %54 = vector.load %arg16[%c0_38, %c0_39] : memref<72x72xf32, #tpu.memory_space<vmem>>, vector<72x72xf32>
    %c0_40 = arith.constant 0 : index
    %c0_41 = arith.constant 0 : index
    %55 = vector.load %arg17[%c0_40, %c0_41] : memref<128x128xbf16, #tpu.memory_space<vmem>>, vector<128x128xbf16>
    %c0_42 = arith.constant 0 : index
    %c0_43 = arith.constant 0 : index
    %56 = vector.load %arg18[%c0_42, %c0_43] : memref<1x128xf32, #tpu.memory_space<vmem>>, vector<1x128xf32>
    %c0_44 = arith.constant 0 : index
    %c0_45 = arith.constant 0 : index
    %57 = vector.load %arg19[%c0_44, %c0_45] : memref<1x128xf32, #tpu.memory_space<vmem>>, vector<1x128xf32>
    %c0_46 = arith.constant 0 : index
    %c0_47 = arith.constant 0 : index
    %58 = vector.load %arg20[%c0_46, %c0_47] : memref<1x128xf32, #tpu.memory_space<vmem>>, vector<1x128xf32>
    %c0_48 = arith.constant 0 : index
    %c0_49 = arith.constant 0 : index
    %59 = vector.load %arg21[%c0_48, %c0_49] : memref<128x128xbf16, #tpu.memory_space<vmem>>, vector<128x128xbf16>
    %c0_50 = arith.constant 0 : index
    %c0_51 = arith.constant 0 : index
    %60 = vector.load %arg22[%c0_50, %c0_51] : memref<128x128xbf16, #tpu.memory_space<vmem>>, vector<128x128xbf16>
    %c0_52 = arith.constant 0 : index
    %c0_53 = arith.constant 0 : index
    %61 = vector.load %arg23[%c0_52, %c0_53] : memref<128x128xbf16, #tpu.memory_space<vmem>>, vector<128x128xbf16>
    %c0_54 = arith.constant 0 : index
    %c0_55 = arith.constant 0 : index
    %62 = vector.load %arg24[%c0_54, %c0_55] : memref<1x128xf32, #tpu.memory_space<vmem>>, vector<1x128xf32>
    %c0_56 = arith.constant 0 : index
    %c0_57 = arith.constant 0 : index
    %63 = vector.load %arg25[%c0_56, %c0_57] : memref<1x128xf32, #tpu.memory_space<vmem>>, vector<1x128xf32>
    %c0_58 = arith.constant 0 : index
    %c0_59 = arith.constant 0 : index
    %64 = vector.load %arg26[%c0_58, %c0_59] : memref<1x128xf32, #tpu.memory_space<vmem>>, vector<1x128xf32>
    %65 = arith.truncf %53 : vector<72x128xf32> to vector<72x128xbf16>
    %cst_60 = arith.constant dense<0.000000e+00> : vector<72x128xf32>
    %66 = tpu.matmul %65, %55, %cst_60 {dimension_numbers = #tpu.dot_dimension_numbers<[1], [0], [0], [1], [0, 0, 1, 1], [], []>} : vector<72x128xbf16>, vector<128x128xbf16>, vector<72x128xf32> -> vector<72x128xf32>
    %67 = vector.broadcast %56 : vector<1x128xf32> to vector<72x128xf32>
    %68 = arith.addf %66, %67 : vector<72x128xf32>
    %cst_61 = arith.constant dense<0.000000e+00> : vector<72x128xf32>
    %69 = tpu.matmul %54, %68, %cst_61 {dimension_numbers = #tpu.dot_dimension_numbers<[1], [0], [0], [1], [0, 0, 1, 1], [], []>} : vector<72x72xf32>, vector<72x128xf32>, vector<72x128xf32> -> vector<72x128xf32>
    %70 = vector.broadcast %57 : vector<1x128xf32> to vector<72x128xf32>
    %71 = arith.mulf %69, %70 : vector<72x128xf32>
    %72 = vector.broadcast %58 : vector<1x128xf32> to vector<72x128xf32>
    %73 = arith.addf %71, %72 : vector<72x128xf32>
    %cst_62 = arith.constant 0.000000e+00 : f32
    %74 = vector.broadcast %cst_62 : f32 to vector<72x128xf32>
    %75 = arith.maximumf %73, %74 : vector<72x128xf32>
    %cst_63 = arith.constant 0.000000e+00 : f32
    %76 = vector.broadcast %cst_63 : f32 to vector<6x128xf32>
    %77 = vector.extract_strided_slice %75 {offsets = [0, 0], sizes = [66, 128], strides = [1, 1]} : vector<72x128xf32> to vector<66x128xf32>
    %78 = tpu.concatenate %76, %77 in 0 : vector<6x128xf32>, vector<66x128xf32> -> vector<72x128xf32>
    %79 = vector.broadcast %5 : vector<72x1xf32> to vector<72x128xf32>
    %80 = arith.mulf %78, %79 : vector<72x128xf32>
    %81 = vector.extract_strided_slice %75 {offsets = [6, 0], sizes = [66, 128], strides = [1, 1]} : vector<72x128xf32> to vector<66x128xf32>
    %82 = tpu.concatenate %81, %76 in 0 : vector<66x128xf32>, vector<6x128xf32> -> vector<72x128xf32>
    %83 = vector.broadcast %6 : vector<72x1xf32> to vector<72x128xf32>
    %84 = arith.mulf %82, %83 : vector<72x128xf32>
    %85 = arith.truncf %80 : vector<72x128xf32> to vector<72x128xbf16>
    %cst_64 = arith.constant dense<0.000000e+00> : vector<72x128xf32>
    %86 = tpu.matmul %85, %59, %cst_64 {dimension_numbers = #tpu.dot_dimension_numbers<[1], [0], [0], [1], [0, 0, 1, 1], [], []>} : vector<72x128xbf16>, vector<128x128xbf16>, vector<72x128xf32> -> vector<72x128xf32>
    %87 = arith.truncf %75 : vector<72x128xf32> to vector<72x128xbf16>
    %cst_65 = arith.constant dense<0.000000e+00> : vector<72x128xf32>
    %88 = tpu.matmul %87, %60, %cst_65 {dimension_numbers = #tpu.dot_dimension_numbers<[1], [0], [0], [1], [0, 0, 1, 1], [], []>} : vector<72x128xbf16>, vector<128x128xbf16>, vector<72x128xf32> -> vector<72x128xf32>
    %89 = arith.addf %86, %88 : vector<72x128xf32>
    %90 = arith.truncf %84 : vector<72x128xf32> to vector<72x128xbf16>
    %cst_66 = arith.constant dense<0.000000e+00> : vector<72x128xf32>
    %91 = tpu.matmul %90, %61, %cst_66 {dimension_numbers = #tpu.dot_dimension_numbers<[1], [0], [0], [1], [0, 0, 1, 1], [], []>} : vector<72x128xbf16>, vector<128x128xbf16>, vector<72x128xf32> -> vector<72x128xf32>
    %92 = arith.addf %89, %91 : vector<72x128xf32>
    %93 = vector.broadcast %62 : vector<1x128xf32> to vector<72x128xf32>
    %94 = arith.addf %92, %93 : vector<72x128xf32>
    %95 = vector.broadcast %63 : vector<1x128xf32> to vector<72x128xf32>
    %96 = arith.mulf %94, %95 : vector<72x128xf32>
    %97 = vector.broadcast %64 : vector<1x128xf32> to vector<72x128xf32>
    %98 = arith.addf %96, %97 : vector<72x128xf32>
    %99 = arith.addf %98, %53 : vector<72x128xf32>
    %cst_67 = arith.constant 0.000000e+00 : f32
    %100 = vector.broadcast %cst_67 : f32 to vector<72x128xf32>
    %101 = arith.maximumf %99, %100 : vector<72x128xf32>
    %c0_68 = arith.constant 0 : index
    %c0_69 = arith.constant 0 : index
    %102 = vector.load %arg27[%c0_68, %c0_69] : memref<72x72xf32, #tpu.memory_space<vmem>>, vector<72x72xf32>
    %c0_70 = arith.constant 0 : index
    %c0_71 = arith.constant 0 : index
    %103 = vector.load %arg28[%c0_70, %c0_71] : memref<128x640xbf16, #tpu.memory_space<vmem>>, vector<128x640xbf16>
    %c0_72 = arith.constant 0 : index
    %c0_73 = arith.constant 0 : index
    %104 = vector.load %arg29[%c0_72, %c0_73] : memref<1x640xf32, #tpu.memory_space<vmem>>, vector<1x640xf32>
    %c0_74 = arith.constant 0 : index
    %c0_75 = arith.constant 0 : index
    %105 = vector.load %arg30[%c0_74, %c0_75] : memref<1x640xf32, #tpu.memory_space<vmem>>, vector<1x640xf32>
    %c0_76 = arith.constant 0 : index
    %c0_77 = arith.constant 0 : index
    %106 = vector.load %arg31[%c0_76, %c0_77] : memref<1x640xf32, #tpu.memory_space<vmem>>, vector<1x640xf32>
    %c0_78 = arith.constant 0 : index
    %c0_79 = arith.constant 0 : index
    %107 = vector.load %arg32[%c0_78, %c0_79] : memref<640x640xbf16, #tpu.memory_space<vmem>>, vector<640x640xbf16>
    %c0_80 = arith.constant 0 : index
    %c0_81 = arith.constant 0 : index
    %108 = vector.load %arg33[%c0_80, %c0_81] : memref<640x640xbf16, #tpu.memory_space<vmem>>, vector<640x640xbf16>
    %c0_82 = arith.constant 0 : index
    %c0_83 = arith.constant 0 : index
    %109 = vector.load %arg34[%c0_82, %c0_83] : memref<640x640xbf16, #tpu.memory_space<vmem>>, vector<640x640xbf16>
    %c0_84 = arith.constant 0 : index
    %c0_85 = arith.constant 0 : index
    %110 = vector.load %arg35[%c0_84, %c0_85] : memref<1x640xf32, #tpu.memory_space<vmem>>, vector<1x640xf32>
    %c0_86 = arith.constant 0 : index
    %c0_87 = arith.constant 0 : index
    %111 = vector.load %arg36[%c0_86, %c0_87] : memref<1x640xf32, #tpu.memory_space<vmem>>, vector<1x640xf32>
    %c0_88 = arith.constant 0 : index
    %c0_89 = arith.constant 0 : index
    %112 = vector.load %arg37[%c0_88, %c0_89] : memref<1x640xf32, #tpu.memory_space<vmem>>, vector<1x640xf32>
    %c0_90 = arith.constant 0 : index
    %c0_91 = arith.constant 0 : index
    %113 = vector.load %arg38[%c0_90, %c0_91] : memref<72x1xf32, #tpu.memory_space<vmem>>, vector<72x1xf32>
    %c0_92 = arith.constant 0 : index
    %c0_93 = arith.constant 0 : index
    %114 = vector.load %arg39[%c0_92, %c0_93] : memref<128x640xbf16, #tpu.memory_space<vmem>>, vector<128x640xbf16>
    %c0_94 = arith.constant 0 : index
    %c0_95 = arith.constant 0 : index
    %115 = vector.load %arg40[%c0_94, %c0_95] : memref<1x640xf32, #tpu.memory_space<vmem>>, vector<1x640xf32>
    %c0_96 = arith.constant 0 : index
    %c0_97 = arith.constant 0 : index
    %116 = vector.load %arg41[%c0_96, %c0_97] : memref<1x640xf32, #tpu.memory_space<vmem>>, vector<1x640xf32>
    %c0_98 = arith.constant 0 : index
    %c0_99 = arith.constant 0 : index
    %117 = vector.load %arg42[%c0_98, %c0_99] : memref<1x640xf32, #tpu.memory_space<vmem>>, vector<1x640xf32>
    %cst_100 = arith.constant dense<0.000000e+00> : vector<72x128xf32>
    %118 = tpu.matmul %102, %101, %cst_100 {dimension_numbers = #tpu.dot_dimension_numbers<[1], [0], [0], [1], [0, 0, 1, 1], [], []>} : vector<72x72xf32>, vector<72x128xf32>, vector<72x128xf32> -> vector<72x128xf32>
    %119 = arith.truncf %118 : vector<72x128xf32> to vector<72x128xbf16>
    %cst_101 = arith.constant dense<0.000000e+00> : vector<72x640xf32>
    %120 = tpu.matmul %119, %103, %cst_101 {dimension_numbers = #tpu.dot_dimension_numbers<[1], [0], [0], [1], [0, 0, 1, 1], [], []>} : vector<72x128xbf16>, vector<128x640xbf16>, vector<72x640xf32> -> vector<72x640xf32>
    %121 = vector.broadcast %113 : vector<72x1xf32> to vector<72x640xf32>
    %122 = vector.broadcast %104 : vector<1x640xf32> to vector<72x640xf32>
    %123 = arith.mulf %121, %122 : vector<72x640xf32>
    %124 = arith.addf %120, %123 : vector<72x640xf32>
    %125 = vector.broadcast %105 : vector<1x640xf32> to vector<72x640xf32>
    %126 = arith.mulf %124, %125 : vector<72x640xf32>
    %127 = vector.broadcast %106 : vector<1x640xf32> to vector<72x640xf32>
    %128 = arith.addf %126, %127 : vector<72x640xf32>
    %cst_102 = arith.constant 0.000000e+00 : f32
    %129 = vector.broadcast %cst_102 : f32 to vector<72x640xf32>
    %130 = arith.maximumf %128, %129 : vector<72x640xf32>
    %cst_103 = arith.constant 0.000000e+00 : f32
    %131 = vector.broadcast %cst_103 : f32 to vector<6x640xf32>
    %132 = vector.extract_strided_slice %130 {offsets = [0, 0], sizes = [66, 640], strides = [1, 1]} : vector<72x640xf32> to vector<66x640xf32>
    %133 = tpu.concatenate %131, %132 in 0 : vector<6x640xf32>, vector<66x640xf32> -> vector<72x640xf32>
    %134 = vector.broadcast %5 : vector<72x1xf32> to vector<72x640xf32>
    %135 = arith.mulf %133, %134 : vector<72x640xf32>
    %136 = vector.extract_strided_slice %130 {offsets = [6, 0], sizes = [66, 640], strides = [1, 1]} : vector<72x640xf32> to vector<66x640xf32>
    %137 = tpu.concatenate %136, %131 in 0 : vector<66x640xf32>, vector<6x640xf32> -> vector<72x640xf32>
    %138 = vector.broadcast %6 : vector<72x1xf32> to vector<72x640xf32>
    %139 = arith.mulf %137, %138 : vector<72x640xf32>
    %140 = arith.truncf %135 : vector<72x640xf32> to vector<72x640xbf16>
    %cst_104 = arith.constant dense<0.000000e+00> : vector<72x640xf32>
    %141 = tpu.matmul %140, %107, %cst_104 {dimension_numbers = #tpu.dot_dimension_numbers<[1], [0], [0], [1], [0, 0, 1, 1], [], []>} : vector<72x640xbf16>, vector<640x640xbf16>, vector<72x640xf32> -> vector<72x640xf32>
    %142 = arith.truncf %130 : vector<72x640xf32> to vector<72x640xbf16>
    %cst_105 = arith.constant dense<0.000000e+00> : vector<72x640xf32>
    %143 = tpu.matmul %142, %108, %cst_105 {dimension_numbers = #tpu.dot_dimension_numbers<[1], [0], [0], [1], [0, 0, 1, 1], [], []>} : vector<72x640xbf16>, vector<640x640xbf16>, vector<72x640xf32> -> vector<72x640xf32>
    %144 = arith.addf %141, %143 : vector<72x640xf32>
    %145 = arith.truncf %139 : vector<72x640xf32> to vector<72x640xbf16>
    %cst_106 = arith.constant dense<0.000000e+00> : vector<72x640xf32>
    %146 = tpu.matmul %145, %109, %cst_106 {dimension_numbers = #tpu.dot_dimension_numbers<[1], [0], [0], [1], [0, 0, 1, 1], [], []>} : vector<72x640xbf16>, vector<640x640xbf16>, vector<72x640xf32> -> vector<72x640xf32>
    %147 = arith.addf %144, %146 : vector<72x640xf32>
    %148 = vector.broadcast %110 : vector<1x640xf32> to vector<72x640xf32>
    %149 = arith.addf %147, %148 : vector<72x640xf32>
    %150 = vector.broadcast %111 : vector<1x640xf32> to vector<72x640xf32>
    %151 = arith.mulf %149, %150 : vector<72x640xf32>
    %152 = vector.broadcast %112 : vector<1x640xf32> to vector<72x640xf32>
    %153 = arith.addf %151, %152 : vector<72x640xf32>
    %154 = arith.truncf %101 : vector<72x128xf32> to vector<72x128xbf16>
    %cst_107 = arith.constant dense<0.000000e+00> : vector<72x640xf32>
    %155 = tpu.matmul %154, %114, %cst_107 {dimension_numbers = #tpu.dot_dimension_numbers<[1], [0], [0], [1], [0, 0, 1, 1], [], []>} : vector<72x128xbf16>, vector<128x640xbf16>, vector<72x640xf32> -> vector<72x640xf32>
    %156 = vector.broadcast %115 : vector<1x640xf32> to vector<72x640xf32>
    %157 = arith.addf %155, %156 : vector<72x640xf32>
    %158 = vector.broadcast %116 : vector<1x640xf32> to vector<72x640xf32>
    %159 = arith.mulf %157, %158 : vector<72x640xf32>
    %160 = vector.broadcast %117 : vector<1x640xf32> to vector<72x640xf32>
    %161 = arith.addf %159, %160 : vector<72x640xf32>
    %162 = arith.addf %153, %161 : vector<72x640xf32>
    %cst_108 = arith.constant 0.000000e+00 : f32
    %163 = vector.broadcast %cst_108 : f32 to vector<72x640xf32>
    %164 = arith.maximumf %162, %163 : vector<72x640xf32>
    %c0_109 = arith.constant 0 : index
    %c0_110 = arith.constant 0 : index
    %165 = vector.load %arg43[%c0_109, %c0_110] : memref<72x640xf32, #tpu.memory_space<vmem>>, vector<72x640xf32>
    tpu.vector_store %arg43[%c0_109, %c0_110], %164 {strides = array<i32>} : memref<72x640xf32, #tpu.memory_space<vmem>>, vector<72x640xf32>,
    return
  }
}

</mosaic_0001>

<bundles_post_ra>
// kernel: tpu_custom_call.1
= control target key start
LH: loop header
LB: loop body
LE: loop exit
PB: predicated region body
PF: predicated region fallthrough
CT: control target
= control target key end

     0   :  { %s15312_s6 = smov 1   ;;  %s15313_s10 = smov 2   ;;  %s19731_s0 = inlined_call_operand.smem [shape: u32[44], index: -1, kind: input, shape index: {}] }
   0x1   :  { %s15399_s5 = sld [smem:[%s19731_s0]]   ;;  %s15314_s14 = smov 3  }
   0x2   :  { %s15404_s9 = sld [smem:[%s19731_s0 + %s15312_s6]]   ;;  %s15315_s18 = smov 4  }
   0x3   :  { %s15409_s13 = sld [smem:[%s19731_s0 + %s15313_s10]]   ;;  %s15316_s22 = smov 5  }
   0x4   :  { %s15414_s17 = sld [smem:[%s19731_s0 + %s15314_s14]]   ;;  %s15317_s26 = smov 6  }
   0x5   :  { %s15419_s21 = sld [smem:[%s19731_s0 + %s15315_s18]]   ;;  %s15318_s30 = smov 7  }
   0x6   :  { %s15424_s25 = sld [smem:[%s19731_s0 + %s15316_s22]]   ;;  %s15319_s4 = smov 8  }
   0x7   :  { %s15429_s29 = sld [smem:[%s19731_s0 + %s15317_s26]]   ;;  %s15320_s10 = smov 9  }
   0x8   :  { %s15434_s3 = sld [smem:[%s19731_s0 + %s15318_s30]]   ;;  %s15321_s15 = smov 10  }
   0x9   :  { %s15439_s8 = sld [smem:[%s19731_s0 + %s15319_s4]]   ;;  %s15322_s20 = smov 11  }
   0xa   :  { %19925 = sst [smem:[#allocation59_spill]] %s15414_s17  ;;  %s15323_s26 = smov 12  }
   0xb   :  { %19926 = sst [smem:[#allocation60_spill]] %s15419_s21  ;;  %s15324_s1 = smov 13  }
   0xc   :  { %19927 = sst [smem:[#allocation61_spill]] %s15424_s25  ;;  %s15325_s7 = smov 14  }
   0xd   :  { %s15444_s14 = sld [smem:[%s19731_s0 + %s15320_s10]]   ;;  %s15327_s22 = smov 16  }
   0xe   :  { %19928 = sst [smem:[#allocation62_spill]] %s15434_s3  ;;  %s15328_s28 = smov 17  }
   0xf   :  { %s15449_s19 = sld [smem:[%s19731_s0 + %s15321_s15]]   ;;  %s15326_s15 = smov 15  }
  0x10   :  { %s15454_s24 = sld [smem:[%s19731_s0 + %s15322_s20]]  }
  0x11   :  { %s15459_s30 = sld [smem:[%s19731_s0 + %s15323_s26]]  }
  0x12   :  { %s15464_s6 = sld [smem:[%s19731_s0 + %s15324_s1]]  }
  0x13   :  { %19929 = sst [smem:[#allocation63_spill]] %s15444_s14 }
  0x14   :  { %s15469_s12 = sld [smem:[%s19731_s0 + %s15325_s7]]   ;;  %s15329_s7 = smov 18  }
  0x15   :  { %s15474_s20 = sld [smem:[%s19731_s0 + %s15326_s15]]   ;;  %s15330_s15 = smov 19  }
  0x16   :  { %19930 = sst [smem:[#allocation64_spill]] %s15454_s24 }
  0x17   :  { %s15479_s27 = sld [smem:[%s19731_s0 + %s15327_s22]]   ;;  %s15331_s22 = smov 20  }
  0x18   :  { %19931 = sst [smem:[#allocation65_spill]] %s15464_s6 }
  0x19   :  { %s15484_s4 = sld [smem:[%s19731_s0 + %s15328_s28]]   ;;  %s15332_s28 = smov 21  }
  0x1a   :  { %s15489_s25 = sld [smem:[%s19731_s0 + %s15329_s7]]   ;;  %s15333_s7 = smov 22  }
  0x1b   :  { %19932 = sst [smem:[#allocation66_spill]] %s15474_s20 }
  0x1c   :  { %s15494_s21 = sld [smem:[%s19731_s0 + %s15330_s15]]   ;;  %s15334_s15 = smov 23  }
  0x1d   :  { %19933 = sst [smem:[#allocation67_spill]] %s15479_s27 }
  0x1e   :  { %s15499_s27 = sld [smem:[%s19731_s0 + %s15331_s22]]   ;;  %s15335_s22 = smov 24  }
  0x1f   :  { %s15504_s17 = sld [smem:[%s19731_s0 + %s15332_s28]]   ;;  %s15336_s28 = smov 25  }
  0x20   :  { %19934 = sst [smem:[#allocation68_spill]] %s15489_s25 }
  0x21   :  { %s15509_s25 = sld [smem:[%s19731_s0 + %s15333_s7]]   ;;  %s15337_s7 = smov 26  }
  0x22   :  { %s15514_s20 = sld [smem:[%s19731_s0 + %s15334_s15]]   ;;  %s15338_s15 = smov 27  }
  0x23   :  { %s15529_s6 = sld [smem:[%s19731_s0 + %s15337_s7]]   ;;  %s15341_s7 = smov 30  }
  0x24   :  { %19935 = sst [smem:[#allocation69_spill]] %s15499_s27 }
  0x25   :  { %19936 = sst [smem:[#allocation70_spill]] %s15504_s17 }
  0x26   :  { %s15519_s27 = sld [smem:[%s19731_s0 + %s15335_s22]]   ;;  %s15339_s22 = smov 28  }
  0x27   :  { %s15524_s17 = sld [smem:[%s19731_s0 + %s15336_s28]]   ;;  %s15340_s28 = smov 29  }
  0x28   :  { %19937 = sst [smem:[#allocation71_spill]] %s15514_s20 }
  0x29   :  { %19939 = sst [smem:[#allocation73_spill]] %s15529_s6 }
  0x2a   :  { %s15534_s20 = sld [smem:[%s19731_s0 + %s15338_s15]]   ;;  %s15342_s15 = smov 31  }
  0x2b   :  { %s15539_s24 = sld [smem:[%s19731_s0 + %s15339_s22]]   ;;  %s15343_s22 = smov 32  }
  0x2c   :  { %s15549_s6 = sld [smem:[%s19731_s0 + %s15341_s7]]   ;;  %s15345_s7 = smov 34  }
  0x2d   :  { %19938 = sst [smem:[#allocation72_spill]] %s15524_s17 }
  0x2e   :  { %s15544_s17 = sld [smem:[%s19731_s0 + %s15340_s28]]   ;;  %s15344_s28 = smov 33  }
  0x2f   :  { %s15559_s14 = sld [smem:[%s19731_s0 + %s15343_s22]]   ;;  %s15347_s22 = smov 36  }
  0x30   :  { %19940 = sst [smem:[#allocation74_spill]] %s15534_s20 }
  0x31   :  { %s15554_s20 = sld [smem:[%s19731_s0 + %s15342_s15]]   ;;  %s15346_s15 = smov 35  }
  0x32   :  { %19942 = sst [smem:[#allocation76_spill]] %s15549_s6 }
  0x33   :  { %s15569_s6 = sld [smem:[%s19731_s0 + %s15345_s7]]   ;;  %s15349_s7 = smov 38  }
  0x34   :  { %19941 = sst [smem:[#allocation75_spill]] %s15544_s17 }
  0x35   :  { %19944 = sst [smem:[#allocation78_spill]] %s15559_s14 }
  0x36   :  { %s15564_s17 = sld [smem:[%s19731_s0 + %s15344_s28]]   ;;  %s15348_s28 = smov 37  }
  0x37   :  { %19943 = sst [smem:[#allocation77_spill]] %s15554_s20 }
  0x38   :  { %s15574_s20 = sld [smem:[%s19731_s0 + %s15346_s15]]   ;;  %s15350_s15 = smov 39  }
  0x39   :  { %19945 = sst [smem:[#allocation79_spill]] %s15569_s6 }
  0x3a   :  { %s15579_s14 = sld [smem:[%s19731_s0 + %s15347_s22]]   ;;  %s15351_s22 = smov 40  }
  0x3b   :  { %s15584_s3 = sld [smem:[%s19731_s0 + %s15348_s28]]   ;;  %s15352_s28 = smov 41  }
  0x3c   :  { %s15589_s6 = sld [smem:[%s19731_s0 + %s15349_s7]]   ;;  %s15353_s7 = smov 42  }
  0x3e   :  { %19946 = sst [smem:[#allocation80_spill]] %s15574_s20 }
  0x3f   :  { %s15594_s20 = sld [smem:[%s19731_s0 + %s15350_s15]]   ;;  %s15354_s15 = smov 43  }
  0x40   :  { %19947 = sst [smem:[#allocation81_spill]] %s15579_s14 }
  0x41   :  { %19948 = sst [smem:[#allocation82_spill]] %s15584_s3 }
  0x42   :  { %19949 = sst [smem:[#allocation83_spill]] %s15589_s6 }
  0x43   :  { %s15599_s14 = sld [smem:[%s19731_s0 + %s15351_s22]]  }
  0x44   :  { %s15604_s3 = sld [smem:[%s19731_s0 + %s15352_s28]]  }
  0x45   :  { %19950 = sst [smem:[#allocation84_spill]] %s15594_s20 }
  0x46   :  { %s15609_s6 = sld [smem:[%s19731_s0 + %s15353_s7]]  }
  0x47   :  { %s15614_s20 = sld [smem:[%s19731_s0 + %s15354_s15]]  }
  0x48   :  { %92 = vsyncpa [#allocation3], 0 }
  0x49   :  { %93 = vsyncpa [#allocation6], 0 }
  0x4a   :  { %94 = vsyncpa [#allocation9], 0 }
  0x4b   :  { %95 = vsyncpa [#allocation12], 0 }
  0x4c   :  { %96 = vsyncpa [#allocation15], 0 }
  0x4d   :  { %97 = vsyncpa [#allocation18], 0 }
  0x4e   :  { %98 = vsyncpa [#allocation21], 0 }
  0x4f   :  { %99 = vsyncpa [#allocation24], 0 }
  0x50   :  { %100 = vsyncpa [#allocation27], 0 }
  0x51   :  { %101 = vsyncpa [#allocation30], 0 }
  0x52   :  { %102 = vsyncpa [#allocation33], 0 }
  0x53   :  { %103 = vsyncpa [#allocation36], 0 }
  0x54   :  { %104 = vsyncpa [#allocation39], 0 }
  0x55   :  { %105 = vsyncpa [#allocation42], 0 }
  0x56   :  { %106 = vsyncpa [#allocation4], 0  ;;  %s15355_s22 = smov [#allocation5]   ;;  %s15356_s26 = smov [#allocation8]  }
  0x57   :  { %s124_s23 = sshll.u32 %s15355_s22, 4  ;;  %s154_s0 = sshll.u32 %s15356_s26, 4  ;;  %s125_s23 = int_to_ptr.vmem [resolvable:$true] %s124_s23  ;;  %s155_s0 = int_to_ptr.vmem [resolvable:$true] %s154_s0 }
  0x58   :  { %s14750_s28 = scalar_lea.vmem %s125_s23, 5760  ;;  %p14755_p1 = scmp.lt.s32.totalorder %s125_s23, %s125_s23 }
  0x59   :  { %p14751_p0 = scmp.ne.s32.totalorder %s125_s23, %s14750_s28  ;;  %p14756_p2 = scmp.lt.s32.totalorder %s14750_s28, %s14750_s28 }
  0x5b   :  { %p14757_p3 = por %p14756_p2, %p14755_p1 }
  0x5d   :  { %p14758_p4 = pnand %p14757_p3, %p14751_p0 }
  0x5f   :  { %14761 = shalt.err (!%p14758_p4)
}
  0x60   :  { %s15357_s1 = smov 640   ;;  %s15358_s2 = smov 40  }
  0x61   :  { %130 = dma.hbm_to_vmem [thread:$0]  %s15404_s9, 5760, %s125_s23, [#allocation6], %s15357_s1, %s15357_s1, %s15358_s2  }
  0x62   :  { %s14770_s7 = scalar_lea.vmem %s155_s0, 5120  ;;  %p14775_p6 = scmp.lt.s32.totalorder %s155_s0, %s155_s0 }
  0x63   :  { %p14771_p5 = scmp.ne.s32.totalorder %s155_s0, %s14770_s7  ;;  %p14776_p7 = scmp.lt.s32.totalorder %s14770_s7, %s14770_s7 }
  0x65   :  { %p14777_p8 = por %p14776_p7, %p14775_p6 }
  0x67   :  { %p14778_p9 = pnand %p14777_p8, %p14771_p5 }
  0x69   :  { %14781 = shalt.err (!%p14778_p9)
}
  0x6a   :  { %s15359_s10 = smov 64   ;;  %s15360_s11 = smov 4  }
  0x6b   :  { %160 = dma.hbm_to_vmem [thread:$0]  %s15429_s29, 5120, %s155_s0, [#allocation9], %s15359_s10, %s15359_s10, %s15360_s11  }
  0x6c   :  { %s15361_s15 = smov [#allocation11]   ;;  %s15362_s18 = smov [#allocation14]  }
  0x6d   :  { %s177_s16 = sshll.u32 %s15361_s15, 4  ;;  %s196_s22 = sshll.u32 %s15362_s18, 4  ;;  %s178_s16 = int_to_ptr.vmem [resolvable:$true] %s177_s16  ;;  %s197_s22 = int_to_ptr.vmem [resolvable:$true] %s196_s22 }
  0x6e   :  { %s14790_s9 = scalar_lea.vmem %s178_s16, 16  ;;  %s14794_s23 = scalar_lea.vmem %s178_s16, 32 }
  0x6f   :  { %p14791_p10 = scmp.ne.s32.totalorder %s178_s16, %s14790_s9  ;;  %p14795_p11 = scmp.lt.s32.totalorder %s178_s16, %s178_s16 }
  0x70   :  { %p14796_p12 = scmp.lt.s32.totalorder %s14794_s23, %s14790_s9 }
  0x72   :  { %p14797_p13 = por %p14796_p12, %p14795_p11 }
  0x74   :  { %p14798_p0 = pnand %p14797_p13, %p14791_p10 }
  0x76   :  { %14801 = shalt.err (!%p14798_p0)
}
  0x77   :  { %180 = dma.hbm_to_vmem [thread:$0]  %s15439_s8, 16, %s178_s16, [#allocation12]  }
  0x78   :  { %s14810_s26 = scalar_lea.vmem %s197_s22, 1024  ;;  %p14815_p2 = scmp.lt.s32.totalorder %s197_s22, %s197_s22 }
  0x79   :  { %p14811_p1 = scmp.ne.s32.totalorder %s197_s22, %s14810_s26  ;;  %p14816_p3 = scmp.lt.s32.totalorder %s14810_s26, %s14810_s26 }
  0x7b   :  { %p14817_p4 = por %p14816_p3, %p14815_p2 }
  0x7d   :  { %p14818_p5 = pnand %p14817_p4, %p14811_p1 }
  0x7f   :  { %14821 = shalt.err (!%p14818_p5)
}
  0x80   :  { %202 = dma.hbm_to_vmem [thread:$0]  %s15449_s19, 1024, %s197_s22, [#allocation15], %s15359_s10, %s15359_s10, %s15360_s11  }
  0x81   :  { %s15363_s29 = smov [#allocation17]   ;;  %s15364_s28 = smov [#allocation20]  }
  0x82   :  { %s220_s0 = sshll.u32 %s15363_s29, 4  ;;  %s243_s7 = sshll.u32 %s15364_s28, 4  ;;  %s221_s0 = int_to_ptr.vmem [resolvable:$true] %s220_s0  ;;  %s244_s7 = int_to_ptr.vmem [resolvable:$true] %s243_s7 }
  0x83   :  { %s14830_s15 = scalar_lea.vmem %s221_s0, 1024  ;;  %p14835_p7 = scmp.lt.s32.totalorder %s221_s0, %s221_s0 }
  0x84   :  { %p14831_p6 = scmp.ne.s32.totalorder %s221_s0, %s14830_s15  ;;  %p14836_p8 = scmp.lt.s32.totalorder %s14830_s15, %s14830_s15 }
  0x86   :  { %p14837_p9 = por %p14836_p8, %p14835_p7 }
  0x88   :  { %p14838_p10 = pnand %p14837_p9, %p14831_p6 }
  0x8a   :  { %14841 = shalt.err (!%p14838_p10)
}
  0x8b   :  { %226 = dma.hbm_to_vmem [thread:$0]  %s15459_s30, 1024, %s221_s0, [#allocation18], %s15359_s10, %s15359_s10, %s15360_s11  }
  0x8c   :  { %s14850_s8 = scalar_lea.vmem %s244_s7, 16  ;;  %s14854_s19 = scalar_lea.vmem %s244_s7, 32 }
  0x8d   :  { %p14851_p11 = scmp.ne.s32.totalorder %s244_s7, %s14850_s8  ;;  %p14855_p12 = scmp.lt.s32.totalorder %s244_s7, %s244_s7 }
  0x8e   :  { %p14856_p13 = scmp.lt.s32.totalorder %s14854_s19, %s14850_s8 }
  0x90   :  { %p14857_p0 = por %p14856_p13, %p14855_p12 }
  0x92   :  { %p14858_p1 = pnand %p14857_p0, %p14851_p11 }
  0x94   :  { %14861 = shalt.err (!%p14858_p1)
}
  0x95   :  { %246 = dma.hbm_to_vmem [thread:$0]  %s15469_s12, 16, %s244_s7, [#allocation21]  }
  0x96   :  { %s15365_s16 = smov [#allocation23]   ;;  %s15366_s22 = smov [#allocation26]  }
  0x97   :  { %s264_s18 = sshll.u32 %s15365_s16, 4  ;;  %s287_s9 = sshll.u32 %s15366_s22, 4  ;;  %s265_s18 = int_to_ptr.vmem [resolvable:$true] %s264_s18  ;;  %s288_s9 = int_to_ptr.vmem [resolvable:$true] %s287_s9 }
  0x98   :  { %s14870_s23 = scalar_lea.vmem %s265_s18, 1024  ;;  %p14875_p3 = scmp.lt.s32.totalorder %s265_s18, %s265_s18 }
  0x99   :  { %p14871_p2 = scmp.ne.s32.totalorder %s265_s18, %s14870_s23  ;;  %p14876_p4 = scmp.lt.s32.totalorder %s14870_s23, %s14870_s23 }
  0x9b   :  { %p14877_p5 = por %p14876_p4, %p14875_p3 }
  0x9d   :  { %p14878_p6 = pnand %p14877_p5, %p14871_p2 }
  0x9f   :  { %14881 = shalt.err (!%p14878_p6)
}
  0xa0   :  { %270 = dma.hbm_to_vmem [thread:$0]  %s15484_s4, 1024, %s265_s18, [#allocation24], %s15359_s10, %s15359_s10, %s15360_s11  }
  0xa1   :  { %s14890_s30 = scalar_lea.vmem %s288_s9, 16  ;;  %s14894_s12 = scalar_lea.vmem %s288_s9, 32 }
  0xa2   :  { %p14891_p7 = scmp.ne.s32.totalorder %s288_s9, %s14890_s30  ;;  %p14895_p8 = scmp.lt.s32.totalorder %s288_s9, %s288_s9 }
  0xa3   :  { %p14896_p9 = scmp.lt.s32.totalorder %s14894_s12, %s14890_s30 }
  0xa5   :  { %p14897_p10 = por %p14896_p9, %p14895_p8 }
  0xa7   :  { %p14898_p11 = pnand %p14897_p10, %p14891_p7 }
  0xa9   :  { %14901 = shalt.err (!%p14898_p11)
}
  0xaa   :  { %290 = dma.hbm_to_vmem [thread:$0]  %s15494_s21, 16, %s288_s9, [#allocation27]  }
  0xab   :  { %s15367_s26 = smov [#allocation29]   ;;  %s15368_s0 = smov [#allocation32]  }
  0xac   :  { %s310_s29 = sshll.u32 %s15367_s26, 4  ;;  %s335_s28 = sshll.u32 %s15368_s0, 4  ;;  %s311_s29 = int_to_ptr.vmem [resolvable:$true] %s310_s29  ;;  %s336_s28 = int_to_ptr.vmem [resolvable:$true] %s335_s28 }
  0xad   :  { %s14910_s7 = scalar_lea.vmem %s311_s29, 1024  ;;  %p14915_p13 = scmp.lt.s32.totalorder %s311_s29, %s311_s29 }
  0xae   :  { %p14911_p12 = scmp.ne.s32.totalorder %s311_s29, %s14910_s7  ;;  %p14916_p0 = scmp.lt.s32.totalorder %s14910_s7, %s14910_s7 }
  0xb0   :  { %p14917_p1 = por %p14916_p0, %p14915_p13 }
  0xb2   :  { %p14918_p2 = pnand %p14917_p1, %p14911_p12 }
  0xb4   :  { %14921 = shalt.err (!%p14918_p2)
}
  0xb5   :  { %316 = dma.hbm_to_vmem [thread:$0]  %s15509_s25, 1024, %s311_s29, [#allocation30], %s15359_s10, %s15359_s10, %s15360_s11  }
  0xb6   :  { %s14930_s4 = scalar_lea.vmem %s336_s28, 16  ;;  %s14934_s21 = scalar_lea.vmem %s336_s28, 32 }
  0xb7   :  { %p14931_p3 = scmp.ne.s32.totalorder %s336_s28, %s14930_s4  ;;  %p14935_p4 = scmp.lt.s32.totalorder %s336_s28, %s336_s28 }
  0xb8   :  { %p14936_p5 = scmp.lt.s32.totalorder %s14934_s21, %s14930_s4 }
  0xba   :  { %p14937_p6 = por %p14936_p5, %p14935_p4 }
  0xbc   :  { %p14938_p7 = pnand %p14937_p6, %p14931_p3 }
  0xbe   :  { %14941 = shalt.err (!%p14938_p7)
}
  0xbf   :  { %338 = dma.hbm_to_vmem [thread:$0]  %s15519_s27, 16, %s336_s28, [#allocation33]  }
  0xc0   :  { %s15369_s15 = smov [#allocation35]  }
  0xc1   :  { %s358_s8 = sshll.u32 %s15369_s15, 4  ;;  %s359_s8 = int_to_ptr.vmem [resolvable:$true] %s358_s8 }
  0xc2   :  { %s14950_s19 = scalar_lea.vmem %s359_s8, 5120  ;;  %p14955_p9 = scmp.lt.s32.totalorder %s359_s8, %s359_s8 }
  0xc3   :  { %p14951_p8 = scmp.ne.s32.totalorder %s359_s8, %s14950_s19  ;;  %p14956_p10 = scmp.lt.s32.totalorder %s14950_s19, %s14950_s19 }
  0xc5   :  { %p14957_p11 = por %p14956_p10, %p14955_p9 }
  0xc7   :  { %p14958_p12 = pnand %p14957_p11, %p14951_p8 }
  0xc9   :  { %14961 = shalt.err (!%p14958_p12)
}
  0xca   :  { %s15370_s25 = smov 320   ;;  %s15371_s16 = smov 20  }
  0xcb   :  { %364 = dma.hbm_to_vmem [thread:$0]  %s15539_s24, 5120, %s359_s8, [#allocation36], %s15370_s25, %s15370_s25, %s15371_s16  }
  0xcc   :  { %s15372_s18 = smov [#allocation38]   ;;  %s15373_s27 = smov [#allocation2]  }
  0xcd   :  { %s388_s22 = sshll.u32 %s15372_s18, 4  ;;  %s112_s9 = sshll.u32 %s15373_s27, 4  ;;  %s389_s22 = int_to_ptr.vmem [resolvable:$true] %s388_s22  ;;  %s113_s9 = int_to_ptr.vmem [resolvable:$true] %s112_s9 }
  0xce   :  { %s14970_s23 = scalar_lea.vmem %s389_s22, 25600  ;;  %p14975_p0 = scmp.lt.s32.totalorder %s389_s22, %s389_s22 }
  0xcf   :  { %p14971_p13 = scmp.ne.s32.totalorder %s389_s22, %s14970_s23  ;;  %p14976_p1 = scmp.lt.s32.totalorder %s14970_s23, %s14970_s23 }
  0xd1   :  { %p14977_p2 = por %p14976_p1, %p14975_p0 }
  0xd3   :  { %p14978_p3 = pnand %p14977_p2, %p14971_p13 }
  0xd5   :  { %14981 = shalt.err (!%p14978_p3)
}
  0xd6   :  { %394 = dma.hbm_to_vmem [thread:$0]  %s15564_s17, 25600, %s389_s22, [#allocation39], %s15370_s25, %s15370_s25, %s15371_s16  }
  0xd7   :  { %s14990_s30 = scalar_lea.vmem %s113_s9, 5760  ;;  %p14995_p5 = scmp.lt.s32.totalorder %s113_s9, %s113_s9 }
  0xd8   :  { %p14991_p4 = scmp.ne.s32.totalorder %s113_s9, %s14990_s30  ;;  %p14996_p6 = scmp.lt.s32.totalorder %s14990_s30, %s14990_s30 }
  0xda   :  { %p14997_p7 = por %p14996_p6, %p14995_p5 }
  0xdc   :  { %p14998_p8 = pnand %p14997_p7, %p14991_p4 }
  0xde   :  { %15001 = shalt.err (!%p14998_p8)
}
  0xdf   :  { %118 = dma.hbm_to_vmem [thread:$0]  %s15399_s5, 5760, %s113_s9, [#allocation3], %s15357_s1, %s15357_s1, %s15358_s2  }
  0xe0   :  { %s15374_s24 = smov [#allocation7]   ;;  %s15375_s26 = smov [#allocation10]  }
  0xe1   :  { %s136_s12 = sshll.u32 %s15374_s24, 4  ;;  %s167_s29 = sshll.u32 %s15375_s26, 4  ;;  %s137_s12 = int_to_ptr.vmem [resolvable:$true] %s136_s12  ;;  %s168_s29 = int_to_ptr.vmem [resolvable:$true] %s167_s29 }
  0xe2   :  { %s15010_s0 = scalar_lea.vmem %s137_s12, 5760  ;;  %p15015_p10 = scmp.lt.s32.totalorder %s137_s12, %s137_s12 }
  0xe3   :  { %p15011_p9 = scmp.ne.s32.totalorder %s137_s12, %s15010_s0  ;;  %p15016_p11 = scmp.lt.s32.totalorder %s15010_s0, %s15010_s0 }
  0xe5   :  { %p15017_p12 = por %p15016_p11, %p15015_p10 }
  0xe7   :  { %p15018_p13 = pnand %p15017_p12, %p15011_p9 }
  0xe9   :  { %15021 = shalt.err (!%p15018_p13)
}
  0xea   :  { %142 = dma.hbm_to_vmem [thread:$0]  %s15409_s13, 5760, %s137_s12, [#allocation6], %s15357_s1, %s15357_s1, %s15358_s2  }
  0xeb   :  { %s15030_s17 = scalar_lea.vmem %s168_s29, 16  ;;  %s15034_s5 = scalar_lea.vmem %s168_s29, 32 }
  0xec   :  { %p15031_p0 = scmp.ne.s32.totalorder %s168_s29, %s15030_s17  ;;  %p15035_p1 = scmp.lt.s32.totalorder %s168_s29, %s168_s29 }
  0xed   :  { %p15036_p2 = scmp.lt.s32.totalorder %s15034_s5, %s15030_s17 }
  0xef   :  { %p15037_p3 = por %p15036_p2, %p15035_p1 }
  0xf1   :  { %p15038_p4 = pnand %p15037_p3, %p15031_p0 }
  0xf3   :  { %15041 = shalt.err (!%p15038_p4)
}
  0xf4   :  { %s19951_s28 = sld [smem:[#allocation62_spill]]  ;;  %s15376_s7 = smov [#allocation13]  }
  0xf5   :  { %s187_s4 = sshll.u32 %s15376_s7, 4  ;;  %s15377_s21 = smov [#allocation16]   ;;  %s188_s4 = int_to_ptr.vmem [resolvable:$true] %s187_s4 }
  0xf6   :  { %s208_s15 = sshll.u32 %s15377_s21, 4  ;;  %s15050_s8 = scalar_lea.vmem %s188_s4, 16  ;;  %s209_s15 = int_to_ptr.vmem [resolvable:$true] %s208_s15 }
  0xf7   :  { %p15051_p5 = scmp.ne.s32.totalorder %s188_s4, %s15050_s8  ;;  %s15054_s19 = scalar_lea.vmem %s188_s4, 32 }
  0xf8   :  { %p15055_p6 = scmp.lt.s32.totalorder %s188_s4, %s188_s4  ;;  %p15056_p7 = scmp.lt.s32.totalorder %s15054_s19, %s15050_s8 }
  0xfa   :  { %170 = dma.hbm_to_vmem [thread:$0]  %s19951_s28, 16, %s168_s29, [#allocation9]  }
  0xfb   :  { %p15057_p8 = por %p15056_p7, %p15055_p6 }
  0xfd   :  { %p15058_p9 = pnand %p15057_p8, %p15051_p5 }
  0xff   :  { %15061 = shalt.err (!%p15058_p9)
}
 0x100   :  { %s19952_s13 = sld [smem:[#allocation63_spill]]  ;;  %s15070_s18 = scalar_lea.vmem %s209_s15, 1024 }
 0x101   :  { %p15071_p10 = scmp.ne.s32.totalorder %s209_s15, %s15070_s18  ;;  %p15075_p11 = scmp.lt.s32.totalorder %s209_s15, %s209_s15 }
 0x102   :  { %p15076_p12 = scmp.lt.s32.totalorder %s15070_s18, %s15070_s18 }
 0x104   :  { %p15077_p13 = por %p15076_p12, %p15075_p11 }
 0x106   :  { %190 = dma.hbm_to_vmem [thread:$0]  %s19952_s13, 16, %s188_s4, [#allocation12]  }
 0x107   :  { %p15078_p0 = pnand %p15077_p13, %p15071_p10 }
 0x109   :  { %15081 = shalt.err (!%p15078_p0)
}
 0x10a   :  { %s19953_s22 = sld [smem:[#allocation64_spill]]  ;;  %s15378_s27 = smov [#allocation19]  }
 0x10b   :  { %s233_s9 = sshll.u32 %s15378_s27, 4  ;;  %s15379_s23 = smov [#allocation22]   ;;  %s234_s9 = int_to_ptr.vmem [resolvable:$true] %s233_s9 }
 0x10c   :  { %s253_s30 = sshll.u32 %s15379_s23, 4  ;;  %s15090_s24 = scalar_lea.vmem %s234_s9, 16  ;;  %s254_s30 = int_to_ptr.vmem [resolvable:$true] %s253_s30 }
 0x10d   :  { %p15091_p1 = scmp.ne.s32.totalorder %s234_s9, %s15090_s24  ;;  %s15094_s12 = scalar_lea.vmem %s234_s9, 32 }
 0x10e   :  { %p15095_p2 = scmp.lt.s32.totalorder %s234_s9, %s234_s9  ;;  %p15096_p3 = scmp.lt.s32.totalorder %s15094_s12, %s15090_s24 }
 0x110   :  { %214 = dma.hbm_to_vmem [thread:$0]  %s19953_s22, 1024, %s209_s15, [#allocation15], %s15359_s10, %s15359_s10, %s15360_s11  }
 0x111   :  { %p15097_p4 = por %p15096_p3, %p15095_p2 }
 0x113   :  { %p15098_p5 = pnand %p15097_p4, %p15091_p1 }
 0x115   :  { %15101 = shalt.err (!%p15098_p5)
}
 0x116   :  { %s19954_s26 = sld [smem:[#allocation65_spill]]  ;;  %s15110_s29 = scalar_lea.vmem %s254_s30, 16 }
 0x117   :  { %p15111_p6 = scmp.ne.s32.totalorder %s254_s30, %s15110_s29  ;;  %s15114_s0 = scalar_lea.vmem %s254_s30, 32 }
 0x118   :  { %p15115_p7 = scmp.lt.s32.totalorder %s254_s30, %s254_s30  ;;  %p15116_p8 = scmp.lt.s32.totalorder %s15114_s0, %s15110_s29 }
 0x11a   :  { %p15117_p9 = por %p15116_p8, %p15115_p7 }
 0x11c   :  { %236 = dma.hbm_to_vmem [thread:$0]  %s19954_s26, 16, %s234_s9, [#allocation18]  }
 0x11d   :  { %p15118_p10 = pnand %p15117_p9, %p15111_p6 }
 0x11f   :  { %15121 = shalt.err (!%p15118_p10)
}
 0x120   :  { %s19955_s17 = sld [smem:[#allocation66_spill]]  ;;  %s15380_s5 = smov [#allocation25]  }
 0x121   :  { %s277_s28 = sshll.u32 %s15380_s5, 4  ;;  %s15381_s7 = smov [#allocation28]   ;;  %s278_s28 = int_to_ptr.vmem [resolvable:$true] %s277_s28 }
 0x122   :  { %s298_s4 = sshll.u32 %s15381_s7, 4  ;;  %s15130_s21 = scalar_lea.vmem %s278_s28, 16  ;;  %s299_s4 = int_to_ptr.vmem [resolvable:$true] %s298_s4 }
 0x123   :  { %p15131_p11 = scmp.ne.s32.totalorder %s278_s28, %s15130_s21  ;;  %s15134_s15 = scalar_lea.vmem %s278_s28, 32 }
 0x124   :  { %p15135_p12 = scmp.lt.s32.totalorder %s278_s28, %s278_s28  ;;  %p15136_p13 = scmp.lt.s32.totalorder %s15134_s15, %s15130_s21 }
 0x126   :  { %256 = dma.hbm_to_vmem [thread:$0]  %s19955_s17, 16, %s254_s30, [#allocation21]  }
 0x127   :  { %p15137_p0 = por %p15136_p13, %p15135_p12 }
 0x129   :  { %p15138_p1 = pnand %p15137_p0, %p15131_p11 }
 0x12b   :  { %15141 = shalt.err (!%p15138_p1)
}
 0x12c   :  { %s19956_s8 = sld [smem:[#allocation68_spill]]  ;;  %s15150_s19 = scalar_lea.vmem %s299_s4, 1024 }
 0x12d   :  { %p15151_p2 = scmp.ne.s32.totalorder %s299_s4, %s15150_s19  ;;  %p15155_p3 = scmp.lt.s32.totalorder %s299_s4, %s299_s4 }
 0x12e   :  { %p15156_p4 = scmp.lt.s32.totalorder %s15150_s19, %s15150_s19 }
 0x130   :  { %p15157_p5 = por %p15156_p4, %p15155_p3 }
 0x132   :  { %280 = dma.hbm_to_vmem [thread:$0]  %s19956_s8, 16, %s278_s28, [#allocation24]  }
 0x133   :  { %p15158_p6 = pnand %p15157_p5, %p15151_p2 }
 0x135   :  { %15161 = shalt.err (!%p15158_p6)
}
 0x136   :  { %s19957_s13 = sld [smem:[#allocation70_spill]]  ;;  %s15382_s18 = smov [#allocation31]  }
 0x137   :  { %s322_s22 = sshll.u32 %s15382_s18, 4  ;;  %s15383_s27 = smov [#allocation34]   ;;  %s323_s22 = int_to_ptr.vmem [resolvable:$true] %s322_s22 }
 0x138   :  { %s345_s9 = sshll.u32 %s15383_s27, 4  ;;  %s15170_s23 = scalar_lea.vmem %s323_s22, 1024  ;;  %s346_s9 = int_to_ptr.vmem [resolvable:$true] %s345_s9 }
 0x139   :  { %p15171_p7 = scmp.ne.s32.totalorder %s323_s22, %s15170_s23  ;;  %p15175_p8 = scmp.lt.s32.totalorder %s323_s22, %s323_s22 }
 0x13a   :  { %p15176_p9 = scmp.lt.s32.totalorder %s15170_s23, %s15170_s23 }
 0x13c   :  { %304 = dma.hbm_to_vmem [thread:$0]  %s19957_s13, 1024, %s299_s4, [#allocation27], %s15359_s10, %s15359_s10, %s15360_s11  }
 0x13d   :  { %p15177_p10 = por %p15176_p9, %p15175_p8 }
 0x13f   :  { %p15178_p11 = pnand %p15177_p10, %p15171_p7 }
 0x141   :  { %15181 = shalt.err (!%p15178_p11)
}
 0x142   :  { %s19958_s30 = sld [smem:[#allocation71_spill]]  ;;  %s15190_s24 = scalar_lea.vmem %s346_s9, 16 }
 0x143   :  { %p15191_p12 = scmp.ne.s32.totalorder %s346_s9, %s15190_s24  ;;  %s15194_s12 = scalar_lea.vmem %s346_s9, 32 }
 0x144   :  { %p15195_p13 = scmp.lt.s32.totalorder %s346_s9, %s346_s9  ;;  %p15196_p0 = scmp.lt.s32.totalorder %s15194_s12, %s15190_s24 }
 0x146   :  { %p15197_p1 = por %p15196_p0, %p15195_p13 }
 0x148   :  { %328 = dma.hbm_to_vmem [thread:$0]  %s19958_s30, 1024, %s323_s22, [#allocation30], %s15359_s10, %s15359_s10, %s15360_s11  }
 0x149   :  { %p15198_p2 = pnand %p15197_p1, %p15191_p12 }
 0x14b   :  { %15201 = shalt.err (!%p15198_p2)
}
 0x14c   :  { %s19959_s26 = sld [smem:[#allocation72_spill]]  ;;  %s15384_s29 = smov [#allocation37]  }
 0x14d   :  { %s376_s0 = sshll.u32 %s15384_s29, 4  ;;  %s15385_s17 = smov [#allocation40]   ;;  %s377_s0 = int_to_ptr.vmem [resolvable:$true] %s376_s0 }
 0x14e   :  { %s400_s5 = sshll.u32 %s15385_s17, 4  ;;  %s15210_s28 = scalar_lea.vmem %s377_s0, 25600  ;;  %s401_s5 = int_to_ptr.vmem [resolvable:$true] %s400_s5 }
 0x14f   :  { %p15211_p3 = scmp.ne.s32.totalorder %s377_s0, %s15210_s28  ;;  %p15215_p4 = scmp.lt.s32.totalorder %s377_s0, %s377_s0 }
 0x150   :  { %p15216_p5 = scmp.lt.s32.totalorder %s15210_s28, %s15210_s28 }
 0x152   :  { %348 = dma.hbm_to_vmem [thread:$0]  %s19959_s26, 16, %s346_s9, [#allocation33]  }
 0x153   :  { %p15217_p6 = por %p15216_p5, %p15215_p4 }
 0x155   :  { %p15218_p7 = pnand %p15217_p6, %p15211_p3 }
 0x157   :  { %15221 = shalt.err (!%p15218_p7)
}
 0x158   :  { %s19960_s10 = sld [smem:[#allocation78_spill]]  ;;  %s15230_s11 = scalar_lea.vmem %s401_s5, 25600 }
 0x159   :  { %p15231_p8 = scmp.ne.s32.totalorder %s401_s5, %s15230_s11  ;;  %p15235_p9 = scmp.lt.s32.totalorder %s401_s5, %s401_s5 }
 0x15a   :  { %p15236_p10 = scmp.lt.s32.totalorder %s15230_s11, %s15230_s11 }
 0x15c   :  { %p15237_p11 = por %p15236_p10, %p15235_p9 }
 0x15e   :  { %382 = dma.hbm_to_vmem [thread:$0]  %s19960_s10, 25600, %s377_s0, [#allocation36], %s15370_s25, %s15370_s25, %s15371_s16  }
 0x15f   :  { %p15238_p12 = pnand %p15237_p11, %p15231_p8 }
 0x161   :  { %15241 = shalt.err (!%p15238_p12)
}
 0x162   :  { %s19961_s7 = sld [smem:[#allocation79_spill]]  ;;  %s15386_s4 = smov [#allocation41]  }
 0x163   :  { %s420_s21 = sshll.u32 %s15386_s4, 4  ;;  %s421_s21 = int_to_ptr.vmem [resolvable:$true] %s420_s21 }
 0x164   :  { %s15250_s15 = scalar_lea.vmem %s421_s21, 5120  ;;  %p15255_p0 = scmp.lt.s32.totalorder %s421_s21, %s421_s21 }
 0x165   :  { %p15251_p13 = scmp.ne.s32.totalorder %s421_s21, %s15250_s15  ;;  %p15256_p1 = scmp.lt.s32.totalorder %s15250_s15, %s15250_s15 }
 0x167   :  { %p15257_p2 = por %p15256_p1, %p15255_p0 }
 0x168   :  { %406 = dma.hbm_to_vmem [thread:$0]  %s19961_s7, 25600, %s401_s5, [#allocation39], %s15370_s25, %s15370_s25, %s15371_s16  }
 0x169   :  { %p15258_p3 = pnand %p15257_p2, %p15251_p13 }
 0x16b   :  { %15261 = shalt.err (!%p15258_p3)
}
 0x16c   :  { %s19962_s8 = sld [smem:[#allocation84_spill]] }
 0x172   :  { %426 = dma.hbm_to_vmem [thread:$0]  %s19962_s8, 5120, %s421_s21, [#allocation42], %s15370_s25, %s15370_s25, %s15371_s16  }
 0x173   :  { %15282 = dma.done.wait [#allocation3], 5760  }
 0x174   :  { %15283 = vsyncadd [#allocation3], 4294961536 }
 0x175   :  { %15284 = dma.done.wait [#allocation6], 11520  }
 0x176   :  { %15285 = vsyncadd [#allocation6], 4294955776 }
 0x177   :  { %15286 = dma.done.wait [#allocation9], 5136  }
 0x178   :  { %15287 = vsyncadd [#allocation9], 4294962160 }
 0x179   :  { %15288 = dma.done.wait [#allocation12], 32  }
 0x17a   :  { %15289 = vsyncadd [#allocation12], 4294967264 }
 0x17b   :  { %15290 = dma.done.wait [#allocation15], 2048  }
 0x17c   :  { %15291 = vsyncadd [#allocation15], 4294965248 }
 0x17d   :  { %15292 = dma.done.wait [#allocation18], 1040  }
 0x17e   :  { %15293 = vsyncadd [#allocation18], 4294966256 }
 0x17f   :  { %15294 = dma.done.wait [#allocation21], 32  }
 0x180   :  { %15295 = vsyncadd [#allocation21], 4294967264 }
 0x181   :  { %15296 = dma.done.wait [#allocation24], 1040  }
 0x182   :  { %15297 = vsyncadd [#allocation24], 4294966256 }
 0x183   :  { %15298 = dma.done.wait [#allocation27], 1040  }
 0x184   :  { %15299 = vsyncadd [#allocation27], 4294966256 }
 0x185   :  { %15300 = dma.done.wait [#allocation30], 2048  }
 0x186   :  { %15301 = vsyncadd [#allocation30], 4294965248 }
 0x187   :  { %15302 = dma.done.wait [#allocation33], 32  }
 0x188   :  { %15303 = vsyncadd [#allocation33], 4294967264 }
 0x189   :  { %15304 = dma.done.wait [#allocation36], 30720  }
 0x18a   :  { %15305 = vsyncadd [#allocation36], 4294936576 }
 0x18b   :  { %15306 = dma.done.wait [#allocation39], 51200  }
 0x18c   :  { %15307 = vsyncadd [#allocation39], 4294916096 }
 0x18d   :  { %15308 = dma.done.wait [#allocation42], 5120  }
 0x18e   :  { %15309 = vsyncadd [#allocation42], 4294962176  ;;  %v13694_v0 = vld [vmem:[#allocation8 + $0x78] sm:$0xff]   ;;  %v13698_v4 = vld [vmem:[#allocation8 + $0x70] sm:$0xff]   ;;  %v19740_v38 = vmov 0.0   ;;  %vm15388_vm0 = vmmov 0  }
 0x18f   :  { %v13695_v1 = vld [vmem:[#allocation8 + $0x38] sm:$0xff]   ;;  %12419 = vmatprep.subr.bf16.mxu0 %v13694_v0  ;;  %v13699_v5 = vld [vmem:[#allocation8 + $0x30] sm:$0xff]   ;;  %v13702_v8 = vld [vmem:[#allocation8 + $0x68] sm:$0xff]   ;;  %s19963_s25 = sld [smem:[#allocation59_spill]]  ;;  %vm1385_vm1 = vcmask 588800   ;;  %vm1571_vm2 = vcmask 1045504  }
 0x190   :  { %v13696_v2 = vld [vmem:[#allocation8 + $0xf8] sm:$0xff]   ;;  %12420 = vmatpush3.bf16.msra.mxu0 %v13695_v1  ;;  %v13700_v6 = vld [vmem:[#allocation8 + $0xf0] sm:$0xff]   ;;  %v13703_v9 = vld [vmem:[#allocation8 + $0x28] sm:$0xff]   ;;  %s19964_s16 = sld [smem:[#allocation60_spill]]  ;;  %vm1653_vm3 = vcmask 1041408  }
 0x191   :  { %v13697_v3 = vld [vmem:[#allocation8 + $0xb8] sm:$0xff]   ;;  %12465 = vmatprep.subr.bf16.mxu1 %v13696_v2  ;;  %12421 = vmatprep.subr.bf16.mxu0 %v13698_v4  ;;  %v13701_v7 = vld [vmem:[#allocation8 + $0xb0] sm:$0xff]   ;;  %v13704_v10 = vld [vmem:[#allocation8 + $0xe8] sm:$0xff]   ;;  %s19965_s19 = sld [smem:[#allocation83_spill]] }
 0x192   :  { %12466 = vmatpush3.bf16.msra.mxu1 %v13697_v3  ;;  %v13705_v11 = vld [vmem:[#allocation8 + $0xa8] sm:$0xff]   ;;  %v13706_v12 = vld [vmem:[#allocation8 + $0x60] sm:$0xff]   ;;  %v13710_v16 = vld [vmem:[#allocation8 + $0x58] sm:$0xff]   ;;  %s19966_s13 = sld [smem:[#allocation61_spill]] }
 0x193   :  { %12467 = vmatprep.subr.bf16.mxu1 %v13700_v6  ;;  %v13707_v13 = vld [vmem:[#allocation8 + $0x20] sm:$0xff]   ;;  %v13711_v17 = vld [vmem:[#allocation8 + $0x18] sm:$0xff]   ;;  %v13714_v20 = vld [vmem:[#allocation8 + $0x50] sm:$0xff]   ;;  %s19985_s18 = sld [smem:[#allocation67_spill]] }
 0x194   :  { %12422 = vmatpush3.bf16.msra.mxu0 %v13699_v5  ;;  %v13708_v14 = vld [vmem:[#allocation8 + $0xe0] sm:$0xff]   ;;  %v13712_v18 = vld [vmem:[#allocation8 + $0xd8] sm:$0xff]   ;;  %v13715_v21 = vld [vmem:[#allocation8 + $0x10] sm:$0xff]   ;;  %s19986_s22 = sld [smem:[#allocation69_spill]] }
 0x195   :  { %12423 = vmatprep.subr.bf16.mxu0 %v13702_v8  ;;  %v13709_v15 = vld [vmem:[#allocation8 + $0xa0] sm:$0xff]   ;;  %v13713_v19 = vld [vmem:[#allocation8 + $0x98] sm:$0xff]   ;;  %v13716_v22 = vld [vmem:[#allocation8 + $0xd0] sm:$0xff]   ;;  %s19987_s27 = sld [smem:[#allocation73_spill]] }
 0x196   :  { %12468 = vmatpush3.bf16.msra.mxu1 %v13701_v7  ;;  %v13717_v23 = vld [vmem:[#allocation8 + $0x90] sm:$0xff]   ;;  %v13718_v24 = vld [vmem:[#allocation8 + $0x48] sm:$0xff]   ;;  %v13722_v28 = vld [vmem:[#allocation8 + $0x40] sm:$0xff]   ;;  %s19996_s9 = sld [smem:[#allocation74_spill]] }
 0x197   :  { %12469 = vmatprep.subr.bf16.mxu1 %v13704_v10  ;;  %v13719_v25 = vld [vmem:[#allocation8 + $0x8] sm:$0xff]   ;;  %v13723_v29 = vld [vmem:[#allocation8] sm:$0xff]   ;;  %v513_v31 = vld [vmem:[#allocation2 + $0x8] sm:$0xff]  ;;  %s19998_s23 = sld [smem:[#allocation75_spill]] }
 0x198   :  { %12424 = vmatpush3.bf16.msra.mxu0 %v13703_v9  ;;  %v13720_v26 = vld [vmem:[#allocation8 + $0xc8] sm:$0xff]   ;;  %v13724_v30 = vld [vmem:[#allocation8 + $0xc0] sm:$0xff]   ;;  %v518_v32 = vld [vmem:[#allocation2 + $0x30] sm:$0xff]  ;;  %s19999_s30 = sld [smem:[#allocation76_spill]] }
 0x199   :  { %12425 = vmatprep.subr.bf16.mxu0 %v13706_v12  ;;  %v13721_v27 = vld [vmem:[#allocation8 + $0x88] sm:$0xff]   ;;  %v558_v33 = vld [vmem:[#allocation5 + $0x8] sm:$0xff]  ;;  %v563_v34 = vld [vmem:[#allocation5 + $0x30] sm:$0xff]  ;;  %s20000_s24 = sld [smem:[#allocation77_spill]] }
 0x19a   :  { %12470 = vmatpush3.bf16.msra.mxu1 %v13705_v11  ;;  %v603_v35 = vmul.f32 %v558_v33, %v513_v31  ;;  %v648_v36 = vld [vmem:[#allocation7 + $0x8] sm:$0xff]  ;;  %v653_v37 = vld [vmem:[#allocation7 + $0x30] sm:$0xff]  ;;  %v608_v39 = vmul.f32 %v563_v34, %v518_v32  ;;  %v517_v43 = vld [vmem:[#allocation2 + $0x28] sm:$0xff]  ;;  %s20540_s12 = sld [smem:[#allocation80_spill]] }
 0x19b   :  { %12471 = vmatprep.subr.bf16.mxu1 %v13708_v14  ;;  %v13725_v40 = vld [vmem:[#allocation8 + $0x80] sm:$0xff]   ;;  %v512_v42 = vld [vmem:[#allocation2] sm:$0xff]  ;;  %v557_v44 = vld [vmem:[#allocation5] sm:$0xff]  ;;  %s20553_s26 = sld [smem:[#allocation81_spill]] }
 0x19c   :  { %12426 = vmatpush3.bf16.msra.mxu0 %v13707_v13  ;;  %v693_v41 = vadd.f32 %v648_v36, %v603_v35  ;;  %v698_v45 = vadd.f32 %v653_v37, %v608_v39  ;;  %v562_v46 = vld [vmem:[#allocation5 + $0x28] sm:$0xff]  ;;  %v602_v47 = vmul.f32 %v557_v44, %v512_v42  ;;  %v652_v49 = vld [vmem:[#allocation7 + $0x28] sm:$0xff]  ;;  %v520_v52 = vld [vmem:[#allocation2 + $0x40] sm:$0xff]  ;;  %s20566_s29 = sld [smem:[#allocation82_spill]] }
 0x19d   :  { %12427 = vmatprep.subr.bf16.mxu0 %v13710_v16  ;;  %v647_v48 = vld [vmem:[#allocation7] sm:$0xff]  ;;  %v607_v50 = vmul.f32 %v562_v46, %v517_v43  ;;  %v515_v51 = vld [vmem:[#allocation2 + $0x18] sm:$0xff]  ;;  %v560_v53 = vld [vmem:[#allocation5 + $0x18] sm:$0xff] }
 0x19e   :  { %12472 = vmatpush3.bf16.msra.mxu1 %v13709_v15  ;;  %v899_v54 = vpack.c.bf16 %v698_v45, %v693_v41  ;;  %v692_v55 = vadd.f32 %v647_v48, %v602_v47  ;;  %v565_v56 = vld [vmem:[#allocation5 + $0x40] sm:$0xff]  ;;  %v605_v57 = vmul.f32 %v560_v53, %v515_v51  ;;  %v655_v59 = vld [vmem:[#allocation7 + $0x40] sm:$0xff]  ;;  %v519_v63 = vld [vmem:[#allocation2 + $0x38] sm:$0xff] }
 0x19f   :  { %12473 = vmatprep.subr.bf16.mxu1 %v13712_v18  ;;  %v650_v58 = vld [vmem:[#allocation7 + $0x18] sm:$0xff]  ;;  %v697_v60 = vadd.f32 %v652_v49, %v607_v50  ;;  %v610_v61 = vmul.f32 %v565_v56, %v520_v52  ;;  %v514_v62 = vld [vmem:[#allocation2 + $0x10] sm:$0xff]  ;;  %v559_v0 = vld [vmem:[#allocation5 + $0x10] sm:$0xff] }
 0x1a0   :  { %12428 = vmatpush3.bf16.msra.mxu0 %v13711_v17  ;;  %1201 = vmatprep.mubr.bf16.mxu0 %v899_v54  ;;  %v695_v1 = vadd.f32 %v650_v58, %v605_v57  ;;  %v564_v2 = vld [vmem:[#allocation5 + $0x38] sm:$0xff]  ;;  %v604_v3 = vmul.f32 %v559_v0, %v514_v62  ;;  %v654_v5 = vld [vmem:[#allocation7 + $0x38] sm:$0xff]  ;;  %v523_v9 = vld [vmem:[#allocation2 + $0x58] sm:$0xff] }
 0x1a1   :  { %12429 = vmatprep.subr.bf16.mxu0 %v13714_v20  ;;  %v649_v4 = vld [vmem:[#allocation7 + $0x10] sm:$0xff]  ;;  %v898_v6 = vpack.c.bf16 %v697_v60, %v692_v55  ;;  %v700_v7 = vadd.f32 %v655_v59, %v610_v61  ;;  %v609_v8 = vmul.f32 %v564_v2, %v519_v63  ;;  %v573_v13 = vld [vmem:[#allocation5 + $0x80] sm:$0xff]  ;;  %v663_v16 = vld [vmem:[#allocation7 + $0x80] sm:$0xff] }
 0x1a2   :  { %12474 = vmatpush3.bf16.msra.mxu1 %v13713_v19  ;;  %v528_v10 = vld [vmem:[#allocation2 + $0x80] sm:$0xff]  ;;  %v694_v12 = vadd.f32 %v649_v4, %v604_v3  ;;  %v658_v15 = vld [vmem:[#allocation7 + $0x58] sm:$0xff]  ;;  %v522_v20 = vld [vmem:[#allocation2 + $0x50] sm:$0xff] }
 0x1a3   :  { %12475 = vmatprep.subr.bf16.mxu1 %v13716_v22  ;;  %v568_v11 = vld [vmem:[#allocation5 + $0x58] sm:$0xff]  ;;  %v901_v17 = vpack.c.bf16 %v700_v7, %v695_v1  ;;  %v699_v18 = vadd.f32 %v654_v5, %v609_v8  ;;  %v618_v19 = vmul.f32 %v573_v13, %v528_v10  ;;  %v567_v22 = vld [vmem:[#allocation5 + $0x50] sm:$0xff]  ;;  %v525_v31 = vld [vmem:[#allocation2 + $0x68] sm:$0xff] }
 0x1a4   :  { %12430 = vmatpush3.bf16.msra.mxu0 %v13715_v21  ;;  %v613_v14 = vmul.f32 %v568_v11, %v523_v9  ;;  %v527_v21 = vld [vmem:[#allocation2 + $0x78] sm:$0xff]  ;;  %v530_v32 = vld [vmem:[#allocation2 + $0x90] sm:$0xff]  ;;  %v665_v39 = vld [vmem:[#allocation7 + $0x90] sm:$0xff] }
 0x1a5   :  { %12431 = vmatprep.subr.bf16.mxu0 %v13718_v24  ;;  %v572_v24 = vld [vmem:[#allocation5 + $0x78] sm:$0xff]  ;;  %1273 = vmatprep.mubr.bf16.mxu1 %v901_v17  ;;  %v570_v33 = vld [vmem:[#allocation5 + $0x68] sm:$0xff]  ;;  %v575_v35 = vld [vmem:[#allocation5 + $0x90] sm:$0xff] }
 0x1a6   :  { %12476 = vmatpush3.bf16.msra.mxu1 %v13717_v23  ;;  %v703_v23 = vadd.f32 %v658_v15, %v613_v14  ;;  %v615_v36 = vmul.f32 %v570_v33, %v525_v31  ;;  %v660_v37 = vld [vmem:[#allocation7 + $0x68] sm:$0xff]  ;;  %v620_v42 = vmul.f32 %v575_v35, %v530_v32  ;;  %v13726_v43 = vld [vmem:[#allocation8 + $0x138] sm:$0xff]   ;;  %v524_v45 = vld [vmem:[#allocation2 + $0x60] sm:$0xff] }
 0x1a7   :  { %12477 = vmatprep.subr.bf16.mxu1 %v13720_v26  ;;  %v657_v26 = vld [vmem:[#allocation7 + $0x50] sm:$0xff]  ;;  %v529_v46 = vld [vmem:[#allocation2 + $0x88] sm:$0xff]  ;;  %v574_v50 = vld [vmem:[#allocation5 + $0x88] sm:$0xff] }
 0x1a8   :  { %12432 = vmatpush3.bf16.msra.mxu0 %v13719_v25  ;;  %v612_v25 = vmul.f32 %v567_v22, %v522_v20  ;;  %v705_v44 = vadd.f32 %v660_v37, %v615_v36  ;;  %v569_v47 = vld [vmem:[#allocation5 + $0x60] sm:$0xff]  ;;  %v710_v49 = vadd.f32 %v665_v39, %v620_v42  ;;  %v659_v52 = vld [vmem:[#allocation7 + $0x60] sm:$0xff]  ;;  %v664_v53 = vld [vmem:[#allocation7 + $0x88] sm:$0xff]  ;;  %v619_v54 = vmul.f32 %v574_v50, %v529_v46 }
 0x1a9   :  { %12433 = vmatprep.subr.bf16.mxu0 %v13722_v28  ;;  %v900_v28 = vpack.c.bf16 %v699_v18, %v694_v12  ;;  %v614_v51 = vmul.f32 %v569_v47, %v524_v45  ;;  %v13727_v55 = vld [vmem:[#allocation8 + $0x130] sm:$0xff]   ;;  %v538_v59 = vld [vmem:[#allocation2 + $0xd0] sm:$0xff]  ;;  %v583_v62 = vld [vmem:[#allocation5 + $0xd0] sm:$0xff] }
 0x1aa   :  { %12478 = vmatpush3.bf16.msra.mxu1 %v13721_v27  ;;  %v662_v27 = vld [vmem:[#allocation7 + $0x78] sm:$0xff]  ;;  %v702_v34 = vadd.f32 %v657_v26, %v612_v25  ;;  %v906_v56 = vpack.c.bf16 %v710_v49, %v705_v44  ;;  %v578_v60 = vld [vmem:[#allocation5 + $0xa8] sm:$0xff]  ;;  %v709_v61 = vadd.f32 %v664_v53, %v619_v54  ;;  %v668_v0 = vld [vmem:[#allocation7 + $0xa8] sm:$0xff]  ;;  %v628_v2 = vmul.f32 %v583_v62, %v538_v59 }
 0x1ab   :  { %12479 = vmatprep.subr.bf16.mxu1 %v13724_v30  ;;  %v617_v30 = vmul.f32 %v572_v24, %v527_v21  ;;  %v704_v57 = vadd.f32 %v659_v52, %v614_v51  ;;  %v533_v58 = vld [vmem:[#allocation2 + $0xa8] sm:$0xff]  ;;  %v673_v1 = vld [vmem:[#allocation7 + $0xd0] sm:$0xff]  ;;  %v582_v8 = vld [vmem:[#allocation5 + $0xc8] sm:$0xff] }
 0x1ac   :  { %12434 = vmatpush3.bf16.msra.mxu0 %v13723_v29  ;;  %v708_v29 = vadd.f32 %v663_v16, %v618_v19  ;;  %v623_v63 = vmul.f32 %v578_v60, %v533_v58  ;;  %v532_v3 = vld [vmem:[#allocation2 + $0xa0] sm:$0xff]  ;;  %v537_v4 = vld [vmem:[#allocation2 + $0xc8] sm:$0xff]  ;;  %v667_v10 = vld [vmem:[#allocation7 + $0xa0] sm:$0xff]  ;;  %v718_v12 = vadd.f32 %v673_v1, %v628_v2 }
 0x1ad   :  { %13010 = vmatprep.subr.bf16.mxu0 %v19740_v38  ;;  %v707_v41 = vadd.f32 %v662_v27, %v617_v30  ;;  %v577_v5 = vld [vmem:[#allocation5 + $0xa0] sm:$0xff]  ;;  %v672_v11 = vld [vmem:[#allocation7 + $0xc8] sm:$0xff]  ;;  %v627_v13 = vmul.f32 %v582_v8, %v537_v4  ;;  %v540_v15 = vld [vmem:[#allocation2 + $0xe0] sm:$0xff] }
 0x1ae   :  { %12480 = vmatpush3.bf16.msra.mxu1 %v13725_v40  ;;  %v904_v40 = vpack.c.bf16 %v708_v29, %v703_v23  ;;  %v713_v7 = vadd.f32 %v668_v0, %v623_v63  ;;  %v622_v9 = vmul.f32 %v577_v5, %v532_v3  ;;  %v535_v14 = vld [vmem:[#allocation2 + $0xb8] sm:$0xff]  ;;  %v580_v16 = vld [vmem:[#allocation5 + $0xb8] sm:$0xff]  ;;  %v585_v18 = vld [vmem:[#allocation5 + $0xe0] sm:$0xff] }
 0x1af   :  { %13046 = vmatprep.subr.mxu1 %v19740_v38  ;;  %1202 = vmatmul.mubr.bf16.vlgmr.msra.gmra.mxu0 %v898_v6  ;;  %v903_v48 = vpack.c.bf16 %v707_v41, %v702_v34  ;;  %v905_v6 = vpack.c.bf16 %v709_v61, %v704_v57  ;;  %v625_v19 = vmul.f32 %v580_v16, %v535_v14  ;;  %v670_v20 = vld [vmem:[#allocation7 + $0xb8] sm:$0xff]  ;;  %v675_v21 = vld [vmem:[#allocation7 + $0xe0] sm:$0xff]  ;;  %v13728_v25 = vld [vmem:[#allocation8 + $0x128] sm:$0xff]  }
 0x1b0   :  { %1209 = vmatprep.mubr.bf16.mxu0 %v904_v40  ;;  %13011 = vmatpush3.bf16.msra.mxu0 %v13726_v43  ;;  %v712_v17 = vadd.f32 %v667_v10, %v622_v9  ;;  %v909_v22 = vpack.c.bf16 %v718_v12, %v713_v7  ;;  %v717_v23 = vadd.f32 %v672_v11, %v627_v13  ;;  %v534_v27 = vld [vmem:[#allocation2 + $0xb0] sm:$0xff]  ;;  %v579_v29 = vld [vmem:[#allocation5 + $0xb0] sm:$0xff]  ;;  %v584_v32 = vld [vmem:[#allocation5 + $0xd8] sm:$0xff] }
 0x1b1   :  { %1274 = vmatmul.mubr.bf16.vlgmr.msra.gmra.mxu1 %v900_v28  ;;  %13012 = vmatprep.subr.bf16.mxu0 %v19740_v38  ;;  %v630_v24 = vmul.f32 %v585_v18, %v540_v15  ;;  %v715_v26 = vadd.f32 %v670_v20, %v625_v19  ;;  %v539_v28 = vld [vmem:[#allocation2 + $0xd8] sm:$0xff]  ;;  %v624_v33 = vmul.f32 %v579_v29, %v534_v27  ;;  %v669_v34 = vld [vmem:[#allocation7 + $0xb0] sm:$0xff]  ;;  %v674_v35 = vld [vmem:[#allocation7 + $0xd8] sm:$0xff] }
 0x1b2   :  { %1281 = vmatprep.mubr.bf16.mxu1 %v906_v56  ;;  %v908_v30 = vpack.c.bf16 %v717_v23, %v712_v17  ;;  %v629_v36 = vmul.f32 %v584_v32, %v539_v28  ;;  %v13729_v37 = vld [vmem:[#allocation8 + $0x120] sm:$0xff]   ;;  %v548_v42 = vld [vmem:[#allocation2 + $0x120] sm:$0xff]  ;;  %v593_v45 = vld [vmem:[#allocation5 + $0x120] sm:$0xff] }
 0x1b3   :  { %v720_v31 = vadd.f32 %v675_v21, %v630_v24  ;;  %v714_v40 = vadd.f32 %v669_v34, %v624_v33  ;;  %v543_v41 = vld [vmem:[#allocation2 + $0xf8] sm:$0xff]  ;;  %v588_v43 = vld [vmem:[#allocation5 + $0xf8] sm:$0xff]  ;;  %v678_v47 = vld [vmem:[#allocation7 + $0xf8] sm:$0xff]  ;;  %v638_v49 = vmul.f32 %v593_v45, %v548_v42 }
 0x1b4   :  { %13013 = vmatpush3.bf16.msra.mxu0 %v13727_v55  ;;  %v719_v44 = vadd.f32 %v674_v35, %v629_v36  ;;  %v633_v46 = vmul.f32 %v588_v43, %v543_v41  ;;  %v542_v50 = vld [vmem:[#allocation2 + $0xf0] sm:$0xff]  ;;  %v547_v51 = vld [vmem:[#allocation2 + $0x118] sm:$0xff]  ;;  %v592_v55 = vld [vmem:[#allocation5 + $0x118] sm:$0xff] }
 0x1b5   :  { %13014 = vmatprep.subr.bf16.mxu0 %v19740_v38  ;;  %v911_v39 = vpack.c.bf16 %v720_v31, %v715_v26  ;;  %v587_v52 = vld [vmem:[#allocation5 + $0xf0] sm:$0xff]  ;;  %v677_v57 = vld [vmem:[#allocation7 + $0xf0] sm:$0xff]  ;;  %v682_v58 = vld [vmem:[#allocation7 + $0x118] sm:$0xff]  ;;  %v637_v60 = vmul.f32 %v592_v55, %v547_v51 }
 0x1b6   :  { %v910_v53 = vpack.c.bf16 %v719_v44, %v714_v40  ;;  %v723_v54 = vadd.f32 %v678_v47, %v633_v46  ;;  %v632_v56 = vmul.f32 %v587_v52, %v542_v50  ;;  %v545_v61 = vld [vmem:[#allocation2 + $0x108] sm:$0xff]  ;;  %v550_v62 = vld [vmem:[#allocation2 + $0x130] sm:$0xff]  ;;  %v595_v1 = vld [vmem:[#allocation5 + $0x130] sm:$0xff] }
 0x1b7   :  { %1210 = vmatmul.mubr.bf16.gmra.mxu0 %v903_v48  ;;  %v683_v48 = vld [vmem:[#allocation7 + $0x120] sm:$0xff]  ;;  %v680_v3 = vld [vmem:[#allocation7 + $0x108] sm:$0xff]  ;;  %v685_v4 = vld [vmem:[#allocation7 + $0x130] sm:$0xff]  ;;  %v640_v7 = vmul.f32 %v595_v1, %v550_v62 }
 0x1b8   :  { %1217 = vmatprep.mubr.bf16.mxu0 %v909_v22  ;;  %13015 = vmatpush3.bf16.msra.mxu0 %v13728_v25  ;;  %v728_v59 = vadd.f32 %v683_v48, %v638_v49  ;;  %v590_v63 = vld [vmem:[#allocation5 + $0x108] sm:$0xff]  ;;  %v722_v0 = vadd.f32 %v677_v57, %v632_v56  ;;  %v544_v10 = vld [vmem:[#allocation2 + $0x100] sm:$0xff]  ;;  %v549_v11 = vld [vmem:[#allocation2 + $0x128] sm:$0xff] }
 0x1b9   :  { %1282 = vmatmul.mubr.bf16.gmra.mxu1 %v905_v6  ;;  %13016 = vmatprep.subr.bf16.mxu0 %v19740_v38  ;;  %v635_v2 = vmul.f32 %v590_v63, %v545_v61  ;;  %v727_v6 = vadd.f32 %v682_v58, %v637_v60  ;;  %v13730_v8 = vld [vmem:[#allocation8 + $0x118] sm:$0xff]   ;;  %v589_v12 = vld [vmem:[#allocation5 + $0x100] sm:$0xff]  ;;  %v730_v14 = vadd.f32 %v685_v4, %v640_v7  ;;  %v684_v18 = vld [vmem:[#allocation7 + $0x128] sm:$0xff] }
 0x1ba   :  { %1289 = vmatprep.mubr.bf16.mxu1 %v911_v39  ;;  %v914_v5 = vpack.c.bf16 %v728_v59, %v723_v54  ;;  %v594_v15 = vld [vmem:[#allocation5 + $0x128] sm:$0xff]  ;;  %v634_v16 = vmul.f32 %v589_v12, %v544_v10  ;;  %v13731_v20 = vld [vmem:[#allocation8 + $0x110] sm:$0xff]   ;;  %v688_v25 = vld [vmem:[#allocation7 + $0x148] sm:$0xff] }
 0x1bb   :  { %v725_v9 = vadd.f32 %v680_v3, %v635_v2  ;;  %v913_v13 = vpack.c.bf16 %v727_v6, %v722_v0  ;;  %v679_v17 = vld [vmem:[#allocation7 + $0x100] sm:$0xff]  ;;  %v639_v19 = vmul.f32 %v594_v15, %v549_v11  ;;  %v553_v23 = vld [vmem:[#allocation2 + $0x148] sm:$0xff]  ;;  %v552_v28 = vld [vmem:[#allocation2 + $0x140] sm:$0xff] }
 0x1bc   :  { %13017 = vmatpush3.bf16.msra.mxu0 %v13729_v37  ;;  %v724_v22 = vadd.f32 %v679_v17, %v634_v16  ;;  %v598_v24 = vld [vmem:[#allocation5 + $0x148] sm:$0xff]  ;;  %v597_v29 = vld [vmem:[#allocation5 + $0x140] sm:$0xff]  ;;  %v555_v32 = vld [vmem:[#allocation2 + $0x158] sm:$0xff] }
 0x1bd   :  { %13018 = vmatprep.subr.bf16.mxu0 %v19740_v38  ;;  %v916_v21 = vpack.c.bf16 %v730_v14, %v725_v9  ;;  %v729_v26 = vadd.f32 %v684_v18, %v639_v19  ;;  %v643_v27 = vmul.f32 %v598_v24, %v553_v23  ;;  %v642_v31 = vmul.f32 %v597_v29, %v552_v28  ;;  %v600_v33 = vld [vmem:[#allocation5 + $0x158] sm:$0xff]  ;;  %v690_v34 = vld [vmem:[#allocation7 + $0x158] sm:$0xff]  ;;  %v554_v41 = vld [vmem:[#allocation2 + $0x150] sm:$0xff] }
 0x1be   :  { %v645_v37 = vmul.f32 %v600_v33, %v555_v32  ;;  %v13732_v39 = vld [vmem:[#allocation8 + $0x108] sm:$0xff]   ;;  %v599_v42 = vld [vmem:[#allocation5 + $0x150] sm:$0xff]  ;;  %v521_v50 = vld [vmem:[#allocation2 + $0x48] sm:$0xff] }
 0x1bf   :  { %1218 = vmatmul.mubr.bf16.gmra.mxu0 %v908_v30  ;;  %v687_v30 = vld [vmem:[#allocation7 + $0x140] sm:$0xff]  ;;  %v915_v35 = vpack.c.bf16 %v729_v26, %v724_v22  ;;  %v733_v36 = vadd.f32 %v688_v25, %v643_v27  ;;  %v689_v43 = vld [vmem:[#allocation7 + $0x150] sm:$0xff]  ;;  %v644_v46 = vmul.f32 %v599_v42, %v554_v41  ;;  %v13733_v47 = vld [vmem:[#allocation8 + $0x100] sm:$0xff]   ;;  %v19738_v42 = vmov 0  }
 0x1c0   :  { %1225 = vmatprep.mubr.bf16.mxu0 %v914_v5  ;;  %13019 = vmatpush3.bf16.msra.mxu0 %v13730_v8  ;;  %v732_v40 = vadd.f32 %v687_v30, %v642_v31  ;;  %v735_v45 = vadd.f32 %v690_v34, %v645_v37  ;;  %v516_v49 = vld [vmem:[#allocation2 + $0x20] sm:$0xff]  ;;  %v561_v51 = vld [vmem:[#allocation5 + $0x20] sm:$0xff]  ;;  %v566_v54 = vld [vmem:[#allocation5 + $0x48] sm:$0xff] }
 0x1c1   :  { %1290 = vmatmul.mubr.bf16.gmra.mxu1 %v910_v53  ;;  %13020 = vmatprep.subr.bf16.mxu0 %v19740_v38  ;;  %v919_v44 = vpack.c.bf16 %v733_v36, %v733_v36  ;;  %v734_v53 = vadd.f32 %v689_v43, %v644_v46  ;;  %v606_v55 = vmul.f32 %v561_v51, %v516_v49  ;;  %v651_v56 = vld [vmem:[#allocation7 + $0x20] sm:$0xff]  ;;  %v656_v57 = vld [vmem:[#allocation7 + $0x48] sm:$0xff]  ;;  %v576_v0 = vld [vmem:[#allocation5 + $0x98] sm:$0xff] }
 0x1c2   :  { %1297 = vmatprep.mubr.bf16.mxu1 %v916_v21  ;;  %v918_v48 = vpack.c.bf16 %v732_v40, %v732_v40  ;;  %v921_v52 = vpack.c.bf16 %v735_v45, %v735_v45  ;;  %v611_v58 = vmul.f32 %v566_v54, %v521_v50  ;;  %v526_v59 = vld [vmem:[#allocation2 + $0x70] sm:$0xff]  ;;  %v531_v62 = vld [vmem:[#allocation2 + $0x98] sm:$0xff]  ;;  %v661_v5 = vld [vmem:[#allocation7 + $0x70] sm:$0xff]  ;;  %13692 = vset.pattern.permute.xlu0 %v19738_v42 }
 0x1c3   :  { %v920_v60 = vpack.c.bf16 %v734_v53, %v734_v53  ;;  %v696_v61 = vadd.f32 %v651_v56, %v606_v55  ;;  %v571_v63 = vld [vmem:[#allocation5 + $0x70] sm:$0xff]  ;;  %v621_v4 = vmul.f32 %v576_v0, %v531_v62  ;;  %v666_v6 = vld [vmem:[#allocation7 + $0x98] sm:$0xff]  ;;  %v536_v7 = vld [vmem:[#allocation2 + $0xc0] sm:$0xff]  ;;  %13693 = vset.pattern.permute.xlu1 %v19738_v42 }
 0x1c4   :  { %13021 = vmatpush3.bf16.msra.mxu0 %v13731_v20  ;;  %v701_v1 = vadd.f32 %v656_v57, %v611_v58  ;;  %v616_v3 = vmul.f32 %v571_v63, %v526_v59  ;;  %v541_v8 = vld [vmem:[#allocation2 + $0xe8] sm:$0xff]  ;;  %v586_v10 = vld [vmem:[#allocation5 + $0xe8] sm:$0xff]  ;;  %v676_v14 = vld [vmem:[#allocation7 + $0xe8] sm:$0xff] }
 0x1c5   :  { %13022 = vmatprep.subr.bf16.mxu0 %v19740_v38  ;;  %v581_v9 = vld [vmem:[#allocation5 + $0xc0] sm:$0xff]  ;;  %v711_v12 = vadd.f32 %v666_v6, %v621_v4  ;;  %v631_v17 = vmul.f32 %v586_v10, %v541_v8  ;;  %v546_v18 = vld [vmem:[#allocation2 + $0x110] sm:$0xff]  ;;  %v551_v19 = vld [vmem:[#allocation2 + $0x138] sm:$0xff] }
 0x1c6   :  { %v902_v2 = vpack.c.bf16 %v701_v1, %v696_v61  ;;  %v706_v11 = vadd.f32 %v661_v5, %v616_v3  ;;  %v626_v16 = vmul.f32 %v581_v9, %v536_v7  ;;  %v591_v20 = vld [vmem:[#allocation5 + $0x110] sm:$0xff]  ;;  %v596_v21 = vld [vmem:[#allocation5 + $0x138] sm:$0xff]  ;;  %v686_v25 = vld [vmem:[#allocation7 + $0x138] sm:$0xff] }
 0x1c7   :  { %1226 = vmatmul.mubr.bf16.gmra.mxu0 %v913_v13  ;;  %v671_v13 = vld [vmem:[#allocation7 + $0xc0] sm:$0xff]  ;;  %v721_v23 = vadd.f32 %v676_v14, %v631_v17  ;;  %v681_v24 = vld [vmem:[#allocation7 + $0x110] sm:$0xff]  ;;  %v636_v27 = vmul.f32 %v591_v20, %v546_v18  ;;  %v641_v28 = vmul.f32 %v596_v21, %v551_v19  ;;  %v601_v30 = vld [vmem:[#allocation5 + $0x160] sm:$0xff] }
 0x1c8   :  { %13023 = vmatpush3.bf16.msra.mxu0 %v13732_v39  ;;  %1233 = vmatprep.mubr.bf16.mxu0 %v919_v44  ;;  %v907_v15 = vpack.c.bf16 %v711_v12, %v706_v11  ;;  %v716_v22 = vadd.f32 %v671_v13, %v626_v16  ;;  %v556_v29 = vld [vmem:[#allocation2 + $0x160] sm:$0xff]  ;;  %v15718_v43 = vld [vmem:[#allocation10] ss:$0 sm:$0xff]  ;;  %v738_v46 = vld [vmem:[%s19963_s25 + $0x8] sm:$0xff] }
 0x1c9   :  { %1298 = vmatmul.mubr.bf16.gmra.mxu1 %v915_v35  ;;  %13024 = vmatprep.subr.bf16.mxu0 %v19740_v38  ;;  %v726_v31 = vadd.f32 %v681_v24, %v636_v27  ;;  %v731_v32 = vadd.f32 %v686_v25, %v641_v28  ;;  %v646_v34 = vmul.f32 %v601_v30, %v556_v29  ;;  %v691_v35 = vld [vmem:[#allocation7 + $0x160] sm:$0xff]  ;;  %v737_v40 = vld [vmem:[%s19963_s25] sm:$0xff]  ;;  %v740_v56 = vld [vmem:[%s19963_s25 + $0x18] sm:$0xff] }
 0x1ca   :  { %1305 = vmatprep.mubr.bf16.mxu1 %v921_v52  ;;  %v912_v26 = vpack.c.bf16 %v721_v23, %v716_v22  ;;  %v746_v41 = vld [vmem:[%s19964_s16] sm:$0xff]  ;;  %1601 = vperm.xlu0 %13692, %v737_v40   ;;  %v739_v55 = vld [vmem:[%s19963_s25 + $0x10] sm:$0xff]  ;;  %v749_v3 = vld [vmem:[%s19964_s16 + $0x18] sm:$0xff] }
 0x1cb   :  { %v917_v33 = vpack.c.bf16 %v731_v32, %v726_v31  ;;  %v736_v36 = vadd.f32 %v691_v35, %v646_v34  ;;  %1683 = vperm.xlu1 %13693, %v746_v41   ;;  %v13736_v61 = vld [vmem:[#allocation14 + $0x38] sm:$0xff]   ;;  %v13738_v4 = vld [vmem:[#allocation14 + $0x30] sm:$0xff]   ;;  %v741_v8 = vld [vmem:[%s19963_s25 + $0x20] sm:$0xff] }
 0x1cc   :  { %13025 = vmatpush3.bf16.msra.mxu0 %v13733_v47  ;;  %v747_v47 = vld [vmem:[%s19964_s16 + $0x8] sm:$0xff]  ;;  %v750_v16 = vld [vmem:[%s19964_s16 + $0x20] sm:$0xff]  ;;  %v743_v23 = vld [vmem:[%s19963_s25 + $0x30] sm:$0xff] }
 0x1cd   :  { %13127 = vmatprep.subr.bf16.mxu0 %v19740_v38  ;;  %v922_v37 = vpack.c.bf16 %v736_v36, %v736_v36  ;;  %v742_v9 = vld [vmem:[%s19963_s25 + $0x28] sm:$0xff]  ;;  %v13742_v18 = vld [vmem:[#allocation14 + $0x20] sm:$0xff]   ;;  %v752_v29 = vld [vmem:[%s19964_s16 + $0x30] sm:$0xff] }
 0x1ce   :  { %1606 = vperm.xlu0 %13692, %v738_v46   ;;  %v13740_v10 = vld [vmem:[#allocation14 + $0x28] sm:$0xff]   ;;  %v744_v24 = vld [vmem:[%s19963_s25 + $0x38] sm:$0xff] }
 0x1cf   :  { %1234 = vmatmul.mubr.bf16.gmra.mxu0 %v918_v48  ;;  %1688 = vperm.xlu1 %13693, %v747_v47   ;;  %v751_v17 = vld [vmem:[%s19964_s16 + $0x28] sm:$0xff]  ;;  %v753_v30 = vld [vmem:[%s19964_s16 + $0x38] sm:$0xff]  ;;  %v745_v34 = vld [vmem:[%s19963_s25 + $0x40] sm:$0xff] }
 0x1d0   :  { %13026 = vmatprep.mubr.msk.bf16.mxu0 %vm15388_vm0, %v19740_v38  ;;  %v754_v35 = vld [vmem:[%s19964_s16 + $0x40] sm:$0xff]  ;;  %v3871_v41 = vld [vmem:[%s19965_s19 + $0x8] sm:$0xff] }
 0x1d1   :  { %1306 = vmatmul.mubr.bf16.gmra.mxu1 %v920_v60  ;;  %v3870_v40 = vld [vmem:[%s19965_s19] sm:$0xff] }
 0x1d2   :  { %13064 = vmatprep.mubr.msk.f32.mxu1 %vm15388_vm0, %v19740_v38  ;;  %1611 = vperm.xlu0 %13692, %v739_v55   ;;  %v3875_v55 = vld [vmem:[%s19965_s19 + $0x28] sm:$0xff] }
 0x1d3   :  { %1616 = vperm.xlu1 %13693, %v740_v56  }
 0x1d7   :  { %13027 = vmatmul.mubr.bf16.vlgmr.msra.gmra.mxu0 %v902_v2  ;;  %v748_v2 = vld [vmem:[%s19964_s16 + $0x10] sm:$0xff]  ;;  %1698 = vperm.xlu1 %13693, %v749_v3  }
 0x1d8   :  { %13030 = vmatprep.mubr.msk.bf16.mxu0 %vm15388_vm0, %v19740_v38  ;;  %13128 = vmatpush3.bf16.msra.mxu0 %v13736_v61  ;;  %v3876_v61 = vld [vmem:[%s19965_s19 + $0x30] sm:$0xff] }
 0x1d9   :  { %13129 = vmatprep.subr.bf16.mxu0 %v19740_v38  ;;  %1693 = vperm.xlu0 %13692, %v748_v2   ;;  %v3878_v2 = vld [vmem:[%s19965_s19 + $0x40] sm:$0xff] }
 0x1db   :  { %1626 = vperm.xlu1 %13693, %v742_v9  }
 0x1dc   :  { %13130 = vmatpush3.bf16.msra.mxu0 %v13738_v4 }
 0x1dd   :  { %13131 = vmatprep.subr.bf16.mxu0 %v19740_v38  ;;  %1621 = vperm.xlu0 %13692, %v741_v8  }
 0x1df   :  { %13031 = vmatmul.mubr.bf16.gmra.mxu0 %v907_v15  ;;  %1708 = vperm.xlu1 %13693, %v751_v17  }
 0x1e0   :  { %13034 = vmatprep.mubr.msk.bf16.mxu0 %vm15388_vm0, %v19740_v38  ;;  %13132 = vmatpush3.bf16.msra.mxu0 %v13740_v10 }
 0x1e1   :  { %13133 = vmatprep.subr.bf16.mxu0 %v19740_v38  ;;  %1703 = vperm.xlu0 %13692, %v750_v16  }
 0x1e3   :  { %1636 = vperm.xlu1 %13693, %v744_v24  }
 0x1e4   :  { %13134 = vmatpush3.bf16.msra.mxu0 %v13742_v18 }
 0x1e5   :  { %13135 = vmatprep.subr.bf16.mxu0 %v19740_v38  ;;  %1631 = vperm.xlu0 %13692, %v743_v23  }
 0x1e7   :  { %13035 = vmatmul.mubr.bf16.gmra.mxu0 %v912_v26  ;;  %1718 = vperm.xlu1 %13693, %v753_v30  }
 0x1e8   :  { %13038 = vmatprep.mubr.msk.bf16.mxu0 %vm15388_vm0, %v19740_v38 }
 0x1e9   :  { %1713 = vperm.xlu0 %13692, %v752_v29  }
 0x1eb   :  { %1723 = vperm.xlu1 %13693, %v754_v35  }
 0x1ed   :  { %1641 = vperm.xlu0 %13692, %v745_v34  }
 0x1ef   :  { %13039 = vmatmul.mubr.bf16.gmra.mxu0 %v917_v33  ;;  %4079 = vperm.xlu1 %13693, %v3871_v41  }
 0x1f0   :  { %13042 = vmatprep.mubr.msk.bf16.mxu0 %vm15388_vm0, %v19740_v38 }
 0x1f1   :  { %4074 = vperm.xlu0 %13692, %v3870_v40  }
 0x1f7   :  { %13043 = vmatmul.mubr.bf16.gmra.mxu0 %v922_v37 }
 0x1f8   :  { %13143 = vmatprep.mubr.msk.bf16.mxu0 %vm15388_vm0, %v19740_v38 }
 0x26f   :  { %v12435_v39 = vpop.f32.mrf.mxu0 }
 0x271   :  { %v12436_v44 = vpop.f32.mrf.mxu0  ;;  %v12481_v48 = vpop.f32.mrf.mxu1 }
 0x272   :  { %v12437_v45 = vadd.f32 %v12436_v44, %v12435_v39 }
 0x273   :  { %v12438_v49 = vpop.f32.mrf.mxu0  ;;  %v12482_v51 = vpop.f32.mrf.mxu1 }
 0x274   :  { %v1204_v50 = vadd.f32 %v12437_v45, %v15718_v43  ;;  %v12483_v53 = vadd.f32 %v12482_v51, %v12481_v48  ;;  %v3872_v48 = vld [vmem:[%s19965_s19 + $0x10] sm:$0xff] }
 0x275   :  { %v12439_v52 = vpop.f32.mrf.mxu0  ;;  %v12484_v57 = vpop.f32.mrf.mxu1  ;;  %4084 = vperm.xlu0 %13692, %v3872_v48  }
 0x276   :  { %v12440_v54 = vadd.f32 %v12439_v52, %v12438_v49  ;;  %v15726_v60 = vadd.f32 %v12483_v53, %v1204_v50  ;;  %v3873_v49 = vld [vmem:[%s19965_s19 + $0x18] sm:$0xff] }
 0x277   :  { %v12441_v58 = vpop.f32.mrf.mxu0  ;;  %v12485_v62 = vpop.f32.mrf.mxu1  ;;  %4089 = vperm.xlu1 %13693, %v3873_v49  }
 0x278   :  { %v1207_v59 = vadd.f32 %v12440_v54, %v15718_v43  ;;  %v12486_v0 = vadd.f32 %v12485_v62, %v12484_v57  ;;  %v3874_v54 = vld [vmem:[%s19965_s19 + $0x20] sm:$0xff]  ;;  %v3877_v62 = vld [vmem:[%s19965_s19 + $0x38] sm:$0xff] }
 0x279   :  { %v12442_v63 = vpop.f32.mrf.mxu0  ;;  %v12487_v6 = vpop.f32.mrf.mxu1  ;;  %4094 = vperm.xlu0 %13692, %v3874_v54  }
 0x27a   :  { %v12443_v1 = vadd.f32 %v12442_v63, %v12441_v58  ;;  %v15733_v7 = vadd.f32 %v12486_v0, %v1207_v59 }
 0x27b   :  { %v15730_v5 = vpop.f32.mrf.mxu0  ;;  %v12488_v13 = vpop.f32.mrf.mxu1  ;;  %4099 = vperm.xlu1 %13693, %v3875_v55  }
 0x27c   :  { %v1212_v11 = vadd.f32 %v12443_v1, %v15718_v43  ;;  %v12489_v14 = vadd.f32 %v12488_v13, %v12487_v6 }
 0x27d   :  { %v15738_v12 = vpop.f32.mrf.mxu0  ;;  %v15741_v15 = vpop.f32.mrf.mxu1  ;;  %4104 = vperm.xlu0 %13692, %v3876_v61   ;;  %v13735_v61 = vld [vmem:[#allocation16 + $0x30] sm:$0xff]  }
 0x27e   :  { %v15747_v20 = vadd.f32 %v12489_v14, %v1212_v11 }
 0x27f   :  { %v15745_v19 = vpop.f32.mrf.mxu0  ;;  %v15749_v21 = vpop.f32.mrf.mxu1  ;;  %4109 = vperm.xlu1 %13693, %v3877_v62   ;;  %v13739_v62 = vld [vmem:[#allocation16 + $0x20] sm:$0xff]  }
 0x281   :  { %v15751_v22 = vpop.f32.mrf.mxu0  ;;  %v15758_v26 = vpop.f32.mrf.mxu1  ;;  %4114 = vperm.xlu0 %13692, %v3878_v2   ;;  %v761_v2 = vld [vmem:[%s19966_s13 + $0x30] sm:$0xff] }
 0x282   :  { %v12449_v49 = vadd.f32 %v15751_v22, %v15745_v19 }
 0x283   :  { %v15756_v25 = vpop.f32.mrf.mxu0  ;;  %v15763_v28 = vpop.f32.mrf.mxu1 }
 0x284   :  { %v12495_v19 = vadd.f32 %v15763_v28, %v15758_v26 }
 0x285   :  { %v15760_v27 = vpop.f32.mrf.mxu0  ;;  %v15767_v31 = vpop.f32.mrf.mxu1 }
 0x286   :  { %v12452_v35 = vadd.f32 %v15760_v27, %v15756_v25 }
 0x287   :  { %v12453_v32 = vpop.f32.mrf.mxu0  ;;  %v15769_v33 = vpop.f32.mrf.mxu1 }
 0x288   :  { %v12498_v25 = vadd.f32 %v15769_v33, %v15767_v31 }
 0x289   :  { %v12454_v36 = vpop.f32.mrf.mxu0  ;;  %v12499_v39 = vpop.f32.mrf.mxu1 }
 0x28a   :  { %v12455_v24 = vadd.f32 %v12454_v36, %v12453_v32  ;;  %v12446_v32 = vadd.f32 %v15738_v12, %v15730_v5  ;;  %v12492_v12 = vadd.f32 %v15749_v21, %v15741_v15 }
 0x28b   :  { %v12456_v37 = vpop.f32.mrf.mxu0  ;;  %v12500_v45 = vpop.f32.mrf.mxu1 }
 0x28c   :  { %v1215_v5 = vadd.f32 %v12446_v32, %v15718_v43 }
 0x28d   :  { %v12457_v44 = vpop.f32.mrf.mxu0  ;;  %v12502_v47 = vpop.f32.mrf.mxu1 }
 0x28e   :  { %v12458_v18 = vadd.f32 %v12457_v44, %v12456_v37  ;;  %v1223_v44 = vadd.f32 %v12452_v35, %v15718_v43  ;;  %v1287_v28 = vadd.f32 %v12492_v12, %v1215_v5 }
 0x28f   :  { %v12459_v46 = vpop.f32.mrf.mxu0  ;;  %v12503_v51 = vpop.f32.mrf.mxu1 }
 0x290   :  { %v1231_v40 = vadd.f32 %v12458_v18, %v15718_v43  ;;  %v12504_v41 = vadd.f32 %v12503_v51, %v12502_v47  ;;  %v1220_v51 = vadd.f32 %v12449_v49, %v15718_v43  ;;  %v1295_v31 = vadd.f32 %v12498_v25, %v1223_v44  ;;  %v15870_v18 = vld [vmem:[#allocation13] ss:$0 sm:$0xff] }
 0x291   :  { %v12460_v50 = vpop.f32.mrf.mxu0  ;;  %v12505_v53 = vpop.f32.mrf.mxu1 }
 0x292   :  { %v12461_v16 = vadd.f32 %v12460_v50, %v12459_v46  ;;  %v1228_v46 = vadd.f32 %v12455_v24, %v15718_v43  ;;  %v12501_v50 = vadd.f32 %v12500_v45, %v12499_v39  ;;  %v1303_v27 = vadd.f32 %v12504_v41, %v1231_v40 }
 0x293   :  { %v12462_v52 = vpop.f32.mrf.mxu0  ;;  %v12506_v57 = vpop.f32.mrf.mxu1  ;;  %v1292_v54 = vadd.f32 %v12495_v19, %v1220_v51 }
 0x294   :  { %v1236_v29 = vadd.f32 %v12461_v16, %v15718_v43  ;;  %v12507_v30 = vadd.f32 %v12506_v57, %v12505_v53  ;;  %v1300_v22 = vadd.f32 %v12501_v50, %v1228_v46  ;;  %v13734_v57 = vld [vmem:[#allocation16 + $0x38] sm:$0xff]   ;;  %v15866_v16 = vpop.permute.xlu0 %1601 }
 0x295   :  { %v12463_v56 = vpop.f32.mrf.mxu0  ;;  %v12508_v59 = vpop.f32.mrf.mxu1  ;;  %19967 = vst [vmem:[#allocation85_spill] sm:$0xff] %v15866_v16 }
 0x296   :  { %v1308_v37 = vadd.f32 %v12507_v30, %v1236_v29  ;;  %v755_v56 = vld [vmem:[%s19966_s13] sm:$0xff]  ;;  %v15874_v29 = vpop.permute.xlu1 %1683 }
 0x297   :  { %v15779_v58 = vpop.f32.mrf.mxu0  ;;  %v12509_v0 = vpop.f32.mrf.mxu1  ;;  %19969 = vst [vmem:[#allocation87_spill] sm:$0xff] %v15874_v29 }
 0x298   :  { %v1348_v59 = vadd.f32 %v15779_v58, %v15726_v60  ;;  %v757_v60 = vld [vmem:[%s19966_s13 + $0x10] sm:$0xff]  ;;  %v758_v58 = vld [vmem:[%s19966_s13 + $0x18] sm:$0xff]  ;;  %v15872_v24 = vpop.permute.xlu0 %1606 }
 0x299   :  { %v13028_v63 = vpop.f32.mrf.mxu0  ;;  %v13741_v0 = vld [vmem:[#allocation16 + $0x18] sm:$0xff]   ;;  %19968 = vst [vmem:[#allocation86_spill] sm:$0xff] %v15872_v24 }
 0x29a   :  { %v759_v63 = vld [vmem:[%s19966_s13 + $0x20] sm:$0xff]  ;;  %v15883_v50 = vpop.permute.xlu1 %1688 }
 0x29b   :  { %v15783_v1 = vpop.f32.mrf.mxu0  ;;  %19971 = vst [vmem:[#allocation89_spill] sm:$0xff] %v15883_v50 }
 0x29c   :  { %v1351_v21 = vadd.f32 %v15783_v1, %v15733_v7  ;;  %v13737_v7 = vld [vmem:[#allocation16 + $0x28] sm:$0xff]   ;;  %v15881_v46 = vpop.permute.xlu0 %1611 }
 0x29d   :  { %v13029_v3 = vpop.f32.mrf.mxu0  ;;  %v760_v1 = vld [vmem:[%s19966_s13 + $0x28] sm:$0xff]  ;;  %19970 = vst [vmem:[#allocation88_spill] sm:$0xff] %v15881_v46 }
 0x29e   :  { %v762_v3 = vld [vmem:[%s19966_s13 + $0x38] sm:$0xff]  ;;  %v15897_v5 = vpop.permute.xlu1 %1616 }
 0x29f   :  { %v1355_v4 = vpop.f32.mrf.mxu0  ;;  %19973 = vst [vmem:[#allocation91_spill] sm:$0xff] %v15897_v5 }
 0x2a0   :  { %v1356_v15 = vadd.f32 %v1355_v4, %v15747_v20  ;;  %v756_v20 = vld [vmem:[%s19966_s13 + $0x8] sm:$0xff]  ;;  %v763_v4 = vld [vmem:[%s19966_s13 + $0x40] sm:$0xff] }
 0x2a1   :  { %v13032_v6 = vpop.f32.mrf.mxu0 }
 0x2a2   :  { %v13743_v6 = vld [vmem:[#allocation16 + $0x10] sm:$0xff]  }
 0x2a3   :  { %v1358_v8 = vpop.f32.mrf.mxu0 }
 0x2a4   :  { %v1359_v43 = vadd.f32 %v1358_v8, %v1287_v28  ;;  %v13744_v8 = vld [vmem:[#allocation14 + $0x18] sm:$0xff]   ;;  %v13751_v28 = vld [vmem:[#allocation17 + $0x30] sm:$0xff]  }
 0x2a5   :  { %v13033_v9 = vpop.f32.mrf.mxu0  ;;  %13136 = vmatpush3.bf16.msra.mxu0 %v13744_v8 }
 0x2a6   :  { %v13745_v9 = vld [vmem:[#allocation16 + $0x8] sm:$0xff]   ;;  %13137 = vmatprep.subr.bf16.mxu0 %v19740_v38 }
 0x2a7   :  { %v1363_v10 = vpop.f32.mrf.mxu0 }
 0x2a8   :  { %v1364_v55 = vadd.f32 %v1363_v10, %v1292_v54  ;;  %v13746_v10 = vld [vmem:[#allocation14 + $0x10] sm:$0xff]  }
 0x2a9   :  { %v13036_v11 = vpop.f32.mrf.mxu0  ;;  %13138 = vmatpush3.bf16.msra.mxu0 %v13746_v10 }
 0x2aa   :  { %v13747_v11 = vld [vmem:[#allocation16] sm:$0xff]   ;;  %13139 = vmatprep.subr.bf16.mxu0 %v19740_v38 }
 0x2ab   :  { %v1366_v13 = vpop.f32.mrf.mxu0 }
 0x2ac   :  { %v1367_v26 = vadd.f32 %v1366_v13, %v1295_v31  ;;  %v13748_v13 = vld [vmem:[#allocation14 + $0x8] sm:$0xff]  }
 0x2ad   :  { %v13037_v14 = vpop.f32.mrf.mxu0  ;;  %13140 = vmatpush3.bf16.msra.mxu0 %v13748_v13 }
 0x2ae   :  { %13141 = vmatprep.subr.bf16.mxu0 %v19740_v38  ;;  %v13749_v14 = vld [vmem:[#allocation14] sm:$0xff]  }
 0x2af   :  { %v1371_v17 = vpop.f32.mrf.mxu0 }
 0x2b0   :  { %v1372_v33 = vadd.f32 %v1371_v17, %v1300_v22  ;;  %v15868_v17 = vld [vmem:[#allocation11] ss:$0 sm:$0xff] }
 0x2b1   :  { %v13040_v23 = vpop.f32.mrf.mxu0  ;;  %13142 = vmatpush3.bf16.msra.mxu0 %v13749_v14 }
 0x2b2   :  { %13199 = vmatprep.subr.bf16.mxu0 %v19740_v38 }
 0x2b3   :  { %v1374_v34 = vpop.f32.mrf.mxu0 }
 0x2b4   :  { %v1375_v39 = vadd.f32 %v1374_v34, %v1303_v27 }
 0x2b5   :  { %v13041_v48 = vpop.f32.mrf.mxu0 }
 0x2b7   :  { %v1379_v36 = vpop.f32.mrf.mxu0 }
 0x2b8   :  { %v1380_v52 = vadd.f32 %v1379_v36, %v1308_v37 }
 0x2b9   :  { %v13044_v47 = vpop.f32.mrf.mxu0 }
 0x2ba   :  { %13047 = vmatpush3.msra.mxu1 %v1380_v52  ;;  %v13750_v52 = vld [vmem:[#allocation17 + $0x38] sm:$0xff]  }
 0x2bb   :  { %v1382_v45 = vpop.f32.mrf.mxu0  ;;  %13048 = vmatprep.subr.mxu1 %v19740_v38 }
 0x2bc   :  { %13049 = vmatpush3.msra.mxu1 %v1375_v39  ;;  %v15895_v45 = vpop.permute.xlu0 %1693 }
 0x2bd   :  { %v13045_v53 = vpop.f32.mrf.mxu0  ;;  %13050 = vmatprep.subr.mxu1 %v19740_v38  ;;  %19972 = vst [vmem:[#allocation90_spill] sm:$0xff] %v15895_v45 }
 0x2be   :  { %13051 = vmatpush3.msra.mxu1 %v1372_v33 }
 0x2bf   :  { %13052 = vmatprep.subr.mxu1 %v19740_v38 }
 0x2c0   :  { %13053 = vmatpush3.msra.mxu1 %v1367_v26 }
 0x2c1   :  { %13054 = vmatprep.subr.mxu1 %v19740_v38 }
 0x2c2   :  { %13055 = vmatpush3.msra.mxu1 %v1364_v55 }
 0x2c3   :  { %13056 = vmatprep.subr.mxu1 %v19740_v38 }
 0x2c4   :  { %13057 = vmatpush3.msra.mxu1 %v1359_v43 }
 0x2c5   :  { %13058 = vmatprep.subr.mxu1 %v19740_v38 }
 0x2c6   :  { %13059 = vmatpush3.msra.mxu1 %v1356_v15 }
 0x2c7   :  { %13060 = vmatprep.subr.mxu1 %v19740_v38 }
 0x2c8   :  { %13061 = vmatpush3.msra.mxu1 %v1351_v21 }
 0x2c9   :  { %13062 = vmatprep.subr.mxu1 %v19740_v38 }
 0x2ca   :  { %13063 = vmatpush3.msra.mxu1 %v1348_v59 }
 0x2cb   :  { %13065 = vmatmul.mubr.msk.f32.vlgmr.msra.gmra.mxu1 %vm1385_vm1, %v755_v56  ;;  %13091 = vmatprep.subr.bf16.mxu1 %v19740_v38 }
 0x2cc   :  { %13067 = vmatprep.mubr.msk.f32.mxu1 %vm15388_vm0, %v19740_v38  ;;  %13092 = vmatpush3.bf16.msra.mxu1 %v13734_v57 }
 0x2cd   :  { %13093 = vmatprep.subr.bf16.mxu1 %v19740_v38 }
 0x2cf   :  { %13068 = vmatmul.mubr.msk.f32.gmra.mxu1 %vm1385_vm1, %v756_v20  ;;  %v13752_v20 = vld [vmem:[#allocation17 + $0x28] sm:$0xff]  }
 0x2d0   :  { %13070 = vmatprep.mubr.msk.f32.mxu1 %vm15388_vm0, %v19740_v38  ;;  %13094 = vmatpush3.bf16.msra.mxu1 %v13735_v61  ;;  %v15913_v61 = vpop.permute.xlu0 %1621 }
 0x2d1   :  { %13095 = vmatprep.subr.bf16.mxu1 %v19740_v38  ;;  %19974 = vst [vmem:[#allocation92_spill] sm:$0xff] %v15913_v61 }
 0x2d3   :  { %13071 = vmatmul.mubr.msk.f32.gmra.mxu1 %vm1385_vm1, %v757_v60  ;;  %v15915_v60 = vpop.permute.xlu1 %1698 }
 0x2d4   :  { %13073 = vmatprep.mubr.msk.f32.mxu1 %vm15388_vm0, %v19740_v38  ;;  %13096 = vmatpush3.bf16.msra.mxu1 %v13737_v7  ;;  %19975 = vst [vmem:[#allocation93_spill] sm:$0xff] %v15915_v60 }
 0x2d5   :  { %13097 = vmatprep.subr.bf16.mxu1 %v19740_v38 }
 0x2d7   :  { %13074 = vmatmul.mubr.msk.f32.gmra.mxu1 %vm1385_vm1, %v758_v58 }
 0x2d8   :  { %13076 = vmatprep.mubr.msk.f32.mxu1 %vm15388_vm0, %v19740_v38  ;;  %13098 = vmatpush3.bf16.msra.mxu1 %v13739_v62 }
 0x2d9   :  { %13099 = vmatprep.subr.bf16.mxu1 %v19740_v38 }
 0x2db   :  { %13077 = vmatmul.mubr.msk.f32.gmra.mxu1 %vm1385_vm1, %v759_v63 }
 0x2dc   :  { %13079 = vmatprep.mubr.msk.f32.mxu1 %vm15388_vm0, %v19740_v38  ;;  %13100 = vmatpush3.bf16.msra.mxu1 %v13741_v0 }
 0x2dd   :  { %13101 = vmatprep.subr.bf16.mxu1 %v19740_v38 }
 0x2df   :  { %13080 = vmatmul.mubr.msk.f32.gmra.mxu1 %vm1385_vm1, %v760_v1 }
 0x2e0   :  { %13082 = vmatprep.mubr.msk.f32.mxu1 %vm15388_vm0, %v19740_v38  ;;  %13102 = vmatpush3.bf16.msra.mxu1 %v13743_v6 }
 0x2e1   :  { %13103 = vmatprep.subr.bf16.mxu1 %v19740_v38 }
 0x2e3   :  { %13083 = vmatmul.mubr.msk.f32.gmra.mxu1 %vm1385_vm1, %v761_v2 }
 0x2e4   :  { %13085 = vmatprep.mubr.msk.f32.mxu1 %vm15388_vm0, %v19740_v38  ;;  %13104 = vmatpush3.bf16.msra.mxu1 %v13745_v9  ;;  %v13753_v9 = vld [vmem:[#allocation17 + $0x20] sm:$0xff]  }
 0x2e5   :  { %13105 = vmatprep.subr.bf16.mxu1 %v19740_v38 }
 0x2e7   :  { %13086 = vmatmul.mubr.msk.f32.gmra.mxu1 %vm1385_vm1, %v762_v3 }
 0x2e8   :  { %13088 = vmatprep.mubr.msk.f32.mxu1 %vm15388_vm0, %v19740_v38  ;;  %13106 = vmatpush3.bf16.msra.mxu1 %v13747_v11 }
 0x2e9   :  { %13163 = vmatprep.subr.bf16.mxu1 %v19740_v38 }
 0x2eb   :  { %13089 = vmatmul.mubr.msk.f32.gmra.mxu1 %vm1385_vm1, %v763_v4 }
 0x2ec   :  { %13107 = vmatprep.mubr.msk.bf16.mxu1 %vm15388_vm0, %v19740_v38 }
 0x38b   :  { %v1479_v23 = vpop.f32.mrf.mxu1 }
 0x38c   :  { %v1529_v30 = vmul.f32 %v15868_v17, %v1479_v23  ;;  %v15936_v23 = vpop.permute.xlu0 %1703 }
 0x38d   :  { %v13066_v34 = vpop.f32.mrf.mxu1  ;;  %19976 = vst [vmem:[#allocation94_spill] sm:$0xff] %v15936_v23 }
 0x38e   :  { %v1544_v35 = vadd.f32 %v15870_v18, %v1529_v30  ;;  %v15938_v30 = vpop.permute.xlu1 %1626 }
 0x38f   :  { %v1484_v40 = vpop.f32.mrf.mxu1  ;;  %19977 = vst [vmem:[#allocation95_spill] sm:$0xff] %v15938_v30 }
 0x390   :  { %v15878_v41 = vmax.f32 %v1544_v35, 0.0  ;;  %v1530_v48 = vmul.f32 %v15868_v17, %v1484_v40 }
 0x391   :  { %v13069_v49 = vpop.f32.mrf.mxu1 }
 0x392   :  { %v1572_v37 = vrot.slane %v15878_v41, 2  ;;  %v1545_v32 = vadd.f32 %v15870_v18, %v1530_v48  ;;  %v13754_v48 = vld [vmem:[#allocation17 + $0x18] sm:$0xff]  }
 0x393   :  { %v1489_v36 = vpop.f32.mrf.mxu1 }
 0x394   :  { %v15887_v44 = vmax.f32 %v1545_v32, 0.0  ;;  %v1531_v25 = vmul.f32 %v15868_v17, %v1489_v36  ;;  %v1598_v47 = vsel %vm1571_vm2, 0.0, %v1572_v37 }
 0x395   :  { %v13072_v27 = vpop.f32.mrf.mxu1  ;;  %v1644_v53 = vmul.f32 %v15866_v16, %v1598_v47 }
 0x396   :  { %v1573_v51 = vrot.slane %v15887_v44, 2  ;;  %v1740_v19 = vpack.c.bf16 %v15887_v44, %v15878_v41  ;;  %v1546_v22 = vadd.f32 %v15870_v18, %v1531_v25 }
 0x397   :  { %v1494_v39 = vpop.f32.mrf.mxu1 }
 0x398   :  { %v1574_v12 = vsel %vm1571_vm2, %v1572_v37, %v1573_v51  ;;  %v15900_v31 = vmax.f32 %v1546_v22, 0.0  ;;  %v1532_v33 = vmul.f32 %v15868_v17, %v1494_v39  ;;  %13108 = vmatmul.mubr.bf16.vlgmr.msra.gmra.mxu1 %v1740_v19  ;;  %v13755_v39 = vld [vmem:[#allocation17 + $0x10] sm:$0xff]  }
 0x399   :  { %v1645_v54 = vmul.f32 %v15872_v24, %v1574_v12  ;;  %v13075_v26 = vpop.f32.mrf.mxu1  ;;  %13111 = vmatprep.mubr.msk.bf16.mxu1 %vm15388_vm0, %v19740_v38  ;;  %13164 = vmatpush3.bf16.msra.mxu1 %v13750_v52  ;;  %v15959_v12 = vpop.permute.xlu0 %1631 }
 0x39a   :  { %v1575_v55 = vrot.slane %v15900_v31, 2  ;;  %v1547_v43 = vadd.f32 %v15870_v18, %v1532_v33  ;;  %13165 = vmatprep.subr.bf16.mxu1 %v19740_v38  ;;  %19978 = vst [vmem:[#allocation96_spill] sm:$0xff] %v15959_v12  ;;  %v15961_v33 = vpop.permute.xlu1 %1708 }
 0x39b   :  { %v1499_v15 = vpop.f32.mrf.mxu1  ;;  %v1735_v21 = vpack.c.bf16 %v1645_v54, %v1644_v53  ;;  %19979 = vst [vmem:[#allocation97_spill] sm:$0xff] %v15961_v33 }
 0x39c   :  { %v15910_v56 = vmax.f32 %v1547_v43, 0.0  ;;  %v1533_v57 = vmul.f32 %v15868_v17, %v1499_v15  ;;  %v1576_v63 = vsel %vm1571_vm2, %v1573_v51, %v1575_v55 }
 0x39d   :  { %v13078_v59 = vpop.f32.mrf.mxu1  ;;  %13144 = vmatmul.mubr.bf16.vlgmr.msra.gmra.mxu0 %v1735_v21  ;;  %13166 = vmatpush3.bf16.msra.mxu1 %v13751_v28  ;;  %v1646_v6 = vmul.f32 %v15881_v46, %v1576_v63  ;;  %v13756_v21 = vld [vmem:[#allocation17 + $0x8] sm:$0xff]  }
 0x39e   :  { %v1577_v7 = vrot.slane %v15910_v56, 2  ;;  %v1548_v58 = vadd.f32 %v15870_v18, %v1533_v57  ;;  %v1741_v62 = vpack.c.bf16 %v15910_v56, %v15900_v31  ;;  %13147 = vmatprep.mubr.msk.bf16.mxu0 %vm15388_vm0, %v19740_v38  ;;  %13167 = vmatprep.subr.bf16.mxu1 %v19740_v38 }
 0x39f   :  { %v1504_v0 = vpop.f32.mrf.mxu1 }
 0x3a0   :  { %v15925_v1 = vmax.f32 %v1548_v58, 0.0  ;;  %v1534_v2 = vmul.f32 %v15868_v17, %v1504_v0  ;;  %13112 = vmatmul.mubr.bf16.gmra.mxu1 %v1741_v62  ;;  %v1578_v3 = vsel %vm1571_vm2, %v1575_v55, %v1577_v7  ;;  %v15977_v58 = vpop.permute.xlu0 %1713 }
 0x3a1   :  { %v13081_v4 = vpop.f32.mrf.mxu1  ;;  %v1647_v8 = vmul.f32 %v15897_v5, %v1578_v3  ;;  %13115 = vmatprep.mubr.msk.bf16.mxu1 %vm15388_vm0, %v19740_v38  ;;  %13168 = vmatpush3.bf16.msra.mxu1 %v13752_v20  ;;  %19980 = vst [vmem:[#allocation98_spill] sm:$0xff] %v15977_v58 }
 0x3a2   :  { %v1579_v10 = vrot.slane %v15925_v1, 2  ;;  %v1549_v11 = vadd.f32 %v15870_v18, %v1534_v2  ;;  %13169 = vmatprep.subr.bf16.mxu1 %v19740_v38  ;;  %v13757_v2 = vld [vmem:[#allocation17] sm:$0xff]   ;;  %v1657_v4 = vrot.slane %v15900_v31, 6 }
 0x3a3   :  { %v1509_v13 = vpop.f32.mrf.mxu1  ;;  %v1736_v14 = vpack.c.bf16 %v1647_v8, %v1646_v6 }
 0x3a4   :  { %v15940_v34 = vmax.f32 %v1549_v11, 0.0  ;;  %v1535_v35 = vmul.f32 %v15868_v17, %v1509_v13  ;;  %v1580_v36 = vsel %vm1571_vm2, %v1577_v7, %v1579_v10  ;;  %v15990_v11 = vpop.permute.xlu0 %1641  ;;  %v1654_v13 = vrot.slane %v15878_v41, 6 }
 0x3a5   :  { %v13084_v40 = vpop.f32.mrf.mxu1  ;;  %13148 = vmatmul.mubr.bf16.gmra.mxu0 %v1736_v14  ;;  %13170 = vmatpush3.bf16.msra.mxu1 %v13753_v9  ;;  %v1648_v19 = vmul.f32 %v15913_v61, %v1580_v36  ;;  %19982 = vst [vmem:[#allocation100_spill] sm:$0xff] %v15990_v11 }
 0x3a6   :  { %v1581_v49 = vrot.slane %v15940_v34, 2  ;;  %v1550_v37 = vadd.f32 %v15870_v18, %v1535_v35  ;;  %v1742_v32 = vpack.c.bf16 %v15940_v34, %v15925_v1  ;;  %13151 = vmatprep.mubr.msk.bf16.mxu0 %vm15388_vm0, %v19740_v38  ;;  %13171 = vmatprep.subr.bf16.mxu1 %v19740_v38  ;;  %v1661_v40 = vrot.slane %v15925_v1, 6 }
 0x3a7   :  { %v1514_v25 = vpop.f32.mrf.mxu1 }
 0x3a8   :  { %v15951_v27 = vmax.f32 %v1550_v37, 0.0  ;;  %v1536_v52 = vmul.f32 %v15868_v17, %v1514_v25  ;;  %13116 = vmatmul.mubr.bf16.gmra.mxu1 %v1742_v32  ;;  %v1582_v47 = vsel %vm1571_vm2, %v1579_v10, %v1581_v49  ;;  %v1655_v10 = vrot.slane %v15887_v44, 6 }
 0x3a9   :  { %v13087_v51 = vpop.f32.mrf.mxu1  ;;  %v1649_v22 = vmul.f32 %v15938_v30, %v1582_v47  ;;  %13119 = vmatprep.mubr.msk.bf16.mxu1 %vm15388_vm0, %v19740_v38  ;;  %13172 = vmatpush3.bf16.msra.mxu1 %v13754_v48  ;;  %v1659_v37 = vrot.slane %v15910_v56, 6  ;;  %v1663_v56 = vrot.slane %v15940_v34, 6 }
 0x3aa   :  { %v1583_v53 = vrot.slane %v15951_v27, 2  ;;  %v1551_v54 = vadd.f32 %v15870_v18, %v1536_v52  ;;  %13173 = vmatprep.subr.bf16.mxu1 %v19740_v38  ;;  %v1658_v31 = vsel %vm1653_vm3, %v1655_v10, %v1657_v4  ;;  %v1656_v35 = vsel %vm1653_vm3, %v1654_v13, %v1655_v10 }
 0x3ab   :  { %v1519_v26 = vpop.f32.mrf.mxu1  ;;  %v1737_v28 = vpack.c.bf16 %v1649_v22, %v1648_v19  ;;  %v1727_v44 = vmul.f32 %v15883_v50, %v1658_v31  ;;  %v1662_v32 = vsel %vm1653_vm3, %v1659_v37, %v1661_v40  ;;  %v1660_v36 = vsel %vm1653_vm3, %v1657_v4, %v1659_v37  ;;  %v13765_v4 = vld [vmem:[#allocation23] sm:$0xff]  }
 0x3ac   :  { %v15966_v55 = vmax.f32 %v1551_v54, 0.0  ;;  %v1537_v43 = vmul.f32 %v15868_v17, %v1519_v26  ;;  %v1584_v7 = vsel %vm1571_vm2, %v1581_v49, %v1583_v53  ;;  %v15979_v17 = vpop.permute.xlu1 %1636  ;;  %v1726_v49 = vmul.f32 %v15874_v29, %v1656_v35 }
 0x3ad   :  { %13152 = vmatmul.mubr.bf16.gmra.mxu0 %v1737_v28  ;;  %v13090_v15 = vpop.f32.mrf.mxu1  ;;  %13174 = vmatpush3.bf16.msra.mxu1 %v13755_v39  ;;  %19981 = vst [vmem:[#allocation99_spill] sm:$0xff] %v15979_v17  ;;  %v1729_v1 = vmul.f32 %v15915_v60, %v1662_v32  ;;  %v1665_v25 = vrot.slane %v15951_v27, 6  ;;  %v1728_v52 = vmul.f32 %v15895_v45, %v1660_v36 }
 0x3ae   :  { %v1585_v57 = vrot.slane %v15966_v55, 2  ;;  %v1552_v59 = vadd.f32 %v15870_v18, %v1537_v43  ;;  %v1743_v20 = vpack.c.bf16 %v15966_v55, %v15951_v27  ;;  %13155 = vmatprep.mubr.msk.bf16.mxu0 %vm15388_vm0, %v19740_v38  ;;  %13175 = vmatprep.subr.bf16.mxu1 %v19740_v38  ;;  %v1650_v18 = vmul.f32 %v15959_v12, %v1584_v7  ;;  %v13758_v7 = vld [vmem:[#allocation23 + $0x38] sm:$0xff]  }
 0x3af   :  { %v1985_v41 = vpack.c.bf16 %v1727_v44, %v1726_v49  ;;  %v1986_v47 = vpack.c.bf16 %v1729_v1, %v1728_v52  ;;  %v1666_v51 = vsel %vm1653_vm3, %v1663_v56, %v1665_v25  ;;  %v1664_v19 = vsel %vm1653_vm3, %v1661_v40, %v1663_v56  ;;  %13200 = vmatpush3.bf16.msra.mxu0 %v13758_v7 }
 0x3b0   :  { %v1561_v62 = vmax.f32 %v1552_v59, 0.0  ;;  %13120 = vmatmul.mubr.bf16.gmra.mxu1 %v1743_v20  ;;  %v1586_v63 = vsel %vm1571_vm2, %v1583_v53, %v1585_v57  ;;  %v1731_v22 = vmul.f32 %v15961_v33, %v1666_v51  ;;  %v1730_v53 = vmul.f32 %v15936_v23, %v1664_v19  ;;  %v16023_v34 = vpop.permute.xlu1 %1718  ;;  %13201 = vmatprep.subr.bf16.mxu0 %v19740_v38 }
 0x3b1   :  { %v1651_v0 = vmul.f32 %v15979_v17, %v1586_v63  ;;  %13123 = vmatprep.mubr.msk.bf16.mxu1 %vm15388_vm0, %v19740_v38  ;;  %13176 = vmatpush3.bf16.msra.mxu1 %v13756_v21  ;;  %v1667_v27 = vrot.slane %v15966_v55, 6  ;;  %19983 = vst [vmem:[#allocation101_spill] sm:$0xff] %v16023_v34  ;;  %v13760_v63 = vld [vmem:[#allocation23 + $0x28] sm:$0xff]  }
 0x3b2   :  { %v1587_v3 = vrot.slane %v1561_v62, 2  ;;  %13177 = vmatprep.subr.bf16.mxu1 %v19740_v38  ;;  %v1744_v8 = vpack.c.bf16 %v1561_v62, %v1561_v62  ;;  %v1669_v39 = vrot.slane %v1561_v62, 6  ;;  %v1987_v54 = vpack.c.bf16 %v1731_v22, %v1730_v53  ;;  %v13759_v62 = vld [vmem:[#allocation23 + $0x30] sm:$0xff]  }
 0x3b3   :  { %v1738_v6 = vpack.c.bf16 %v1651_v0, %v1650_v18  ;;  %v1668_v28 = vsel %vm1653_vm3, %v1665_v25, %v1667_v27  ;;  %13202 = vmatpush3.bf16.msra.mxu0 %v13759_v62  ;;  %v13761_v18 = vld [vmem:[#allocation23 + $0x20] sm:$0xff]   ;;  %v13762_v0 = vld [vmem:[#allocation23 + $0x18] sm:$0xff]  }
 0x3b4   :  { %v1588_v9 = vsel %vm1571_vm2, %v1585_v57, %v1587_v3  ;;  %v1670_v26 = vsel %vm1653_vm3, %v1667_v27, %v1669_v39  ;;  %v1732_v15 = vmul.f32 %v15977_v58, %v1668_v28  ;;  %v1680_v57 = vsel %vm1653_vm3, %v1669_v39, 0.0  ;;  %v16031_v55 = vpop.permute.xlu1 %1723  ;;  %13203 = vmatprep.subr.bf16.mxu0 %v19740_v38  ;;  %v13764_v3 = vld [vmem:[#allocation23 + $0x8] sm:$0xff]  }
 0x3b5   :  { %13156 = vmatmul.mubr.bf16.gmra.mxu0 %v1738_v6  ;;  %13178 = vmatpush3.bf16.msra.mxu1 %v13757_v2  ;;  %v1652_v14 = vmul.f32 %v15990_v11, %v1588_v9  ;;  %v1733_v43 = vmul.f32 %v16023_v34, %v1670_v26  ;;  %19984 = vst [vmem:[#allocation102_spill] sm:$0xff] %v16031_v55  ;;  %v13763_v2 = vld [vmem:[#allocation23 + $0x10] sm:$0xff]  }
 0x3b6   :  { %13159 = vmatprep.mubr.msk.bf16.mxu0 %vm15388_vm0, %v19740_v38  ;;  %13235 = vmatprep.subr.mxu1 %v19740_v38  ;;  %v1734_v59 = vmul.f32 %v16031_v55, %v1680_v57 }
 0x3b7   :  { %v1739_v48 = vpack.c.bf16 %v1652_v14, %v1652_v14  ;;  %v1988_v21 = vpack.c.bf16 %v1733_v43, %v1732_v15  ;;  %13204 = vmatpush3.bf16.msra.mxu0 %v13760_v63 }
 0x3b8   :  { %13124 = vmatmul.mubr.bf16.gmra.mxu1 %v1744_v8  ;;  %v1989_v20 = vpack.c.bf16 %v1734_v59, %v1734_v59  ;;  %13205 = vmatprep.subr.bf16.mxu0 %v19740_v38 }
 0x3b9   :  { %13179 = vmatprep.mubr.msk.bf16.mxu1 %vm15388_vm0, %v19740_v38 }
 0x3bb   :  { %13206 = vmatpush3.bf16.msra.mxu0 %v13761_v18  ;;  %v16056_v18 = vld [vmem:[#allocation19] ss:$0 sm:$0xff] }
 0x3bc   :  { %13207 = vmatprep.subr.bf16.mxu0 %v19740_v38 }
 0x3bd   :  { %13160 = vmatmul.mubr.bf16.gmra.mxu0 %v1739_v48 }
 0x3be   :  { %13215 = vmatprep.mubr.msk.bf16.mxu0 %vm15388_vm0, %v19740_v38 }
 0x3bf   :  { %13208 = vmatpush3.bf16.msra.mxu0 %v13762_v0 }
 0x3c0   :  { %13180 = vmatmul.mubr.bf16.vlgmr.msra.gmra.mxu1 %v1985_v41  ;;  %13209 = vmatprep.subr.bf16.mxu0 %v19740_v38 }
 0x3c1   :  { %13183 = vmatprep.mubr.msk.bf16.mxu1 %vm15388_vm0, %v19740_v38 }
 0x3c3   :  { %13210 = vmatpush3.bf16.msra.mxu0 %v13763_v2 }
 0x3c4   :  { %13211 = vmatprep.subr.bf16.mxu0 %v19740_v38 }
 0x3c7   :  { %13212 = vmatpush3.bf16.msra.mxu0 %v13764_v3 }
 0x3c8   :  { %13184 = vmatmul.mubr.bf16.gmra.mxu1 %v1986_v47  ;;  %13213 = vmatprep.subr.bf16.mxu0 %v19740_v38 }
 0x3c9   :  { %13187 = vmatprep.mubr.msk.bf16.mxu1 %vm15388_vm0, %v19740_v38 }
 0x3cb   :  { %13214 = vmatpush3.bf16.msra.mxu0 %v13765_v4  ;;  %v16058_v4 = vld [vmem:[#allocation20] ss:$0 sm:$0xff] }
 0x3cc   :  { %13280 = vmatprep.subr.bf16.mxu0 %v19740_v38 }
 0x3d0   :  { %13188 = vmatmul.mubr.bf16.gmra.mxu1 %v1987_v54 }
 0x3d1   :  { %13191 = vmatprep.mubr.msk.bf16.mxu1 %vm15388_vm0, %v19740_v38 }
 0x3d8   :  { %13192 = vmatmul.mubr.bf16.gmra.mxu1 %v1988_v21 }
 0x3d9   :  { %13195 = vmatprep.mubr.msk.bf16.mxu1 %vm15388_vm0, %v19740_v38 }
 0x3e0   :  { %13196 = vmatmul.mubr.bf16.gmra.mxu1 %v1989_v20 }
 0x3e1   :  { %13253 = vmatprep.mubr.msk.f32.mxu1 %vm15388_vm0, %v19740_v38 }
 0x458   :  { %v1827_v6 = vpop.f32.mrf.mxu1 }
 0x45a   :  { %v13109_v8 = vpop.f32.mrf.mxu1 }
 0x45c   :  { %v1830_v9 = vpop.f32.mrf.mxu1 }
 0x45d   :  { %v1947_v10 = vpop.f32.mrf.mxu0 }
 0x45e   :  { %v13110_v13 = vpop.f32.mrf.mxu1  ;;  %v1948_v62 = vadd.f32 %v1947_v10, %v1827_v6 }
 0x45f   :  { %v13145_v31 = vpop.f32.mrf.mxu0 }
 0x460   :  { %v1835_v14 = vpop.f32.mrf.mxu1 }
 0x461   :  { %v1950_v35 = vpop.f32.mrf.mxu0 }
 0x462   :  { %v13113_v44 = vpop.f32.mrf.mxu1  ;;  %v1951_v13 = vadd.f32 %v1950_v35, %v1830_v9 }
 0x463   :  { %v13146_v40 = vpop.f32.mrf.mxu0 }
 0x464   :  { %v1838_v48 = vpop.f32.mrf.mxu1 }
 0x465   :  { %v1955_v49 = vpop.f32.mrf.mxu0 }
 0x466   :  { %v13114_v37 = vpop.f32.mrf.mxu1  ;;  %v1956_v10 = vadd.f32 %v1955_v49, %v1835_v14 }
 0x467   :  { %v13149_v41 = vpop.f32.mrf.mxu0 }
 0x468   :  { %v1843_v32 = vpop.f32.mrf.mxu1 }
 0x469   :  { %v1958_v36 = vpop.f32.mrf.mxu0 }
 0x46a   :  { %v13117_v1 = vpop.f32.mrf.mxu1 }
 0x46b   :  { %v13150_v25 = vpop.f32.mrf.mxu0  ;;  %v16062_v1 = vld [vmem:[#allocation22] ss:$0 sm:$0xff] }
 0x46c   :  { %v1846_v52 = vpop.f32.mrf.mxu1 }
 0x46d   :  { %v1963_v56 = vpop.f32.mrf.mxu0 }
 0x46e   :  { %v13118_v47 = vpop.f32.mrf.mxu1 }
 0x46f   :  { %v13153_v51 = vpop.f32.mrf.mxu0 }
 0x470   :  { %v16046_v19 = vpop.f32.mrf.mxu1 }
 0x471   :  { %v1966_v22 = vpop.f32.mrf.mxu0 }
 0x472   :  { %v13121_v39 = vpop.f32.mrf.mxu1 }
 0x473   :  { %v13154_v53 = vpop.f32.mrf.mxu0 }
 0x474   :  { %v16048_v27 = vpop.f32.mrf.mxu1  ;;  %v1959_v53 = vadd.f32 %v1958_v36, %v1838_v48 }
 0x475   :  { %v1971_v54 = vpop.f32.mrf.mxu0 }
 0x476   :  { %v13122_v26 = vpop.f32.mrf.mxu1 }
 0x477   :  { %v13157_v28 = vpop.f32.mrf.mxu0 }
 0x478   :  { %v16050_v43 = vpop.f32.mrf.mxu1 }
 0x479   :  { %v16052_v15 = vpop.f32.mrf.mxu0 }
 0x47a   :  { %v13125_v21 = vpop.f32.mrf.mxu1 }
 0x47b   :  { %v13158_v57 = vpop.f32.mrf.mxu0 }
 0x47c   :  { %v1862_v59 = vpop.f32.mrf.mxu1 }
 0x47d   :  { %v16054_v20 = vpop.f32.mrf.mxu0 }
 0x47e   :  { %v13126_v7 = vpop.f32.mrf.mxu1 }
 0x47f   :  { %v13161_v63 = vpop.f32.mrf.mxu0 }
 0x480   :  { %v2072_v0 = vpop.f32.mrf.mxu1 }
 0x481   :  { %v2110_v2 = vadd.f32 %v2072_v0, %v1948_v62  ;;  %v1982_v3 = vpop.f32.mrf.mxu0  ;;  %v1964_v62 = vadd.f32 %v1963_v56, %v1843_v32  ;;  %v1967_v32 = vadd.f32 %v1966_v22, %v1846_v52 }
 0x482   :  { %v13181_v8 = vpop.f32.mrf.mxu1 }
 0x483   :  { %v2125_v31 = vadd.f32 %v16056_v18, %v2110_v2  ;;  %v13162_v44 = vpop.f32.mrf.mxu0 }
 0x484   :  { %v2075_v40 = vpop.f32.mrf.mxu1 }
 0x485   :  { %v2140_v37 = vmul.f32 %v16058_v4, %v2125_v31  ;;  %v2111_v41 = vadd.f32 %v2075_v40, %v1951_v13 }
 0x486   :  { %v13182_v6 = vpop.f32.mrf.mxu1 }
 0x487   :  { %v2126_v25 = vadd.f32 %v16056_v18, %v2111_v41  ;;  %v16066_v51 = vadd.f32 %v16062_v1, %v2140_v37 }
 0x488   :  { %v2080_v47 = vpop.f32.mrf.mxu1 }
 0x489   :  { %v2141_v39 = vmul.f32 %v16058_v4, %v2126_v25  ;;  %v2112_v9 = vadd.f32 %v2080_v47, %v1956_v10  ;;  %v2164_v57 = vmax.f32 %v16066_v51, 0.0  ;;  %v1972_v10 = vadd.f32 %v1971_v54, %v16046_v19 }
 0x48a   :  { %v13185_v35 = vpop.f32.mrf.mxu1  ;;  %v1975_v19 = vadd.f32 %v16052_v15, %v16048_v27 }
 0x48b   :  { %v16070_v26 = vadd.f32 %v16062_v1, %v2141_v39  ;;  %v2127_v28 = vadd.f32 %v16056_v18, %v2112_v9 }
 0x48c   :  { %v2083_v21 = vpop.f32.mrf.mxu1 }
 0x48d   :  { %v2165_v14 = vmax.f32 %v16070_v26, 0.0  ;;  %v2142_v49 = vmul.f32 %v16058_v4, %v2127_v28  ;;  %v2113_v59 = vadd.f32 %v2083_v21, %v1959_v53 }
 0x48e   :  { %v13186_v7 = vpop.f32.mrf.mxu1 }
 0x48f   :  { %v2252_v48 = vpack.c.bf16 %v2165_v14, %v2164_v57  ;;  %v2128_v36 = vadd.f32 %v16056_v18, %v2113_v59  ;;  %v16083_v3 = vadd.f32 %v16062_v1, %v2142_v49 }
 0x490   :  { %v2088_v63 = vpop.f32.mrf.mxu1 }
 0x491   :  { %v2143_v0 = vmul.f32 %v16058_v4, %v2128_v36  ;;  %v2114_v2 = vadd.f32 %v2088_v63, %v1964_v62  ;;  %13216 = vmatmul.mubr.bf16.vlgmr.msra.gmra.mxu0 %v2252_v48  ;;  %v2166_v37 = vmax.f32 %v16083_v3, 0.0  ;;  %v1980_v48 = vadd.f32 %v16054_v20, %v16050_v43 }
 0x492   :  { %v13189_v8 = vpop.f32.mrf.mxu1  ;;  %13219 = vmatprep.mubr.msk.bf16.mxu0 %vm15388_vm0, %v19740_v38 }
 0x493   :  { %v2129_v56 = vadd.f32 %v16056_v18, %v2114_v2  ;;  %v16089_v13 = vadd.f32 %v16062_v1, %v2143_v0 }
 0x494   :  { %v2091_v31 = vpop.f32.mrf.mxu1 }
 0x495   :  { %v2144_v44 = vmul.f32 %v16058_v4, %v2129_v56  ;;  %v2115_v40 = vadd.f32 %v2091_v31, %v1967_v32  ;;  %v2167_v41 = vmax.f32 %v16089_v13, 0.0 }
 0x496   :  { %v13190_v6 = vpop.f32.mrf.mxu1 }
 0x497   :  { %v2130_v25 = vadd.f32 %v16056_v18, %v2115_v40  ;;  %v2253_v52 = vpack.c.bf16 %v2167_v41, %v2166_v37  ;;  %v16102_v9 = vadd.f32 %v16062_v1, %v2144_v44 }
 0x498   :  { %v2096_v22 = vpop.f32.mrf.mxu1 }
 0x499   :  { %v2145_v47 = vmul.f32 %v16058_v4, %v2130_v25  ;;  %v2116_v39 = vadd.f32 %v2096_v22, %v1972_v10  ;;  %13220 = vmatmul.mubr.bf16.gmra.mxu0 %v2253_v52  ;;  %v2168_v59 = vmax.f32 %v16102_v9, 0.0  ;;  %v13766_v25 = vld [vmem:[#allocation29 + $0x38] sm:$0xff]   ;;  %v13767_v52 = vld [vmem:[#allocation29 + $0x30] sm:$0xff]   ;;  %v13771_v22 = vld [vmem:[#allocation29 + $0x20] sm:$0xff]  }
 0x49a   :  { %v13193_v35 = vpop.f32.mrf.mxu1  ;;  %13223 = vmatprep.mubr.msk.bf16.mxu0 %vm15388_vm0, %v19740_v38  ;;  %13281 = vmatpush3.bf16.msra.mxu0 %v13766_v25 }
 0x49b   :  { %v2131_v54 = vadd.f32 %v16056_v18, %v2116_v39  ;;  %v16110_v53 = vadd.f32 %v16062_v1, %v2145_v47  ;;  %13282 = vmatprep.subr.bf16.mxu0 %v19740_v38  ;;  %v13773_v47 = vld [vmem:[#allocation29 + $0x18] sm:$0xff]  }
 0x49c   :  { %v2099_v28 = vpop.f32.mrf.mxu1 }
 0x49d   :  { %v2146_v21 = vmul.f32 %v16058_v4, %v2131_v54  ;;  %v2117_v49 = vadd.f32 %v2099_v28, %v1975_v19  ;;  %v2169_v7 = vmax.f32 %v16110_v53, 0.0 }
 0x49e   :  { %v13194_v62 = vpop.f32.mrf.mxu1  ;;  %13283 = vmatpush3.bf16.msra.mxu0 %v13767_v52 }
 0x49f   :  { %v2132_v36 = vadd.f32 %v16056_v18, %v2117_v49  ;;  %v2254_v27 = vpack.c.bf16 %v2169_v7, %v2168_v59  ;;  %v16124_v2 = vadd.f32 %v16062_v1, %v2146_v21  ;;  %13284 = vmatprep.subr.bf16.mxu0 %v19740_v38 }
 0x4a0   :  { %v2104_v15 = vpop.f32.mrf.mxu1 }
 0x4a1   :  { %v2147_v63 = vmul.f32 %v16058_v4, %v2132_v36  ;;  %v2118_v0 = vadd.f32 %v2104_v15, %v1980_v48  ;;  %13224 = vmatmul.mubr.bf16.gmra.mxu0 %v2254_v27  ;;  %v19743_v31 = vmax.f32 %v16124_v2, 0.0 }
 0x4a2   :  { %v13197_v8 = vpop.f32.mrf.mxu1  ;;  %13227 = vmatprep.mubr.msk.bf16.mxu0 %vm15388_vm0, %v19740_v38 }
 0x4a3   :  { %v2133_v43 = vadd.f32 %v16056_v18, %v2118_v0  ;;  %v16130_v20 = vadd.f32 %v16062_v1, %v2147_v63 }
 0x4a4   :  { %v2107_v32 = vpop.f32.mrf.mxu1 }
 0x4a5   :  { %v2148_v56 = vmul.f32 %v16058_v4, %v2133_v43  ;;  %v19742_v44 = vmax.f32 %v16130_v20, 0.0  ;;  %v11683_v32 = vld [vmem:[#allocation25] ss:$0 sm:$0xff] }
 0x4a6   :  { %v13198_v40 = vpop.f32.mrf.mxu1 }
 0x4a7   :  { %v2255_v6 = vpack.c.bf16 %v19742_v44, %v19743_v31  ;;  %v2163_v10 = vadd.f32 %v16062_v1, %v2148_v56  ;;  %v13769_v1 = vld [vmem:[#allocation29 + $0x28] sm:$0xff]  }
 0x4a8   :  { %13285 = vmatpush3.bf16.msra.mxu0 %v13769_v1 }
 0x4a9   :  { %13228 = vmatmul.mubr.bf16.gmra.mxu0 %v2255_v6  ;;  %v16142_v18 = vmax.f32 %v2163_v10, 0.0  ;;  %13286 = vmatprep.subr.bf16.mxu0 %v19740_v38 }
 0x4aa   :  { %13231 = vmatprep.mubr.msk.bf16.mxu0 %vm15388_vm0, %v19740_v38 }
 0x4ab   :  { %v2256_v4 = vpack.c.bf16 %v16142_v18, %v16142_v18 }
 0x4ac   :  { %13287 = vmatpush3.bf16.msra.mxu0 %v13771_v22 }
 0x4ad   :  { %13288 = vmatprep.subr.bf16.mxu0 %v19740_v38 }
 0x4b0   :  { %13289 = vmatpush3.bf16.msra.mxu0 %v13773_v47 }
 0x4b1   :  { %13232 = vmatmul.mubr.bf16.gmra.mxu0 %v2256_v4  ;;  %13290 = vmatprep.subr.bf16.mxu0 %v19740_v38 }
 0x4b2   :  { %13296 = vmatprep.mubr.msk.bf16.mxu0 %vm15388_vm0, %v19740_v38 }
 0x551   :  { %v2345_v39 = vpop.f32.mrf.mxu0 }
 0x553   :  { %v13217_v35 = vpop.f32.mrf.mxu0 }
 0x555   :  { %v2348_v19 = vpop.f32.mrf.mxu0 }
 0x557   :  { %v13218_v54 = vpop.f32.mrf.mxu0 }
 0x558   :  { %v2349_v54 = vadd.f32 %v11683_v32, %v2348_v19  ;;  %v2174_v19 = vld [vmem:[%s19985_s18 + $0x8] sm:$0xff] }
 0x559   :  { %v2353_v28 = vpop.f32.mrf.mxu0 }
 0x55a   :  { %v2354_v35 = vadd.f32 %v11683_v32, %v2353_v28  ;;  %v13770_v28 = vld [vmem:[#allocation28 + $0x30] sm:$0xff]  }
 0x55b   :  { %v13221_v21 = vpop.f32.mrf.mxu0 }
 0x55c   :  { %v2346_v21 = vadd.f32 %v11683_v32, %v2345_v39  ;;  %v2175_v39 = vld [vmem:[%s19985_s18 + $0x10] sm:$0xff] }
 0x55d   :  { %v2356_v49 = vpop.f32.mrf.mxu0 }
 0x55e   :  { %v2357_v47 = vadd.f32 %v11683_v32, %v2356_v49  ;;  %v13772_v49 = vld [vmem:[#allocation28 + $0x28] sm:$0xff]  }
 0x55f   :  { %v13222_v62 = vpop.f32.mrf.mxu0 }
 0x560   :  { %v2173_v62 = vld [vmem:[%s19985_s18] sm:$0xff] }
 0x561   :  { %v2361_v48 = vpop.f32.mrf.mxu0 }
 0x562   :  { %v2362_v22 = vadd.f32 %v11683_v32, %v2361_v48  ;;  %v13768_v48 = vld [vmem:[#allocation28 + $0x38] sm:$0xff]  }
 0x563   :  { %v13225_v36 = vpop.f32.mrf.mxu0 }
 0x564   :  { %v2176_v36 = vld [vmem:[%s19985_s18 + $0x18] sm:$0xff] }
 0x565   :  { %v2364_v27 = vpop.f32.mrf.mxu0 }
 0x566   :  { %v2365_v1 = vadd.f32 %v11683_v32, %v2364_v27  ;;  %v13774_v27 = vld [vmem:[#allocation28 + $0x20] sm:$0xff]  }
 0x567   :  { %v13226_v15 = vpop.f32.mrf.mxu0 }
 0x568   :  { %v2177_v15 = vld [vmem:[%s19985_s18 + $0x20] sm:$0xff] }
 0x569   :  { %v2369_v63 = vpop.f32.mrf.mxu0 }
 0x56a   :  { %v2370_v25 = vadd.f32 %v11683_v32, %v2369_v63  ;;  %v2178_v63 = vld [vmem:[%s19985_s18 + $0x28] sm:$0xff] }
 0x56b   :  { %v13229_v0 = vpop.f32.mrf.mxu0 }
 0x56c   :  { %v2179_v0 = vld [vmem:[%s19985_s18 + $0x30] sm:$0xff] }
 0x56d   :  { %v2372_v8 = vpop.f32.mrf.mxu0 }
 0x56e   :  { %v2373_v10 = vadd.f32 %v11683_v32, %v2372_v8  ;;  %v2180_v8 = vld [vmem:[%s19985_s18 + $0x38] sm:$0xff] }
 0x56f   :  { %v13230_v43 = vpop.f32.mrf.mxu0 }
 0x570   :  { %v2181_v43 = vld [vmem:[%s19985_s18 + $0x40] sm:$0xff] }
 0x571   :  { %v2377_v56 = vpop.f32.mrf.mxu0 }
 0x572   :  { %v2378_v40 = vadd.f32 %v11683_v32, %v2377_v56  ;;  %v13775_v32 = vld [vmem:[#allocation29 + $0x10] sm:$0xff]   ;;  %v13776_v56 = vld [vmem:[#allocation28 + $0x18] sm:$0xff]  }
 0x573   :  { %v13233_v6 = vpop.f32.mrf.mxu0  ;;  %13291 = vmatpush3.bf16.msra.mxu0 %v13775_v32 }
 0x574   :  { %13236 = vmatpush3.msra.mxu1 %v2378_v40  ;;  %13292 = vmatprep.subr.bf16.mxu0 %v19740_v38  ;;  %v13777_v40 = vld [vmem:[#allocation29 + $0x8] sm:$0xff]   ;;  %v13778_v6 = vld [vmem:[#allocation28 + $0x10] sm:$0xff]  }
 0x575   :  { %v2380_v4 = vpop.f32.mrf.mxu0  ;;  %13237 = vmatprep.subr.mxu1 %v19740_v38 }
 0x576   :  { %13238 = vmatpush3.msra.mxu1 %v2373_v10  ;;  %v13779_v10 = vld [vmem:[#allocation29] sm:$0xff]   ;;  %v13780_v4 = vld [vmem:[#allocation28 + $0x8] sm:$0xff]  }
 0x577   :  { %v13234_v52 = vpop.f32.mrf.mxu0  ;;  %13239 = vmatprep.subr.mxu1 %v19740_v38  ;;  %13293 = vmatpush3.bf16.msra.mxu0 %v13777_v40 }
 0x578   :  { %13240 = vmatpush3.msra.mxu1 %v2370_v25  ;;  %13294 = vmatprep.subr.bf16.mxu0 %v19740_v38  ;;  %v13781_v25 = vld [vmem:[#allocation28] sm:$0xff]   ;;  %v16209_v52 = vld [vmem:[#allocation26] ss:$0 sm:$0xff] }
 0x579   :  { %13241 = vmatprep.subr.mxu1 %v19740_v38 }
 0x57a   :  { %13242 = vmatpush3.msra.mxu1 %v2365_v1  ;;  %v16212_v1 = vld [vmem:[%s19986_s22] ss:$0 sm:$0xff] }
 0x57b   :  { %13243 = vmatprep.subr.mxu1 %v19740_v38  ;;  %13295 = vmatpush3.bf16.msra.mxu0 %v13779_v10 }
 0x57c   :  { %13244 = vmatpush3.msra.mxu1 %v2362_v22  ;;  %13352 = vmatprep.subr.bf16.mxu0 %v19740_v38 }
 0x57d   :  { %13245 = vmatprep.subr.mxu1 %v19740_v38 }
 0x57e   :  { %13246 = vmatpush3.msra.mxu1 %v2357_v47 }
 0x57f   :  { %13247 = vmatprep.subr.mxu1 %v19740_v38 }
 0x580   :  { %13248 = vmatpush3.msra.mxu1 %v2354_v35 }
 0x581   :  { %13249 = vmatprep.subr.mxu1 %v19740_v38 }
 0x582   :  { %13250 = vmatpush3.msra.mxu1 %v2349_v54 }
 0x583   :  { %13251 = vmatprep.subr.mxu1 %v19740_v38 }
 0x584   :  { %13252 = vmatpush3.msra.mxu1 %v2346_v21 }
 0x585   :  { %13254 = vmatmul.mubr.msk.f32.vlgmr.msra.gmra.mxu1 %vm1385_vm1, %v2173_v62  ;;  %13316 = vmatprep.subr.bf16.mxu1 %v19740_v38 }
 0x586   :  { %13256 = vmatprep.mubr.msk.f32.mxu1 %vm15388_vm0, %v19740_v38  ;;  %13317 = vmatpush3.bf16.msra.mxu1 %v13768_v48 }
 0x587   :  { %13318 = vmatprep.subr.bf16.mxu1 %v19740_v38 }
 0x589   :  { %13257 = vmatmul.mubr.msk.f32.gmra.mxu1 %vm1385_vm1, %v2174_v19 }
 0x58a   :  { %13259 = vmatprep.mubr.msk.f32.mxu1 %vm15388_vm0, %v19740_v38  ;;  %13319 = vmatpush3.bf16.msra.mxu1 %v13770_v28 }
 0x58b   :  { %13320 = vmatprep.subr.bf16.mxu1 %v19740_v38 }
 0x58d   :  { %13260 = vmatmul.mubr.msk.f32.gmra.mxu1 %vm1385_vm1, %v2175_v39 }
 0x58e   :  { %13262 = vmatprep.mubr.msk.f32.mxu1 %vm15388_vm0, %v19740_v38  ;;  %13321 = vmatpush3.bf16.msra.mxu1 %v13772_v49 }
 0x58f   :  { %13322 = vmatprep.subr.bf16.mxu1 %v19740_v38 }
 0x591   :  { %13263 = vmatmul.mubr.msk.f32.gmra.mxu1 %vm1385_vm1, %v2176_v36 }
 0x592   :  { %13265 = vmatprep.mubr.msk.f32.mxu1 %vm15388_vm0, %v19740_v38  ;;  %13323 = vmatpush3.bf16.msra.mxu1 %v13774_v27 }
 0x593   :  { %13324 = vmatprep.subr.bf16.mxu1 %v19740_v38 }
 0x595   :  { %13266 = vmatmul.mubr.msk.f32.gmra.mxu1 %vm1385_vm1, %v2177_v15 }
 0x596   :  { %13268 = vmatprep.mubr.msk.f32.mxu1 %vm15388_vm0, %v19740_v38  ;;  %13325 = vmatpush3.bf16.msra.mxu1 %v13776_v56 }
 0x597   :  { %13326 = vmatprep.subr.bf16.mxu1 %v19740_v38 }
 0x599   :  { %13269 = vmatmul.mubr.msk.f32.gmra.mxu1 %vm1385_vm1, %v2178_v63  ;;  %v13782_v63 = vld [vmem:[#allocation31 + $0x38] sm:$0xff]  }
 0x59a   :  { %13271 = vmatprep.mubr.msk.f32.mxu1 %vm15388_vm0, %v19740_v38  ;;  %13327 = vmatpush3.bf16.msra.mxu1 %v13778_v6 }
 0x59b   :  { %13328 = vmatprep.subr.bf16.mxu1 %v19740_v38 }
 0x59d   :  { %13272 = vmatmul.mubr.msk.f32.gmra.mxu1 %vm1385_vm1, %v2179_v0 }
 0x59e   :  { %13274 = vmatprep.mubr.msk.f32.mxu1 %vm15388_vm0, %v19740_v38  ;;  %13329 = vmatpush3.bf16.msra.mxu1 %v13780_v4 }
 0x59f   :  { %13330 = vmatprep.subr.bf16.mxu1 %v19740_v38 }
 0x5a1   :  { %13275 = vmatmul.mubr.msk.f32.gmra.mxu1 %vm1385_vm1, %v2180_v8 }
 0x5a2   :  { %13277 = vmatprep.mubr.msk.f32.mxu1 %vm15388_vm0, %v19740_v38  ;;  %13331 = vmatpush3.bf16.msra.mxu1 %v13781_v25 }
 0x5a3   :  { %13388 = vmatprep.subr.mxu1 %v19740_v38 }
 0x5a5   :  { %13278 = vmatmul.mubr.msk.f32.gmra.mxu1 %vm1385_vm1, %v2181_v43 }
 0x5a6   :  { %13332 = vmatprep.mubr.msk.bf16.mxu1 %vm15388_vm0, %v19740_v38 }
 0x645   :  { %v2476_v22 = vpop.f32.mrf.mxu1 }
 0x646   :  { %v2526_v47 = vmul.f32 %v16209_v52, %v2476_v22 }
 0x647   :  { %v13255_v35 = vpop.f32.mrf.mxu1 }
 0x648   :  { %v2541_v54 = vadd.f32 %v16212_v1, %v2526_v47  ;;  %v13783_v47 = vld [vmem:[#allocation31 + $0x30] sm:$0xff]  }
 0x649   :  { %v2481_v21 = vpop.f32.mrf.mxu1 }
 0x64a   :  { %v16216_v62 = vmax.f32 %v2541_v54, 0.0  ;;  %v2527_v48 = vmul.f32 %v16209_v52, %v2481_v21 }
 0x64b   :  { %v13258_v19 = vpop.f32.mrf.mxu1 }
 0x64c   :  { %v2568_v28 = vrot.slane %v16216_v62, 2  ;;  %v2542_v39 = vadd.f32 %v16212_v1, %v2527_v48 }
 0x64d   :  { %v2486_v49 = vpop.f32.mrf.mxu1 }
 0x64e   :  { %v16221_v36 = vmax.f32 %v2542_v39, 0.0  ;;  %v2528_v27 = vmul.f32 %v16209_v52, %v2486_v49  ;;  %v2594_v0 = vsel %vm1571_vm2, 0.0, %v2568_v28  ;;  %v13784_v49 = vld [vmem:[#allocation31 + $0x28] sm:$0xff]  }
 0x64f   :  { %v13261_v15 = vpop.f32.mrf.mxu1  ;;  %v2595_v4 = vmul.f32 %v2594_v0, %v15866_v16 }
 0x650   :  { %v2569_v8 = vrot.slane %v16221_v36, 2  ;;  %v2645_v43 = vpack.c.bf16 %v16221_v36, %v16216_v62  ;;  %v2543_v32 = vadd.f32 %v16212_v1, %v2528_v27 }
 0x651   :  { %v2491_v56 = vpop.f32.mrf.mxu1 }
 0x652   :  { %v2570_v40 = vsel %vm1571_vm2, %v2568_v28, %v2569_v8  ;;  %v16230_v6 = vmax.f32 %v2543_v32, 0.0  ;;  %v2529_v10 = vmul.f32 %v16209_v52, %v2491_v56  ;;  %13297 = vmatmul.mubr.bf16.vlgmr.msra.gmra.mxu0 %v2645_v43 }
 0x653   :  { %v2596_v25 = vmul.f32 %v2570_v40, %v15872_v24  ;;  %v13264_v22 = vpop.f32.mrf.mxu1  ;;  %13300 = vmatprep.mubr.msk.bf16.mxu0 %vm15388_vm0, %v19740_v38  ;;  %13353 = vmatpush3.bf16.msra.mxu0 %v13782_v63 }
 0x654   :  { %v2571_v35 = vrot.slane %v16230_v6, 2  ;;  %v2544_v54 = vadd.f32 %v16212_v1, %v2529_v10  ;;  %13354 = vmatprep.subr.bf16.mxu0 %v19740_v38 }
 0x655   :  { %v2496_v21 = vpop.f32.mrf.mxu1  ;;  %v2640_v48 = vpack.c.bf16 %v2596_v25, %v2595_v4 }
 0x656   :  { %v16240_v19 = vmax.f32 %v2544_v54, 0.0  ;;  %v2530_v28 = vmul.f32 %v16209_v52, %v2496_v21  ;;  %v2572_v0 = vsel %vm1571_vm2, %v2569_v8, %v2571_v35  ;;  %v13785_v8 = vld [vmem:[#allocation31 + $0x20] sm:$0xff]  }
 0x657   :  { %v13267_v39 = vpop.f32.mrf.mxu1  ;;  %13333 = vmatmul.mubr.bf16.vlgmr.msra.gmra.mxu1 %v2640_v48  ;;  %13355 = vmatpush3.bf16.msra.mxu0 %v13783_v47  ;;  %v2597_v4 = vmul.f32 %v2572_v0, %v15881_v46 }
 0x658   :  { %v2573_v27 = vrot.slane %v16240_v19, 2  ;;  %v2545_v15 = vadd.f32 %v16212_v1, %v2530_v28  ;;  %v2646_v63 = vpack.c.bf16 %v16240_v19, %v16230_v6  ;;  %13336 = vmatprep.mubr.msk.bf16.mxu1 %vm15388_vm0, %v19740_v38  ;;  %13356 = vmatprep.subr.bf16.mxu0 %v19740_v38  ;;  %v13786_v39 = vld [vmem:[#allocation31 + $0x18] sm:$0xff]  }
 0x659   :  { %v2501_v43 = vpop.f32.mrf.mxu1 }
 0x65a   :  { %v16251_v32 = vmax.f32 %v2545_v15, 0.0  ;;  %v2531_v56 = vmul.f32 %v16209_v52, %v2501_v43  ;;  %13301 = vmatmul.mubr.bf16.gmra.mxu0 %v2646_v63  ;;  %v2574_v40 = vsel %vm1571_vm2, %v2571_v35, %v2573_v27 }
 0x65b   :  { %v13270_v10 = vpop.f32.mrf.mxu1  ;;  %v2598_v25 = vmul.f32 %v2574_v40, %v15897_v5  ;;  %13304 = vmatprep.mubr.msk.bf16.mxu0 %vm15388_vm0, %v19740_v38  ;;  %13357 = vmatpush3.bf16.msra.mxu0 %v13784_v49 }
 0x65c   :  { %v2575_v22 = vrot.slane %v16251_v32, 2  ;;  %v2546_v47 = vadd.f32 %v16212_v1, %v2531_v56  ;;  %13358 = vmatprep.subr.bf16.mxu0 %v19740_v38 }
 0x65d   :  { %v2506_v54 = vpop.f32.mrf.mxu1  ;;  %v2641_v21 = vpack.c.bf16 %v2598_v25, %v2597_v4 }
 0x65e   :  { %v16262_v48 = vmax.f32 %v2546_v47, 0.0  ;;  %v2532_v35 = vmul.f32 %v16209_v52, %v2506_v54  ;;  %v2576_v0 = vsel %vm1571_vm2, %v2573_v27, %v2575_v22  ;;  %v13787_v27 = vld [vmem:[#allocation31 + $0x10] sm:$0xff]  }
 0x65f   :  { %v13273_v28 = vpop.f32.mrf.mxu1  ;;  %13337 = vmatmul.mubr.bf16.gmra.mxu1 %v2641_v21  ;;  %13359 = vmatpush3.bf16.msra.mxu0 %v13785_v8  ;;  %v2599_v25 = vmul.f32 %v2576_v0, %v15913_v61 }
 0x660   :  { %v2577_v15 = vrot.slane %v16262_v48, 2  ;;  %v2547_v49 = vadd.f32 %v16212_v1, %v2532_v35  ;;  %v2647_v63 = vpack.c.bf16 %v16262_v48, %v16251_v32  ;;  %13340 = vmatprep.mubr.msk.bf16.mxu1 %vm15388_vm0, %v19740_v38  ;;  %13360 = vmatprep.subr.bf16.mxu0 %v19740_v38 }
 0x661   :  { %v2511_v43 = vpop.f32.mrf.mxu1 }
 0x662   :  { %v16273_v56 = vmax.f32 %v2547_v49, 0.0  ;;  %v2533_v40 = vmul.f32 %v16209_v52, %v2511_v43  ;;  %13305 = vmatmul.mubr.bf16.gmra.mxu0 %v2647_v63  ;;  %v2578_v10 = vsel %vm1571_vm2, %v2575_v22, %v2577_v15  ;;  %v13788_v63 = vld [vmem:[#allocation31 + $0x8] sm:$0xff]  }
 0x663   :  { %v13276_v4 = vpop.f32.mrf.mxu1  ;;  %v2600_v8 = vmul.f32 %v2578_v10, %v15938_v30  ;;  %13308 = vmatprep.mubr.msk.bf16.mxu0 %vm15388_vm0, %v19740_v38  ;;  %13361 = vmatpush3.bf16.msra.mxu0 %v13786_v39 }
 0x664   :  { %v2579_v47 = vrot.slane %v16273_v56, 2  ;;  %v2548_v54 = vadd.f32 %v16212_v1, %v2533_v40  ;;  %13362 = vmatprep.subr.bf16.mxu0 %v19740_v38 }
 0x665   :  { %v2516_v21 = vpop.f32.mrf.mxu1  ;;  %v2642_v35 = vpack.c.bf16 %v2600_v8, %v2599_v25 }
 0x666   :  { %v16284_v28 = vmax.f32 %v2548_v54, 0.0  ;;  %v2534_v22 = vmul.f32 %v16209_v52, %v2516_v21  ;;  %v2580_v40 = vsel %vm1571_vm2, %v2577_v15, %v2579_v47  ;;  %v2607_v15 = vrot.slane %v16230_v6, 6 }
 0x667   :  { %13341 = vmatmul.mubr.bf16.gmra.mxu1 %v2642_v35  ;;  %v13279_v49 = vpop.f32.mrf.mxu1  ;;  %13363 = vmatpush3.bf16.msra.mxu0 %v13787_v27  ;;  %v2601_v4 = vmul.f32 %v2580_v40, %v15959_v12  ;;  %v2604_v35 = vrot.slane %v16216_v62, 6 }
 0x668   :  { %v2581_v0 = vrot.slane %v16284_v28, 2  ;;  %v2549_v39 = vadd.f32 %v16212_v1, %v2534_v22  ;;  %v2648_v43 = vpack.c.bf16 %v16284_v28, %v16273_v56  ;;  %13344 = vmatprep.mubr.msk.bf16.mxu1 %vm15388_vm0, %v19740_v38  ;;  %13364 = vmatprep.subr.bf16.mxu0 %v19740_v38  ;;  %v13789_v1 = vld [vmem:[#allocation31] sm:$0xff]  }
 0x66a   :  { %v2558_v10 = vmax.f32 %v2549_v39, 0.0  ;;  %13309 = vmatmul.mubr.bf16.gmra.mxu0 %v2648_v43  ;;  %v2582_v52 = vsel %vm1571_vm2, %v2579_v47, %v2581_v0  ;;  %v2605_v47 = vrot.slane %v16221_v36, 6  ;;  %v2611_v36 = vrot.slane %v16251_v32, 6 }
 0x66b   :  { %v2602_v25 = vmul.f32 %v2582_v52, %v15979_v17  ;;  %13312 = vmatprep.mubr.msk.bf16.mxu0 %vm15388_vm0, %v19740_v38  ;;  %13365 = vmatpush3.bf16.msra.mxu0 %v13788_v63  ;;  %v2609_v43 = vrot.slane %v16240_v19, 6  ;;  %v2613_v19 = vrot.slane %v16262_v48, 6 }
 0x66c   :  { %v2583_v8 = vrot.slane %v2558_v10, 2  ;;  %13366 = vmatprep.subr.bf16.mxu0 %v19740_v38  ;;  %v2649_v54 = vpack.c.bf16 %v2558_v10, %v2558_v10  ;;  %v2608_v22 = vsel %vm1653_vm3, %v2605_v47, %v2607_v15  ;;  %v2606_v6 = vsel %vm1653_vm3, %v2604_v35, %v2605_v47 }
 0x66d   :  { %v2643_v27 = vpack.c.bf16 %v2602_v25, %v2601_v4  ;;  %v2632_v63 = vmul.f32 %v2608_v22, %v15883_v50  ;;  %v2631_v39 = vmul.f32 %v2606_v6, %v15874_v29  ;;  %v2612_v40 = vsel %vm1653_vm3, %v2609_v43, %v2611_v36 }
 0x66e   :  { %v2584_v21 = vsel %vm1571_vm2, %v2581_v0, %v2583_v8  ;;  %v2610_v52 = vsel %vm1653_vm3, %v2607_v15, %v2609_v43  ;;  %v2634_v32 = vmul.f32 %v2612_v40, %v15915_v60  ;;  %v2615_v4 = vrot.slane %v16273_v56, 6 }
 0x66f   :  { %13345 = vmatmul.mubr.bf16.gmra.mxu1 %v2643_v27  ;;  %13367 = vmatpush3.bf16.msra.mxu0 %v13789_v1  ;;  %v2603_v49 = vmul.f32 %v2584_v21, %v15990_v11  ;;  %v2890_v62 = vpack.c.bf16 %v2632_v63, %v2631_v39  ;;  %v2633_v25 = vmul.f32 %v2610_v52, %v15895_v45  ;;  %v2619_v15 = vrot.slane %v2558_v10, 6  ;;  %v13790_v52 = vld [vmem:[#allocation35 + $0x118] ss:$20 sps:$4 sm:$0xff]  }
 0x670   :  { %13348 = vmatprep.mubr.msk.bf16.mxu1 %vm15388_vm0, %v19740_v38  ;;  %v2616_v8 = vsel %vm1653_vm3, %v2613_v19, %v2615_v4  ;;  %v2614_v27 = vsel %vm1653_vm3, %v2611_v36, %v2613_v19  ;;  %v2617_v56 = vrot.slane %v16284_v28, 6 }
 0x671   :  { %v2644_v0 = vpack.c.bf16 %v2603_v49, %v2603_v49  ;;  %v2891_v1 = vpack.c.bf16 %v2634_v32, %v2633_v25  ;;  %v2635_v21 = vmul.f32 %v2614_v27, %v15936_v23  ;;  %v2630_v10 = vsel %vm1653_vm3, %v2619_v15, 0.0  ;;  %v13792_v32 = vld [vmem:[#allocation35 + $0x11c] ss:$20 sps:$4 sm:$0xff]   ;;  %v13798_v25 = vld [vmem:[#allocation35 + $0xf4] ss:$20 sps:$4 sm:$0xff]  }
 0x672   :  { %13313 = vmatmul.mubr.bf16.gmra.mxu0 %v2649_v54  ;;  %v2636_v54 = vmul.f32 %v2616_v8, %v15961_v33  ;;  %v2620_v35 = vsel %vm1653_vm3, %v2617_v56, %v2619_v15  ;;  %v2618_v48 = vsel %vm1653_vm3, %v2615_v4, %v2617_v56  ;;  %v2639_v28 = vmul.f32 %v2630_v10, %v16031_v55  ;;  %v13796_v8 = vld [vmem:[#allocation35 + $0xf0] ss:$20 sps:$4 sm:$0xff]   ;;  %v13804_v15 = vld [vmem:[#allocation35 + $0xcc] ss:$20 sps:$4 sm:$0xff]  }
 0x673   :  { %13368 = vmatprep.mubr.msk.bf16.mxu0 %vm15388_vm0, %v19740_v38  ;;  %v2638_v22 = vmul.f32 %v2620_v35, %v16023_v34  ;;  %v2637_v49 = vmul.f32 %v2618_v48, %v15977_v58  ;;  %4396 = vmatprep.subr.bf16.mxu0 %v13792_v32  ;;  %v13802_v35 = vld [vmem:[#allocation35 + $0xc8] ss:$20 sps:$4 sm:$0xff]  }
 0x674   :  { %v2892_v47 = vpack.c.bf16 %v2636_v54, %v2635_v21  ;;  %v2894_v63 = vpack.c.bf16 %v2639_v28, %v2639_v28 }
 0x675   :  { %v2893_v6 = vpack.c.bf16 %v2638_v22, %v2637_v49  ;;  %v13810_v49 = vld [vmem:[#allocation35 + $0xa4] ss:$20 sps:$4 sm:$0xff]  }
 0x677   :  { %13349 = vmatmul.mubr.bf16.gmra.mxu1 %v2644_v0 }
 0x678   :  { %13406 = vmatprep.mubr.msk.f32.mxu1 %vm15388_vm0, %v19740_v38 }
 0x67a   :  { %13369 = vmatmul.mubr.bf16.vlgmr.msra.gmra.mxu0 %v2890_v62 }
 0x67b   :  { %13372 = vmatprep.mubr.msk.bf16.mxu0 %vm15388_vm0, %v19740_v38  ;;  %4397 = vmatpush1.bf16.msra.mxu0 %v13790_v52  ;;  %v13814_v52 = vld [vmem:[#allocation35 + $0x78] ss:$20 sps:$4 sm:$0xff]  }
 0x67c   :  { %4398 = vmatprep.subr.bf16.mxu0 %v13798_v25 }
 0x67f   :  { %4399 = vmatpush1.bf16.msra.mxu0 %v13796_v8  ;;  %v13820_v8 = vld [vmem:[#allocation35 + $0x50] ss:$20 sps:$4 sm:$0xff]  }
 0x680   :  { %4400 = vmatprep.subr.bf16.mxu0 %v13804_v15  ;;  %v13828_v15 = vld [vmem:[#allocation35 + $0x2c] ss:$20 sps:$4 sm:$0xff]  }
 0x682   :  { %13373 = vmatmul.mubr.bf16.gmra.mxu0 %v2891_v1 }
 0x683   :  { %13376 = vmatprep.mubr.msk.bf16.mxu0 %vm15388_vm0, %v19740_v38  ;;  %4401 = vmatpush1.bf16.msra.mxu0 %v13802_v35 }
 0x684   :  { %4402 = vmatprep.subr.bf16.mxu0 %v13810_v49 }
 0x68a   :  { %13377 = vmatmul.mubr.bf16.gmra.mxu0 %v2892_v47 }
 0x68b   :  { %13380 = vmatprep.mubr.msk.bf16.mxu0 %vm15388_vm0, %v19740_v38 }
 0x692   :  { %13381 = vmatmul.mubr.bf16.gmra.mxu0 %v2893_v6 }
 0x693   :  { %13384 = vmatprep.mubr.msk.bf16.mxu0 %vm15388_vm0, %v19740_v38 }
 0x69a   :  { %13385 = vmatmul.mubr.bf16.gmra.mxu0 %v2894_v63  ;;  %v13808_v63 = vld [vmem:[#allocation35 + $0xa0] ss:$20 sps:$4 sm:$0xff]  }
 0x69b   :  { %4428 = vmatprep.mubr.bf16.mxu0 %v19738_v42  ;;  %4403 = vmatpush1.bf16.msra.mxu0 %v13808_v63 }
 0x712   :  { %v2732_v36 = vpop.f32.mrf.mxu0 }
 0x714   :  { %v13298_v0 = vpop.f32.mrf.mxu0 }
 0x715   :  { %v13816_v0 = vld [vmem:[#allocation35 + $0x7c] ss:$20 sps:$4 sm:$0xff]  }
 0x716   :  { %v2735_v39 = vpop.f32.mrf.mxu0  ;;  %4404 = vmatprep.subr.bf16.mxu0 %v13816_v0 }
 0x717   :  { %v2852_v43 = vpop.f32.mrf.mxu1  ;;  %4405 = vmatpush1.bf16.msra.mxu0 %v13814_v52 }
 0x718   :  { %v16344_v62 = vadd.f32 %v2852_v43, %v2732_v36  ;;  %v13299_v40 = vpop.f32.mrf.mxu0 }
 0x719   :  { %v13334_v4 = vpop.f32.mrf.mxu1 }
 0x71a   :  { %v2740_v19 = vpop.f32.mrf.mxu0  ;;  %v13822_v4 = vld [vmem:[#allocation35 + $0x54] ss:$20 sps:$4 sm:$0xff]  }
 0x71b   :  { %v2855_v1 = vpop.f32.mrf.mxu1  ;;  %4406 = vmatprep.subr.bf16.mxu0 %v13822_v4 }
 0x71c   :  { %v16346_v27 = vadd.f32 %v2855_v1, %v2735_v39  ;;  %v13302_v54 = vpop.f32.mrf.mxu0  ;;  %4407 = vmatpush1.bf16.msra.mxu0 %v13820_v8 }
 0x71d   :  { %v13335_v21 = vpop.f32.mrf.mxu1  ;;  %4408 = vmatprep.subr.bf16.mxu0 %v13828_v15 }
 0x71e   :  { %v16348_v56 = vpop.f32.mrf.mxu0 }
 0x71f   :  { %v2860_v47 = vpop.f32.mrf.mxu1 }
 0x720   :  { %v2861_v48 = vadd.f32 %v2860_v47, %v2740_v19  ;;  %v13303_v22 = vpop.f32.mrf.mxu0 }
 0x721   :  { %v13338_v6 = vpop.f32.mrf.mxu1  ;;  %v13826_v22 = vld [vmem:[#allocation35 + $0x28] ss:$20 sps:$4 sm:$0xff]  }
 0x722   :  { %v16350_v10 = vpop.f32.mrf.mxu0  ;;  %4409 = vmatpush1.bf16.msra.mxu0 %v13826_v22  ;;  %v16371_v22 = vld [vmem:[%s19987_s27] ss:$0 sm:$0xff] }
 0x723   :  { %v2863_v28 = vpop.f32.mrf.mxu1 }
 0x724   :  { %v13306_v36 = vpop.f32.mrf.mxu0 }
 0x725   :  { %v13339_v39 = vpop.f32.mrf.mxu1 }
 0x726   :  { %v16352_v43 = vpop.f32.mrf.mxu0 }
 0x727   :  { %v2868_v40 = vpop.f32.mrf.mxu1 }
 0x728   :  { %v13307_v32 = vpop.f32.mrf.mxu0 }
 0x729   :  { %v13342_v25 = vpop.f32.mrf.mxu1 }
 0x72a   :  { %v16354_v19 = vpop.f32.mrf.mxu0 }
 0x72b   :  { %v2871_v1 = vpop.f32.mrf.mxu1 }
 0x72c   :  { %v13310_v54 = vpop.f32.mrf.mxu0 }
 0x72d   :  { %v13343_v21 = vpop.f32.mrf.mxu1  ;;  %v16364_v54 = vld [vmem:[#allocation32] ss:$0 sm:$0xff] }
 0x72e   :  { %v16356_v47 = vpop.f32.mrf.mxu0 }
 0x72f   :  { %v2876_v35 = vpop.f32.mrf.mxu1 }
 0x730   :  { %v13311_v49 = vpop.f32.mrf.mxu0 }
 0x731   :  { %v13346_v6 = vpop.f32.mrf.mxu1  ;;  %v16367_v49 = vld [vmem:[#allocation34] ss:$0 sm:$0xff] }
 0x732   :  { %v16358_v63 = vpop.f32.mrf.mxu0 }
 0x733   :  { %v16360_v36 = vpop.f32.mrf.mxu1 }
 0x734   :  { %v13314_v0 = vpop.f32.mrf.mxu0  ;;  %v2880_v13 = vadd.f32 %v16360_v36, %v16356_v47 }
 0x735   :  { %v13347_v39 = vpop.f32.mrf.mxu1 }
 0x736   :  { %v2767_v52 = vpop.f32.mrf.mxu0 }
 0x737   :  { %v16362_v32 = vpop.f32.mrf.mxu1 }
 0x738   :  { %v13315_v4 = vpop.f32.mrf.mxu0 }
 0x739   :  { %v13350_v25 = vpop.f32.mrf.mxu1 }
 0x73a   :  { %v2977_v8 = vpop.f32.mrf.mxu0 }
 0x73b   :  { %v3015_v21 = vadd.f32 %v2977_v8, %v16344_v62  ;;  %v2887_v15 = vpop.f32.mrf.mxu1 }
 0x73c   :  { %v13370_v6 = vpop.f32.mrf.mxu0 }
 0x73d   :  { %v3030_v42 = vadd.f32 %v16364_v54, %v3015_v21  ;;  %v13351_v38 = vpop.f32.mrf.mxu1  ;;  %v2864_v21 = vadd.f32 %v2863_v28, %v16348_v56 }
 0x73e   :  { %v2980_v0 = vpop.f32.mrf.mxu0 }
 0x73f   :  { %v3045_v39 = vmul.f32 %v16367_v49, %v3030_v42  ;;  %v3016_v52 = vadd.f32 %v2980_v0, %v16346_v27 }
 0x740   :  { %v13371_v4 = vpop.f32.mrf.mxu0 }
 0x741   :  { %v3060_v25 = vadd.f32 %v16371_v22, %v3045_v39  ;;  %v3031_v44 = vadd.f32 %v16364_v54, %v3016_v52 }
 0x742   :  { %v2985_v62 = vpop.f32.mrf.mxu0 }
 0x743   :  { %v3046_v8 = vmul.f32 %v16367_v49, %v3031_v44  ;;  %v3017_v15 = vadd.f32 %v2985_v62, %v2861_v48  ;;  %v16383_v42 = vadd.f32 %v3060_v25, %v2164_v57  ;;  %v2869_v44 = vadd.f32 %v2868_v40, %v16350_v10 }
 0x744   :  { %v13374_v6 = vpop.f32.mrf.mxu0  ;;  %v2872_v10 = vadd.f32 %v2871_v1, %v16352_v43 }
 0x745   :  { %v3061_v38 = vadd.f32 %v16371_v22, %v3046_v8  ;;  %v3032_v31 = vadd.f32 %v16364_v54, %v3017_v15  ;;  %v3078_v51 = vmax.f32 %v16383_v42, 0.0  ;;  %v3089_v42 = vld [vmem:[%s19996_s9 + $0x10] sm:$0xff] }
 0x746   :  { %v2988_v27 = vpop.f32.mrf.mxu0 }
 0x747   :  { %v3047_v0 = vmul.f32 %v16367_v49, %v3032_v31  ;;  %v3018_v39 = vadd.f32 %v2988_v27, %v2864_v21  ;;  %v16388_v52 = vadd.f32 %v3061_v38, %v2165_v14  ;;  %v2877_v27 = vadd.f32 %v2876_v35, %v16354_v19 }
 0x748   :  { %v13375_v48 = vpop.f32.mrf.mxu0 }
 0x749   :  { %v3062_v56 = vadd.f32 %v16371_v22, %v3047_v0  ;;  %v3033_v28 = vadd.f32 %v16364_v54, %v3018_v39  ;;  %v3079_v4 = vmax.f32 %v16388_v52, 0.0  ;;  %v13799_v52 = vld [vmem:[#allocation35 + $0xf8] ss:$20 sps:$4 sm:$0xff]  }
 0x74a   :  { %v2993_v57 = vpop.f32.mrf.mxu0 }
 0x74b   :  { %v3048_v25 = vmul.f32 %v16367_v49, %v3033_v28  ;;  %v3019_v31 = vadd.f32 %v2993_v57, %v2869_v44  ;;  %v16400_v26 = vpack.c.bf16 %v3079_v4, %v3078_v51  ;;  %v3071_v8 = vadd.f32 %v3062_v56, %v2166_v37 }
 0x74c   :  { %v13378_v14 = vpop.f32.mrf.mxu0 }
 0x74d   :  { %19988 = vst [vmem:[#allocation103_spill] sm:$0xff] %v16400_v26  ;;  %v3063_v40 = vadd.f32 %v16371_v22, %v3048_v25  ;;  %v3034_v62 = vadd.f32 %v16364_v54, %v3019_v31  ;;  %v3080_v44 = vmax.f32 %v3071_v8, 0.0 }
 0x74e   :  { %v2996_v15 = vpop.f32.mrf.mxu0 }
 0x74f   :  { %v3049_v6 = vmul.f32 %v16367_v49, %v3034_v62  ;;  %v3020_v21 = vadd.f32 %v2996_v15, %v2872_v10  ;;  %v3072_v38 = vadd.f32 %v3063_v40, %v2167_v41  ;;  %v2885_v10 = vadd.f32 %v16362_v32, %v16358_v63 }
 0x750   :  { %v13379_v0 = vpop.f32.mrf.mxu0  ;;  %v19991_v63 = vmax.f32 %v16124_v2, 0.0  ;;  %v19995_v2 = vmov 0.0  }
 0x751   :  { %v3064_v39 = vadd.f32 %v16371_v22, %v3049_v6  ;;  %v3035_v43 = vadd.f32 %v16364_v54, %v3020_v21  ;;  %v3081_v1 = vmax.f32 %v3072_v38, 0.0  ;;  %v19992_v0 = vmax.f32 %v16130_v20, 0.0  ;;  %v13795_v20 = vld [vmem:[#allocation35 + $0x124] ss:$20 sps:$4 sm:$0xff]  }
 0x752   :  { %v3001_v48 = vpop.f32.mrf.mxu0 }
 0x753   :  { %v3050_v3 = vmul.f32 %v16367_v49, %v3035_v43  ;;  %v3021_v37 = vadd.f32 %v3001_v48, %v2877_v27  ;;  %v16414_v56 = vpack.c.bf16 %v3081_v1, %v3080_v44  ;;  %v3073_v35 = vadd.f32 %v3064_v39, %v2168_v59 }
 0x754   :  { %v13382_v28 = vpop.f32.mrf.mxu0 }
 0x755   :  { %19989 = vst [vmem:[#allocation104_spill] sm:$0xff] %v16414_v56  ;;  %v3065_v41 = vadd.f32 %v16371_v22, %v3050_v3  ;;  %v3036_v19 = vadd.f32 %v16364_v54, %v3021_v37  ;;  %v3082_v8 = vmax.f32 %v3073_v35, 0.0  ;;  %v13819_v35 = vld [vmem:[#allocation35 + $0x84] ss:$20 sps:$4 sm:$0xff]  }
 0x756   :  { %v3004_v57 = vpop.f32.mrf.mxu0 }
 0x757   :  { %v3051_v25 = vmul.f32 %v16367_v49, %v3036_v19  ;;  %v3022_v31 = vadd.f32 %v3004_v57, %v2880_v13  ;;  %v3074_v14 = vadd.f32 %v3065_v41, %v2169_v7  ;;  %v13811_v19 = vld [vmem:[#allocation35 + $0xa8] ss:$20 sps:$4 sm:$0xff]   ;;  %v3091_v57 = vld [vmem:[%s19996_s9 + $0x20] sm:$0xff] }
 0x758   :  { %v13383_v40 = vpop.f32.mrf.mxu0 }
 0x759   :  { %v3066_v47 = vadd.f32 %v16371_v22, %v3051_v25  ;;  %v3037_v36 = vadd.f32 %v16364_v54, %v3022_v31  ;;  %v3083_v62 = vmax.f32 %v3074_v14, 0.0  ;;  %v13817_v25 = vld [vmem:[#allocation35 + $0x80] ss:$20 sps:$4 sm:$0xff]   ;;  %v13825_v31 = vld [vmem:[#allocation35 + $0x5c] ss:$20 sps:$4 sm:$0xff]  }
 0x75a   :  { %v3009_v15 = vpop.f32.mrf.mxu0  ;;  %v3092_v14 = vld [vmem:[%s19996_s9 + $0x28] sm:$0xff]  ;;  %v13831_v40 = vld [vmem:[#allocation35 + $0x34] ss:$20 sps:$4 sm:$0xff]  }
 0x75b   :  { %v3052_v9 = vmul.f32 %v16367_v49, %v3037_v36  ;;  %v3023_v59 = vadd.f32 %v3009_v15, %v2885_v10  ;;  %v16430_v6 = vpack.c.bf16 %v3083_v62, %v3082_v8  ;;  %v3075_v32 = vadd.f32 %v3066_v47, %v19991_v63  ;;  %v13823_v10 = vld [vmem:[#allocation35 + $0x58] ss:$20 sps:$4 sm:$0xff]   ;;  %v3093_v47 = vld [vmem:[%s19996_s9 + $0x30] sm:$0xff] }
 0x75c   :  { %v13386_v21 = vpop.f32.mrf.mxu0  ;;  %v13829_v36 = vld [vmem:[#allocation35 + $0x30] ss:$20 sps:$4 sm:$0xff]   ;;  %v19997_v15 = vmov 0  }
 0x75d   :  { %19990 = vst [vmem:[#allocation105_spill] sm:$0xff] %v16430_v6  ;;  %v3067_v53 = vadd.f32 %v16371_v22, %v3052_v9  ;;  %v3038_v7 = vadd.f32 %v16364_v54, %v3023_v59  ;;  %v3084_v37 = vmax.f32 %v3075_v32, 0.0  ;;  %v13793_v54 = vld [vmem:[#allocation35 + $0x120] ss:$20 sps:$4 sm:$0xff]   ;;  %v13834_v59 = vld [vmem:[#allocation35 + $0x4] ss:$20 sps:$4 sm:$0xff]  }
 0x75e   :  { %v3012_v38 = vpop.f32.mrf.mxu0  ;;  %v13832_v9 = vld [vmem:[#allocation35] ss:$20 sps:$4 sm:$0xff]   ;;  %v13835_v21 = vld [vmem:[#allocation35 + $0x8] ss:$20 sps:$4 sm:$0xff]   ;;  %4410 = vmatprep.subr.bf16.mxu0 %v13834_v59 }
 0x75f   :  { %v3053_v27 = vmul.f32 %v16367_v49, %v3038_v7  ;;  %v3076_v39 = vadd.f32 %v3067_v53, %v19992_v0  ;;  %v13801_v49 = vld [vmem:[#allocation35 + $0xfc] ss:$20 sps:$4 sm:$0xff]   ;;  %v13837_v53 = vld [vmem:[#allocation35 + $0xc] ss:$20 sps:$4 sm:$0xff]   ;;  %4411 = vmatpush1.bf16.msra.mxu0 %v13832_v9 }
 0x760   :  { %v13387_v43 = vpop.f32.mrf.mxu0  ;;  %13433 = vmatprep.subr.bf16.mxu0 %v19995_v2  ;;  %v13851_v7 = vld [vmem:[#allocation38 + $0x11c] ss:$20 sps:$4 sm:$0xff]   ;;  %v13887_v9 = vld [vmem:[#allocation38 + $0x2c] ss:$20 sps:$4 sm:$0xff]  }
 0x761   :  { %v3068_v48 = vadd.f32 %v16371_v22, %v3053_v27  ;;  %v3085_v3 = vmax.f32 %v3076_v39, 0.0  ;;  %v3088_v22 = vld [vmem:[%s19996_s9 + $0x8] sm:$0xff]  ;;  %v13849_v39 = vld [vmem:[#allocation38 + $0x118] ss:$20 sps:$4 sm:$0xff]  }
 0x762   :  { %v13838_v0 = vld [vmem:[#allocation35 + $0x128] ss:$20 sps:$4 sm:$0xff]  }
 0x763   :  { %v3077_v28 = vadd.f32 %v3068_v48, %v16142_v18  ;;  %v16441_v13 = vpack.c.bf16 %v3085_v3, %v3084_v37  ;;  %v3087_v18 = vld [vmem:[%s19996_s9] sm:$0xff] }
 0x764   :  { %v13857_v48 = vld [vmem:[#allocation38 + $0xf4] ss:$20 sps:$4 sm:$0xff]  }
 0x765   :  { %19993 = vst [vmem:[#allocation106_spill] sm:$0xff] %v16441_v13  ;;  %v16443_v41 = vmax.f32 %v3077_v28, 0.0  ;;  %v13855_v28 = vld [vmem:[#allocation38 + $0xf0] ss:$20 sps:$4 sm:$0xff]  }
 0x767   :  { %19994 = vst [vmem:[#allocation107_spill] sm:$0xff] %v16443_v41  ;;  %13389 = vmatpush3.msra.mxu1 %v16443_v41 }
 0x768   :  { %13390 = vmatprep.subr.mxu1 %v19995_v2 }
 0x769   :  { %13391 = vmatpush3.msra.mxu1 %v3085_v3 }
 0x76a   :  { %13392 = vmatprep.subr.mxu1 %v19995_v2 }
 0x76b   :  { %13393 = vmatpush3.msra.mxu1 %v3084_v37  ;;  %v13839_v37 = vld [vmem:[#allocation35 + $0x100] ss:$20 sps:$4 sm:$0xff]  }
 0x76c   :  { %13394 = vmatprep.subr.mxu1 %v19995_v2 }
 0x76d   :  { %13395 = vmatpush3.msra.mxu1 %v3083_v62  ;;  %v3094_v62 = vld [vmem:[%s19996_s9 + $0x38] sm:$0xff] }
 0x76e   :  { %13396 = vmatprep.subr.mxu1 %v19995_v2 }
 0x76f   :  { %13397 = vmatpush3.msra.mxu1 %v3082_v8  ;;  %v3095_v8 = vld [vmem:[%s19996_s9 + $0x40] sm:$0xff] }
 0x770   :  { %13398 = vmatprep.subr.mxu1 %v19995_v2 }
 0x771   :  { %13399 = vmatpush3.msra.mxu1 %v3081_v1  ;;  %v13813_v1 = vld [vmem:[#allocation35 + $0xac] ss:$20 sps:$4 sm:$0xff]  }
 0x772   :  { %13400 = vmatprep.subr.mxu1 %v19995_v2 }
 0x773   :  { %13401 = vmatpush3.msra.mxu1 %v3080_v44  ;;  %v3090_v44 = vld [vmem:[%s19996_s9 + $0x18] sm:$0xff] }
 0x774   :  { %13402 = vmatprep.subr.mxu1 %v19995_v2 }
 0x775   :  { %13403 = vmatpush3.msra.mxu1 %v3079_v4  ;;  %v13807_v4 = vld [vmem:[#allocation35 + $0xd4] ss:$20 sps:$4 sm:$0xff]  }
 0x776   :  { %13404 = vmatprep.subr.mxu1 %v19995_v2 }
 0x777   :  { %13405 = vmatpush3.msra.mxu1 %v3078_v51  ;;  %v13805_v51 = vld [vmem:[#allocation35 + $0xd0] ss:$20 sps:$4 sm:$0xff]  }
 0x778   :  { %13407 = vmatmul.mubr.msk.f32.vlgmr.msra.gmra.mxu1 %vm1385_vm1, %v3087_v18  ;;  %4477 = vmatprep.subr.bf16.mxu1 %v13795_v20  ;;  %v13863_v18 = vld [vmem:[#allocation38 + $0xcc] ss:$20 sps:$4 sm:$0xff]  }
 0x779   :  { %13409 = vmatprep.mubr.msk.f32.mxu1 %vm15388_vm0, %v19995_v2  ;;  %4478 = vmatpush1.bf16.msra.mxu1 %v13793_v54 }
 0x77a   :  { %4479 = vmatprep.subr.bf16.mxu1 %v13801_v49 }
 0x77c   :  { %13410 = vmatmul.mubr.msk.f32.gmra.mxu1 %vm1385_vm1, %v3088_v22  ;;  %v13840_v22 = vld [vmem:[#allocation35 + $0xd8] ss:$20 sps:$4 sm:$0xff]  }
 0x77d   :  { %13412 = vmatprep.mubr.msk.f32.mxu1 %vm15388_vm0, %v19995_v2  ;;  %4480 = vmatpush1.bf16.msra.mxu1 %v13799_v52  ;;  %v13861_v52 = vld [vmem:[#allocation38 + $0xc8] ss:$20 sps:$4 sm:$0xff]  }
 0x77e   :  { %4481 = vmatprep.subr.bf16.mxu1 %v13807_v4 }
 0x780   :  { %13413 = vmatmul.mubr.msk.f32.gmra.mxu1 %vm1385_vm1, %v3089_v42  ;;  %v13869_v42 = vld [vmem:[#allocation38 + $0xa4] ss:$20 sps:$4 sm:$0xff]  }
 0x781   :  { %13415 = vmatprep.mubr.msk.f32.mxu1 %vm15388_vm0, %v19995_v2  ;;  %4482 = vmatpush1.bf16.msra.mxu1 %v13805_v51 }
 0x782   :  { %4483 = vmatprep.subr.bf16.mxu1 %v13813_v1  ;;  %v13841_v1 = vld [vmem:[#allocation35 + $0xb0] ss:$20 sps:$4 sm:$0xff]  }
 0x784   :  { %13416 = vmatmul.mubr.msk.f32.gmra.mxu1 %vm1385_vm1, %v3090_v44  ;;  %v13867_v44 = vld [vmem:[#allocation38 + $0xa0] ss:$20 sps:$4 sm:$0xff]  }
 0x785   :  { %13418 = vmatprep.mubr.msk.f32.mxu1 %vm15388_vm0, %v19995_v2  ;;  %4484 = vmatpush1.bf16.msra.mxu1 %v13811_v19 }
 0x786   :  { %4485 = vmatprep.subr.bf16.mxu1 %v13819_v35  ;;  %v13875_v35 = vld [vmem:[#allocation38 + $0x7c] ss:$20 sps:$4 sm:$0xff]  }
 0x788   :  { %13419 = vmatmul.mubr.msk.f32.gmra.mxu1 %vm1385_vm1, %v3091_v57 }
 0x789   :  { %13421 = vmatprep.mubr.msk.f32.mxu1 %vm15388_vm0, %v19995_v2  ;;  %4486 = vmatpush1.bf16.msra.mxu1 %v13817_v25 }
 0x78a   :  { %4487 = vmatprep.subr.bf16.mxu1 %v13825_v31  ;;  %v13842_v31 = vld [vmem:[#allocation35 + $0x88] ss:$20 sps:$4 sm:$0xff]  }
 0x78c   :  { %13422 = vmatmul.mubr.msk.f32.gmra.mxu1 %vm1385_vm1, %v3092_v14  ;;  %v13873_v14 = vld [vmem:[#allocation38 + $0x78] ss:$20 sps:$4 sm:$0xff]  }
 0x78d   :  { %13424 = vmatprep.mubr.msk.f32.mxu1 %vm15388_vm0, %v19995_v2  ;;  %4488 = vmatpush1.bf16.msra.mxu1 %v13823_v10 }
 0x78e   :  { %4489 = vmatprep.subr.bf16.mxu1 %v13831_v40  ;;  %v13881_v40 = vld [vmem:[#allocation38 + $0x54] ss:$20 sps:$4 sm:$0xff]  }
 0x790   :  { %13425 = vmatmul.mubr.msk.f32.gmra.mxu1 %vm1385_vm1, %v3093_v47 }
 0x791   :  { %13427 = vmatprep.mubr.msk.f32.mxu1 %vm15388_vm0, %v19995_v2  ;;  %4490 = vmatpush1.bf16.msra.mxu1 %v13829_v36  ;;  %v13843_v36 = vld [vmem:[#allocation35 + $0x60] ss:$20 sps:$4 sm:$0xff]  }
 0x792   :  { %4491 = vmatprep.subr.bf16.mxu1 %v13837_v53  ;;  %v13844_v53 = vld [vmem:[#allocation35 + $0x38] ss:$20 sps:$4 sm:$0xff]  }
 0x794   :  { %13428 = vmatmul.mubr.msk.f32.gmra.mxu1 %vm1385_vm1, %v3094_v62  ;;  %v13879_v62 = vld [vmem:[#allocation38 + $0x50] ss:$20 sps:$4 sm:$0xff]  }
 0x795   :  { %13430 = vmatprep.mubr.msk.f32.mxu1 %vm15388_vm0, %v19995_v2  ;;  %4492 = vmatpush1.bf16.msra.mxu1 %v13835_v21 }
 0x796   :  { %6312 = vmatprep.subr.bf16.mxu1 %v13851_v7  ;;  %v13885_v7 = vld [vmem:[#allocation38 + $0x28] ss:$20 sps:$4 sm:$0xff]  }
 0x798   :  { %13431 = vmatmul.mubr.msk.f32.gmra.mxu1 %vm1385_vm1, %v3095_v8 }
 0x799   :  { %4509 = vmatprep.mubr.bf16.mxu1 %v19997_v15 }
 0x838   :  { %v4023_v63 = vpop.f32.mrf.mxu1 }
 0x83a   :  { %v13408_v32 = vpop.f32.mrf.mxu1 }
 0x83b   :  { %v13893_v32 = vld [vmem:[#allocation38 + $0x4] ss:$20 sps:$4 sm:$0xff]  }
 0x83c   :  { %v4028_v38 = vpop.f32.mrf.mxu1 }
 0x83d   :  { %v16494_v27 = vpack.c.bf16 %v4028_v38, %v4023_v63 }
 0x83e   :  { %v13411_v43 = vpop.f32.mrf.mxu1 }
 0x83f   :  { %4429 = vmatmul.mubr.bf16.vlgmr.msra.gmra.mxu0 %v16494_v27  ;;  %4510 = vmatmul.mubr.bf16.vlgmr.msra.gmra.mxu1 %v16494_v27 }
 0x840   :  { %v4033_v3 = vpop.f32.mrf.mxu1  ;;  %4438 = vmatprep.mubr.bf16.mxu0 %v19997_v15  ;;  %4519 = vmatprep.mubr.bf16.mxu1 %v19997_v15 }
 0x841   :  { %13434 = vmatpush3.bf16.msra.mxu0 %v13838_v0  ;;  %6313 = vmatpush1.bf16.msra.mxu1 %v13849_v39  ;;  %v13845_v0 = vld [vmem:[#allocation35 + $0x10] ss:$20 sps:$4 sm:$0xff]   ;;  %v13891_v39 = vld [vmem:[#allocation38] ss:$20 sps:$4 sm:$0xff]  }
 0x842   :  { %v13414_v20 = vpop.f32.mrf.mxu1  ;;  %13435 = vmatprep.subr.bf16.mxu0 %v19995_v2  ;;  %6314 = vmatprep.subr.bf16.mxu1 %v13857_v48  ;;  %v13848_v48 = vld [vmem:[#allocation38 + $0x39c] ss:$20 sps:$4 sm:$0xff]  }
 0x843   :  { %v13905_v20 = vld [vmem:[#allocation38 + $0x234] ss:$20 sps:$4 sm:$0xff]  }
 0x844   :  { %v4038_v54 = vpop.f32.mrf.mxu1 }
 0x845   :  { %v16501_v49 = vpack.c.bf16 %v4038_v54, %v4033_v3  ;;  %13436 = vmatpush3.bf16.msra.mxu0 %v13839_v37  ;;  %6315 = vmatpush1.bf16.msra.mxu1 %v13855_v28  ;;  %v13899_v3 = vld [vmem:[#allocation38 + $0x25c] ss:$20 sps:$4 sm:$0xff]   ;;  %v13897_v28 = vld [vmem:[#allocation38 + $0x258] ss:$20 sps:$4 sm:$0xff]  }
 0x846   :  { %v13417_v4 = vpop.f32.mrf.mxu1  ;;  %13437 = vmatprep.subr.bf16.mxu0 %v19995_v2  ;;  %6316 = vmatprep.subr.bf16.mxu1 %v13863_v18  ;;  %v13903_v18 = vld [vmem:[#allocation38 + $0x230] ss:$20 sps:$4 sm:$0xff]   ;;  %v13911_v54 = vld [vmem:[#allocation38 + $0x20c] ss:$20 sps:$4 sm:$0xff]  }
 0x847   :  { %4439 = vmatmul.mubr.bf16.gmra.mxu0 %v16501_v49  ;;  %4520 = vmatmul.mubr.bf16.gmra.mxu1 %v16501_v49  ;;  %v13909_v4 = vld [vmem:[#allocation38 + $0x208] ss:$20 sps:$4 sm:$0xff]  }
 0x848   :  { %v4043_v51 = vpop.f32.mrf.mxu1  ;;  %4448 = vmatprep.mubr.bf16.mxu0 %v19997_v15  ;;  %4529 = vmatprep.mubr.bf16.mxu1 %v19997_v15 }
 0x849   :  { %13438 = vmatpush3.bf16.msra.mxu0 %v13840_v22  ;;  %6317 = vmatpush1.bf16.msra.mxu1 %v13861_v52  ;;  %v13846_v22 = vld [vmem:[#allocation38 + $0x398] ss:$20 sps:$4 sm:$0xff]   ;;  %v13854_v52 = vld [vmem:[#allocation38 + $0x374] ss:$20 sps:$4 sm:$0xff]  }
 0x84a   :  { %v13420_v19 = vpop.f32.mrf.mxu1  ;;  %13439 = vmatprep.subr.bf16.mxu0 %v19995_v2  ;;  %6318 = vmatprep.subr.bf16.mxu1 %v13869_v42  ;;  %v13917_v42 = vld [vmem:[#allocation38 + $0x1e4] ss:$20 sps:$4 sm:$0xff]  }
 0x84b   :  { %v13858_v19 = vld [vmem:[#allocation38 + $0x348] ss:$20 sps:$4 sm:$0xff]  }
 0x84c   :  { %v4048_v57 = vpop.f32.mrf.mxu1 }
 0x84d   :  { %v16509_v25 = vpack.c.bf16 %v4048_v57, %v4043_v51  ;;  %13440 = vmatpush3.bf16.msra.mxu0 %v13841_v1  ;;  %6319 = vmatpush1.bf16.msra.mxu1 %v13867_v44  ;;  %v13852_v51 = vld [vmem:[#allocation38 + $0x370] ss:$20 sps:$4 sm:$0xff]   ;;  %v13860_v1 = vld [vmem:[#allocation38 + $0x34c] ss:$20 sps:$4 sm:$0xff]  }
 0x84e   :  { %v13423_v10 = vpop.f32.mrf.mxu1  ;;  %13441 = vmatprep.subr.bf16.mxu0 %v19995_v2  ;;  %6320 = vmatprep.subr.bf16.mxu1 %v13875_v35  ;;  %v13915_v44 = vld [vmem:[#allocation38 + $0x1e0] ss:$20 sps:$4 sm:$0xff]   ;;  %v13866_v35 = vld [vmem:[#allocation38 + $0x324] ss:$20 sps:$4 sm:$0xff]   ;;  %v13872_v57 = vld [vmem:[#allocation38 + $0x2fc] ss:$20 sps:$4 sm:$0xff]  }
 0x84f   :  { %4449 = vmatmul.mubr.bf16.gmra.mxu0 %v16509_v25  ;;  %4530 = vmatmul.mubr.bf16.gmra.mxu1 %v16509_v25  ;;  %v13876_v10 = vld [vmem:[#allocation38 + $0x2d0] ss:$20 sps:$4 sm:$0xff]  }
 0x850   :  { %v4053_v47 = vpop.f32.mrf.mxu1  ;;  %4458 = vmatprep.mubr.bf16.mxu0 %v19997_v15  ;;  %4539 = vmatprep.mubr.bf16.mxu1 %v19997_v15 }
 0x851   :  { %13442 = vmatpush3.bf16.msra.mxu0 %v13842_v31  ;;  %6321 = vmatpush1.bf16.msra.mxu1 %v13873_v14  ;;  %v13870_v31 = vld [vmem:[#allocation38 + $0x2f8] ss:$20 sps:$4 sm:$0xff]   ;;  %v13878_v14 = vld [vmem:[#allocation38 + $0x2d4] ss:$20 sps:$4 sm:$0xff]  }
 0x852   :  { %v13426_v8 = vpop.f32.mrf.mxu1  ;;  %13443 = vmatprep.subr.bf16.mxu0 %v19995_v2  ;;  %6322 = vmatprep.subr.bf16.mxu1 %v13881_v40  ;;  %v13882_v40 = vld [vmem:[#allocation38 + $0x2a8] ss:$20 sps:$4 sm:$0xff]  }
 0x853   :  { %v13921_v8 = vld [vmem:[#allocation38 + $0x1b8] ss:$20 sps:$4 sm:$0xff]  }
 0x854   :  { %v4058_v59 = vpop.f32.mrf.mxu1 }
 0x855   :  { %v16517_v21 = vpack.c.bf16 %v4058_v59, %v4053_v47  ;;  %13444 = vmatpush3.bf16.msra.mxu0 %v13843_v36  ;;  %6323 = vmatpush1.bf16.msra.mxu1 %v13879_v62  ;;  %v13890_v47 = vld [vmem:[#allocation38 + $0x284] ss:$20 sps:$4 sm:$0xff]   ;;  %v13888_v36 = vld [vmem:[#allocation38 + $0x280] ss:$20 sps:$4 sm:$0xff]   ;;  %v13923_v62 = vld [vmem:[#allocation38 + $0x1bc] ss:$20 sps:$4 sm:$0xff]  }
 0x856   :  { %v13429_v63 = vpop.f32.mrf.mxu1  ;;  %13445 = vmatprep.subr.bf16.mxu0 %v19995_v2  ;;  %6324 = vmatprep.subr.bf16.mxu1 %v13887_v9  ;;  %v13894_v9 = vld [vmem:[#allocation38 + $0x4d8] ss:$20 sps:$4 sm:$0xff]   ;;  %v13902_v59 = vld [vmem:[#allocation38 + $0x4b4] ss:$20 sps:$4 sm:$0xff]  }
 0x857   :  { %4459 = vmatmul.mubr.bf16.gmra.mxu0 %v16517_v21  ;;  %4540 = vmatmul.mubr.bf16.gmra.mxu1 %v16517_v21  ;;  %v13927_v63 = vld [vmem:[#allocation38 + $0x190] ss:$20 sps:$4 sm:$0xff]  }
 0x858   :  { %v4063_v38 = vpop.f32.mrf.mxu1  ;;  %4468 = vmatprep.mubr.bf16.mxu0 %v19997_v15  ;;  %4549 = vmatprep.mubr.bf16.mxu1 %v19997_v15 }
 0x859   :  { %13446 = vmatpush3.bf16.msra.mxu0 %v13844_v53  ;;  %6325 = vmatpush1.bf16.msra.mxu1 %v13885_v7  ;;  %v16525_v37 = vpack.c.bf16 %v4063_v38, %v4063_v38  ;;  %v13900_v53 = vld [vmem:[#allocation38 + $0x4b0] ss:$20 sps:$4 sm:$0xff]   ;;  %v13908_v7 = vld [vmem:[#allocation38 + $0x48c] ss:$20 sps:$4 sm:$0xff]  }
 0x85a   :  { %13447 = vmatprep.subr.bf16.mxu0 %v19995_v2  ;;  %v13432_v43 = vpop.f32.mrf.mxu1  ;;  %6326 = vmatprep.subr.bf16.mxu1 %v13893_v32  ;;  %v13906_v32 = vld [vmem:[#allocation38 + $0x488] ss:$20 sps:$4 sm:$0xff]   ;;  %v13914_v38 = vld [vmem:[#allocation38 + $0x464] ss:$20 sps:$4 sm:$0xff]  }
 0x85b   :  { %v13935_v43 = vld [vmem:[#allocation38 + $0x16c] ss:$20 sps:$4 sm:$0xff]  }
 0x85d   :  { %13448 = vmatpush3.bf16.msra.mxu0 %v13845_v0  ;;  %6327 = vmatpush1.bf16.msra.mxu1 %v13891_v39  ;;  %v13912_v0 = vld [vmem:[#allocation38 + $0x460] ss:$20 sps:$4 sm:$0xff]   ;;  %v13920_v39 = vld [vmem:[#allocation38 + $0x43c] ss:$20 sps:$4 sm:$0xff]  }
 0x85e   :  { %6393 = vmatprep.subr.bf16.mxu0 %v13848_v48  ;;  %6328 = vmatprep.subr.bf16.mxu1 %v13899_v3  ;;  %v13933_v48 = vld [vmem:[#allocation38 + $0x168] ss:$20 sps:$4 sm:$0xff]   ;;  %v13918_v3 = vld [vmem:[#allocation38 + $0x438] ss:$20 sps:$4 sm:$0xff]  }
 0x85f   :  { %4469 = vmatmul.mubr.bf16.gmra.mxu0 %v16525_v37  ;;  %4550 = vmatmul.mubr.bf16.gmra.mxu1 %v16525_v37 }
 0x860   :  { %13449 = vmatprep.mubr.msk.bf16.mxu0 %vm15388_vm0, %v19995_v2 }
 0x861   :  { %6329 = vmatpush2.bf16.msra.mxu1 %v13897_v28  ;;  %v13941_v28 = vld [vmem:[#allocation38 + $0x144] ss:$20 sps:$4 sm:$0xff]  }
 0x862   :  { %6330 = vmatprep.subr.bf16.mxu1 %v13905_v20  ;;  %v13939_v20 = vld [vmem:[#allocation38 + $0x140] ss:$20 sps:$4 sm:$0xff]  }
 0x865   :  { %6331 = vmatpush2.bf16.msra.mxu1 %v13903_v18  ;;  %v13924_v18 = vld [vmem:[#allocation38 + $0x410] ss:$20 sps:$4 sm:$0xff]  }
 0x866   :  { %6332 = vmatprep.subr.bf16.mxu1 %v13911_v54  ;;  %v13932_v54 = vld [vmem:[#allocation38 + $0x3ec] ss:$20 sps:$4 sm:$0xff]  }
 0x867   :  { %13450 = vmatmul.mubr.bf16.vlgmr.msra.gmra.mxu0 %v16494_v27  ;;  %v13864_v27 = vld [vmem:[#allocation38 + $0x320] ss:$20 sps:$4 sm:$0xff]  }
 0x868   :  { %13453 = vmatprep.mubr.msk.bf16.mxu0 %vm15388_vm0, %v19995_v2  ;;  %6394 = vmatpush1.bf16.msra.mxu0 %v13846_v22  ;;  %v13930_v22 = vld [vmem:[#allocation38 + $0x3e8] ss:$20 sps:$4 sm:$0xff]  }
 0x869   :  { %6395 = vmatprep.subr.bf16.mxu0 %v13854_v52  ;;  %6333 = vmatpush2.bf16.msra.mxu1 %v13909_v4  ;;  %v13938_v52 = vld [vmem:[#allocation38 + $0x3c4] ss:$20 sps:$4 sm:$0xff]   ;;  %v13936_v4 = vld [vmem:[#allocation38 + $0x3c0] ss:$20 sps:$4 sm:$0xff]  }
 0x86a   :  { %6334 = vmatprep.subr.bf16.mxu1 %v13917_v42  ;;  %v13944_v42 = vld [vmem:[#allocation38 + $0x124] ss:$20 sps:$4 sm:$0xff]  }
 0x86c   :  { %6396 = vmatpush1.bf16.msra.mxu0 %v13852_v51  ;;  %v13950_v51 = vld [vmem:[#allocation38 + $0x61c] ss:$20 sps:$4 sm:$0xff]  }
 0x86d   :  { %6397 = vmatprep.subr.bf16.mxu0 %v13860_v1  ;;  %6335 = vmatpush2.bf16.msra.mxu1 %v13915_v44  ;;  %v4118_v1 = vlaneseq  ;;  %v16544_v44 = vpop.permute.xlu0 %4074 }
 0x86e   :  { %6336 = vmatprep.subr.bf16.mxu1 %v13923_v62 }
 0x86f   :  { %13454 = vmatmul.mubr.bf16.gmra.mxu0 %v16501_v49  ;;  %v13884_v49 = vld [vmem:[#allocation38 + $0x2ac] ss:$20 sps:$4 sm:$0xff]  }
 0x870   :  { %13457 = vmatprep.mubr.msk.bf16.mxu0 %vm15388_vm0, %v19995_v2  ;;  %6398 = vmatpush1.bf16.msra.mxu0 %v13858_v19  ;;  %v16546_v19 = vshrl.u32 %v4118_v1, 7 }
 0x871   :  { %6399 = vmatprep.subr.bf16.mxu0 %v13866_v35  ;;  %6337 = vmatpush2.bf16.msra.mxu1 %v13921_v8  ;;  %v16548_v35 = vpop.permute.xlu0 %4084 }
 0x874   :  { %6400 = vmatpush1.bf16.msra.mxu0 %v13864_v27  ;;  %v16550_v27 = vpop.permute.xlu1 %4079 }
 0x875   :  { %6401 = vmatprep.subr.bf16.mxu0 %v13872_v57  ;;  %v16553_v57 = vsub.s32 0, %v16546_v19 }
 0x877   :  { %13458 = vmatmul.mubr.bf16.gmra.mxu0 %v16509_v25  ;;  %v13896_v25 = vld [vmem:[#allocation38 + $0x4dc] ss:$20 sps:$4 sm:$0xff]   ;;  %20001 = vst [vmem:[#allocation108_spill] sm:$0xff] %v16553_v57 }
 0x878   :  { %13461 = vmatprep.mubr.msk.bf16.mxu0 %vm15388_vm0, %v19995_v2  ;;  %6402 = vmatpush1.bf16.msra.mxu0 %v13870_v31  ;;  %v16556_v31 = vsub.s32 2, %v16546_v19 }
 0x879   :  { %6403 = vmatprep.subr.bf16.mxu0 %v13878_v14  ;;  %v16559_v14 = vld [vmem:[%s19998_s23] sm:$0x1f] }
 0x87a   :  { %20002 = vst [vmem:[#allocation109_spill] sm:$0xff] %v16556_v31 }
 0x87c   :  { %6404 = vmatpush1.bf16.msra.mxu0 %v13876_v10  ;;  %v16562_v10 = vsub.s32 1, %v16546_v19 }
 0x87d   :  { %6405 = vmatprep.subr.bf16.mxu0 %v13884_v49  ;;  %v16565_v49 = vsub.s32 3, %v16546_v19 }
 0x87e   :  { %20003 = vst [vmem:[#allocation110_spill] sm:$0xff] %v16562_v10  ;;  %v16581_v62 = vrot.slane %v16559_v14, %v16562_v10 }
 0x87f   :  { %13462 = vmatmul.mubr.bf16.gmra.mxu0 %v16517_v21  ;;  %v13929_v21 = vld [vmem:[#allocation38 + $0x194] ss:$20 sps:$4 sm:$0xff]   ;;  %20004 = vst [vmem:[#allocation111_spill] sm:$0xff] %v16565_v49  ;;  %v16585_v8 = vrot.slane %v16559_v14, %v16565_v49 }
 0x880   :  { %13465 = vmatprep.mubr.msk.bf16.mxu0 %vm15388_vm0, %v19995_v2  ;;  %6406 = vmatpush1.bf16.msra.mxu0 %v13882_v40  ;;  %v16569_v40 = vrot.slane %v16559_v14, %v16553_v57 }
 0x881   :  { %6407 = vmatprep.subr.bf16.mxu0 %v13890_v47  ;;  %6338 = vmatprep.subr.bf16.mxu1 %v13929_v21  ;;  %v16573_v47 = vrot.slane %v16559_v14, %v16556_v31 }
 0x882   :  { %6339 = vmatpush2.bf16.msra.mxu1 %v13927_v63 }
 0x883   :  { %6340 = vmatprep.subr.bf16.mxu1 %v13935_v43  ;;  %v4145_v21 = vmul.f32 %v16573_v47, %v16544_v44  ;;  %v4148_v43 = vmul.f32 %v16569_v40, %v16550_v27  ;;  %v16641_v1 = vmul.f32 %v16573_v47, %v16548_v35 }
 0x884   :  { %6408 = vmatpush1.bf16.msra.mxu0 %v13888_v36  ;;  %v16575_v36 = vpop.permute.xlu0 %4094 }
 0x885   :  { %6409 = vmatprep.subr.bf16.mxu0 %v13896_v25  ;;  %v16577_v25 = vpop.permute.xlu1 %4089  ;;  %v16681_v11 = vmul.f32 %v16581_v62, %v16575_v36  ;;  %v16685_v2 = vmul.f32 %v16585_v8, %v16575_v36 }
 0x886   :  { %6341 = vmatpush2.bf16.msra.mxu1 %v13933_v48  ;;  %v4150_v48 = vmul.f32 %v16573_v47, %v16550_v27  ;;  %v16663_v6 = vmul.f32 %v16573_v47, %v16577_v25  ;;  %v16667_v56 = vmul.f32 %v16581_v62, %v16577_v25 }
 0x887   :  { %13466 = vmatmul.mubr.bf16.gmra.mxu0 %v16525_v37  ;;  %v13926_v37 = vld [vmem:[#allocation38 + $0x414] ss:$20 sps:$4 sm:$0xff]   ;;  %6342 = vmatprep.subr.bf16.mxu1 %v13941_v28  ;;  %20008 = vst [vmem:[#allocation115_spill] sm:$0xff] %v16681_v11  ;;  %20009 = vst [vmem:[#allocation116_spill] sm:$0xff] %v16685_v2 }
 0x888   :  { %6410 = vmatpush2.bf16.msra.mxu0 %v13894_v9  ;;  %v16588_v9 = vld [vmem:[%s19999_s30] sm:$0x1f]  ;;  %v16625_v28 = vpop.permute.xlu0 %4104 }
 0x889   :  { %6411 = vmatprep.subr.bf16.mxu0 %v13902_v59  ;;  %20005 = vst [vmem:[#allocation112_spill] sm:$0xff] %v16588_v9  ;;  %v16591_v59 = vld [vmem:[%s20000_s24] sm:$0x1f]  ;;  %v16603_v63 = vrot.slane %v16588_v9, %v16556_v31  ;;  %v16689_v60 = vmul.f32 %v16569_v40, %v16625_v28 }
 0x88a   :  { %6343 = vmatpush2.bf16.msra.mxu1 %v13939_v20  ;;  %v16627_v20 = vpop.permute.xlu1 %4099 }
 0x88b   :  { %6474 = vmatprep.subr.bf16.mxu1 %v13950_v51  ;;  %v4151_v51 = vmul.f32 %v16585_v8, %v16550_v27  ;;  %20010 = vst [vmem:[#allocation117_spill] sm:$0xff] %v16689_v60  ;;  %v16723_v46 = vmul.f32 %v16581_v62, %v16627_v20 }
 0x88c   :  { %6412 = vmatpush2.bf16.msra.mxu0 %v13900_v53  ;;  %v4143_v53 = vmul.f32 %v16569_v40, %v16544_v44 }
 0x88d   :  { %6413 = vmatprep.subr.bf16.mxu0 %v13908_v7  ;;  %v16599_v7 = vrot.slane %v16588_v9, %v16553_v57  ;;  %20018 = vst [vmem:[#allocation125_spill] sm:$0xff] %v16723_v46  ;;  %v16763_v46 = vrot.slane %v16588_v9, %v16562_v10 }
 0x88e   :  { %v16697_v45 = vpop.permute.xlu1 %4109 }
 0x890   :  { %6414 = vmatpush2.bf16.msra.mxu0 %v13906_v32  ;;  %v16607_v32 = vmul.f32 %v16581_v62, %v16544_v44 }
 0x891   :  { %6415 = vmatprep.subr.bf16.mxu0 %v13914_v38  ;;  %v16611_v38 = vmul.f32 %v16585_v8, %v16544_v44 }
 0x894   :  { %6416 = vmatpush2.bf16.msra.mxu0 %v13912_v0 }
 0x895   :  { %6417 = vmatprep.subr.bf16.mxu0 %v13920_v39 }
 0x898   :  { %6418 = vmatpush2.bf16.msra.mxu0 %v13918_v3  ;;  %v16619_v3 = vmul.f32 %v16581_v62, %v16550_v27 }
 0x899   :  { %6419 = vmatprep.subr.bf16.mxu0 %v13926_v37  ;;  %v16623_v37 = vmul.f32 %v16569_v40, %v16548_v35 }
 0x89c   :  { %6420 = vmatpush2.bf16.msra.mxu0 %v13924_v18 }
 0x89d   :  { %6421 = vmatprep.subr.bf16.mxu0 %v13932_v54  ;;  %v16631_v54 = vrot.slane %v16591_v59, %v16553_v57  ;;  %v16659_v57 = vmul.f32 %v16569_v40, %v16575_v36 }
 0x89f   :  { %20006 = vst [vmem:[#allocation113_spill] sm:$0xff] %v16659_v57 }
 0x8a0   :  { %6422 = vmatpush2.bf16.msra.mxu0 %v13930_v22 }
 0x8a1   :  { %6423 = vmatprep.subr.bf16.mxu0 %v13938_v52  ;;  %v16635_v52 = vrot.slane %v16591_v59, %v16556_v31  ;;  %v16655_v31 = vmul.f32 %v16569_v40, %v16577_v25 }
 0x8a4   :  { %6424 = vmatpush2.bf16.msra.mxu0 %v13936_v4 }
 0x8a5   :  { %6555 = vmatprep.subr.bf16.mxu0 %v13944_v42 }
 0x8ff   :  { %v4430_v0 = vpop.f32.mrf.mxu0  ;;  %v4511_v39 = vpop.f32.mrf.mxu1 }
 0x900   :  { %v4431_v18 = vadd.f32 %v4430_v0, %v4143_v53  ;;  %v4512_v22 = vadd.f32 %v4511_v39, %v4145_v21  ;;  %v16645_v53 = vmul.f32 %v16581_v62, %v16548_v35  ;;  %v16649_v21 = vmul.f32 %v16585_v8, %v16548_v35 }
 0x901   :  { %v4432_v4 = vpop.f32.mrf.mxu0  ;;  %v4513_v42 = vpop.f32.mrf.mxu1 }
 0x902   :  { %v4656_v0 = vmul.f32 %v16599_v7, %v4431_v18  ;;  %v4658_v39 = vmul.f32 %v16603_v63, %v4512_v22  ;;  %v16671_v18 = vmul.f32 %v16585_v8, %v16577_v25  ;;  %v16675_v22 = vmul.f32 %v16573_v47, %v16575_v36 }
 0x903   :  { %v4434_v41 = vpop.f32.mrf.mxu0  ;;  %v4515_v13 = vpop.f32.mrf.mxu1 }
 0x904   :  { %20007 = vst [vmem:[#allocation114_spill] sm:$0xff] %v16675_v22  ;;  %v4727_v26 = vadd.f32 %v16631_v54, %v4656_v0  ;;  %v4729_v55 = vadd.f32 %v16635_v52, %v4658_v39  ;;  %v4435_v34 = vadd.f32 %v4434_v41, %v4148_v43  ;;  %v4516_v58 = vadd.f32 %v4515_v13, %v4150_v48  ;;  %v16695_v39 = vpop.permute.xlu0 %4114 }
 0x905   :  { %v4436_v33 = vpop.f32.mrf.mxu0  ;;  %v4517_v23 = vpop.f32.mrf.mxu1  ;;  %v16693_v0 = vmul.f32 %v16573_v47, %v16625_v28  ;;  %v16705_v13 = vmul.f32 %v16569_v40, %v16627_v20  ;;  %v16709_v41 = vmul.f32 %v16581_v62, %v16625_v28  ;;  %v16741_v60 = vmul.f32 %v16569_v40, %v16695_v39 }
 0x906   :  { %v16699_v17 = vmax.f32 %v4727_v26, 0.0  ;;  %v16701_v12 = vmax.f32 %v4729_v55, 0.0  ;;  %v4661_v43 = vmul.f32 %v16599_v7, %v4435_v34  ;;  %v4663_v48 = vmul.f32 %v16603_v63, %v4516_v58 }
 0x907   :  { %20011 = vst [vmem:[#allocation118_spill] sm:$0xff] %v16693_v0  ;;  %20014 = vst [vmem:[#allocation121_spill] sm:$0xff] %v16705_v13  ;;  %v4440_v30 = vpop.f32.mrf.mxu0  ;;  %v4521_v61 = vpop.f32.mrf.mxu1  ;;  %v16715_v26 = vmul.f32 %v16573_v47, %v16627_v20  ;;  %v16718_v55 = vsub.s32 4, %v16546_v19  ;;  %v16727_v34 = vmul.f32 %v16585_v8, %v16627_v20  ;;  %v16731_v58 = vmul.f32 %v16585_v8, %v16625_v28 }
 0x908   :  { %20012 = vst [vmem:[#allocation119_spill] sm:$0xff] %v16699_v17  ;;  %20013 = vst [vmem:[#allocation120_spill] sm:$0xff] %v16701_v12  ;;  %v4862_v5 = vrot.slane %v16699_v17, 2  ;;  %v4732_v15 = vadd.f32 %v16631_v54, %v4661_v43  ;;  %v4734_v0 = vadd.f32 %v16635_v52, %v4663_v48  ;;  %v16754_v43 = vmul.f32 %v16581_v62, %v16695_v39 }
 0x909   :  { %20015 = vst [vmem:[#allocation122_spill] sm:$0xff] %v16709_v41  ;;  %20016 = vst [vmem:[#allocation123_spill] sm:$0xff] %v16715_v26  ;;  %v16735_v19 = vpop.f32.mrf.mxu0  ;;  %v16737_v41 = vpop.f32.mrf.mxu1  ;;  %v16745_v26 = vmul.f32 %v16573_v47, %v16695_v39  ;;  %v16758_v48 = vmul.f32 %v16585_v8, %v16695_v39  ;;  %v5042_v2 = vrot.slane %v16699_v17, 6  ;;  %v4437_v11 = vadd.f32 %v4436_v33, %v16619_v3 }
 0x90a   :  { %20017 = vst [vmem:[#allocation124_spill] sm:$0xff] %v16718_v55  ;;  %20019 = vst [vmem:[#allocation126_spill] sm:$0xff] %v16727_v34  ;;  %v4864_v34 = vrot.slane %v16701_v12, 2  ;;  %v16781_v13 = vmax.f32 %v4734_v0, 0.0  ;;  %v4518_v22 = vadd.f32 %v4517_v23, %v4151_v51  ;;  %v4441_v57 = vadd.f32 %v4440_v30, %v16623_v37 }
 0x90b   :  { %20020 = vst [vmem:[#allocation127_spill] sm:$0xff] %v16731_v58  ;;  %20021 = vst [vmem:[#allocation128_spill] sm:$0xff] %v16741_v60  ;;  %v16750_v58 = vmul.f32 %v16569_v40, %v16697_v45  ;;  %v4433_v60 = vadd.f32 %v4432_v4, %v16607_v32  ;;  %v16769_v40 = vpop.f32.mrf.mxu0  ;;  %v4514_v32 = vadd.f32 %v4513_v42, %v16611_v38  ;;  %v16779_v4 = vmax.f32 %v4732_v15, 0.0 }
 0x90c   :  { %20022 = vst [vmem:[#allocation129_spill] sm:$0xff] %v16745_v26  ;;  %20024 = vst [vmem:[#allocation131_spill] sm:$0xff] %v16754_v43  ;;  %v16767_v26 = vrot.slane %v16588_v9, %v16565_v49  ;;  %v16775_v43 = vrot.slane %v16559_v14, %v16718_v55  ;;  %v4994_v14 = vsel %vm1571_vm2, 0.0, %v4864_v34  ;;  %v19790_v38 = vrot.slane %v16781_v13, 2 }
 0x90d   :  { %20023 = vst [vmem:[#allocation130_spill] sm:$0xff] %v16750_v58  ;;  %20025 = vst [vmem:[#allocation132_spill] sm:$0xff] %v16758_v48  ;;  %v16771_v58 = vpop.f32.mrf.mxu1  ;;  %v4992_v48 = vsel %vm1571_vm2, 0.0, %v4862_v5  ;;  %v16786_v9 = vpop.f32.mrf.mxu0  ;;  %v19791_v55 = vrot.slane %v16779_v4, 2  ;;  %v5043_v15 = vrot.slane %v16779_v4, 6  ;;  %v5048_v0 = vrot.slane %v16701_v12, 6 }
 0x90e   :  { %20026 = vst [vmem:[#allocation133_spill] sm:$0xff] %v16771_v58  ;;  %20027 = vst [vmem:[#allocation134_spill] sm:$0xff] %v16779_v4  ;;  %v4997_v42 = vmul.f32 %v4992_v48, %v15866_v16  ;;  %v4522_v30 = vadd.f32 %v4521_v61, %v16641_v1  ;;  %v4872_v48 = vsel %vm1571_vm2, %v4864_v34, %v19790_v38 }
 0x90f   :  { %20028 = vst [vmem:[#allocation135_spill] sm:$0xff] %v16781_v13  ;;  %v16788_v58 = vpop.f32.mrf.mxu1  ;;  %v16798_v33 = vpop.f32.mrf.mxu0  ;;  %v4868_v37 = vsel %vm1571_vm2, %v4862_v5, %v19791_v55  ;;  %v5044_v51 = vsel %vm1653_vm3, %v5042_v2, %v5043_v15  ;;  %v4666_v12 = vmul.f32 %v16599_v7, %v4441_v57  ;;  %v4999_v23 = vmul.f32 %v4994_v14, %v15866_v16 }
 0x910   :  { %v5002_v61 = vmul.f32 %v4868_v37, %v15872_v24  ;;  %v5004_v1 = vmul.f32 %v4872_v48, %v15872_v24  ;;  %v16822_v2 = vmul.f32 %v16573_v47, %v16697_v45  ;;  %v16826_v57 = vmul.f32 %v16581_v62, %v16697_v45 }
 0x911   :  { %v16800_v3 = vpop.f32.mrf.mxu1  ;;  %v16816_v17 = vpop.f32.mrf.mxu0  ;;  %v16830_v34 = vmul.f32 %v16585_v8, %v16697_v45  ;;  %v16834_v14 = vmul.f32 %v16775_v43, %v16544_v44  ;;  %v4662_v37 = vmul.f32 %v16763_v46, %v4437_v11  ;;  %v4737_v47 = vadd.f32 %v16631_v54, %v4666_v12 }
 0x912   :  { %20029 = vst [vmem:[#allocation136_spill] sm:$0xff] %v16800_v3  ;;  %v20030_v3 = vrot.slane %v16781_v13, 6  ;;  %v16848_v8 = vrot.slane %v16591_v59, %v16562_v10  ;;  %v4664_v38 = vmul.f32 %v16767_v26, %v4518_v22  ;;  %v4668_v44 = vmul.f32 %v16603_v63, %v4522_v30 }
 0x913   :  { %v16818_v5 = vpop.f32.mrf.mxu1  ;;  %v16842_v48 = vpop.f32.mrf.mxu0  ;;  %v4657_v11 = vmul.f32 %v16763_v46, %v4433_v60  ;;  %v4659_v12 = vmul.f32 %v16767_v26, %v4514_v32  ;;  %v16875_v60 = vmul.f32 %v16775_v43, %v16625_v28  ;;  %v16879_v32 = vmul.f32 %v16775_v43, %v16695_v39 }
 0x914   :  { %v5050_v4 = vsel %vm1653_vm3, %v5048_v0, %v20030_v3  ;;  %v16836_v0 = vpack.c.bf16 %v5002_v61, %v4997_v42  ;;  %v16838_v3 = vpack.c.bf16 %v5004_v1, %v4999_v23  ;;  %v16854_v42 = vmul.f32 %v16775_v43, %v16548_v35 }
 0x915   :  { %v16844_v62 = vpop.f32.mrf.mxu1  ;;  %v16860_v23 = vrot.slane %v16591_v59, %v16565_v49  ;;  %v16862_v61 = vmax.f32 %v4737_v47, 0.0  ;;  %v16864_v1 = vpop.f32.mrf.mxu0  ;;  %v4739_v22 = vadd.f32 %v16635_v52, %v4668_v44  ;;  %v16871_v35 = vmul.f32 %v16775_v43, %v16575_v36  ;;  %20036 = vst [vmem:[#allocation142_spill] sm:$0xff] %v16875_v60  ;;  %20037 = vst [vmem:[#allocation143_spill] sm:$0xff] %v16879_v32 }
 0x916   :  { %20031 = vst [vmem:[#allocation137_spill] sm:$0xff] %v16836_v0  ;;  %20032 = vst [vmem:[#allocation138_spill] sm:$0xff] %v16838_v3  ;;  %v4733_v30 = vadd.f32 %v16848_v8, %v4662_v37  ;;  %v4443_v49 = vadd.f32 %v16735_v19, %v16645_v53  ;;  %v16891_v36 = vmul.f32 %v16775_v43, %v16550_v27 }
 0x917   :  { %20033 = vst [vmem:[#allocation139_spill] sm:$0xff] %v16854_v42  ;;  %20034 = vst [vmem:[#allocation140_spill] sm:$0xff] %v16862_v61  ;;  %v16866_v55 = vpop.f32.mrf.mxu1  ;;  %v16885_v44 = vpop.f32.mrf.mxu0  ;;  %v4735_v28 = vadd.f32 %v16860_v23, %v4664_v38  ;;  %v16894_v3 = vmax.f32 %v4739_v22, 0.0  ;;  %v16898_v39 = vmul.f32 %v16775_v43, %v16577_v25  ;;  %v16902_v37 = vmul.f32 %v16775_v43, %v16627_v20  ;;  %v13945_v42 = vld [vmem:[#allocation38 + $0xf8] ss:$20 sps:$4 sm:$0xff]  }
 0x918   :  { %20035 = vst [vmem:[#allocation141_spill] sm:$0xff] %v16871_v35  ;;  %v4728_v53 = vadd.f32 %v16848_v8, %v4657_v11  ;;  %v4730_v19 = vadd.f32 %v16860_v23, %v4659_v12  ;;  %v5177_v47 = vmul.f32 %v5044_v51, %v15874_v29  ;;  %v20041_v27 = vrot.slane %v16862_v61, 6 }
 0x919   :  { %v16887_v10 = vpop.f32.mrf.mxu1  ;;  %20038 = vst [vmem:[#allocation144_spill] sm:$0xff] %v16894_v3  ;;  %20039 = vst [vmem:[#allocation145_spill] sm:$0xff] %v16898_v39  ;;  %v16910_v22 = vpop.f32.mrf.mxu0  ;;  %v4447_v20 = vadd.f32 %v16786_v9, %v16667_v56  ;;  %v4528_v11 = vadd.f32 %v16788_v58, %v16671_v18  ;;  %v16920_v12 = vmax.f32 %v4733_v30, 0.0  ;;  %v4667_v51 = vmul.f32 %v16763_v46, %v4443_v49  ;;  %v20046_v58 = vld [vmem:[#allocation133_spill] sm:$0xff] }
 0x91a   :  { %20040 = vst [vmem:[#allocation146_spill] sm:$0xff] %v16902_v37  ;;  %v5058_v38 = vsel %vm1653_vm3, %v5043_v15, %v20041_v27  ;;  %v4524_v15 = vadd.f32 %v16737_v41, %v16649_v21  ;;  %v4445_v27 = vadd.f32 %v16769_v40, %v16655_v31  ;;  %v16931_v32 = vmax.f32 %v4735_v28, 0.0  ;;  %v20047_v28 = vld [vmem:[#allocation124_spill] sm:$0xff]  ;;  %v13948_v37 = vld [vmem:[#allocation38 + $0x618] ss:$20 sps:$4 sm:$0xff]  }
 0x91b   :  { %v16912_v0 = vpop.f32.mrf.mxu1  ;;  %v5182_v25 = vmul.f32 %v5058_v38, %v15883_v50  ;;  %20042 = vst [vmem:[#allocation147_spill] sm:$0xff] %v16920_v12  ;;  %v16927_v60 = vpop.f32.mrf.mxu0  ;;  %v20044_v9 = vrot.slane %v16894_v3, 6  ;;  %v20045_v18 = vrot.slane %v16781_v13, 6  ;;  %v4526_v21 = vadd.f32 %v20046_v58, %v16663_v6 }
 0x91c   :  { %v5179_v41 = vmul.f32 %v5050_v4, %v15874_v29  ;;  %v4672_v6 = vmul.f32 %v16763_v46, %v4447_v20  ;;  %v4674_v4 = vmul.f32 %v16767_v26, %v4528_v11  ;;  %v4738_v58 = vadd.f32 %v16848_v8, %v4667_v51  ;;  %v13942_v51 = vld [vmem:[#allocation38 + $0x120] ss:$20 sps:$4 sm:$0xff]  }
 0x91d   :  { %v16929_v38 = vpop.f32.mrf.mxu1  ;;  %v16933_v56 = vpack.c.bf16 %v5182_v25, %v5177_v47  ;;  %v5062_v49 = vsel %vm1653_vm3, %v20045_v18, %v20044_v9  ;;  %v16944_v40 = vpop.f32.mrf.mxu0  ;;  %v20048_v47 = vld [vmem:[#allocation112_spill] sm:$0xff]  ;;  %v16956_v9 = vmax.f32 %v4728_v53, 0.0  ;;  %v16958_v18 = vmax.f32 %v4730_v19, 0.0  ;;  %v20052_v53 = vld [vmem:[#allocation113_spill] sm:$0xff] }
 0x91e   :  { %v5184_v31 = vmul.f32 %v5062_v49, %v15883_v50  ;;  %v16950_v25 = vrot.slane %v20048_v47, %v20047_v28  ;;  %v4669_v50 = vmul.f32 %v16767_v26, %v4524_v15  ;;  %v4671_v47 = vmul.f32 %v16599_v7, %v4445_v27  ;;  %v20055_v15 = vld [vmem:[#allocation119_spill] sm:$0xff]  ;;  %v20056_v27 = vld [vmem:[#allocation134_spill] sm:$0xff] }
 0x91f   :  { %20043 = vst [vmem:[#allocation148_spill] sm:$0xff] %v16933_v56  ;;  %v16946_v30 = vpop.f32.mrf.mxu1  ;;  %v16954_v56 = vmul.f32 %v16775_v43, %v16697_v45  ;;  %20050 = vst [vmem:[#allocation112_spill] sm:$0xff] %v16956_v9  ;;  %v16967_v29 = vpop.f32.mrf.mxu0  ;;  %v4673_v43 = vmul.f32 %v16603_v63, %v4526_v21  ;;  %v4451_v19 = vadd.f32 %v16798_v33, %v20052_v53  ;;  %v20060_v21 = vld [vmem:[#allocation114_spill] sm:$0xff] }
 0x920   :  { %v16962_v49 = vpack.c.bf16 %v5184_v31, %v5179_v41  ;;  %v16976_v20 = vpack.c.bf16 %v16920_v12, %v16956_v9  ;;  %v16980_v11 = vpack.c.bf16 %v16931_v32, %v16958_v18  ;;  %v16984_v41 = vpack.c.bf16 %v20056_v27, %v20055_v15  ;;  %v20058_v31 = vld [vmem:[#allocation120_spill] sm:$0xff]  ;;  %v13947_v53 = vld [vmem:[#allocation38 + $0xfc] ss:$20 sps:$4 sm:$0xff]  }
 0x921   :  { %20049 = vst [vmem:[#allocation133_spill] sm:$0xff] %v16954_v56  ;;  %v16969_v45 = vpop.f32.mrf.mxu1  ;;  %v20061_v56 = vld [vmem:[#allocation136_spill] sm:$0xff]  ;;  %v16992_v24 = vpop.f32.mrf.mxu0  ;;  %v16998_v35 = vrot.slane %v16591_v59, %v20047_v28  ;;  %v4743_v27 = vadd.f32 %v16848_v8, %v4672_v6  ;;  %v4740_v59 = vadd.f32 %v16860_v23, %v4669_v50  ;;  %v4676_v39 = vmul.f32 %v16599_v7, %v4451_v19  ;;  %v13953_v50 = vld [vmem:[#allocation38 + $0xd4] ss:$20 sps:$4 sm:$0xff]  }
 0x922   :  { %20051 = vst [vmem:[#allocation149_spill] sm:$0xff] %v16962_v49  ;;  %20053 = vst [vmem:[#allocation113_spill] sm:$0xff] %v16976_v20  ;;  %v16988_v49 = vpack.c.bf16 %v16781_v13, %v20058_v31  ;;  %v4532_v33 = vadd.f32 %v20061_v56, %v20060_v21  ;;  %v4745_v31 = vadd.f32 %v16860_v23, %v4674_v4  ;;  %6344 = vmatprep.mubr.bf16.mxu1 %v16976_v20  ;;  %v20062_v56 = vld [vmem:[#allocation115_spill] sm:$0xff]  ;;  %v13956_v13 = vld [vmem:[#allocation38 + $0x5f4] ss:$20 sps:$4 sm:$0xff]  }
 0x923   :  { %20054 = vst [vmem:[#allocation150_spill] sm:$0xff] %v16980_v11  ;;  %20057 = vst [vmem:[#allocation119_spill] sm:$0xff] %v16984_v41  ;;  %v16994_v16 = vpop.f32.mrf.mxu1  ;;  %6425 = vmatprep.mubr.bf16.mxu0 %v16980_v11  ;;  %v4453_v21 = vadd.f32 %v16816_v17, %v20062_v56  ;;  %v20063_v28 = vld [vmem:[#allocation116_spill] sm:$0xff]  ;;  %6345 = vmatmul.mubr.bf16.vlgmr.msra.gmra.mxu1 %v16984_v41  ;;  %v4474_v6 = vpop.f32.mrf.mxu0  ;;  %v17014_v11 = vmax.f32 %v4738_v58, 0.0  ;;  %v4742_v17 = vadd.f32 %v16631_v54, %v4671_v47  ;;  %v20069_v41 = vld [vmem:[#allocation123_spill] sm:$0xff] }
 0x924   :  { %20059 = vst [vmem:[#allocation120_spill] sm:$0xff] %v16988_v49  ;;  %v4534_v15 = vadd.f32 %v16818_v5, %v20063_v28  ;;  %6426 = vmatmul.mubr.bf16.vlgmr.msra.gmra.mxu0 %v16988_v49  ;;  %v4744_v56 = vadd.f32 %v16635_v52, %v4673_v43  ;;  %v4678_v6 = vmul.f32 %v16603_v63, %v4532_v33  ;;  %v13954_v58 = vld [vmem:[#allocation38 + $0x5f0] ss:$20 sps:$4 sm:$0xff]   ;;  %v17024_v49 = vmax.f32 %v4743_v27, 0.0  ;;  %v13962_v20 = vld [vmem:[#allocation38 + $0x5cc] ss:$20 sps:$4 sm:$0xff]  }
 0x925   :  { %v4555_v4 = vpop.f32.mrf.mxu1  ;;  %20064 = vst [vmem:[#allocation114_spill] sm:$0xff] %v17014_v11  ;;  %6556 = vmatpush1.bf16.msra.mxu0 %v13942_v51  ;;  %6475 = vmatpush1.bf16.msra.mxu1 %v13948_v37  ;;  %v17026_v19 = vmax.f32 %v4745_v31, 0.0  ;;  %v4677_v51 = vmul.f32 %v16763_v46, %v4453_v21  ;;  %v17030_v28 = vmax.f32 %v4740_v59, 0.0  ;;  %v20065_v37 = vld [vmem:[#allocation121_spill] sm:$0xff]  ;;  %v20068_v43 = vld [vmem:[#allocation126_spill] sm:$0xff] }
 0x926   :  { %6557 = vmatprep.subr.bf16.mxu0 %v13947_v53  ;;  %v4475_v4 = vpop.f32.mrf.mxu0  ;;  %6476 = vmatprep.subr.bf16.mxu1 %v13956_v13  ;;  %v4679_v33 = vmul.f32 %v16767_v26, %v4534_v15  ;;  %v4455_v53 = vadd.f32 %v16842_v48, %v20065_v37  ;;  %v17040_v31 = vmax.f32 %v4744_v56, 0.0  ;;  %v4747_v13 = vadd.f32 %v16631_v54, %v4676_v39  ;;  %v20067_v5 = vld [vmem:[#allocation125_spill] sm:$0xff]  ;;  %v13951_v37 = vld [vmem:[#allocation38 + $0xd0] ss:$20 sps:$4 sm:$0xff]  }
 0x927   :  { %v4556_v47 = vpop.f32.mrf.mxu1  ;;  %v4749_v59 = vadd.f32 %v16635_v52, %v4678_v6  ;;  %v4457_v15 = vadd.f32 %v16864_v1, %v20067_v5  ;;  %v4538_v48 = vadd.f32 %v16866_v55, %v20068_v43  ;;  %v4748_v56 = vadd.f32 %v16848_v8, %v4677_v51  ;;  %v13959_v5 = vld [vmem:[#allocation38 + $0xac] ss:$20 sps:$4 sm:$0xff]   ;;  %v13968_v55 = vld [vmem:[#allocation38 + $0x5a4] ss:$20 sps:$4 sm:$0xff]  }
 0x928   :  { %v17035_v4 = vpop.f32.mrf.mxu0  ;;  %v17038_v47 = vmax.f32 %v4742_v17, 0.0  ;;  %20066 = vst [vmem:[#allocation136_spill] sm:$0xff] %v17040_v31  ;;  %v13960_v17 = vld [vmem:[#allocation38 + $0x5c8] ss:$20 sps:$4 sm:$0xff]   ;;  %v17054_v39 = vpack.c.bf16 %v17024_v49, %v17014_v11  ;;  %v17058_v1 = vpack.c.bf16 %v17026_v19, %v17030_v28  ;;  %v4681_v43 = vmul.f32 %v16599_v7, %v4455_v53 }
 0x929   :  { %6558 = vmatpush1.bf16.msra.mxu0 %v13945_v42  ;;  %6477 = vmatpush1.bf16.msra.mxu1 %v13954_v58  ;;  %v4536_v42 = vadd.f32 %v16844_v62, %v20069_v41  ;;  %v4750_v58 = vadd.f32 %v16860_v23, %v4679_v33  ;;  %v17069_v21 = vmax.f32 %v4747_v13, 0.0  ;;  %v4682_v53 = vmul.f32 %v16763_v46, %v4457_v15 }
 0x92a   :  { %6559 = vmatprep.subr.bf16.mxu0 %v13953_v50  ;;  %v13451_v27 = vpop.f32.mrf.mxu0  ;;  %20070 = vst [vmem:[#allocation115_spill] sm:$0xff] %v17054_v39  ;;  %20071 = vst [vmem:[#allocation116_spill] sm:$0xff] %v17058_v1  ;;  %6478 = vmatprep.subr.bf16.mxu1 %v13962_v20  ;;  %v4684_v6 = vmul.f32 %v16767_v26, %v4538_v48  ;;  %v13957_v50 = vld [vmem:[#allocation38 + $0xa8] ss:$20 sps:$4 sm:$0xff]   ;;  %v17078_v13 = vmax.f32 %v4749_v59, 0.0  ;;  %v17080_v41 = vmax.f32 %v4748_v56, 0.0 }
 0x92b   :  { %6354 = vmatprep.mubr.bf16.mxu1 %v17054_v39  ;;  %6435 = vmatprep.mubr.bf16.mxu0 %v17058_v1  ;;  %v4683_v1 = vmul.f32 %v16603_v63, %v4536_v42  ;;  %v13966_v20 = vld [vmem:[#allocation38 + $0x5a0] ss:$20 sps:$4 sm:$0xff]   ;;  %v17083_v33 = vmax.f32 %v4750_v58, 0.0  ;;  %v4752_v15 = vadd.f32 %v16631_v54, %v4681_v43  ;;  %v17088_v48 = vpack.c.bf16 %v17038_v47, %v16862_v61  ;;  %v13965_v59 = vld [vmem:[#allocation38 + $0x84] ss:$20 sps:$4 sm:$0xff]  }
 0x92c   :  { %v17064_v62 = vpop.f32.mrf.mxu0  ;;  %v13974_v43 = vld [vmem:[#allocation38 + $0x57c] ss:$20 sps:$4 sm:$0xff]   ;;  %v4753_v27 = vadd.f32 %v16848_v8, %v4682_v53  ;;  %v4755_v39 = vadd.f32 %v16860_v23, %v4684_v6  ;;  %v13963_v42 = vld [vmem:[#allocation38 + $0x80] ss:$20 sps:$4 sm:$0xff]  }
 0x92d   :  { %6560 = vmatpush1.bf16.msra.mxu0 %v13951_v37  ;;  %6479 = vmatpush1.bf16.msra.mxu1 %v13960_v17  ;;  %20072 = vst [vmem:[#allocation121_spill] sm:$0xff] %v17088_v48  ;;  %v17092_v37 = vpack.c.bf16 %v17040_v31, %v16894_v3  ;;  %v20075_v31 = vld [vmem:[#allocation122_spill] sm:$0xff] }
 0x92e   :  { %v13452_v51 = vpop.f32.mrf.mxu0  ;;  %6561 = vmatprep.subr.bf16.mxu0 %v13959_v5  ;;  %6480 = vmatprep.subr.bf16.mxu1 %v13968_v55  ;;  %v20074_v55 = vld [vmem:[#allocation117_spill] sm:$0xff]  ;;  %v4463_v3 = vadd.f32 %v16910_v22, %v20075_v31  ;;  %v13971_v6 = vld [vmem:[#allocation38 + $0x5c] ss:$20 sps:$4 sm:$0xff]  }
 0x92f   :  { %20073 = vst [vmem:[#allocation125_spill] sm:$0xff] %v17092_v37  ;;  %v4461_v58 = vadd.f32 %v16885_v44, %v20074_v55  ;;  %6355 = vmatmul.mubr.bf16.gmra.mxu1 %v17088_v48  ;;  %6436 = vmatmul.mubr.bf16.gmra.mxu0 %v17092_v37  ;;  %v20076_v51 = vld [vmem:[#allocation127_spill] sm:$0xff]  ;;  %v17115_v48 = vmax.f32 %v4752_v15, 0.0  ;;  %v20078_v55 = vld [vmem:[#allocation118_spill] sm:$0xff] }
 0x930   :  { %v17094_v17 = vpop.f32.mrf.mxu0  ;;  %v4544_v53 = vadd.f32 %v16912_v0, %v20076_v51  ;;  %v13972_v5 = vld [vmem:[#allocation38 + $0x578] ss:$20 sps:$4 sm:$0xff]   ;;  %v4542_v0 = vadd.f32 %v16887_v10, %v20078_v55  ;;  %v13980_v15 = vld [vmem:[#allocation38 + $0x554] ss:$20 sps:$4 sm:$0xff]   ;;  %v17127_v51 = vmax.f32 %v4753_v27, 0.0 }
 0x931   :  { %6562 = vmatpush1.bf16.msra.mxu0 %v13957_v50  ;;  %6481 = vmatpush1.bf16.msra.mxu1 %v13966_v20  ;;  %20077 = vst [vmem:[#allocation126_spill] sm:$0xff] %v17115_v48  ;;  %v4686_v44 = vmul.f32 %v16599_v7, %v4461_v58  ;;  %v4467_v50 = vadd.f32 %v16944_v40, %v16826_v57  ;;  %v20079_v22 = vld [vmem:[#allocation130_spill] sm:$0xff] }
 0x932   :  { %v13455_v56 = vpop.f32.mrf.mxu0  ;;  %6563 = vmatprep.subr.bf16.mxu0 %v13965_v59  ;;  %v4548_v20 = vadd.f32 %v16946_v30, %v16830_v34  ;;  %6482 = vmatprep.subr.bf16.mxu1 %v13974_v43  ;;  %v4687_v59 = vmul.f32 %v16763_v46, %v4463_v3  ;;  %v4465_v58 = vadd.f32 %v16927_v60, %v20079_v22  ;;  %v13969_v30 = vld [vmem:[#allocation38 + $0x58] ss:$20 sps:$4 sm:$0xff]   ;;  %v13977_v60 = vld [vmem:[#allocation38 + $0x34] ss:$20 sps:$4 sm:$0xff]  }
 0x933   :  { %v4754_v56 = vadd.f32 %v16635_v52, %v4683_v1  ;;  %v17129_v1 = vmax.f32 %v4755_v39, 0.0  ;;  %v4689_v10 = vmul.f32 %v16767_v26, %v4544_v53  ;;  %v4546_v57 = vadd.f32 %v16929_v38, %v16822_v2  ;;  %v13978_v53 = vld [vmem:[#allocation38 + $0x550] ss:$20 sps:$4 sm:$0xff]  }
 0x934   :  { %v17118_v37 = vpop.f32.mrf.mxu0  ;;  %v4692_v40 = vmul.f32 %v16763_v46, %v4467_v50  ;;  %v4694_v34 = vmul.f32 %v16767_v26, %v4548_v20  ;;  %v4757_v2 = vadd.f32 %v16631_v54, %v4686_v44  ;;  %v4688_v38 = vmul.f32 %v16603_v63, %v4542_v0  ;;  %v13986_v50 = vld [vmem:[#allocation38 + $0x52c] ss:$20 sps:$4 sm:$0xff]  }
 0x935   :  { %6564 = vmatpush1.bf16.msra.mxu0 %v13963_v42  ;;  %v17142_v43 = vmax.f32 %v4754_v56, 0.0  ;;  %6483 = vmatpush1.bf16.msra.mxu1 %v13972_v5  ;;  %v4691_v56 = vmul.f32 %v16599_v7, %v4465_v58  ;;  %v17155_v5 = vpack.c.bf16 %v17127_v51, %v17080_v41  ;;  %v4760_v0 = vadd.f32 %v16860_v23, %v4689_v10  ;;  %v13975_v58 = vld [vmem:[#allocation38 + $0x30] ss:$20 sps:$4 sm:$0xff]  }
 0x936   :  { %v13456_v31 = vpop.f32.mrf.mxu0  ;;  %6565 = vmatprep.subr.bf16.mxu0 %v13971_v6  ;;  %v4763_v42 = vadd.f32 %v16848_v8, %v4692_v40  ;;  %6484 = vmatprep.subr.bf16.mxu1 %v13980_v15  ;;  %v4765_v6 = vadd.f32 %v16860_v23, %v4694_v34  ;;  %v4693_v20 = vmul.f32 %v16603_v63, %v4546_v57  ;;  %v20082_v40 = vld [vmem:[#allocation131_spill] sm:$0xff]  ;;  %v20083_v10 = vld [vmem:[#allocation132_spill] sm:$0xff]  ;;  %v17181_v34 = vmax.f32 %v4757_v2, 0.0 }
 0x937   :  { %v4758_v31 = vadd.f32 %v16848_v8, %v4687_v59  ;;  %20080 = vst [vmem:[#allocation123_spill] sm:$0xff] %v17155_v5  ;;  %v17161_v15 = vpack.c.bf16 %v17129_v1, %v17083_v33  ;;  %v4473_v59 = vadd.f32 %v16992_v24, %v20082_v40  ;;  %6364 = vmatprep.mubr.bf16.mxu1 %v17155_v5  ;;  %v20084_v40 = vld [vmem:[#allocation128_spill] sm:$0xff] }
 0x938   :  { %v17144_v55 = vpop.f32.mrf.mxu0  ;;  %v17167_v39 = vmax.f32 %v4763_v42, 0.0  ;;  %v4554_v57 = vadd.f32 %v16994_v16, %v20083_v10  ;;  %v4759_v24 = vadd.f32 %v16635_v52, %v4688_v38  ;;  %v4471_v3 = vadd.f32 %v16967_v29, %v20084_v40  ;;  %v13984_v42 = vld [vmem:[#allocation38 + $0x528] ss:$20 sps:$4 sm:$0xff]  }
 0x939   :  { %20081 = vst [vmem:[#allocation117_spill] sm:$0xff] %v17161_v15  ;;  %6566 = vmatpush1.bf16.msra.mxu0 %v13969_v30  ;;  %v17176_v30 = vmax.f32 %v4765_v6, 0.0  ;;  %6445 = vmatprep.mubr.bf16.mxu0 %v17161_v15  ;;  %v17183_v16 = vmax.f32 %v4758_v31, 0.0  ;;  %v20085_v10 = vld [vmem:[#allocation129_spill] sm:$0xff]  ;;  %v17188_v6 = vmax.f32 %v4760_v0, 0.0  ;;  %v4764_v5 = vadd.f32 %v16635_v52, %v4693_v20 }
 0x93a   :  { %v13459_v44 = vpop.f32.mrf.mxu0  ;;  %6567 = vmatprep.subr.bf16.mxu0 %v13977_v60  ;;  %6485 = vmatpush1.bf16.msra.mxu1 %v13978_v53  ;;  %v4762_v60 = vadd.f32 %v16631_v54, %v4691_v56  ;;  %v4552_v22 = vadd.f32 %v16969_v45, %v20085_v10  ;;  %v4697_v29 = vmul.f32 %v16763_v46, %v4473_v59  ;;  %v20103_v15 = vld [vmem:[#allocation85_spill] sm:$0xff] }
 0x93b   :  { %v13983_v44 = vld [vmem:[#allocation38 + $0xc] ss:$20 sps:$4 sm:$0xff]   ;;  %6486 = vmatprep.subr.bf16.mxu1 %v13986_v50  ;;  %v4699_v53 = vmul.f32 %v16767_v26, %v4554_v57  ;;  %v17195_v2 = vpack.c.bf16 %v17115_v48, %v17069_v21  ;;  %v17199_v31 = vpack.c.bf16 %v17142_v43, %v17078_v13  ;;  %v4593_v45 = vadd.f32 %v17035_v4, %v16834_v14  ;;  %v13981_v50 = vld [vmem:[#allocation38 + $0x8] ss:$20 sps:$4 sm:$0xff]   ;;  %v13992_v14 = vld [vmem:[#allocation38 + $0x504] ss:$20 sps:$4 sm:$0xff]  }
 0x93c   :  { %v17172_v27 = vpop.f32.mrf.mxu0  ;;  %v17205_v56 = vpack.c.bf16 %v17167_v39, %v17183_v16  ;;  %v4696_v26 = vmul.f32 %v16599_v7, %v4471_v3  ;;  %v4768_v0 = vadd.f32 %v16848_v8, %v4697_v29  ;;  %v17214_v59 = vpack.c.bf16 %v17176_v30, %v17188_v6  ;;  %v13987_v29 = vld [vmem:[#allocation38 + $0x260] ss:$20 sps:$4 sm:$0xff]  }
 0x93d   :  { %6568 = vmatpush1.bf16.msra.mxu0 %v13975_v58  ;;  %20086 = vst [vmem:[#allocation122_spill] sm:$0xff] %v17195_v2  ;;  %20087 = vst [vmem:[#allocation127_spill] sm:$0xff] %v17199_v31  ;;  %v4770_v20 = vadd.f32 %v16860_v23, %v4699_v53  ;;  %v13989_v58 = vld [vmem:[#allocation38 + $0x264] ss:$20 sps:$4 sm:$0xff]   ;;  %v17216_v4 = vmax.f32 %v4759_v24, 0.0  ;;  %v4698_v57 = vmul.f32 %v16603_v63, %v4552_v22  ;;  %6365 = vmatmul.mubr.bf16.gmra.mxu1 %v17195_v2 }
 0x93e   :  { %v13460_v38 = vpop.f32.mrf.mxu0  ;;  %20088 = vst [vmem:[#allocation118_spill] sm:$0xff] %v17205_v56  ;;  %6569 = vmatprep.subr.bf16.mxu0 %v13983_v44  ;;  %20089 = vst [vmem:[#allocation130_spill] sm:$0xff] %v17214_v59  ;;  %6487 = vmatpush1.bf16.msra.mxu1 %v13984_v42  ;;  %v4660_v7 = vmul.f32 %v16950_v25, %v4593_v45  ;;  %v4596_v8 = vadd.f32 %v17064_v62, %v16891_v36  ;;  %v13990_v23 = vld [vmem:[#allocation38 + $0x500] ss:$20 sps:$4 sm:$0xff]   ;;  %v17225_v40 = vmax.f32 %v4768_v0, 0.0  ;;  %v20092_v63 = vld [vmem:[#allocation139_spill] sm:$0xff] }
 0x93f   :  { %6446 = vmatmul.mubr.bf16.gmra.mxu0 %v17199_v31  ;;  %v17227_v42 = vmax.f32 %v4770_v20, 0.0  ;;  %6374 = vmatprep.mubr.bf16.mxu1 %v17205_v56  ;;  %v4601_v22 = vadd.f32 %v17094_v17, %v20092_v63  ;;  %v14001_v24 = vld [vmem:[#allocation38 + $0x3a4] ss:$20 sps:$4 sm:$0xff]   ;;  %v17233_v10 = vmax.f32 %v4762_v60, 0.0  ;;  %v17235_v38 = vmax.f32 %v4764_v5, 0.0 }
 0x940   :  { %v17207_v46 = vpop.f32.mrf.mxu0  ;;  %20090 = vst [vmem:[#allocation131_spill] sm:$0xff] %v17225_v40  ;;  %6455 = vmatprep.mubr.bf16.mxu0 %v17214_v59  ;;  %v4731_v36 = vadd.f32 %v16998_v35, %v4660_v7  ;;  %v4665_v62 = vmul.f32 %v16950_v25, %v4596_v8  ;;  %v4767_v20 = vadd.f32 %v16631_v54, %v4696_v26  ;;  %v13995_v17 = vld [vmem:[#allocation38 + $0x23c] ss:$20 sps:$4 sm:$0xff]   ;;  %v20093_v5 = vrot.slane %v16956_v9, 2  ;;  %v13998_v44 = vld [vmem:[#allocation38 + $0x214] ss:$20 sps:$4 sm:$0xff]  }
 0x941   :  { %20091 = vst [vmem:[#allocation132_spill] sm:$0xff] %v17227_v42  ;;  %6570 = vmatpush1.bf16.msra.mxu0 %v13981_v50  ;;  %6488 = vmatprep.subr.bf16.mxu1 %v13992_v14  ;;  %v4769_v50 = vadd.f32 %v16635_v52, %v4698_v57  ;;  %v17256_v54 = vpack.c.bf16 %v17225_v40, %v17225_v40  ;;  %v20096_v14 = vld [vmem:[#allocation145_spill] sm:$0xff]  ;;  %v13996_v31 = vld [vmem:[#allocation38 + $0x210] ss:$20 sps:$4 sm:$0xff]  }
 0x942   :  { %v13463_v3 = vpop.f32.mrf.mxu0  ;;  %6571 = vmatprep.subr.bf16.mxu0 %v13989_v58  ;;  %v17247_v60 = vsel %vm1571_vm2, 0.0, %v20093_v5  ;;  %v17251_v8 = vmax.f32 %v4731_v36, 0.0  ;;  %6489 = vmatpush1.bf16.msra.mxu1 %v13990_v23  ;;  %v17260_v26 = vpack.c.bf16 %v17227_v42, %v17227_v42  ;;  %v4670_v58 = vmul.f32 %v16950_v25, %v4601_v22 }
 0x943   :  { %v4736_v3 = vadd.f32 %v16998_v35, %v4665_v62  ;;  %20094 = vst [vmem:[#allocation128_spill] sm:$0xff] %v17256_v54  ;;  %v4604_v5 = vadd.f32 %v17118_v37, %v20096_v14  ;;  %6636 = vmatprep.subr.bf16.mxu1 %v14001_v24  ;;  %v17268_v57 = vpack.c.bf16 %v17233_v10, %v17181_v34  ;;  %v13993_v62 = vld [vmem:[#allocation38 + $0x238] ss:$20 sps:$4 sm:$0xff]   ;;  %v17280_v24 = vmax.f32 %v4767_v20, 0.0 }
 0x944   :  { %v17239_v53 = vpop.f32.mrf.mxu0  ;;  %20095 = vst [vmem:[#allocation129_spill] sm:$0xff] %v17260_v26  ;;  %v4866_v52 = vrot.slane %v17251_v8, 2  ;;  %v17272_v23 = vpack.c.bf16 %v17235_v38, %v17216_v4  ;;  %v4741_v14 = vadd.f32 %v16998_v35, %v4670_v58  ;;  %v5054_v45 = vrot.slane %v17251_v8, 6  ;;  %v20101_v37 = vld [vmem:[#allocation141_spill] sm:$0xff] }
 0x945   :  { %20097 = vst [vmem:[#allocation139_spill] sm:$0xff] %v17268_v57  ;;  %v17274_v36 = vmax.f32 %v4736_v3, 0.0  ;;  %6572 = vmatpush2.bf16.msra.mxu0 %v13987_v29  ;;  %20099 = vst [vmem:[#allocation151_spill] sm:$0xff] %v17280_v24  ;;  %6375 = vmatmul.mubr.bf16.gmra.mxu1 %v17268_v57  ;;  %v4675_v58 = vmul.f32 %v16950_v25, %v4604_v5  ;;  %v4609_v22 = vadd.f32 %v17144_v55, %v20101_v37  ;;  %v20108_v37 = vld [vmem:[#allocation87_spill] sm:$0xff] }
 0x946   :  { %v13464_v63 = vpop.f32.mrf.mxu0  ;;  %20098 = vst [vmem:[#allocation145_spill] sm:$0xff] %v17272_v23  ;;  %6573 = vmatprep.subr.bf16.mxu0 %v13995_v17  ;;  %v4996_v7 = vsel %vm1571_vm2, 0.0, %v4866_v52  ;;  %6384 = vmatprep.mubr.bf16.mxu1 %v17256_v54  ;;  %v17292_v17 = vmax.f32 %v4741_v14, 0.0  ;;  %v17298_v59 = vmax.f32 %v4769_v50, 0.0  ;;  %v20104_v54 = vld [vmem:[#allocation86_spill] sm:$0xff] }
 0x947   :  { %6456 = vmatmul.mubr.bf16.gmra.mxu0 %v17272_v23  ;;  %v19846_v29 = vrot.slane %v17274_v36, 2  ;;  %v5055_v3 = vrot.slane %v17274_v36, 6  ;;  %v5001_v5 = vmul.f32 %v4996_v7, %v20103_v15  ;;  %v14004_v50 = vld [vmem:[#allocation38 + $0x1ec] ss:$20 sps:$4 sm:$0xff]  }
 0x948   :  { %v17276_v63 = vpop.f32.mrf.mxu0  ;;  %6465 = vmatprep.mubr.bf16.mxu0 %v17260_v26  ;;  %20100 = vst [vmem:[#allocation152_spill] sm:$0xff] %v17292_v17  ;;  %20102 = vst [vmem:[#allocation141_spill] sm:$0xff] %v17298_v59  ;;  %v19851_v55 = vrot.slane %v17292_v17, 6  ;;  %v20109_v23 = vld [vmem:[#allocation89_spill] sm:$0xff] }
 0x949   :  { %v5056_v20 = vsel %vm1653_vm3, %v5054_v45, %v5055_v3  ;;  %6574 = vmatpush2.bf16.msra.mxu0 %v13993_v62  ;;  %v20106_v62 = vld [vmem:[#allocation142_spill] sm:$0xff] }
 0x94a   :  { %v13467_v0 = vpop.f32.mrf.mxu0  ;;  %6575 = vmatprep.subr.bf16.mxu0 %v13998_v44  ;;  %v5066_v7 = vsel %vm1653_vm3, %v5055_v3, %v19851_v55  ;;  %v4746_v44 = vadd.f32 %v16998_v35, %v4675_v58  ;;  %v5181_v56 = vmul.f32 %v5056_v20, %v20108_v37  ;;  %v20112_v58 = vld [vmem:[#allocation133_spill] sm:$0xff]  ;;  %v4998_v3 = vmul.f32 %v17247_v60, %v20103_v15 }
 0x94b   :  { %v4876_v0 = vsel %vm1571_vm2, %v4866_v52, %v19846_v29  ;;  %v20105_v52 = vld [vmem:[#allocation146_spill] sm:$0xff]  ;;  %v5186_v2 = vmul.f32 %v5066_v7, %v20109_v23  ;;  %v4620_v20 = vadd.f32 %v17239_v53, %v20112_v58  ;;  %v20114_v7 = vrot.slane %v16920_v12, 2  ;;  %v20117_v58 = vld [vmem:[#allocation113_spill] sm:$0xff] }
 0x94c   :  { %v4627_v26 = vpop.f32.mrf.mxu0  ;;  %v5006_v57 = vmul.f32 %v4876_v0, %v20104_v54  ;;  %v4612_v45 = vadd.f32 %v17172_v27, %v20105_v52  ;;  %v4680_v0 = vmul.f32 %v16950_v25, %v4609_v22  ;;  %v17325_v27 = vpack.c.bf16 %v17280_v24, %v17280_v24  ;;  %v14010_v22 = vld [vmem:[#allocation38 + $0x1c4] ss:$20 sps:$4 sm:$0xff]   ;;  %v14008_v52 = vld [vmem:[#allocation38 + $0x1c0] ss:$20 sps:$4 sm:$0xff]  }
 0x94d   :  { %v4617_v26 = vadd.f32 %v17207_v46, %v20106_v62  ;;  %v17329_v46 = vpack.c.bf16 %v17298_v59, %v17298_v59  ;;  %6576 = vmatpush2.bf16.msra.mxu0 %v13996_v31  ;;  %v17337_v62 = vpack.c.bf16 %v5186_v2, %v5181_v56  ;;  %v17349_v53 = vpack.c.bf16 %v17274_v36, %v17251_v8 }
 0x94e   :  { %v13468_v29 = vpop.f32.mrf.mxu0  ;;  %v17314_v14 = vpack.c.bf16 %v5006_v57, %v5001_v5  ;;  %20110 = vst [vmem:[#allocation86_spill] sm:$0xff] %v17325_v27  ;;  %v14002_v57 = vld [vmem:[#allocation38 + $0x1e8] ss:$20 sps:$4 sm:$0xff]   ;;  %6577 = vmatprep.subr.bf16.mxu0 %v14004_v50  ;;  %v4865_v5 = vrot.slane %v16958_v18, 2  ;;  %6385 = vmatmul.mubr.bf16.gmra.mxu1 %v17325_v27  ;;  %v4685_v31 = vmul.f32 %v16950_v25, %v4612_v45  ;;  %v20115_v50 = vrot.slane %v16956_v9, 2 }
 0x94f   :  { %20111 = vst [vmem:[#allocation146_spill] sm:$0xff] %v17329_v46  ;;  %20113 = vst [vmem:[#allocation142_spill] sm:$0xff] %v17337_v62  ;;  %6466 = vmatmul.mubr.bf16.gmra.mxu0 %v17329_v46  ;;  %v17352_v2 = vmax.f32 %v4746_v44, 0.0  ;;  %v4751_v56 = vadd.f32 %v16998_v35, %v4680_v0  ;;  %v20118_v29 = vmov 0   ;;  %v4690_v45 = vmul.f32 %v16950_v25, %v4617_v26  ;;  %v20125_v27 = vld [vmem:[#allocation91_spill] sm:$0xff] }
 0x950   :  { %20107 = vst [vmem:[#allocation85_spill] sm:$0xff] %v17314_v14  ;;  %v4870_v55 = vsel %vm1571_vm2, %v20115_v50, %v20114_v7  ;;  %20116 = vst [vmem:[#allocation87_spill] sm:$0xff] %v17349_v53  ;;  %6587 = vmatprep.mubr.bf16.mxu0 %v20117_v58  ;;  %6506 = vmatprep.mubr.bf16.mxu1 %v20118_v29  ;;  %v20119_v8 = vrot.slane %v17014_v11, 2  ;;  %v20120_v50 = vrot.slane %v16920_v12, 2  ;;  %v20121_v62 = vrot.slane %v17024_v49, 2  ;;  %v20123_v58 = vld [vmem:[#allocation143_spill] sm:$0xff] }
 0x951   :  { %6578 = vmatpush2.bf16.msra.mxu0 %v14002_v57  ;;  %v5003_v7 = vmul.f32 %v4870_v55, %v20104_v54  ;;  %v4695_v26 = vmul.f32 %v16950_v25, %v4620_v20  ;;  %v14016_v57 = vld [vmem:[#allocation38 + $0x19c] ss:$20 sps:$4 sm:$0xff]   ;;  %v4625_v60 = vadd.f32 %v17276_v63, %v20123_v58  ;;  %v20124_v55 = vld [vmem:[#allocation88_spill] sm:$0xff]  ;;  %v20132_v63 = vrot.slane %v17080_v41, 2 }
 0x952   :  { %v4880_v44 = vsel %vm1571_vm2, %v20120_v50, %v20119_v8  ;;  %v20122_v0 = vmov %v20119_v8  ;;  %6579 = vmatprep.subr.bf16.mxu0 %v14010_v22  ;;  %v20127_v8 = vrot.slane %v16862_v61, 2  ;;  %v20128_v50 = vld [vmem:[#allocation134_spill] sm:$0xff]  ;;  %v20130_v22 = vrot.slane %v17038_v47, 2 }
 0x953   :  { %v4890_v14 = vsel %vm1571_vm2, %v20122_v0, %v20121_v62  ;;  %v5008_v46 = vmul.f32 %v4880_v44, %v20124_v55  ;;  %v17375_v12 = vpack.c.bf16 %v5003_v7, %v4998_v3  ;;  %v20129_v23 = vrot.slane %v20128_v50, 2  ;;  %v13999_v7 = vld [vmem:[#allocation38 + $0x3a0] ss:$20 sps:$4 sm:$0xff]   ;;  %v14014_v50 = vld [vmem:[#allocation38 + $0x198] ss:$20 sps:$4 sm:$0xff]  }
 0x954   :  { %v5013_v9 = vmul.f32 %v4890_v14, %v20125_v27  ;;  %v20131_v20 = vmov %v20127_v8  ;;  %v20133_v58 = vrot.slane %v17024_v49, 2  ;;  %v4756_v44 = vadd.f32 %v16998_v35, %v4685_v31 }
 0x955   :  { %20126 = vst [vmem:[#allocation133_spill] sm:$0xff] %v17375_v12  ;;  %v4878_v11 = vsel %vm1571_vm2, %v20129_v23, %v20127_v8  ;;  %v4888_v62 = vsel %vm1571_vm2, %v20131_v20, %v20130_v22  ;;  %v4995_v23 = vsel %vm1571_vm2, 0.0, %v4865_v5  ;;  %v14007_v8 = vld [vmem:[#allocation38 + $0x37c] ss:$20 sps:$4 sm:$0xff]   ;;  %6580 = vmatpush2.bf16.msra.mxu0 %v14008_v52  ;;  %v20135_v12 = vrot.slane %v17127_v51, 2 }
 0x956   :  { %v4900_v14 = vsel %vm1571_vm2, %v20133_v58, %v20132_v63  ;;  %v17394_v0 = vpack.c.bf16 %v5013_v9, %v5008_v46  ;;  %v5007_v22 = vmul.f32 %v4878_v11, %v20124_v55  ;;  %v5012_v20 = vmul.f32 %v4888_v62, %v20125_v27  ;;  %6581 = vmatprep.subr.bf16.mxu0 %v14016_v57  ;;  %v14022_v62 = vld [vmem:[#allocation38 + $0x174] ss:$20 sps:$4 sm:$0xff]  }
 0x957   :  { %v4910_v58 = vsel %vm1571_vm2, %v20132_v63, %v20135_v12  ;;  %v20136_v3 = vrot.slane %v16931_v32, 2  ;;  %v4761_v31 = vadd.f32 %v16998_v35, %v4690_v45  ;;  %v17411_v52 = vpack.c.bf16 %v17352_v2, %v17292_v17  ;;  %6507 = vmatmul.mubr.bf16.vlgmr.msra.gmra.mxu1 %v17349_v53  ;;  %v14005_v45 = vld [vmem:[#allocation38 + $0x378] ss:$20 sps:$4 sm:$0xff]  }
 0x958   :  { %20134 = vst [vmem:[#allocation143_spill] sm:$0xff] %v17394_v0  ;;  %v4700_v11 = vmul.f32 %v16950_v25, %v4625_v60  ;;  %v4766_v12 = vadd.f32 %v16998_v35, %v4695_v26  ;;  %v17416_v63 = vpack.c.bf16 %v5012_v20, %v5007_v22  ;;  %v20139_v0 = vld [vmem:[#allocation92_spill] sm:$0xff]  ;;  %v17420_v61 = vmax.f32 %v4751_v56, 0.0  ;;  %6637 = vmatpush1.bf16.msra.mxu1 %v13999_v7 }
 0x959   :  { %v4874_v9 = vsel %vm1571_vm2, %v4865_v5, %v20136_v3  ;;  %20137 = vst [vmem:[#allocation88_spill] sm:$0xff] %v17411_v52  ;;  %v5018_v5 = vmul.f32 %v4900_v14, %v20139_v0  ;;  %v20140_v3 = vld [vmem:[#allocation95_spill] sm:$0xff]  ;;  %6516 = vmatprep.mubr.bf16.mxu1 %v20118_v29  ;;  %v5000_v57 = vmul.f32 %v4995_v23, %v20103_v15  ;;  %v20141_v60 = vrot.slane %v17069_v21, 2  ;;  %v14013_v14 = vld [vmem:[#allocation38 + $0x354] ss:$20 sps:$4 sm:$0xff]  }
 0x95a   :  { %20138 = vst [vmem:[#allocation91_spill] sm:$0xff] %v17416_v63  ;;  %v5023_v46 = vmul.f32 %v4910_v58, %v20140_v3  ;;  %v5005_v25 = vmul.f32 %v4874_v9, %v20104_v54  ;;  %v20142_v26 = vrot.slane %v17038_v47, 2  ;;  %v17430_v20 = vmax.f32 %v4756_v44, 0.0  ;;  %6638 = vmatprep.subr.bf16.mxu1 %v14007_v8  ;;  %6582 = vmatpush2.bf16.msra.mxu0 %v14014_v50  ;;  %v14020_v56 = vld [vmem:[#allocation38 + $0x170] ss:$20 sps:$4 sm:$0xff]  }
 0x95b   :  { %v20144_v58 = vrot.slane %v17115_v48, 2  ;;  %v20145_v15 = vmov %v20141_v60  ;;  %6583 = vmatprep.subr.bf16.mxu0 %v14022_v62  ;;  %v14028_v9 = vld [vmem:[#allocation38 + $0x14c] ss:$20 sps:$4 sm:$0xff]   ;;  %v20147_v8 = vrot.slane %v17183_v16, 2  ;;  %v20148_v50 = vrot.slane %v17127_v51, 2  ;;  %v20152_v62 = vld [vmem:[#allocation99_spill] sm:$0xff] }
 0x95c   :  { %v4898_v22 = vsel %vm1571_vm2, %v20142_v26, %v20141_v60  ;;  %v17432_v7 = vpack.c.bf16 %v5023_v46, %v5018_v5  ;;  %v17440_v63 = vpack.c.bf16 %v5005_v25, %v5000_v57  ;;  %v20149_v5 = vrot.slane %v17167_v39, 2  ;;  %6639 = vmatpush1.bf16.msra.mxu1 %v14005_v45  ;;  %v14026_v45 = vld [vmem:[#allocation38 + $0x148] ss:$20 sps:$4 sm:$0xff]  }
 0x95d   :  { %v4908_v54 = vsel %vm1571_vm2, %v20145_v15, %v20144_v58  ;;  %v5017_v23 = vmul.f32 %v4898_v22, %v20139_v0  ;;  %v4920_v46 = vsel %vm1571_vm2, %v20148_v50, %v20147_v8  ;;  %v20150_v60 = vmov %v20147_v8  ;;  %v20151_v58 = vld [vmem:[#allocation96_spill] sm:$0xff]  ;;  %6640 = vmatprep.subr.bf16.mxu1 %v14013_v14 }
 0x95e   :  { %20143 = vst [vmem:[#allocation134_spill] sm:$0xff] %v17432_v7  ;;  %20146 = vst [vmem:[#allocation92_spill] sm:$0xff] %v17440_v63  ;;  %v5022_v44 = vmul.f32 %v4908_v54, %v20140_v3  ;;  %v4930_v26 = vsel %vm1571_vm2, %v20150_v60, %v20149_v5  ;;  %v5028_v22 = vmul.f32 %v4920_v46, %v20151_v58  ;;  %v20153_v57 = vrot.slane %v17181_v34, 2  ;;  %v14011_v7 = vld [vmem:[#allocation38 + $0x350] ss:$20 sps:$4 sm:$0xff]  }
 0x95f   :  { %v5033_v15 = vmul.f32 %v4930_v26, %v20152_v62  ;;  %v20154_v25 = vrot.slane %v17115_v48, 2  ;;  %v20155_v63 = vrot.slane %v17233_v10, 2  ;;  %v20158_v60 = vrot.slane %v17225_v40, 2  ;;  %v14019_v48 = vld [vmem:[#allocation38 + $0x32c] ss:$20 sps:$4 sm:$0xff]   ;;  %6584 = vmatpush2.bf16.msra.mxu0 %v14020_v56  ;;  %6517 = vmatmul.mubr.bf16.gmra.mxu1 %v17411_v52 }
 0x960   :  { %v20156_v8 = vmov %v20153_v57  ;;  %v17465_v53 = vpack.c.bf16 %v5022_v44, %v5017_v23  ;;  %v20159_v26 = vrot.slane %v17167_v39, 2  ;;  %v20162_v44 = vrot.slane %v17280_v24, 2  ;;  %6585 = vmatprep.subr.bf16.mxu0 %v14028_v9  ;;  %6641 = vmatpush1.bf16.msra.mxu1 %v14011_v7  ;;  %v14041_v52 = vld [vmem:[#allocation38 + $0x620] ss:$20 sps:$4 sm:$0xff]  }
 0x961   :  { %v4918_v54 = vsel %vm1571_vm2, %v20154_v25, %v20153_v57  ;;  %v4928_v50 = vsel %vm1571_vm2, %v20156_v8, %v20155_v63  ;;  %v4905_v25 = vrot.slane %v17420_v61, 2  ;;  %v4771_v63 = vadd.f32 %v16998_v35, %v4700_v11  ;;  %6526 = vmatprep.mubr.bf16.mxu1 %v20118_v29  ;;  %6642 = vmatprep.subr.bf16.mxu1 %v14019_v48 }
 0x962   :  { %20157 = vst [vmem:[#allocation95_spill] sm:$0xff] %v17465_v53  ;;  %v5027_v46 = vmul.f32 %v4918_v54, %v20151_v58  ;;  %v5032_v5 = vmul.f32 %v4928_v50, %v20152_v62  ;;  %v17474_v57 = vsel %vm1571_vm2, %v20159_v26, %v20158_v60  ;;  %v17478_v23 = vpack.c.bf16 %v5033_v15, %v5028_v22  ;;  %v14043_v60 = vld [vmem:[#allocation38 + $0x624] ss:$20 sps:$4 sm:$0xff]  }
 0x963   :  { %20160 = vst [vmem:[#allocation96_spill] sm:$0xff] %v17474_v57  ;;  %v20163_v54 = vrot.slane %v17233_v10, 2  ;;  %v20166_v14 = vrot.slane %v17030_v28, 2  ;;  %v20167_v35 = vrot.slane %v16931_v32, 2  ;;  %v20168_v56 = vrot.slane %v17026_v19, 2  ;;  %v20172_v50 = vld [vmem:[#allocation135_spill] sm:$0xff]  ;;  %6586 = vmatpush2.bf16.msra.mxu0 %v14026_v45 }
 0x964   :  { %20161 = vst [vmem:[#allocation99_spill] sm:$0xff] %v17478_v23  ;;  %v17488_v26 = vpack.c.bf16 %v5032_v5, %v5027_v46  ;;  %v20170_v5 = vld [vmem:[#allocation144_spill] sm:$0xff]  ;;  %v20179_v57 = vrot.slane %v17292_v17, 2  ;;  %v20180_v23 = vrot.slane %v17274_v36, 2  ;;  %6717 = vmatprep.subr.bf16.mxu0 %v14043_v60  ;;  %v20185_v36 = vrot.slane %v17129_v1, 2 }
 0x965   :  { %v17485_v8 = vsel %vm1571_vm2, %v20163_v54, %v20162_v44  ;;  %v4884_v11 = vsel %vm1571_vm2, %v20167_v35, %v20166_v14  ;;  %v20169_v22 = vmov %v20166_v14  ;;  %v17500_v44 = vmax.f32 %v4761_v31, 0.0  ;;  %v14049_v60 = vld [vmem:[#allocation38 + $0x5fc] ss:$20 sps:$4 sm:$0xff]  }
 0x966   :  { %20164 = vst [vmem:[#allocation153_spill] sm:$0xff] %v17485_v8  ;;  %20165 = vst [vmem:[#allocation154_spill] sm:$0xff] %v17488_v26  ;;  %v4894_v15 = vsel %vm1571_vm2, %v20169_v22, %v20168_v56  ;;  %v5010_v9 = vmul.f32 %v4884_v11, %v20124_v55  ;;  %v20171_v54 = vrot.slane %v20170_v5, 2  ;;  %v20173_v8 = vrot.slane %v20172_v50, 2  ;;  %v14017_v26 = vld [vmem:[#allocation38 + $0x328] ss:$20 sps:$4 sm:$0xff]  }
 0x967   :  { %v5015_v46 = vmul.f32 %v4894_v15, %v20125_v27  ;;  %v17510_v35 = vmax.f32 %v4766_v12, 0.0  ;;  %v17515_v31 = vpack.c.bf16 %v17430_v20, %v17420_v61  ;;  %v20174_v56 = vld [vmem:[#allocation136_spill] sm:$0xff]  ;;  %v4886_v53 = vsel %vm1571_vm2, %v20180_v23, %v20179_v57  ;;  %6643 = vmatpush1.bf16.msra.mxu1 %v14017_v26 }
 0x968   :  { %v4882_v14 = vsel %vm1571_vm2, %v20173_v8, %v20171_v54  ;;  %v20175_v11 = vrot.slane %v20174_v56, 2  ;;  %v20176_v22 = vmov %v20171_v54  ;;  %v17523_v8 = vmax.f32 %v4771_v63, 0.0  ;;  %v14025_v12 = vld [vmem:[#allocation38 + $0x304] ss:$20 sps:$4 sm:$0xff]  }
 0x969   :  { %v5009_v50 = vmul.f32 %v4882_v14, %v20124_v55  ;;  %v17525_v7 = vpack.c.bf16 %v5015_v46, %v5010_v9  ;;  %v20182_v48 = vmov %v20179_v57  ;;  %v5011_v45 = vmul.f32 %v4886_v53, %v20124_v55  ;;  %6644 = vmatprep.subr.bf16.mxu1 %v14025_v12  ;;  %6527 = vmatmul.mubr.bf16.gmra.mxu1 %v17515_v31 }
 0x96a   :  { %v4892_v15 = vsel %vm1571_vm2, %v20176_v22, %v20175_v11  ;;  %20177 = vst [vmem:[#allocation144_spill] sm:$0xff] %v17523_v8  ;;  %v20181_v11 = vrot.slane %v17352_v2, 2  ;;  %v20183_v9 = vrot.slane %v17083_v33, 2  ;;  %v20184_v46 = vrot.slane %v17026_v19, 2  ;;  %6536 = vmatprep.mubr.bf16.mxu1 %v20118_v29 }
 0x96b   :  { %20178 = vst [vmem:[#allocation135_spill] sm:$0xff] %v17525_v7  ;;  %v5014_v54 = vmul.f32 %v4892_v15, %v20125_v27  ;;  %v4925_v55 = vrot.slane %v17500_v44, 2  ;;  %v20190_v7 = vrot.slane %v20174_v56, 2  ;;  %v4935_v26 = vrot.slane %v17510_v35, 2 }
 0x96c   :  { %v4896_v63 = vsel %vm1571_vm2, %v20182_v48, %v20181_v11  ;;  %v4904_v14 = vsel %vm1571_vm2, %v20184_v46, %v20183_v9  ;;  %v20186_v57 = vmov %v20183_v9  ;;  %v14023_v48 = vld [vmem:[#allocation38 + $0x300] ss:$20 sps:$4 sm:$0xff]   ;;  %v20188_v9 = vld [vmem:[#allocation119_spill] sm:$0xff]  ;;  %v20189_v46 = vrot.slane %v17078_v13, 2 }
 0x96d   :  { %v4914_v23 = vsel %vm1571_vm2, %v20186_v57, %v20185_v36  ;;  %v17549_v22 = vpack.c.bf16 %v5014_v54, %v5009_v50  ;;  %v5016_v15 = vmul.f32 %v4896_v63, %v20125_v27  ;;  %v5020_v11 = vmul.f32 %v4904_v14, %v20139_v0  ;;  %6588 = vmatmul.mubr.bf16.vlgmr.msra.gmra.mxu0 %v20188_v9  ;;  %v14031_v57 = vld [vmem:[#allocation38 + $0x2dc] ss:$20 sps:$4 sm:$0xff]  }
 0x96e   :  { %v5025_v53 = vmul.f32 %v4914_v23, %v20140_v3  ;;  %v4902_v36 = vsel %vm1571_vm2, %v20190_v7, %v20189_v46  ;;  %v20191_v50 = vrot.slane %v17142_v43, 2  ;;  %v20192_v27 = vmov %v20189_v46  ;;  %v20194_v23 = vld [vmem:[#allocation115_spill] sm:$0xff]  ;;  %6718 = vmatpush1.bf16.msra.mxu0 %v14041_v52  ;;  %v14055_v52 = vld [vmem:[#allocation38 + $0x5d4] ss:$20 sps:$4 sm:$0xff]   ;;  %6645 = vmatpush1.bf16.msra.mxu1 %v14023_v48 }
 0x96f   :  { %20187 = vst [vmem:[#allocation136_spill] sm:$0xff] %v17549_v22  ;;  %v20193_v63 = vrot.slane %v17352_v2, 2  ;;  %6597 = vmatprep.mubr.bf16.mxu0 %v20194_v23  ;;  %v17571_v22 = vpack.c.bf16 %v5016_v15, %v5011_v45  ;;  %v5019_v7 = vmul.f32 %v4902_v36, %v20139_v0  ;;  %v14047_v46 = vld [vmem:[#allocation38 + $0x5f8] ss:$20 sps:$4 sm:$0xff]   ;;  %v20196_v12 = vrot.slane %v17188_v6, 2  ;;  %6719 = vmatprep.subr.bf16.mxu0 %v14049_v60 }
 0x970   :  { %v4912_v54 = vsel %vm1571_vm2, %v20192_v27, %v20191_v50  ;;  %v17573_v9 = vpack.c.bf16 %v5025_v53, %v5020_v11  ;;  %v20195_v27 = vrot.slane %v17430_v20, 2  ;;  %v20197_v23 = vrot.slane %v17129_v1, 2  ;;  %6646 = vmatprep.subr.bf16.mxu1 %v14031_v57 }
 0x971   :  { %v4906_v14 = vsel %vm1571_vm2, %v20193_v63, %v4905_v25  ;;  %v5024_v50 = vmul.f32 %v4912_v54, %v20140_v3  ;;  %v4945_v15 = vrot.slane %v17523_v8, 2  ;;  %v20198_v53 = vrot.slane %v17176_v30, 2  ;;  %v14053_v54 = vld [vmem:[#allocation38 + $0x5d0] ss:$20 sps:$4 sm:$0xff]  }
 0x972   :  { %v4916_v63 = vsel %vm1571_vm2, %v4905_v25, %v20195_v27  ;;  %v5021_v17 = vmul.f32 %v4906_v14, %v20139_v0  ;;  %v4924_v45 = vsel %vm1571_vm2, %v20197_v23, %v20196_v12  ;;  %v20199_v25 = vmov %v20196_v12  ;;  %v14029_v14 = vld [vmem:[#allocation38 + $0x2d8] ss:$20 sps:$4 sm:$0xff]   ;;  %v14034_v12 = vld [vmem:[#allocation38 + $0x2b4] ss:$20 sps:$4 sm:$0xff]   ;;  %6720 = vmatpush1.bf16.msra.mxu0 %v14047_v46 }
 0x973   :  { %v5026_v11 = vmul.f32 %v4916_v63, %v20140_v3  ;;  %v4934_v0 = vsel %vm1571_vm2, %v20199_v25, %v20198_v53  ;;  %v5030_v36 = vmul.f32 %v4924_v45, %v20151_v58  ;;  %v17597_v23 = vpack.c.bf16 %v5024_v50, %v5019_v7  ;;  %6721 = vmatprep.subr.bf16.mxu0 %v14055_v52  ;;  %v20222_v52 = vld [vmem:[#allocation147_spill] sm:$0xff] }
 0x974   :  { %v5035_v60 = vmul.f32 %v4934_v0, %v20152_v62  ;;  %v20201_v3 = vrot.slane %v17216_v4, 2  ;;  %v20202_v27 = vrot.slane %v17142_v43, 2  ;;  %v20203_v45 = vrot.slane %v17235_v38, 2  ;;  %6647 = vmatpush1.bf16.msra.mxu1 %v14029_v14 }
 0x975   :  { %20200 = vst [vmem:[#allocation155_spill] sm:$0xff] %v17597_v23  ;;  %v17605_v53 = vpack.c.bf16 %v5026_v11, %v5021_v17  ;;  %v20205_v50 = vrot.slane %v17430_v20, 2  ;;  %v4936_v17 = vsel %vm1571_vm2, %v4925_v55, %v4935_v26  ;;  %v20210_v46 = vrot.slane %v17298_v59, 2  ;;  %6648 = vmatprep.subr.bf16.mxu1 %v14034_v12 }
 0x976   :  { %v4922_v63 = vsel %vm1571_vm2, %v20202_v27, %v20201_v3  ;;  %v20204_v48 = vmov %v20201_v3  ;;  %v17616_v23 = vpack.c.bf16 %v5035_v60, %v5030_v36  ;;  %v14061_v3 = vld [vmem:[#allocation38 + $0x5ac] ss:$20 sps:$4 sm:$0xff]   ;;  %v5036_v27 = vmul.f32 %v4936_v17, %v20152_v62  ;;  %6722 = vmatpush1.bf16.msra.mxu0 %v14053_v54 }
 0x977   :  { %v4932_v25 = vsel %vm1571_vm2, %v20204_v48, %v20203_v45  ;;  %v5029_v7 = vmul.f32 %v4922_v63, %v20151_v58  ;;  %v4926_v0 = vsel %vm1571_vm2, %v20205_v50, %v4925_v55  ;;  %v20207_v63 = vrot.slane %v17227_v42, 2  ;;  %v20214_v50 = vld [vmem:[#allocation121_spill] sm:$0xff]  ;;  %6723 = vmatprep.subr.bf16.mxu0 %v14061_v3  ;;  %v20224_v54 = vld [vmem:[#allocation112_spill] sm:$0xff] }
 0x978   :  { %20206 = vst [vmem:[#allocation156_spill] sm:$0xff] %v17616_v23  ;;  %v5034_v57 = vmul.f32 %v4932_v25, %v20152_v62  ;;  %v5031_v11 = vmul.f32 %v4926_v0, %v20151_v58  ;;  %v20208_v45 = vrot.slane %v17176_v30, 2  ;;  %v20211_v36 = vrot.slane %v17235_v38, 2  ;;  %v14032_v25 = vld [vmem:[#allocation38 + $0x2b0] ss:$20 sps:$4 sm:$0xff]   ;;  %6598 = vmatmul.mubr.bf16.gmra.mxu0 %v20214_v50 }
 0x979   :  { %v17637_v58 = vsel %vm1571_vm2, %v4935_v26, %v4945_v15  ;;  %v14037_v26 = vld [vmem:[#allocation38 + $0x28c] ss:$20 sps:$4 sm:$0xff]   ;;  %v20216_v15 = vld [vmem:[#allocation123_spill] sm:$0xff]  ;;  %v20218_v14 = vrot.slane %v16958_v18, 6  ;;  %v17662_v12 = vpack.c.bf16 %v17523_v8, %v17523_v8  ;;  %v20219_v62 = vrot.slane %v17030_v28, 6  ;;  %6649 = vmatpush1.bf16.msra.mxu1 %v14032_v25 }
 0x97a   :  { %v17627_v48 = vsel %vm1571_vm2, %v20208_v45, %v20207_v63  ;;  %v17634_v60 = vsel %vm1571_vm2, %v20211_v36, %v20210_v46  ;;  %20213 = vst [vmem:[#allocation159_spill] sm:$0xff] %v17637_v58  ;;  %v17643_v0 = vpack.c.bf16 %v5034_v57, %v5029_v7  ;;  %v17648_v63 = vpack.c.bf16 %v17510_v35, %v17500_v44  ;;  %v14059_v55 = vld [vmem:[#allocation38 + $0x5a8] ss:$20 sps:$4 sm:$0xff]  }
 0x97b   :  { %20209 = vst [vmem:[#allocation157_spill] sm:$0xff] %v17627_v48  ;;  %20212 = vst [vmem:[#allocation158_spill] sm:$0xff] %v17634_v60  ;;  %6607 = vmatprep.mubr.bf16.mxu0 %v20216_v15  ;;  %v17651_v45 = vpack.c.bf16 %v5036_v27, %v5031_v11  ;;  %v20217_v46 = vrot.slane %v16931_v32, 6  ;;  %v20221_v7 = vld [vmem:[#allocation89_spill] sm:$0xff]  ;;  %v20223_v17 = vrot.slane %v20222_v52, 6  ;;  %v20225_v60 = vrot.slane %v20224_v54, 6  ;;  %6650 = vmatprep.subr.bf16.mxu1 %v14037_v26 }
 0x97c   :  { %20215 = vst [vmem:[#allocation121_spill] sm:$0xff] %v17643_v0  ;;  %6537 = vmatmul.mubr.bf16.gmra.mxu1 %v17648_v63  ;;  %v20229_v48 = vrot.slane %v17026_v19, 6  ;;  %v20230_v54 = vrot.slane %v17030_v28, 6  ;;  %v20232_v23 = vrot.slane %v17083_v33, 6  ;;  %6724 = vmatpush1.bf16.msra.mxu0 %v14059_v55  ;;  %v20235_v58 = vld [vmem:[#allocation93_spill] sm:$0xff] }
 0x97d   :  { %v5053_v36 = vsel %vm1653_vm3, %v20218_v14, %v20217_v46  ;;  %v20220_v11 = vmov %v20217_v46  ;;  %v14067_v46 = vld [vmem:[#allocation38 + $0x584] ss:$20 sps:$4 sm:$0xff]   ;;  %v5047_v0 = vsel %vm1653_vm3, %v20225_v60, %v20223_v17  ;;  %6546 = vmatprep.mubr.bf16.mxu1 %v20118_v29  ;;  %v20228_v3 = vmov %v20223_v17 }
 0x97e   :  { %v5064_v27 = vsel %vm1653_vm3, %v20220_v11, %v20219_v62  ;;  %v5180_v14 = vmul.f32 %v5053_v36, %v20108_v37  ;;  %v14035_v62 = vld [vmem:[#allocation38 + $0x288] ss:$20 sps:$4 sm:$0xff]   ;;  %v20226_v11 = vld [vmem:[#allocation114_spill] sm:$0xff]  ;;  %v5074_v60 = vsel %vm1653_vm3, %v20230_v54, %v20229_v48  ;;  %v14040_v17 = vld [vmem:[#allocation38 + $0x4e4] ss:$20 sps:$4 sm:$0xff]   ;;  %v20233_v52 = vmov %v20229_v48  ;;  %6725 = vmatprep.subr.bf16.mxu0 %v14067_v46 }
 0x97f   :  { %v5185_v57 = vmul.f32 %v5064_v27, %v20221_v7  ;;  %v20227_v18 = vrot.slane %v20226_v11, 6  ;;  %v5178_v27 = vmul.f32 %v5047_v0, %v20108_v37  ;;  %v14065_v0 = vld [vmem:[#allocation38 + $0x580] ss:$20 sps:$4 sm:$0xff]   ;;  %v20236_v48 = vrot.slane %v17024_v49, 6  ;;  %v14073_v54 = vld [vmem:[#allocation38 + $0x55c] ss:$20 sps:$4 sm:$0xff]   ;;  %6651 = vmatpush1.bf16.msra.mxu1 %v14035_v62 }
 0x980   :  { %v20237_v26 = vrot.slane %v20226_v11, 6  ;;  %6652 = vmatprep.subr.bf16.mxu1 %v14040_v17  ;;  %v20250_v62 = vld [vmem:[#allocation140_spill] sm:$0xff]  ;;  %6726 = vmatpush1.bf16.msra.mxu0 %v14065_v0  ;;  %v20257_v0 = vrot.slane %v17188_v6, 6 }
 0x981   :  { %v5060_v36 = vsel %vm1653_vm3, %v20228_v3, %v20227_v18  ;;  %v17691_v25 = vpack.c.bf16 %v5185_v57, %v5180_v14  ;;  %v5084_v18 = vsel %vm1653_vm3, %v20233_v52, %v20232_v23  ;;  %v20234_v3 = vld [vmem:[#allocation90_spill] sm:$0xff]  ;;  %v20239_v14 = vmov %v20236_v48  ;;  %6727 = vmatprep.subr.bf16.mxu0 %v14073_v54  ;;  %v14044_v54 = vld [vmem:[#allocation38 + $0x4b8] ss:$20 sps:$4 sm:$0xff]  }
 0x982   :  { %v5183_v32 = vmul.f32 %v5060_v36, %v20221_v7  ;;  %v5190_v37 = vmul.f32 %v5074_v60, %v20234_v3  ;;  %v5195_v28 = vmul.f32 %v5084_v18, %v20235_v58  ;;  %v5070_v57 = vsel %vm1653_vm3, %v20237_v26, %v20236_v48 }
 0x983   :  { %20231 = vst [vmem:[#allocation123_spill] sm:$0xff] %v17691_v25  ;;  %v20238_v7 = vrot.slane %v17080_v41, 6  ;;  %v20240_v23 = vrot.slane %v20174_v56, 6  ;;  %v20241_v36 = vrot.slane %v20170_v5, 6  ;;  %v5188_v11 = vmul.f32 %v5070_v57, %v20234_v3  ;;  %v14038_v5 = vld [vmem:[#allocation38 + $0x4e0] ss:$20 sps:$4 sm:$0xff]  }
 0x984   :  { %v17716_v60 = vpack.c.bf16 %v5183_v32, %v5178_v27  ;;  %v20243_v18 = vrot.slane %v17078_v13, 6  ;;  %v17727_v46 = vpack.c.bf16 %v5195_v28, %v5190_v37  ;;  %v20252_v37 = vrot.slane %v17069_v21, 6  ;;  %6547 = vmatmul.mubr.bf16.gmra.mxu1 %v17662_v12  ;;  %v20264_v57 = vld [vmem:[#allocation97_spill] sm:$0xff] }
 0x985   :  { %v5080_v19 = vsel %vm1653_vm3, %v20239_v14, %v20238_v7  ;;  %v5072_v55 = vsel %vm1653_vm3, %v20241_v36, %v20240_v23  ;;  %v20244_v49 = vmov %v20240_v23  ;;  %v20245_v7 = vld [vmem:[#allocation122_spill] sm:$0xff]  ;;  %v20249_v23 = vrot.slane %v17038_v47, 6  ;;  %6653 = vmatpush2.bf16.msra.mxu1 %v14038_v5 }
 0x986   :  { %20242 = vst [vmem:[#allocation89_spill] sm:$0xff] %v17716_v60  ;;  %v5193_v52 = vmul.f32 %v5080_v19, %v20235_v58  ;;  %v5082_v48 = vsel %vm1653_vm3, %v20244_v49, %v20243_v18  ;;  %6608 = vmatmul.mubr.bf16.gmra.mxu0 %v20245_v7  ;;  %20246 = vst [vmem:[#allocation147_spill] sm:$0xff] %v17727_v46  ;;  %v5189_v32 = vmul.f32 %v5072_v55, %v20234_v3  ;;  %v14046_v14 = vld [vmem:[#allocation38 + $0x4bc] ss:$20 sps:$4 sm:$0xff]   ;;  %v14071_v49 = vld [vmem:[#allocation38 + $0x558] ss:$20 sps:$4 sm:$0xff]  }
 0x987   :  { %v5194_v27 = vmul.f32 %v5082_v48, %v20235_v58  ;;  %v20247_v19 = vld [vmem:[#allocation118_spill] sm:$0xff]  ;;  %v20251_v36 = vrot.slane %v20250_v62, 6  ;;  %v20253_v28 = vmov %v20249_v23  ;;  %v20256_v62 = vrot.slane %v17083_v33, 6  ;;  %6654 = vmatprep.subr.bf16.mxu1 %v14046_v14  ;;  %6728 = vmatpush1.bf16.msra.mxu0 %v14071_v49 }
 0x988   :  { %6617 = vmatprep.mubr.bf16.mxu0 %v20247_v19  ;;  %v17733_v56 = vpack.c.bf16 %v5193_v52, %v5188_v11  ;;  %v5078_v55 = vsel %vm1653_vm3, %v20253_v28, %v20252_v37  ;;  %v20255_v52 = vrot.slane %v17129_v1, 6  ;;  %v14079_v47 = vld [vmem:[#allocation38 + $0x534] ss:$20 sps:$4 sm:$0xff]   ;;  %v20260_v28 = vrot.slane %v17127_v51, 6  ;;  %v14285_v60 = vld [vmem:[#allocation37 + $0x30] ss:$20 sps:$4 sm:$0xff]  }
 0x989   :  { %v5068_v18 = vsel %vm1653_vm3, %v20251_v36, %v20249_v23  ;;  %v17745_v17 = vpack.c.bf16 %v5194_v27, %v5189_v32  ;;  %v5192_v11 = vmul.f32 %v5078_v55, %v20235_v58  ;;  %v20261_v33 = vrot.slane %v17080_v41, 6  ;;  %v14052_v41 = vld [vmem:[#allocation38 + $0x494] ss:$20 sps:$4 sm:$0xff]   ;;  %6729 = vmatprep.subr.bf16.mxu0 %v14079_v47  ;;  %6655 = vmatpush2.bf16.msra.mxu1 %v14044_v54  ;;  %v14050_v47 = vld [vmem:[#allocation38 + $0x490] ss:$20 sps:$4 sm:$0xff]  }
 0x98a   :  { %20248 = vst [vmem:[#allocation112_spill] sm:$0xff] %v17733_v56  ;;  %v5187_v48 = vmul.f32 %v5068_v18, %v20234_v3  ;;  %v5094_v23 = vsel %vm1653_vm3, %v20256_v62, %v20255_v52  ;;  %v20258_v32 = vmov %v20255_v52  ;;  %v20259_v18 = vld [vmem:[#allocation94_spill] sm:$0xff]  ;;  %v20267_v5 = vrot.slane %v17142_v43, 6  ;;  %6656 = vmatprep.subr.bf16.mxu1 %v14052_v41 }
 0x98b   :  { %20254 = vst [vmem:[#allocation114_spill] sm:$0xff] %v17745_v17  ;;  %v5104_v27 = vsel %vm1653_vm3, %v20258_v32, %v20257_v0  ;;  %v5200_v37 = vmul.f32 %v5094_v23, %v20259_v18  ;;  %v5090_v55 = vsel %vm1653_vm3, %v20261_v33, %v20260_v28  ;;  %v20262_v62 = vld [vmem:[#allocation150_spill] sm:$0xff]  ;;  %v20265_v0 = vrot.slane %v17183_v16, 6 }
 0x98c   :  { %6668 = vmatprep.mubr.bf16.mxu1 %v20262_v62  ;;  %v17769_v26 = vpack.c.bf16 %v5192_v11, %v5187_v48  ;;  %v5205_v1 = vmul.f32 %v5104_v27, %v20264_v57  ;;  %v20266_v23 = vmov %v20260_v28  ;;  %v5198_v28 = vmul.f32 %v5090_v55, %v20259_v18  ;;  %v14294_v56 = vld [vmem:[#allocation37 + $0x4e0] ss:$20 sps:$4 sm:$0xff]  }
 0x98d   :  { %v5100_v32 = vsel %vm1653_vm3, %v20266_v23, %v20265_v0  ;;  %v20268_v36 = vrot.slane %v17078_v13, 6  ;;  %v20269_v11 = vrot.slane %v17216_v4, 6  ;;  %v20270_v27 = vmov %v20267_v5  ;;  %v14077_v0 = vld [vmem:[#allocation38 + $0x530] ss:$20 sps:$4 sm:$0xff]   ;;  %6657 = vmatpush2.bf16.msra.mxu1 %v14050_v47 }
 0x98e   :  { %20263 = vst [vmem:[#allocation90_spill] sm:$0xff] %v17769_v26  ;;  %v5203_v33 = vmul.f32 %v5100_v32, %v20264_v57  ;;  %v17789_v14 = vpack.c.bf16 %v5205_v1, %v5200_v37  ;;  %v20272_v32 = vld [vmem:[#allocation126_spill] sm:$0xff]  ;;  %v20274_v13 = vrot.slane %v17069_v21, 6  ;;  %v20276_v43 = vrot.slane %v17181_v34, 6  ;;  %6730 = vmatpush1.bf16.msra.mxu0 %v14077_v0  ;;  %v14064_v47 = vld [vmem:[#allocation38 + $0x444] ss:$20 sps:$4 sm:$0xff]  }
 0x98f   :  { %v5092_v48 = vsel %vm1653_vm3, %v20268_v36, %v20267_v5  ;;  %v5102_v51 = vsel %vm1653_vm3, %v20270_v27, %v20269_v11  ;;  %v20273_v52 = vrot.slane %v20272_v32, 6  ;;  %v14085_v5 = vld [vmem:[#allocation38 + $0x50c] ss:$20 sps:$4 sm:$0xff]   ;;  %v20279_v11 = vrot.slane %v17188_v6, 6 }
 0x990   :  { %20271 = vst [vmem:[#allocation93_spill] sm:$0xff] %v17789_v14  ;;  %v5199_v55 = vmul.f32 %v5092_v48, %v20259_v18  ;;  %v5204_v23 = vmul.f32 %v5102_v51, %v20264_v57  ;;  %v17798_v26 = vpack.c.bf16 %v5203_v33, %v5198_v28  ;;  %v20278_v48 = vrot.slane %v17176_v30, 6  ;;  %v20280_v28 = vld [vmem:[#allocation139_spill] sm:$0xff]  ;;  %6731 = vmatprep.subr.bf16.mxu0 %v14085_v5 }
 0x991   :  { %v5088_v36 = vsel %vm1653_vm3, %v20274_v13, %v20273_v52  ;;  %v20277_v49 = vmov %v20273_v52  ;;  %v5075_v52 = vrot.slane %v17352_v2, 6  ;;  %6618 = vmatmul.mubr.bf16.gmra.mxu0 %v20280_v28  ;;  %v20282_v51 = vrot.slane %v17227_v42, 6  ;;  %v20285_v2 = vld [vmem:[#allocation98_spill] sm:$0xff]  ;;  %v20368_v42 = vld [vmem:[#allocation156_spill] sm:$0xff] }
 0x992   :  { %20275 = vst [vmem:[#allocation122_spill] sm:$0xff] %v17798_v26  ;;  %v5098_v37 = vsel %vm1653_vm3, %v20277_v49, %v20276_v43  ;;  %v5197_v1 = vmul.f32 %v5088_v36, %v20259_v18  ;;  %v5114_v21 = vsel %vm1653_vm3, %v20279_v11, %v20278_v48  ;;  %v17813_v33 = vpack.c.bf16 %v5204_v23, %v5199_v55  ;;  %v14058_v36 = vld [vmem:[#allocation38 + $0x46c] ss:$20 sps:$4 sm:$0xff]   ;;  %v14083_v11 = vld [vmem:[#allocation38 + $0x508] ss:$20 sps:$4 sm:$0xff]  }
 0x993   :  { %v5202_v27 = vmul.f32 %v5098_v37, %v20264_v57  ;;  %v20283_v32 = vmov %v20278_v48  ;;  %v5085_v6 = vrot.slane %v17420_v61, 6  ;;  %v20284_v43 = vld [vmem:[#allocation128_spill] sm:$0xff]  ;;  %v5210_v54 = vmul.f32 %v5114_v21, %v20285_v2  ;;  %v20286_v49 = vld [vmem:[#allocation101_spill] sm:$0xff]  ;;  %6658 = vmatprep.subr.bf16.mxu1 %v14058_v36  ;;  %6732 = vmatpush1.bf16.msra.mxu0 %v14083_v11 }
 0x994   :  { %20281 = vst [vmem:[#allocation118_spill] sm:$0xff] %v17813_v33  ;;  %v5124_v13 = vsel %vm1653_vm3, %v20283_v32, %v20282_v51  ;;  %6627 = vmatprep.mubr.bf16.mxu0 %v20284_v43  ;;  %v20287_v55 = vrot.slane %v17167_v39, 6  ;;  %v20288_v23 = vrot.slane %v17183_v16, 6  ;;  %v5095_v30 = vrot.slane %v17430_v20, 6  ;;  %v14290_v26 = vld [vmem:[#allocation37 + $0x28c] ss:$20 sps:$4 sm:$0xff]  }
 0x995   :  { %v5215_v48 = vmul.f32 %v5124_v13, %v20286_v49  ;;  %v17831_v51 = vpack.c.bf16 %v5202_v27, %v5197_v1  ;;  %v20290_v61 = vrot.slane %v17225_v40, 6  ;;  %v20292_v32 = vrot.slane %v17235_v38, 6  ;;  %v14278_v40 = vld [vmem:[#allocation37 + $0x2dc] ss:$20 sps:$4 sm:$0xff]  }
 0x996   :  { %v5110_v37 = vsel %vm1653_vm3, %v20288_v23, %v20287_v55  ;;  %v20291_v41 = vmov %v20287_v55  ;;  %v20293_v13 = vrot.slane %v17216_v4, 6  ;;  %v14086_v55 = vld [vmem:[#allocation38 + $0x4e8] ss:$20 sps:$4 sm:$0xff]   ;;  %v20295_v1 = vrot.slane %v17298_v59, 6 }
 0x997   :  { %20289 = vst [vmem:[#allocation140_spill] sm:$0xff] %v17831_v51  ;;  %v5120_v21 = vsel %vm1653_vm3, %v20291_v41, %v20290_v61  ;;  %v17843_v23 = vpack.c.bf16 %v5215_v48, %v5210_v54  ;;  %v5208_v20 = vmul.f32 %v5110_v37, %v20285_v2  ;;  %v20296_v39 = vmov %v20292_v32  ;;  %v14056_v61 = vld [vmem:[#allocation38 + $0x468] ss:$20 sps:$4 sm:$0xff]  }
 0x998   :  { %v5112_v16 = vsel %vm1653_vm3, %v20293_v13, %v20292_v32  ;;  %v5213_v0 = vmul.f32 %v5120_v21, %v20286_v49  ;;  %v5122_v27 = vsel %vm1653_vm3, %v20296_v39, %v20295_v1  ;;  %v20297_v5 = vrot.slane %v17233_v10, 6  ;;  %12728 = vmatprep.subr.bf16.mxu0 %v14086_v55  ;;  %6659 = vmatpush2.bf16.msra.mxu1 %v14056_v61 }
 0x999   :  { %20294 = vst [vmem:[#allocation94_spill] sm:$0xff] %v17843_v23  ;;  %v5209_v4 = vmul.f32 %v5112_v16, %v20285_v2  ;;  %v5214_v41 = vmul.f32 %v5122_v27, %v20286_v49  ;;  %v20298_v54 = vrot.slane %v17181_v34, 6  ;;  %v20299_v37 = vrot.slane %v17280_v24, 6  ;;  %6660 = vmatprep.subr.bf16.mxu1 %v14064_v47  ;;  %v14074_v47 = vld [vmem:[#allocation38 + $0x3f0] ss:$20 sps:$4 sm:$0xff]  }
 0x99a   :  { %v20300_v21 = vmov %v20297_v5  ;;  %v5105_v32 = vrot.slane %v17500_v44, 6  ;;  %v17865_v13 = vpack.c.bf16 %v5213_v0, %v5208_v20  ;;  %v5115_v34 = vrot.slane %v17510_v35, 6  ;;  %v14062_v0 = vld [vmem:[#allocation38 + $0x440] ss:$20 sps:$4 sm:$0xff]  }
 0x99b   :  { %v5108_v48 = vsel %vm1653_vm3, %v20298_v54, %v20297_v5  ;;  %v5118_v38 = vsel %vm1653_vm3, %v20300_v21, %v20299_v37  ;;  %v19885_v39 = vrot.slane %v17523_v8, 6  ;;  %v17871_v27 = vpack.c.bf16 %v5214_v41, %v5209_v4  ;;  %v20304_v5 = vld [vmem:[#allocation152_spill] sm:$0xff]  ;;  %v20306_v54 = vld [vmem:[#allocation86_spill] sm:$0xff] }
 0x99c   :  { %20301 = vst [vmem:[#allocation150_spill] sm:$0xff] %v17865_v13  ;;  %v5207_v16 = vmul.f32 %v5108_v48, %v20285_v2  ;;  %v5212_v1 = vmul.f32 %v5118_v38, %v20286_v49  ;;  %v20305_v44 = vrot.slane %v20304_v5, 6  ;;  %v5086_v20 = vsel %vm1653_vm3, %v5075_v52, %v5085_v6  ;;  %6628 = vmatmul.mubr.bf16.gmra.mxu0 %v20306_v54  ;;  %v14070_v48 = vld [vmem:[#allocation38 + $0x41c] ss:$20 sps:$4 sm:$0xff]  }
 0x99d   :  { %20302 = vst [vmem:[#allocation97_spill] sm:$0xff] %v17871_v27  ;;  %6749 = vmatprep.mubr.bf16.mxu0 %v20118_v29  ;;  %v5196_v11 = vmul.f32 %v5086_v20, %v20235_v58  ;;  %v5096_v55 = vsel %vm1653_vm3, %v5085_v6, %v5095_v30  ;;  %v5106_v4 = vsel %vm1653_vm3, %v5095_v30, %v5105_v32  ;;  %v14068_v6 = vld [vmem:[#allocation38 + $0x418] ss:$20 sps:$4 sm:$0xff]   ;;  %v14087_v5 = vld [vmem:[#allocation38 + $0x268] ss:$20 sps:$4 sm:$0xff]   ;;  %v20311_v20 = vld [vmem:[#allocation88_spill] sm:$0xff] }
 0x99e   :  { %v17873_v10 = vpack.c.bf16 %v5212_v1, %v5207_v16  ;;  %v5076_v36 = vsel %vm1653_vm3, %v20305_v44, %v5075_v52  ;;  %v5201_v41 = vmul.f32 %v5096_v55, %v20259_v18  ;;  %v5206_v52 = vmul.f32 %v5106_v4, %v20264_v57  ;;  %6661 = vmatpush2.bf16.msra.mxu1 %v14062_v0  ;;  %v14076_v18 = vld [vmem:[#allocation38 + $0x3f4] ss:$20 sps:$4 sm:$0xff]   ;;  %v20310_v16 = vld [vmem:[#allocation87_spill] sm:$0xff]  ;;  %v14082_v1 = vld [vmem:[#allocation38 + $0x3cc] ss:$20 sps:$4 sm:$0xff]  }
 0x99f   :  { %v5191_v35 = vmul.f32 %v5076_v36, %v20234_v3  ;;  %v5116_v61 = vsel %vm1653_vm3, %v5105_v32, %v5115_v34  ;;  %v5126_v3 = vsel %vm1653_vm3, %v5115_v34, %v19885_v39  ;;  %6662 = vmatprep.subr.bf16.mxu1 %v14070_v48  ;;  %v14088_v57 = vld [vmem:[#allocation38 + $0x3a8] ss:$20 sps:$4 sm:$0xff]   ;;  %v14090_v32 = vld [vmem:[#allocation38 + $0x4c0] ss:$20 sps:$4 sm:$0xff]   ;;  %v14096_v44 = vld [vmem:[#allocation38 + $0x358] ss:$20 sps:$4 sm:$0xff]  }
 0x9a0   :  { %20303 = vst [vmem:[#allocation126_spill] sm:$0xff] %v17873_v10  ;;  %v5211_v21 = vmul.f32 %v5116_v61, %v20285_v2  ;;  %v5216_v58 = vmul.f32 %v5126_v3, %v20286_v49  ;;  %v17895_v38 = vpack.c.bf16 %v5206_v52, %v5201_v41  ;;  %v14092_v2 = vld [vmem:[#allocation38 + $0x380] ss:$20 sps:$4 sm:$0xff]   ;;  %v14094_v49 = vld [vmem:[#allocation38 + $0x498] ss:$20 sps:$4 sm:$0xff]  }
 0x9a1   :  { %v17891_v37 = vpack.c.bf16 %v5196_v11, %v5191_v35  ;;  %v14080_v34 = vld [vmem:[#allocation38 + $0x3c8] ss:$20 sps:$4 sm:$0xff]   ;;  %v14098_v36 = vld [vmem:[#allocation38 + $0x470] ss:$20 sps:$4 sm:$0xff]   ;;  %v14091_v35 = vld [vmem:[#allocation38 + $0x240] ss:$20 sps:$4 sm:$0xff]  }
 0x9a2   :  { %20308 = vst [vmem:[#allocation128_spill] sm:$0xff] %v17895_v38  ;;  %v17897_v30 = vpack.c.bf16 %v5216_v58, %v5211_v21  ;;  %6663 = vmatpush2.bf16.msra.mxu1 %v14068_v6  ;;  %v14089_v0 = vld [vmem:[#allocation38 + $0x128] ss:$20 sps:$4 sm:$0xff]   ;;  %v14100_v48 = vld [vmem:[#allocation38 + $0x330] ss:$20 sps:$4 sm:$0xff]  }
 0x9a3   :  { %20307 = vst [vmem:[#allocation139_spill] sm:$0xff] %v17891_v37  ;;  %6664 = vmatprep.subr.bf16.mxu1 %v14076_v18  ;;  %v20312_v11 = vld [vmem:[#allocation120_spill] sm:$0xff]  ;;  %v14102_v55 = vld [vmem:[#allocation38 + $0x448] ss:$20 sps:$4 sm:$0xff]   ;;  %v14095_v52 = vld [vmem:[#allocation38 + $0x218] ss:$20 sps:$4 sm:$0xff]  }
 0x9a4   :  { %20309 = vst [vmem:[#allocation98_spill] sm:$0xff] %v17897_v30  ;;  %6750 = vmatmul.mubr.bf16.vlgmr.msra.gmra.mxu0 %v20310_v16  ;;  %v20313_v4 = vld [vmem:[#allocation116_spill] sm:$0xff]  ;;  %v14104_v61 = vld [vmem:[#allocation38 + $0x308] ss:$20 sps:$4 sm:$0xff]   ;;  %v14097_v21 = vld [vmem:[#allocation38 + $0xd8] ss:$20 sps:$4 sm:$0xff]  }
 0x9a5   :  { %6759 = vmatprep.mubr.bf16.mxu0 %v20118_v29  ;;  %12729 = vmatpush3.bf16.msra.mxu0 %v14088_v57  ;;  %v14093_v41 = vld [vmem:[#allocation38 + $0x100] ss:$20 sps:$4 sm:$0xff]   ;;  %v14099_v58 = vld [vmem:[#allocation38 + $0x1f0] ss:$20 sps:$4 sm:$0xff]   ;;  %v20314_v18 = vld [vmem:[#allocation125_spill] sm:$0xff] }
 0x9a6   :  { %12730 = vmatprep.subr.bf16.mxu0 %v14090_v32  ;;  %6665 = vmatpush2.bf16.msra.mxu1 %v14074_v47  ;;  %v14106_v3 = vld [vmem:[#allocation38 + $0x420] ss:$20 sps:$4 sm:$0xff]   ;;  %v14110_v57 = vld [vmem:[#allocation38 + $0x3f8] ss:$20 sps:$4 sm:$0xff]   ;;  %v14101_v47 = vld [vmem:[#allocation38 + $0xb0] ss:$20 sps:$4 sm:$0xff]  }
 0x9a7   :  { %6666 = vmatprep.subr.bf16.mxu1 %v14082_v1  ;;  %v14108_v6 = vld [vmem:[#allocation38 + $0x2e0] ss:$20 sps:$4 sm:$0xff]   ;;  %v20315_v32 = vld [vmem:[#allocation117_spill] sm:$0xff] }
 0x9a8   :  { %v14103_v1 = vld [vmem:[#allocation38 + $0x1c8] ss:$20 sps:$4 sm:$0xff]   ;;  %v20340_v39 = vld [vmem:[#allocation92_spill] sm:$0xff]  ;;  %v14225_v37 = vld [vmem:[#allocation37 + $0x438] ss:$20 sps:$4 sm:$0xff]  }
 0x9a9   :  { %12731 = vmatpush3.bf16.msra.mxu0 %v14092_v2  ;;  %v14112_v2 = vld [vmem:[#allocation38 + $0x2b8] ss:$20 sps:$4 sm:$0xff]   ;;  %v14219_v30 = vld [vmem:[#allocation37 + $0x460] ss:$20 sps:$4 sm:$0xff]  }
 0x9aa   :  { %12732 = vmatprep.subr.bf16.mxu0 %v14094_v49  ;;  %6667 = vmatpush2.bf16.msra.mxu1 %v14080_v34  ;;  %v14114_v49 = vld [vmem:[#allocation38 + $0x3d0] ss:$20 sps:$4 sm:$0xff]   ;;  %v14105_v34 = vld [vmem:[#allocation38 + $0x88] ss:$20 sps:$4 sm:$0xff]  }
 0x9ab   :  { %12682 = vmatprep.subr.bf16.mxu1 %v14087_v5  ;;  %v14107_v5 = vld [vmem:[#allocation38 + $0x1a0] ss:$20 sps:$4 sm:$0xff]  }
 0x9ac   :  { %6760 = vmatmul.mubr.bf16.gmra.mxu0 %v20311_v20  ;;  %v14263_v10 = vld [vmem:[#allocation37 + $0xd4] ss:$20 sps:$4 sm:$0xff]  }
 0x9ad   :  { %6769 = vmatprep.mubr.bf16.mxu0 %v20118_v29  ;;  %12733 = vmatpush3.bf16.msra.mxu0 %v14096_v44  ;;  %v14116_v44 = vld [vmem:[#allocation38 + $0x290] ss:$20 sps:$4 sm:$0xff]  }
 0x9ae   :  { %6669 = vmatmul.mubr.bf16.vlgmr.msra.gmra.mxu1 %v20312_v11  ;;  %12734 = vmatprep.subr.bf16.mxu0 %v14098_v36  ;;  %v20316_v36 = vld [vmem:[#allocation127_spill] sm:$0xff] }
 0x9af   :  { %6678 = vmatprep.mubr.bf16.mxu1 %v20313_v4  ;;  %12683 = vmatpush3.bf16.msra.mxu1 %v14089_v0  ;;  %v14120_v0 = vld [vmem:[#allocation37 + $0x11c] ss:$20 sps:$4 sm:$0xff]  }
 0x9b0   :  { %12684 = vmatprep.subr.bf16.mxu1 %v14091_v35  ;;  %v20317_v35 = vld [vmem:[#allocation130_spill] sm:$0xff] }
 0x9b1   :  { %12735 = vmatpush3.bf16.msra.mxu0 %v14100_v48  ;;  %v14109_v48 = vld [vmem:[#allocation38 + $0x60] ss:$20 sps:$4 sm:$0xff]  }
 0x9b2   :  { %12736 = vmatprep.subr.bf16.mxu0 %v14102_v55  ;;  %v14111_v55 = vld [vmem:[#allocation38 + $0x178] ss:$20 sps:$4 sm:$0xff]  }
 0x9b3   :  { %12685 = vmatpush3.bf16.msra.mxu1 %v14093_v41  ;;  %v14113_v41 = vld [vmem:[#allocation38 + $0x38] ss:$20 sps:$4 sm:$0xff]  }
 0x9b4   :  { %6770 = vmatmul.mubr.bf16.gmra.mxu0 %v17515_v31  ;;  %12686 = vmatprep.subr.bf16.mxu1 %v14095_v52  ;;  %v14115_v52 = vld [vmem:[#allocation38 + $0x150] ss:$20 sps:$4 sm:$0xff]  }
 0x9b5   :  { %6779 = vmatprep.mubr.bf16.mxu0 %v20118_v29  ;;  %12737 = vmatpush3.bf16.msra.mxu0 %v14104_v61  ;;  %v20318_v61 = vld [vmem:[#allocation145_spill] sm:$0xff] }
 0x9b6   :  { %6679 = vmatmul.mubr.bf16.gmra.mxu1 %v20314_v18  ;;  %12738 = vmatprep.subr.bf16.mxu0 %v14106_v3  ;;  %v20319_v3 = vld [vmem:[#allocation129_spill] sm:$0xff] }
 0x9b7   :  { %6688 = vmatprep.mubr.bf16.mxu1 %v20315_v32  ;;  %12687 = vmatpush3.bf16.msra.mxu1 %v14097_v21  ;;  %v14117_v21 = vld [vmem:[#allocation38 + $0x10] ss:$20 sps:$4 sm:$0xff]  }
 0x9b8   :  { %12688 = vmatprep.subr.bf16.mxu1 %v14099_v58  ;;  %v14118_v58 = vld [vmem:[#allocation37 + $0x118] ss:$20 sps:$4 sm:$0xff]  }
 0x9b9   :  { %12739 = vmatpush3.bf16.msra.mxu0 %v14108_v6  ;;  %v14123_v6 = vld [vmem:[#allocation37 + $0xf4] ss:$20 sps:$4 sm:$0xff]  }
 0x9ba   :  { %12740 = vmatprep.subr.bf16.mxu0 %v14110_v57  ;;  %v14121_v57 = vld [vmem:[#allocation37 + $0xf0] ss:$20 sps:$4 sm:$0xff]  }
 0x9bb   :  { %12689 = vmatpush3.bf16.msra.mxu1 %v14101_v47  ;;  %v20320_v47 = vmov 0.0  }
 0x9bc   :  { %6780 = vmatmul.mubr.bf16.gmra.mxu0 %v17648_v63  ;;  %12690 = vmatprep.subr.bf16.mxu1 %v14103_v1  ;;  %v20321_v1 = vld [vmem:[#allocation146_spill] sm:$0xff] }
 0x9bd   :  { %6789 = vmatprep.mubr.bf16.mxu0 %v20118_v29  ;;  %12741 = vmatpush3.bf16.msra.mxu0 %v14112_v2  ;;  %v20322_v2 = vld [vmem:[#allocation113_spill] sm:$0xff] }
 0x9be   :  { %6689 = vmatmul.mubr.bf16.gmra.mxu1 %v20316_v36  ;;  %12742 = vmatprep.subr.bf16.mxu0 %v14114_v49  ;;  %v14124_v49 = vld [vmem:[#allocation37 + $0xc8] ss:$20 sps:$4 sm:$0xff]  }
 0x9bf   :  { %6698 = vmatprep.mubr.bf16.mxu1 %v20317_v35  ;;  %12691 = vmatpush3.bf16.msra.mxu1 %v14105_v34  ;;  %v14130_v34 = vld [vmem:[#allocation37 + $0xa4] ss:$20 sps:$4 sm:$0xff]  }
 0x9c0   :  { %12692 = vmatprep.subr.bf16.mxu1 %v14107_v5  ;;  %v14127_v5 = vld [vmem:[#allocation38 + $0x628] ss:$20 sps:$4 sm:$0xff]  }
 0x9c1   :  { %12743 = vmatpush3.bf16.msra.mxu0 %v14116_v44  ;;  %v20323_v44 = vld [vmem:[#allocation119_spill] sm:$0xff] }
 0x9c2   :  { %8054 = vmatprep.subr.bf16.mxu0 %v14120_v0  ;;  %v20324_v0 = vld [vmem:[#allocation115_spill] sm:$0xff] }
 0x9c3   :  { %12693 = vmatpush3.bf16.msra.mxu1 %v14109_v48  ;;  %v14131_v48 = vld [vmem:[#allocation38 + $0x600] ss:$20 sps:$4 sm:$0xff]  }
 0x9c4   :  { %6790 = vmatmul.mubr.bf16.gmra.mxu0 %v17662_v12  ;;  %12694 = vmatprep.subr.bf16.mxu1 %v14111_v55  ;;  %v14132_v55 = vld [vmem:[#allocation37 + $0x78] ss:$20 sps:$4 sm:$0xff]  }
 0x9c5   :  { %6902 = vmatprep.mubr.bf16.mxu0 %v20262_v62  ;;  %v14126_v62 = vld [vmem:[#allocation37 + $0xcc] ss:$20 sps:$4 sm:$0xff]  }
 0x9c6   :  { %6699 = vmatmul.mubr.bf16.gmra.mxu1 %v20318_v61 }
 0x9c7   :  { %6708 = vmatprep.mubr.bf16.mxu1 %v20319_v3  ;;  %12695 = vmatpush3.bf16.msra.mxu1 %v14113_v41  ;;  %v14138_v41 = vld [vmem:[#allocation37 + $0x54] ss:$20 sps:$4 sm:$0xff]  }
 0x9c8   :  { %12696 = vmatprep.subr.bf16.mxu1 %v14115_v52  ;;  %v14142_v52 = vld [vmem:[#allocation37 + $0x2c] ss:$20 sps:$4 sm:$0xff]  }
 0x9cb   :  { %12697 = vmatpush3.bf16.msra.mxu1 %v14117_v21  ;;  %v14139_v21 = vld [vmem:[#allocation38 + $0x5b0] ss:$20 sps:$4 sm:$0xff]  }
 0x9cc   :  { %6903 = vmatmul.mubr.bf16.vlgmr.msra.gmra.mxu0 %v20312_v11  ;;  %13469 = vmatprep.subr.bf16.mxu1 %v20320_v47  ;;  %v14128_v11 = vld [vmem:[#allocation37 + $0xa0] ss:$20 sps:$4 sm:$0xff]  }
 0x9cd   :  { %8055 = vmatpush1.bf16.msra.mxu0 %v14118_v58  ;;  %6910 = vmatprep.mubr.bf16.mxu0 %v20313_v4  ;;  %v14134_v4 = vld [vmem:[#allocation37 + $0x7c] ss:$20 sps:$4 sm:$0xff]  }
 0x9ce   :  { %8056 = vmatprep.subr.bf16.mxu0 %v14123_v6  ;;  %6709 = vmatmul.mubr.bf16.gmra.mxu1 %v20321_v1  ;;  %v14140_v58 = vld [vmem:[#allocation37 + $0x28] ss:$20 sps:$4 sm:$0xff]  }
 0x9cf   :  { %6830 = vmatprep.mubr.bf16.mxu1 %v20322_v2  ;;  %v14143_v6 = vld [vmem:[#allocation38 + $0x588] ss:$20 sps:$4 sm:$0xff]  }
 0x9d0   :  { %v20325_v2 = vld [vmem:[#allocation133_spill] sm:$0xff] }
 0x9d1   :  { %8057 = vmatpush1.bf16.msra.mxu0 %v14121_v57  ;;  %v14148_v57 = vld [vmem:[#allocation37 + $0x258] ss:$20 sps:$4 sm:$0xff]  }
 0x9d2   :  { %8058 = vmatprep.subr.bf16.mxu0 %v14126_v62  ;;  %v14151_v62 = vld [vmem:[#allocation38 + $0x538] ss:$20 sps:$4 sm:$0xff]  }
 0x9d4   :  { %6911 = vmatmul.mubr.bf16.gmra.mxu0 %v20314_v18  ;;  %v14135_v18 = vld [vmem:[#allocation38 + $0x5d8] ss:$20 sps:$4 sm:$0xff]  }
 0x9d5   :  { %8059 = vmatpush1.bf16.msra.mxu0 %v14124_v49  ;;  %6918 = vmatprep.mubr.bf16.mxu0 %v20315_v32  ;;  %v14136_v32 = vld [vmem:[#allocation37 + $0x50] ss:$20 sps:$4 sm:$0xff]   ;;  %v14156_v49 = vld [vmem:[#allocation37 + $0x208] ss:$20 sps:$4 sm:$0xff]  }
 0x9d6   :  { %8060 = vmatprep.subr.bf16.mxu0 %v14130_v34  ;;  %6831 = vmatmul.mubr.bf16.vlgmr.msra.gmra.mxu1 %v20323_v44  ;;  %v14164_v34 = vld [vmem:[#allocation37 + $0x1e4] ss:$20 sps:$4 sm:$0xff]  }
 0x9d7   :  { %6838 = vmatprep.mubr.bf16.mxu1 %v20324_v0  ;;  %13470 = vmatpush3.bf16.msra.mxu1 %v14127_v5  ;;  %v14162_v5 = vld [vmem:[#allocation37 + $0x1e0] ss:$20 sps:$4 sm:$0xff]  }
 0x9d8   :  { %13471 = vmatprep.subr.bf16.mxu1 %v20320_v47  ;;  %v14176_v0 = vld [vmem:[#allocation37 + $0x194] ss:$20 sps:$4 sm:$0xff]  }
 0x9d9   :  { %8061 = vmatpush1.bf16.msra.mxu0 %v14128_v11  ;;  %v14170_v11 = vld [vmem:[#allocation37 + $0x1bc] ss:$20 sps:$4 sm:$0xff]  }
 0x9da   :  { %8062 = vmatprep.subr.bf16.mxu0 %v14134_v4 }
 0x9db   :  { %13472 = vmatpush3.bf16.msra.mxu1 %v14131_v48 }
 0x9dc   :  { %6919 = vmatmul.mubr.bf16.gmra.mxu0 %v20316_v36  ;;  %13473 = vmatprep.subr.bf16.mxu1 %v20320_v47  ;;  %v14146_v36 = vld [vmem:[#allocation37 + $0x4] ss:$20 sps:$4 sm:$0xff]  }
 0x9dd   :  { %8063 = vmatpush1.bf16.msra.mxu0 %v14132_v55  ;;  %6926 = vmatprep.mubr.bf16.mxu0 %v20317_v35  ;;  %v14144_v35 = vld [vmem:[#allocation37] ss:$20 sps:$4 sm:$0xff]  }
 0x9de   :  { %8064 = vmatprep.subr.bf16.mxu0 %v14138_v41  ;;  %6839 = vmatmul.mubr.bf16.gmra.mxu1 %v20214_v50  ;;  %v14150_v50 = vld [vmem:[#allocation37 + $0x25c] ss:$20 sps:$4 sm:$0xff]   ;;  %v14159_v41 = vld [vmem:[#allocation37 + $0x398] ss:$20 sps:$4 sm:$0xff]  }
 0x9df   :  { %6846 = vmatprep.mubr.bf16.mxu1 %v20216_v15  ;;  %13474 = vmatpush3.bf16.msra.mxu1 %v14135_v18  ;;  %v14147_v15 = vld [vmem:[#allocation38 + $0x560] ss:$20 sps:$4 sm:$0xff]  }
 0x9e0   :  { %13475 = vmatprep.subr.bf16.mxu1 %v20320_v47 }
 0x9e1   :  { %8065 = vmatpush1.bf16.msra.mxu0 %v14136_v32  ;;  %v14167_v32 = vld [vmem:[#allocation37 + $0x374] ss:$20 sps:$4 sm:$0xff]  }
 0x9e2   :  { %8066 = vmatprep.subr.bf16.mxu0 %v14142_v52  ;;  %v14174_v52 = vld [vmem:[#allocation37 + $0x190] ss:$20 sps:$4 sm:$0xff]  }
 0x9e3   :  { %13476 = vmatpush3.bf16.msra.mxu1 %v14139_v21 }
 0x9e4   :  { %6927 = vmatmul.mubr.bf16.gmra.mxu0 %v20318_v61  ;;  %13477 = vmatprep.subr.bf16.mxu1 %v20320_v47  ;;  %v14154_v61 = vld [vmem:[#allocation37 + $0x234] ss:$20 sps:$4 sm:$0xff]   ;;  %v6427_v4 = vpop.f32.mrf.mxu0 }
 0x9e5   :  { %8067 = vmatpush1.bf16.msra.mxu0 %v14140_v58  ;;  %6934 = vmatprep.mubr.bf16.mxu0 %v20319_v3  ;;  %v14152_v3 = vld [vmem:[#allocation37 + $0x230] ss:$20 sps:$4 sm:$0xff]  }
 0x9e6   :  { %8068 = vmatprep.subr.bf16.mxu0 %v14146_v36  ;;  %6847 = vmatmul.mubr.bf16.gmra.mxu1 %v20245_v7  ;;  %v14158_v7 = vld [vmem:[#allocation37 + $0x20c] ss:$20 sps:$4 sm:$0xff]   ;;  %v6429_v55 = vpop.f32.mrf.mxu0 }
 0x9e7   :  { %6854 = vmatprep.mubr.bf16.mxu1 %v20247_v19  ;;  %13478 = vmatpush3.bf16.msra.mxu1 %v14143_v6  ;;  %v14155_v19 = vld [vmem:[#allocation38 + $0x510] ss:$20 sps:$4 sm:$0xff]   ;;  %v14182_v36 = vld [vmem:[#allocation37 + $0x16c] ss:$20 sps:$4 sm:$0xff]  }
 0x9e8   :  { %13479 = vmatprep.subr.bf16.mxu1 %v20320_v47  ;;  %v6431_v21 = vpop.f32.mrf.mxu0  ;;  %v14165_v6 = vld [vmem:[#allocation37 + $0x370] ss:$20 sps:$4 sm:$0xff]  }
 0x9e9   :  { %8069 = vmatpush1.bf16.msra.mxu0 %v14144_v35  ;;  %v14173_v35 = vld [vmem:[#allocation37 + $0x34c] ss:$20 sps:$4 sm:$0xff]  }
 0x9ea   :  { %8070 = vmatprep.subr.bf16.mxu0 %v14150_v50  ;;  %v14180_v50 = vld [vmem:[#allocation37 + $0x168] ss:$20 sps:$4 sm:$0xff]  }
 0x9eb   :  { %13480 = vmatpush3.bf16.msra.mxu1 %v14147_v15  ;;  %v14188_v15 = vld [vmem:[#allocation37 + $0x144] ss:$20 sps:$4 sm:$0xff]  }
 0x9ec   :  { %6935 = vmatmul.mubr.bf16.gmra.mxu0 %v20321_v1  ;;  %13481 = vmatprep.subr.bf16.mxu1 %v20320_v47  ;;  %v14161_v1 = vld [vmem:[#allocation37 + $0x39c] ss:$20 sps:$4 sm:$0xff]  }
 0x9ed   :  { %8071 = vmatpush2.bf16.msra.mxu0 %v14148_v57  ;;  %8086 = vmatprep.mubr.bf16.mxu0 %v20325_v2 }
 0x9ee   :  { %8072 = vmatprep.subr.bf16.mxu0 %v14154_v61  ;;  %6855 = vmatmul.mubr.bf16.gmra.mxu1 %v20280_v28  ;;  %v14168_v28 = vld [vmem:[#allocation37 + $0x1b8] ss:$20 sps:$4 sm:$0xff]   ;;  %v17959_v61 = vpop.f32.mrf.mxu0 }
 0x9ef   :  { %6862 = vmatprep.mubr.bf16.mxu1 %v20284_v43  ;;  %13482 = vmatpush3.bf16.msra.mxu1 %v14151_v62  ;;  %v6346_v43 = vpop.f32.mrf.mxu1  ;;  %20327 = vst [vmem:[#allocation152_spill] sm:$0xff] %v17959_v61  ;;  %v14171_v62 = vld [vmem:[#allocation37 + $0x348] ss:$20 sps:$4 sm:$0xff]  }
 0x9f0   :  { %13483 = vmatprep.subr.bf16.mxu1 %v20320_v47  ;;  %v17948_v44 = vadd.f32 %v6427_v4, %v6346_v43  ;;  %v14198_v4 = vld [vmem:[#allocation37 + $0x618] ss:$20 sps:$4 sm:$0xff]  }
 0x9f1   :  { %8073 = vmatpush2.bf16.msra.mxu0 %v14152_v3  ;;  %v6348_v48 = vpop.f32.mrf.mxu1  ;;  %v14179_v3 = vld [vmem:[#allocation37 + $0x324] ss:$20 sps:$4 sm:$0xff]  }
 0x9f2   :  { %8074 = vmatprep.subr.bf16.mxu0 %v14158_v7  ;;  %v17950_v18 = vadd.f32 %v6429_v55, %v6348_v48  ;;  %v14200_v7 = vld [vmem:[#allocation37 + $0x61c] ss:$20 sps:$4 sm:$0xff]   ;;  %v14206_v48 = vld [vmem:[#allocation37 + $0x5f4] ss:$20 sps:$4 sm:$0xff]   ;;  %v14183_v55 = vld [vmem:[#allocation37 + $0x2f8] ss:$20 sps:$4 sm:$0xff]  }
 0x9f3   :  { %13484 = vmatpush3.bf16.msra.mxu1 %v14155_v19 }
 0x9f4   :  { %8135 = vmatprep.subr.bf16.mxu1 %v14161_v1  ;;  %v14177_v1 = vld [vmem:[#allocation37 + $0x320] ss:$20 sps:$4 sm:$0xff]  }
 0x9f5   :  { %8075 = vmatpush2.bf16.msra.mxu0 %v14156_v49  ;;  %v6437_v49 = vpop.f32.mrf.mxu0 }
 0x9f6   :  { %8076 = vmatprep.subr.bf16.mxu0 %v14164_v34  ;;  %6863 = vmatmul.mubr.bf16.gmra.mxu1 %v20306_v54  ;;  %v6350_v54 = vpop.f32.mrf.mxu1 }
 0x9f7   :  { %13485 = vmatprep.mubr.msk.bf16.mxu1 %vm15388_vm0, %v20320_v47  ;;  %v17952_v58 = vadd.f32 %v6431_v21, %v6350_v54  ;;  %v20329_v54 = vld [vmem:[#allocation143_spill] sm:$0xff]  ;;  %v14204_v21 = vld [vmem:[#allocation37 + $0x5f0] ss:$20 sps:$4 sm:$0xff]  }
 0x9f8   :  { %v17957_v57 = vpop.f32.mrf.mxu1 }
 0x9f9   :  { %8077 = vmatpush2.bf16.msra.mxu0 %v14162_v5  ;;  %20326 = vst [vmem:[#allocation101_spill] sm:$0xff] %v17957_v57  ;;  %v14185_v5 = vld [vmem:[#allocation37 + $0x2fc] ss:$20 sps:$4 sm:$0xff]  }
 0x9fa   :  { %8078 = vmatprep.subr.bf16.mxu0 %v14170_v11  ;;  %v6356_v19 = vpop.f32.mrf.mxu1 }
 0x9fb   :  { %v17964_v34 = vadd.f32 %v6437_v49, %v6356_v19  ;;  %v20333_v19 = vld [vmem:[#allocation134_spill] sm:$0xff] }
 0x9fc   :  { %v6358_v11 = vpop.f32.mrf.mxu1  ;;  %v14216_v49 = vld [vmem:[#allocation37 + $0x5a0] ss:$20 sps:$4 sm:$0xff]  }
 0x9fd   :  { %8079 = vmatpush2.bf16.msra.mxu0 %v14168_v28  ;;  %v6439_v28 = vpop.f32.mrf.mxu0 }
 0x9fe   :  { %8080 = vmatprep.subr.bf16.mxu0 %v14176_v0  ;;  %13486 = vmatmul.mubr.bf16.vlgmr.msra.gmra.mxu1 %v20310_v16  ;;  %v14186_v16 = vld [vmem:[#allocation37 + $0x140] ss:$20 sps:$4 sm:$0xff]   ;;  %v17966_v43 = vadd.f32 %v6439_v28, %v6358_v11  ;;  %v6360_v0 = vpop.f32.mrf.mxu1  ;;  %v14224_v11 = vld [vmem:[#allocation37 + $0x57c] ss:$20 sps:$4 sm:$0xff]  }
 0x9ff   :  { %8136 = vmatpush1.bf16.msra.mxu1 %v14159_v41  ;;  %13489 = vmatprep.mubr.msk.bf16.mxu1 %vm15388_vm0, %v20320_v47 }
 0xa00   :  { %8137 = vmatprep.subr.bf16.mxu1 %v14167_v32  ;;  %v20328_v32 = vld [vmem:[#allocation137_spill] sm:$0xff] }
 0xa01   :  { %8081 = vmatpush2.bf16.msra.mxu0 %v14174_v52  ;;  %v14191_v52 = vld [vmem:[#allocation37 + $0x2d4] ss:$20 sps:$4 sm:$0xff]  }
 0xa02   :  { %8082 = vmatprep.subr.bf16.mxu0 %v14182_v36  ;;  %v14212_v36 = vld [vmem:[#allocation37 + $0x5cc] ss:$20 sps:$4 sm:$0xff]  }
 0xa03   :  { %8138 = vmatpush1.bf16.msra.mxu1 %v14165_v6  ;;  %v14189_v6 = vld [vmem:[#allocation37 + $0x2d0] ss:$20 sps:$4 sm:$0xff]  }
 0xa04   :  { %8139 = vmatprep.subr.bf16.mxu1 %v14173_v35  ;;  %v14194_v35 = vld [vmem:[#allocation37 + $0x2ac] ss:$20 sps:$4 sm:$0xff]  }
 0xa05   :  { %8083 = vmatpush2.bf16.msra.mxu0 %v14180_v50  ;;  %v14210_v50 = vld [vmem:[#allocation37 + $0x5c8] ss:$20 sps:$4 sm:$0xff]  }
 0xa06   :  { %8084 = vmatprep.subr.bf16.mxu0 %v14188_v15  ;;  %13490 = vmatmul.mubr.bf16.gmra.mxu1 %v20311_v20  ;;  %v6441_v20 = vpop.f32.mrf.mxu0  ;;  %v17975_v15 = vpop.f32.mrf.mxu1 }
 0xa07   :  { %8140 = vmatpush1.bf16.msra.mxu1 %v14171_v62  ;;  %13493 = vmatprep.mubr.msk.bf16.mxu1 %vm15388_vm0, %v20320_v47  ;;  %v17968_v41 = vadd.f32 %v6441_v20, %v6360_v0  ;;  %20330 = vst [vmem:[#allocation86_spill] sm:$0xff] %v17975_v15 }
 0xa08   :  { %8141 = vmatprep.subr.bf16.mxu1 %v14179_v3  ;;  %v17977_v62 = vpop.f32.mrf.mxu0  ;;  %v14218_v3 = vld [vmem:[#allocation37 + $0x5a4] ss:$20 sps:$4 sm:$0xff]  }
 0xa09   :  { %8085 = vmatpush2.bf16.msra.mxu0 %v14186_v16  ;;  %20331 = vst [vmem:[#allocation87_spill] sm:$0xff] %v17977_v62  ;;  %v14192_v16 = vld [vmem:[#allocation37 + $0x2a8] ss:$20 sps:$4 sm:$0xff]  }
 0xa0a   :  { %8216 = vmatprep.subr.bf16.mxu0 %v14200_v7  ;;  %v14197_v7 = vld [vmem:[#allocation37 + $0x284] ss:$20 sps:$4 sm:$0xff]  }
 0xa0b   :  { %8142 = vmatpush1.bf16.msra.mxu1 %v14177_v1  ;;  %v6366_v1 = vpop.f32.mrf.mxu1 }
 0xa0c   :  { %8087 = vmatmul.mubr.bf16.vlgmr.msra.gmra.mxu0 %v20328_v32  ;;  %8143 = vmatprep.subr.bf16.mxu1 %v14185_v5  ;;  %v6447_v5 = vpop.f32.mrf.mxu0 }
 0xa0d   :  { %8096 = vmatprep.mubr.bf16.mxu0 %v20329_v54  ;;  %8217 = vmatpush1.bf16.msra.mxu0 %v14198_v4  ;;  %v17982_v28 = vadd.f32 %v6447_v5, %v6366_v1  ;;  %v14195_v4 = vld [vmem:[#allocation37 + $0x280] ss:$20 sps:$4 sm:$0xff]   ;;  %v6368_v0 = vpop.f32.mrf.mxu1  ;;  %v20337_v1 = vld [vmem:[#allocation99_spill] sm:$0xff] }
 0xa0e   :  { %13494 = vmatmul.mubr.bf16.gmra.mxu1 %v17515_v31  ;;  %8218 = vmatprep.subr.bf16.mxu0 %v14206_v48  ;;  %v20332_v31 = vld [vmem:[#allocation91_spill] sm:$0xff]  ;;  %v6449_v20 = vpop.f32.mrf.mxu0 }
 0xa0f   :  { %8144 = vmatpush1.bf16.msra.mxu1 %v14183_v55  ;;  %13497 = vmatprep.mubr.msk.bf16.mxu1 %vm15388_vm0, %v20320_v47  ;;  %v14203_v48 = vld [vmem:[#allocation37 + $0x4dc] ss:$20 sps:$4 sm:$0xff]   ;;  %v17986_v55 = vadd.f32 %v6449_v20, %v6368_v0  ;;  %v20339_v0 = vld [vmem:[#allocation96_spill] sm:$0xff] }
 0xa10   :  { %8145 = vmatprep.subr.bf16.mxu1 %v14191_v52  ;;  %v14222_v52 = vld [vmem:[#allocation37 + $0x578] ss:$20 sps:$4 sm:$0xff]  }
 0xa11   :  { %8219 = vmatpush1.bf16.msra.mxu0 %v14204_v21  ;;  %v6451_v21 = vpop.f32.mrf.mxu0 }
 0xa12   :  { %8220 = vmatprep.subr.bf16.mxu0 %v14212_v36  ;;  %v14230_v36 = vld [vmem:[#allocation37 + $0x554] ss:$20 sps:$4 sm:$0xff]  }
 0xa13   :  { %8146 = vmatpush1.bf16.msra.mxu1 %v14189_v6 }
 0xa14   :  { %8097 = vmatmul.mubr.bf16.gmra.mxu0 %v20332_v31  ;;  %8147 = vmatprep.subr.bf16.mxu1 %v14194_v35  ;;  %v14201_v35 = vld [vmem:[#allocation37 + $0x4d8] ss:$20 sps:$4 sm:$0xff]  }
 0xa15   :  { %8106 = vmatprep.mubr.bf16.mxu0 %v20333_v19  ;;  %8221 = vmatpush1.bf16.msra.mxu0 %v14210_v50  ;;  %v20334_v50 = vld [vmem:[#allocation95_spill] sm:$0xff] }
 0xa16   :  { %13498 = vmatmul.mubr.bf16.gmra.mxu1 %v17648_v63  ;;  %8222 = vmatprep.subr.bf16.mxu0 %v14218_v3  ;;  %v6370_v63 = vpop.f32.mrf.mxu1 }
 0xa17   :  { %8148 = vmatpush1.bf16.msra.mxu1 %v14192_v16  ;;  %13501 = vmatprep.mubr.msk.bf16.mxu1 %vm15388_vm0, %v20320_v47  ;;  %v17988_v6 = vadd.f32 %v6451_v21, %v6370_v63  ;;  %v17993_v16 = vpop.f32.mrf.mxu0  ;;  %v14236_v63 = vld [vmem:[#allocation37 + $0x52c] ss:$20 sps:$4 sm:$0xff]  }
 0xa18   :  { %8149 = vmatprep.subr.bf16.mxu1 %v14197_v7  ;;  %v17991_v3 = vpop.f32.mrf.mxu1  ;;  %20336 = vst [vmem:[#allocation120_spill] sm:$0xff] %v17993_v16  ;;  %v14209_v7 = vld [vmem:[#allocation37 + $0x4b4] ss:$20 sps:$4 sm:$0xff]  }
 0xa19   :  { %8223 = vmatpush1.bf16.msra.mxu0 %v14216_v49  ;;  %20335 = vst [vmem:[#allocation88_spill] sm:$0xff] %v17991_v3  ;;  %v14228_v49 = vld [vmem:[#allocation37 + $0x550] ss:$20 sps:$4 sm:$0xff]  }
 0xa1a   :  { %8224 = vmatprep.subr.bf16.mxu0 %v14224_v11  ;;  %v6376_v5 = vpop.f32.mrf.mxu1  ;;  %v6457_v11 = vpop.f32.mrf.mxu0 }
 0xa1b   :  { %8150 = vmatpush1.bf16.msra.mxu1 %v14195_v4  ;;  %v20338_v4 = vld [vmem:[#allocation100_spill] sm:$0xff]  ;;  %v17999_v21 = vadd.f32 %v6457_v11, %v6376_v5  ;;  %v14213_v5 = vld [vmem:[#allocation37 + $0x488] ss:$20 sps:$4 sm:$0xff]   ;;  %v20341_v11 = vld [vmem:[#allocation154_spill] sm:$0xff] }
 0xa1c   :  { %8107 = vmatmul.mubr.bf16.gmra.mxu0 %v20334_v50  ;;  %8151 = vmatprep.subr.bf16.mxu1 %v14203_v48  ;;  %v5038_v20 = vmul.f32 %v20339_v0, %v20338_v4  ;;  %v14207_v48 = vld [vmem:[#allocation37 + $0x4b0] ss:$20 sps:$4 sm:$0xff]   ;;  %v6378_v16 = vpop.f32.mrf.mxu1  ;;  %v6459_v3 = vpop.f32.mrf.mxu0 }
 0xa1d   :  { %8116 = vmatprep.mubr.bf16.mxu0 %v20337_v1  ;;  %8225 = vmatpush1.bf16.msra.mxu0 %v14222_v52  ;;  %v14215_v52 = vld [vmem:[#allocation37 + $0x48c] ss:$20 sps:$4 sm:$0xff]   ;;  %v18002_v62 = vadd.f32 %v6459_v3, %v6378_v16  ;;  %v14221_v3 = vld [vmem:[#allocation37 + $0x464] ss:$20 sps:$4 sm:$0xff]  }
 0xa1e   :  { %13502 = vmatmul.mubr.bf16.gmra.mxu1 %v17662_v12  ;;  %8226 = vmatprep.subr.bf16.mxu0 %v14230_v36  ;;  %v14234_v12 = vld [vmem:[#allocation37 + $0x528] ss:$20 sps:$4 sm:$0xff]   ;;  %v6380_v15 = vpop.f32.mrf.mxu1  ;;  %v6461_v61 = vpop.f32.mrf.mxu0  ;;  %v18004_v57 = vpack.c.bf16 %v5038_v20, %v5038_v20  ;;  %v14242_v36 = vld [vmem:[#allocation37 + $0x504] ss:$20 sps:$4 sm:$0xff]   ;;  %v14240_v20 = vld [vmem:[#allocation37 + $0x500] ss:$20 sps:$4 sm:$0xff]  }
 0xa1f   :  { %8152 = vmatpush2.bf16.msra.mxu1 %v14201_v35  ;;  %8167 = vmatprep.mubr.bf16.mxu1 %v20340_v39  ;;  %v18006_v35 = vadd.f32 %v6461_v61, %v6380_v15  ;;  %v20344_v16 = vld [vmem:[#allocation153_spill] sm:$0xff]  ;;  %v14248_v61 = vld [vmem:[#allocation37 + $0x3a4] ss:$20 sps:$4 sm:$0xff]  }
 0xa20   :  { %8153 = vmatprep.subr.bf16.mxu1 %v14209_v7  ;;  %v18009_v0 = vpop.f32.mrf.mxu1  ;;  %v18011_v7 = vpop.f32.mrf.mxu0 }
 0xa21   :  { %8227 = vmatpush1.bf16.msra.mxu0 %v14228_v49  ;;  %20342 = vst [vmem:[#allocation116_spill] sm:$0xff] %v18009_v0  ;;  %20343 = vst [vmem:[#allocation125_spill] sm:$0xff] %v18011_v7  ;;  %v5037_v49 = vmul.f32 %v20344_v16, %v20338_v4 }
 0xa22   :  { %8228 = vmatprep.subr.bf16.mxu0 %v14236_v63  ;;  %v6386_v63 = vpop.f32.mrf.mxu1 }
 0xa23   :  { %8154 = vmatpush2.bf16.msra.mxu1 %v14207_v48  ;;  %v6467_v48 = vpop.f32.mrf.mxu0  ;;  %v18020_v38 = vpack.c.bf16 %v5037_v49, %v5037_v49 }
 0xa24   :  { %8117 = vmatmul.mubr.bf16.gmra.mxu0 %v20341_v11  ;;  %8155 = vmatprep.subr.bf16.mxu1 %v14215_v52  ;;  %v18016_v15 = vadd.f32 %v6467_v48, %v6386_v63  ;;  %v6388_v0 = vpop.f32.mrf.mxu1  ;;  %v14227_v52 = vld [vmem:[#allocation37 + $0x43c] ss:$20 sps:$4 sm:$0xff]   ;;  %v14233_v63 = vld [vmem:[#allocation37 + $0x414] ss:$20 sps:$4 sm:$0xff]  }
 0xa25   :  { %8126 = vmatprep.mubr.bf16.mxu0 %v18004_v57  ;;  %8229 = vmatpush1.bf16.msra.mxu0 %v14234_v12  ;;  %v6469_v8 = vpop.f32.mrf.mxu0  ;;  %v14246_v48 = vld [vmem:[#allocation37 + $0x3a0] ss:$20 sps:$4 sm:$0xff]  }
 0xa26   :  { %8230 = vmatprep.subr.bf16.mxu0 %v14242_v36  ;;  %v18018_v7 = vadd.f32 %v6469_v8, %v6388_v0  ;;  %v6390_v16 = vpop.f32.mrf.mxu1  ;;  %v14231_v0 = vld [vmem:[#allocation37 + $0x410] ss:$20 sps:$4 sm:$0xff]  }
 0xa27   :  { %8156 = vmatpush2.bf16.msra.mxu1 %v14213_v5  ;;  %v6471_v12 = vpop.f32.mrf.mxu0 }
 0xa28   :  { %8157 = vmatprep.subr.bf16.mxu1 %v14221_v3  ;;  %v6391_v36 = vpop.f32.mrf.mxu1  ;;  %v14237_v12 = vld [vmem:[#allocation37 + $0x3e8] ss:$20 sps:$4 sm:$0xff]  }
 0xa29   :  { %8231 = vmatpush1.bf16.msra.mxu0 %v14240_v20  ;;  %v6472_v5 = vpop.f32.mrf.mxu0  ;;  %v14239_v20 = vld [vmem:[#allocation37 + $0x3ec] ss:$20 sps:$4 sm:$0xff]  }
 0xa2a   :  { %8378 = vmatprep.subr.bf16.mxu0 %v14248_v61  ;;  %v6508_v3 = vpop.f32.mrf.mxu1  ;;  %v14254_v61 = vld [vmem:[#allocation37 + $0x37c] ss:$20 sps:$4 sm:$0xff]   ;;  %v20347_v36 = vld [vmem:[#allocation85_spill] sm:$0xff] }
 0xa2b   :  { %8158 = vmatpush2.bf16.msra.mxu1 %v14219_v30  ;;  %v18025_v8 = vadd.f32 %v6508_v3, %v17948_v44  ;;  %v14245_v44 = vld [vmem:[#allocation37 + $0x3c4] ss:$20 sps:$4 sm:$0xff]  }
 0xa2c   :  { %8127 = vmatmul.mubr.bf16.gmra.mxu0 %v18020_v38  ;;  %8159 = vmatprep.subr.bf16.mxu1 %v14227_v52  ;;  %v6510_v49 = vpop.f32.mrf.mxu1  ;;  %v14252_v5 = vld [vmem:[#allocation37 + $0x378] ss:$20 sps:$4 sm:$0xff]  }
 0xa2d   :  { %8248 = vmatprep.mubr.bf16.mxu0 %v20118_v29  ;;  %v18028_v30 = vadd.f32 %v6510_v49, %v17950_v18  ;;  %v14260_v18 = vld [vmem:[#allocation37 + $0x354] ss:$20 sps:$4 sm:$0xff]   ;;  %v14251_v49 = vld [vmem:[#allocation37 + $0x124] ss:$20 sps:$4 sm:$0xff]  }
 0xa2e   :  { %v6512_v16 = vpop.f32.mrf.mxu1 }
 0xa2f   :  { %8160 = vmatpush2.bf16.msra.mxu1 %v14225_v37  ;;  %20345 = vst [vmem:[#allocation117_spill] sm:$0xff] %v18028_v30  ;;  %v18031_v52 = vadd.f32 %v6512_v16, %v17952_v58  ;;  %v14243_v58 = vld [vmem:[#allocation37 + $0x3c0] ss:$20 sps:$4 sm:$0xff]   ;;  %v14258_v16 = vld [vmem:[#allocation37 + $0x350] ss:$20 sps:$4 sm:$0xff]  }
 0xa30   :  { %8161 = vmatprep.subr.bf16.mxu1 %v14233_v63  ;;  %v18034_v37 = vpop.f32.mrf.mxu1 }
 0xa31   :  { %20346 = vst [vmem:[#allocation127_spill] sm:$0xff] %v18031_v52  ;;  %20348 = vst [vmem:[#allocation130_spill] sm:$0xff] %v18034_v37  ;;  %v14347_v52 = vld [vmem:[#allocation37 + $0x240] ss:$20 sps:$4 sm:$0xff]  }
 0xa32   :  { %v6518_v63 = vpop.f32.mrf.mxu1 }
 0xa33   :  { %8162 = vmatpush2.bf16.msra.mxu1 %v14231_v0  ;;  %v18038_v3 = vadd.f32 %v6518_v63, %v17964_v34  ;;  %v18047_v34 = vpop.f32.mrf.mxu0 }
 0xa34   :  { %8249 = vmatmul.mubr.bf16.vlgmr.msra.gmra.mxu0 %v20347_v36  ;;  %8163 = vmatprep.subr.bf16.mxu1 %v14239_v20  ;;  %v6520_v0 = vpop.f32.mrf.mxu1 }
 0xa35   :  { %8379 = vmatpush1.bf16.msra.mxu0 %v14246_v48  ;;  %8258 = vmatprep.mubr.bf16.mxu0 %v20118_v29  ;;  %20349 = vst [vmem:[#allocation145_spill] sm:$0xff] %v18038_v3  ;;  %v18041_v20 = vadd.f32 %v6520_v0, %v17966_v43  ;;  %v14266_v48 = vld [vmem:[#allocation37 + $0x32c] ss:$20 sps:$4 sm:$0xff]   ;;  %v18051_v43 = vpop.f32.mrf.mxu0  ;;  %v20354_v0 = vld [vmem:[#allocation135_spill] sm:$0xff] }
 0xa36   :  { %8380 = vmatprep.subr.bf16.mxu0 %v14254_v61  ;;  %v6522_v61 = vpop.f32.mrf.mxu1 }
 0xa37   :  { %8164 = vmatpush2.bf16.msra.mxu1 %v14237_v12  ;;  %20350 = vst [vmem:[#allocation129_spill] sm:$0xff] %v18041_v20  ;;  %v18044_v37 = vadd.f32 %v6522_v61, %v17968_v41  ;;  %v14249_v12 = vld [vmem:[#allocation37 + $0x120] ss:$20 sps:$4 sm:$0xff]  }
 0xa38   :  { %8165 = vmatprep.subr.bf16.mxu1 %v14245_v44  ;;  %v18049_v63 = vpop.f32.mrf.mxu1  ;;  %v14257_v44 = vld [vmem:[#allocation37 + $0xfc] ss:$20 sps:$4 sm:$0xff]  }
 0xa39   :  { %8381 = vmatpush1.bf16.msra.mxu0 %v14252_v5  ;;  %20351 = vst [vmem:[#allocation146_spill] sm:$0xff] %v18044_v37  ;;  %20352 = vst [vmem:[#allocation113_spill] sm:$0xff] %v18049_v63  ;;  %v14264_v5 = vld [vmem:[#allocation37 + $0x328] ss:$20 sps:$4 sm:$0xff]   ;;  %v14255_v63 = vld [vmem:[#allocation37 + $0xf8] ss:$20 sps:$4 sm:$0xff]  }
 0xa3a   :  { %8382 = vmatprep.subr.bf16.mxu0 %v14260_v18  ;;  %v14272_v18 = vld [vmem:[#allocation37 + $0x304] ss:$20 sps:$4 sm:$0xff]   ;;  %v6528_v41 = vpop.f32.mrf.mxu1 }
 0xa3b   :  { %8166 = vmatpush2.bf16.msra.mxu1 %v14243_v58  ;;  %v20353_v58 = vld [vmem:[#allocation138_spill] sm:$0xff]  ;;  %v18057_v61 = vadd.f32 %v6528_v41, %v17982_v28 }
 0xa3c   :  { %8259 = vmatmul.mubr.bf16.gmra.mxu0 %v17571_v22  ;;  %8297 = vmatprep.subr.bf16.mxu1 %v14251_v49  ;;  %v18059_v49 = vpop.f32.mrf.mxu0 }
 0xa3d   :  { %8383 = vmatpush1.bf16.msra.mxu0 %v14258_v16  ;;  %8268 = vmatprep.mubr.bf16.mxu0 %v20118_v29  ;;  %20355 = vst [vmem:[#allocation119_spill] sm:$0xff] %v18057_v61  ;;  %v6530_v16 = vpop.f32.mrf.mxu1  ;;  %v14336_v61 = vld [vmem:[#allocation37 + $0x3c8] ss:$20 sps:$4 sm:$0xff]  }
 0xa3e   :  { %8384 = vmatprep.subr.bf16.mxu0 %v14266_v48  ;;  %8168 = vmatmul.mubr.bf16.vlgmr.msra.gmra.mxu1 %v20353_v58  ;;  %v14270_v48 = vld [vmem:[#allocation37 + $0x300] ss:$20 sps:$4 sm:$0xff]   ;;  %v18062_v24 = vadd.f32 %v6530_v16, %v17986_v55  ;;  %v18064_v13 = vpop.f32.mrf.mxu0  ;;  %v14276_v55 = vld [vmem:[#allocation37 + $0x2d8] ss:$20 sps:$4 sm:$0xff]  }
 0xa3f   :  { %8177 = vmatprep.mubr.bf16.mxu1 %v20354_v0  ;;  %8298 = vmatpush1.bf16.msra.mxu1 %v14249_v12  ;;  %20357 = vst [vmem:[#allocation133_spill] sm:$0xff] %v18064_v13  ;;  %v6532_v51 = vpop.f32.mrf.mxu1  ;;  %v14261_v12 = vld [vmem:[#allocation37 + $0xd0] ss:$20 sps:$4 sm:$0xff]  }
 0xa40   :  { %8299 = vmatprep.subr.bf16.mxu1 %v14257_v44  ;;  %20356 = vst [vmem:[#allocation115_spill] sm:$0xff] %v18062_v24  ;;  %v18067_v28 = vadd.f32 %v6532_v51, %v17988_v6  ;;  %v18070_v41 = vpop.f32.mrf.mxu0  ;;  %v14275_v13 = vld [vmem:[#allocation37 + $0x84] ss:$20 sps:$4 sm:$0xff]   ;;  %v14315_v24 = vld [vmem:[#allocation37 + $0x1e8] ss:$20 sps:$4 sm:$0xff]  }
 0xa41   :  { %8385 = vmatpush1.bf16.msra.mxu0 %v14264_v5  ;;  %v18072_v44 = vpop.f32.mrf.mxu1  ;;  %v14269_v5 = vld [vmem:[#allocation37 + $0xac] ss:$20 sps:$4 sm:$0xff]  }
 0xa42   :  { %8386 = vmatprep.subr.bf16.mxu0 %v14272_v18  ;;  %20358 = vst [vmem:[#allocation137_spill] sm:$0xff] %v18067_v28  ;;  %20359 = vst [vmem:[#allocation143_spill] sm:$0xff] %v18072_v44  ;;  %v18074_v16 = vpop.f32.mrf.mxu0  ;;  %v20360_v18 = vld [vmem:[#allocation136_spill] sm:$0xff]  ;;  %v14267_v44 = vld [vmem:[#allocation37 + $0xa8] ss:$20 sps:$4 sm:$0xff]  }
 0xa43   :  { %8300 = vmatpush1.bf16.msra.mxu1 %v14255_v63  ;;  %v14284_v63 = vld [vmem:[#allocation37 + $0x2b4] ss:$20 sps:$4 sm:$0xff]   ;;  %v6538_v51 = vpop.f32.mrf.mxu1 }
 0xa44   :  { %8269 = vmatmul.mubr.bf16.gmra.mxu0 %v17605_v53  ;;  %8301 = vmatprep.subr.bf16.mxu1 %v14263_v10  ;;  %v18080_v6 = vadd.f32 %v6538_v51, %v17999_v21  ;;  %v18082_v10 = vpop.f32.mrf.mxu0 }
 0xa45   :  { %8387 = vmatpush1.bf16.msra.mxu0 %v14270_v48  ;;  %8278 = vmatprep.mubr.bf16.mxu0 %v20118_v29  ;;  %v6540_v48 = vpop.f32.mrf.mxu1 }
 0xa46   :  { %8388 = vmatprep.subr.bf16.mxu0 %v14278_v40  ;;  %8178 = vmatmul.mubr.bf16.gmra.mxu1 %v20360_v18  ;;  %20361 = vst [vmem:[#allocation91_spill] sm:$0xff] %v18080_v6  ;;  %v14282_v40 = vld [vmem:[#allocation37 + $0x2b0] ss:$20 sps:$4 sm:$0xff]   ;;  %v18085_v27 = vadd.f32 %v6540_v48, %v18002_v62  ;;  %v18087_v59 = vpop.f32.mrf.mxu0  ;;  %v14288_v62 = vld [vmem:[#allocation37 + $0x288] ss:$20 sps:$4 sm:$0xff]  }
 0xa47   :  { %8187 = vmatprep.mubr.bf16.mxu1 %v17573_v9  ;;  %8302 = vmatpush1.bf16.msra.mxu1 %v14261_v12  ;;  %20363 = vst [vmem:[#allocation95_spill] sm:$0xff] %v18087_v59  ;;  %v6542_v23 = vpop.f32.mrf.mxu1  ;;  %v14273_v12 = vld [vmem:[#allocation37 + $0x80] ss:$20 sps:$4 sm:$0xff]   ;;  %v14324_v6 = vld [vmem:[#allocation37 + $0x418] ss:$20 sps:$4 sm:$0xff]  }
 0xa48   :  { %8303 = vmatprep.subr.bf16.mxu1 %v14269_v5  ;;  %20362 = vst [vmem:[#allocation134_spill] sm:$0xff] %v18085_v27  ;;  %v18090_v21 = vadd.f32 %v6542_v23, %v18006_v35  ;;  %v18093_v51 = vpop.f32.mrf.mxu0  ;;  %v20366_v23 = vld [vmem:[#allocation159_spill] sm:$0xff] }
 0xa49   :  { %8389 = vmatpush1.bf16.msra.mxu0 %v14276_v55  ;;  %v18095_v5 = vpop.f32.mrf.mxu1  ;;  %v14281_v55 = vld [vmem:[#allocation37 + $0x5c] ss:$20 sps:$4 sm:$0xff]   ;;  %v5041_v35 = vmul.f32 %v20366_v23, %v20338_v4  ;;  %v20371_v23 = vld [vmem:[#allocation157_spill] sm:$0xff] }
 0xa4a   :  { %8390 = vmatprep.subr.bf16.mxu0 %v14284_v63  ;;  %20364 = vst [vmem:[#allocation99_spill] sm:$0xff] %v18090_v21  ;;  %20365 = vst [vmem:[#allocation100_spill] sm:$0xff] %v18095_v5  ;;  %v18097_v48 = vpop.f32.mrf.mxu0  ;;  %v20367_v63 = vld [vmem:[#allocation155_spill] sm:$0xff]  ;;  %v5040_v17 = vmul.f32 %v20371_v23, %v20338_v4  ;;  %v20373_v23 = vld [vmem:[#allocation121_spill] sm:$0xff] }
 0xa4b   :  { %8304 = vmatpush1.bf16.msra.mxu1 %v14267_v44  ;;  %v14296_v44 = vld [vmem:[#allocation37 + $0x4e4] ss:$20 sps:$4 sm:$0xff]   ;;  %v6548_v59 = vpop.f32.mrf.mxu1 }
 0xa4c   :  { %8279 = vmatmul.mubr.bf16.gmra.mxu0 %v17651_v45  ;;  %8305 = vmatprep.subr.bf16.mxu1 %v14275_v13  ;;  %v18105_v13 = vadd.f32 %v6548_v59, %v18016_v15  ;;  %v18107_v5 = vpop.f32.mrf.mxu0  ;;  %v14302_v59 = vld [vmem:[#allocation37 + $0x4bc] ss:$20 sps:$4 sm:$0xff]  }
 0xa4d   :  { %8391 = vmatpush1.bf16.msra.mxu0 %v14282_v40  ;;  %8288 = vmatprep.mubr.bf16.mxu0 %v20118_v29  ;;  %v14279_v40 = vld [vmem:[#allocation37 + $0x58] ss:$20 sps:$4 sm:$0xff]   ;;  %v6550_v33 = vpop.f32.mrf.mxu1 }
 0xa4e   :  { %8392 = vmatprep.subr.bf16.mxu0 %v14290_v26  ;;  %8188 = vmatmul.mubr.bf16.gmra.mxu1 %v20367_v63  ;;  %20369 = vst [vmem:[#allocation96_spill] sm:$0xff] %v18105_v13  ;;  %v14287_v26 = vld [vmem:[#allocation37 + $0x34] ss:$20 sps:$4 sm:$0xff]   ;;  %v18110_v14 = vadd.f32 %v6550_v33, %v18018_v7  ;;  %v18114_v46 = vpop.f32.mrf.mxu0  ;;  %v14293_v33 = vld [vmem:[#allocation37 + $0xc] ss:$20 sps:$4 sm:$0xff]  }
 0xa4f   :  { %8197 = vmatprep.mubr.bf16.mxu1 %v20368_v42  ;;  %8306 = vmatpush1.bf16.msra.mxu1 %v14273_v12  ;;  %20372 = vst [vmem:[#allocation154_spill] sm:$0xff] %v18114_v46  ;;  %v18116_v12 = vpack.c.bf16 %v5041_v35, %v5041_v35  ;;  %v6552_v15 = vpop.f32.mrf.mxu1  ;;  %v14300_v7 = vld [vmem:[#allocation37 + $0x4b8] ss:$20 sps:$4 sm:$0xff]   ;;  %v14308_v35 = vld [vmem:[#allocation37 + $0x494] ss:$20 sps:$4 sm:$0xff]  }
 0xa50   :  { %8307 = vmatprep.subr.bf16.mxu1 %v14281_v55  ;;  %20370 = vst [vmem:[#allocation92_spill] sm:$0xff] %v18110_v14  ;;  %v18121_v14 = vpack.c.bf16 %v5040_v17, %v5040_v17  ;;  %v14299_v17 = vld [vmem:[#allocation37 + $0x264] ss:$20 sps:$4 sm:$0xff]   ;;  %v14297_v13 = vld [vmem:[#allocation37 + $0x260] ss:$20 sps:$4 sm:$0xff]  }
 0xa51   :  { %8393 = vmatpush1.bf16.msra.mxu0 %v14288_v62  ;;  %v18119_v55 = vpop.f32.mrf.mxu0  ;;  %v6553_v62 = vpop.f32.mrf.mxu1 }
 0xa52   :  { %8394 = vmatprep.subr.bf16.mxu0 %v14296_v44  ;;  %v14306_v62 = vld [vmem:[#allocation37 + $0x490] ss:$20 sps:$4 sm:$0xff]  }
 0xa53   :  { %8308 = vmatpush1.bf16.msra.mxu1 %v14279_v40  ;;  %v18124_v44 = vpop.f32.mrf.mxu0  ;;  %v14291_v40 = vld [vmem:[#allocation37 + $0x8] ss:$20 sps:$4 sm:$0xff]  }
 0xa54   :  { %8289 = vmatmul.mubr.bf16.gmra.mxu0 %v18116_v12  ;;  %8309 = vmatprep.subr.bf16.mxu1 %v14287_v26 }
 0xa55   :  { %8395 = vmatpush2.bf16.msra.mxu0 %v14294_v56  ;;  %8410 = vmatprep.mubr.bf16.mxu0 %v20340_v39  ;;  %v18128_v15 = vpop.f32.mrf.mxu0  ;;  %v20374_v56 = vld [vmem:[#allocation158_spill] sm:$0xff] }
 0xa56   :  { %8396 = vmatprep.subr.bf16.mxu0 %v14302_v59  ;;  %8198 = vmatmul.mubr.bf16.gmra.mxu1 %v20373_v23  ;;  %v5039_v26 = vmul.f32 %v20374_v56, %v20338_v4  ;;  %v14314_v59 = vld [vmem:[#allocation37 + $0x46c] ss:$20 sps:$4 sm:$0xff]   ;;  %v14320_v4 = vld [vmem:[#allocation37 + $0x444] ss:$20 sps:$4 sm:$0xff]  }
 0xa57   :  { %8207 = vmatprep.mubr.bf16.mxu1 %v18121_v14  ;;  %8310 = vmatpush1.bf16.msra.mxu1 %v14285_v60  ;;  %v18132_v46 = vpop.f32.mrf.mxu0  ;;  %v14305_v60 = vld [vmem:[#allocation37 + $0x23c] ss:$20 sps:$4 sm:$0xff]   ;;  %v14318_v56 = vld [vmem:[#allocation37 + $0x440] ss:$20 sps:$4 sm:$0xff]  }
 0xa58   :  { %8311 = vmatprep.subr.bf16.mxu1 %v14293_v33  ;;  %20375 = vst [vmem:[#allocation153_spill] sm:$0xff] %v18132_v46  ;;  %v18136_v27 = vpack.c.bf16 %v5039_v26, %v5039_v26  ;;  %v14312_v33 = vld [vmem:[#allocation37 + $0x468] ss:$20 sps:$4 sm:$0xff]  }
 0xa59   :  { %8397 = vmatpush2.bf16.msra.mxu0 %v14300_v7  ;;  %v14303_v7 = vld [vmem:[#allocation37 + $0x238] ss:$20 sps:$4 sm:$0xff]  }
 0xa5a   :  { %8398 = vmatprep.subr.bf16.mxu0 %v14308_v35 }
 0xa5b   :  { %8312 = vmatpush1.bf16.msra.mxu1 %v14291_v40  ;;  %v14311_v40 = vld [vmem:[#allocation37 + $0x214] ss:$20 sps:$4 sm:$0xff]  }
 0xa5c   :  { %v18134_v21 = vpop.f32.mrf.mxu0  ;;  %8313 = vmatprep.subr.bf16.mxu1 %v14299_v17  ;;  %v14326_v17 = vld [vmem:[#allocation37 + $0x41c] ss:$20 sps:$4 sm:$0xff]  }
 0xa5d   :  { %8399 = vmatpush2.bf16.msra.mxu0 %v14306_v62  ;;  %v14309_v62 = vld [vmem:[#allocation37 + $0x210] ss:$20 sps:$4 sm:$0xff]  }
 0xa5e   :  { %v18138_v25 = vpop.f32.mrf.mxu0  ;;  %8400 = vmatprep.subr.bf16.mxu0 %v14314_v59  ;;  %8208 = vmatmul.mubr.bf16.gmra.mxu1 %v18136_v27  ;;  %v14317_v59 = vld [vmem:[#allocation37 + $0x1ec] ss:$20 sps:$4 sm:$0xff]  }
 0xa5f   :  { %8314 = vmatpush2.bf16.msra.mxu1 %v14297_v13  ;;  %8329 = vmatprep.mubr.bf16.mxu1 %v20325_v2  ;;  %v14332_v13 = vld [vmem:[#allocation37 + $0x3f4] ss:$20 sps:$4 sm:$0xff]  }
 0xa60   :  { %v6633_v35 = vpop.f32.mrf.mxu0  ;;  %8315 = vmatprep.subr.bf16.mxu1 %v14305_v60  ;;  %v14323_v60 = vld [vmem:[#allocation37 + $0x1c4] ss:$20 sps:$4 sm:$0xff]  }
 0xa61   :  { %8401 = vmatpush2.bf16.msra.mxu0 %v14312_v33  ;;  %v14330_v33 = vld [vmem:[#allocation37 + $0x3f0] ss:$20 sps:$4 sm:$0xff]  }
 0xa62   :  { %v6634_v26 = vpop.f32.mrf.mxu0  ;;  %8402 = vmatprep.subr.bf16.mxu0 %v14320_v4  ;;  %v14338_v4 = vld [vmem:[#allocation37 + $0x3cc] ss:$20 sps:$4 sm:$0xff]  }
 0xa63   :  { %8316 = vmatpush2.bf16.msra.mxu1 %v14303_v7  ;;  %v14321_v7 = vld [vmem:[#allocation37 + $0x1c0] ss:$20 sps:$4 sm:$0xff]  }
 0xa64   :  { %v6751_v46 = vpop.f32.mrf.mxu0  ;;  %8317 = vmatprep.subr.bf16.mxu1 %v14311_v40 }
 0xa65   :  { %8403 = vmatpush2.bf16.msra.mxu0 %v14318_v56  ;;  %v14329_v56 = vld [vmem:[#allocation37 + $0x19c] ss:$20 sps:$4 sm:$0xff]  }
 0xa66   :  { %v6753_v28 = vpop.f32.mrf.mxu0  ;;  %8404 = vmatprep.subr.bf16.mxu0 %v14326_v17 }
 0xa67   :  { %8318 = vmatpush2.bf16.msra.mxu1 %v14309_v62  ;;  %v14342_v62 = vld [vmem:[#allocation37 + $0x268] ss:$20 sps:$4 sm:$0xff]  }
 0xa68   :  { %v6755_v35 = vpop.f32.mrf.mxu0  ;;  %8319 = vmatprep.subr.bf16.mxu1 %v14317_v59 }
 0xa69   :  { %8405 = vmatpush2.bf16.msra.mxu0 %v14324_v6  ;;  %v14327_v6 = vld [vmem:[#allocation37 + $0x198] ss:$20 sps:$4 sm:$0xff]  }
 0xa6a   :  { %v18142_v26 = vpop.f32.mrf.mxu0  ;;  %8406 = vmatprep.subr.bf16.mxu0 %v14332_v13  ;;  %v14335_v13 = vld [vmem:[#allocation37 + $0x174] ss:$20 sps:$4 sm:$0xff]  }
 0xa6b   :  { %20376 = vst [vmem:[#allocation85_spill] sm:$0xff] %v18142_v26  ;;  %8320 = vmatpush2.bf16.msra.mxu1 %v14315_v24 }
 0xa6c   :  { %v6761_v40 = vpop.f32.mrf.mxu0  ;;  %8321 = vmatprep.subr.bf16.mxu1 %v14323_v60 }
 0xa6d   :  { %8407 = vmatpush2.bf16.msra.mxu0 %v14330_v33  ;;  %v14346_v33 = vld [vmem:[#allocation37 + $0x128] ss:$20 sps:$4 sm:$0xff]  }
 0xa6e   :  { %v6763_v17 = vpop.f32.mrf.mxu0  ;;  %8408 = vmatprep.subr.bf16.mxu0 %v14338_v4  ;;  %v6670_v37 = vpop.f32.mrf.mxu1 }
 0xa6f   :  { %v6671_v59 = vadd.f32 %v6670_v37, %v18047_v34  ;;  %8322 = vmatpush2.bf16.msra.mxu1 %v14321_v7  ;;  %v14333_v34 = vld [vmem:[#allocation37 + $0x170] ss:$20 sps:$4 sm:$0xff]  }
 0xa70   :  { %v6765_v20 = vpop.f32.mrf.mxu0  ;;  %v6672_v3 = vpop.f32.mrf.mxu1  ;;  %8323 = vmatprep.subr.bf16.mxu1 %v14329_v56  ;;  %v14351_v56 = vld [vmem:[#allocation37 + $0x100] ss:$20 sps:$4 sm:$0xff]  }
 0xa71   :  { %8409 = vmatpush2.bf16.msra.mxu0 %v14336_v61  ;;  %v18145_v24 = vadd.f32 %v6751_v46, %v6671_v59  ;;  %v6673_v60 = vadd.f32 %v6672_v3, %v18051_v43  ;;  %v14341_v46 = vld [vmem:[#allocation37 + $0x14c] ss:$20 sps:$4 sm:$0xff]   ;;  %v14339_v59 = vld [vmem:[#allocation37 + $0x148] ss:$20 sps:$4 sm:$0xff]  }
 0xa72   :  { %v18148_v26 = vpop.f32.mrf.mxu0  ;;  %12787 = vmatprep.subr.bf16.mxu0 %v14342_v62  ;;  %v6674_v4 = vpop.f32.mrf.mxu1  ;;  %v14352_v62 = vld [vmem:[#allocation37 + $0x218] ss:$20 sps:$4 sm:$0xff]  }
 0xa73   :  { %20377 = vst [vmem:[#allocation138_spill] sm:$0xff] %v18148_v26  ;;  %v18150_v30 = vadd.f32 %v6753_v28, %v6673_v60  ;;  %v6675_v37 = vadd.f32 %v6674_v4, %v18059_v49  ;;  %8324 = vmatpush2.bf16.msra.mxu1 %v14327_v6  ;;  %v14345_v4 = vld [vmem:[#allocation37 + $0x624] ss:$20 sps:$4 sm:$0xff]  }
 0xa74   :  { %8411 = vmatmul.mubr.bf16.vlgmr.msra.gmra.mxu0 %v20353_v58  ;;  %v6771_v7 = vpop.f32.mrf.mxu0  ;;  %v18154_v61 = vpop.f32.mrf.mxu1  ;;  %8325 = vmatprep.subr.bf16.mxu1 %v14335_v13 }
 0xa75   :  { %20378 = vst [vmem:[#allocation135_spill] sm:$0xff] %v18154_v61  ;;  %8420 = vmatprep.mubr.bf16.mxu0 %v20354_v0  ;;  %v18157_v3 = vadd.f32 %v6755_v35, %v6675_v37  ;;  %12788 = vmatpush3.bf16.msra.mxu0 %v14346_v33  ;;  %v14356_v33 = vld [vmem:[#allocation37 + $0xd8] ss:$20 sps:$4 sm:$0xff]  }
 0xa76   :  { %v6773_v43 = vpop.f32.mrf.mxu0  ;;  %v6680_v28 = vpop.f32.mrf.mxu1  ;;  %12789 = vmatprep.subr.bf16.mxu0 %v14347_v52  ;;  %v14357_v52 = vld [vmem:[#allocation37 + $0x1f0] ss:$20 sps:$4 sm:$0xff]  }
 0xa77   :  { %v6681_v49 = vadd.f32 %v6680_v28, %v18070_v41  ;;  %8326 = vmatpush2.bf16.msra.mxu1 %v14333_v34  ;;  %v14343_v34 = vld [vmem:[#allocation37 + $0x620] ss:$20 sps:$4 sm:$0xff]  }
 0xa78   :  { %v6775_v6 = vpop.f32.mrf.mxu0  ;;  %v6682_v60 = vpop.f32.mrf.mxu1  ;;  %8327 = vmatprep.subr.bf16.mxu1 %v14341_v46 }
 0xa79   :  { %v18160_v13 = vadd.f32 %v6761_v40, %v6681_v49  ;;  %v6683_v26 = vadd.f32 %v6682_v60, %v18074_v16  ;;  %12790 = vmatpush3.bf16.msra.mxu0 %v14351_v56  ;;  %v14350_v16 = vld [vmem:[#allocation37 + $0x5fc] ss:$20 sps:$4 sm:$0xff]   ;;  %v14348_v49 = vld [vmem:[#allocation37 + $0x5f8] ss:$20 sps:$4 sm:$0xff]  }
 0xa7a   :  { %v18163_v35 = vpop.f32.mrf.mxu0  ;;  %v6684_v37 = vpop.f32.mrf.mxu1  ;;  %12791 = vmatprep.subr.bf16.mxu0 %v14352_v62  ;;  %v14361_v62 = vld [vmem:[#allocation37 + $0xb0] ss:$20 sps:$4 sm:$0xff]  }
 0xa7b   :  { %20379 = vst [vmem:[#allocation136_spill] sm:$0xff] %v18163_v35  ;;  %v18165_v61 = vadd.f32 %v6763_v17, %v6683_v26  ;;  %v6685_v41 = vadd.f32 %v6684_v37, %v18082_v10  ;;  %8328 = vmatpush2.bf16.msra.mxu1 %v14339_v59  ;;  %v14362_v10 = vld [vmem:[#allocation37 + $0x1c8] ss:$20 sps:$4 sm:$0xff]   ;;  %v14367_v35 = vld [vmem:[#allocation37 + $0x1a0] ss:$20 sps:$4 sm:$0xff]  }
 0xa7c   :  { %8421 = vmatmul.mubr.bf16.gmra.mxu0 %v20360_v18  ;;  %v6781_v46 = vpop.f32.mrf.mxu0  ;;  %v18169_v40 = vpop.f32.mrf.mxu1  ;;  %8459 = vmatprep.subr.bf16.mxu1 %v14345_v4  ;;  %v14355_v4 = vld [vmem:[#allocation37 + $0x5d4] ss:$20 sps:$4 sm:$0xff]  }
 0xa7d   :  { %20380 = vst [vmem:[#allocation159_spill] sm:$0xff] %v18169_v40  ;;  %8430 = vmatprep.mubr.bf16.mxu0 %v17573_v9  ;;  %v18172_v56 = vadd.f32 %v6765_v20, %v6685_v41  ;;  %12792 = vmatpush3.bf16.msra.mxu0 %v14356_v33  ;;  %v14366_v41 = vld [vmem:[#allocation37 + $0x88] ss:$20 sps:$4 sm:$0xff]  }
 0xa7e   :  { %v6783_v28 = vpop.f32.mrf.mxu0  ;;  %8330 = vmatmul.mubr.bf16.vlgmr.msra.gmra.mxu1 %v20328_v32  ;;  %v6690_v26 = vpop.f32.mrf.mxu1  ;;  %12793 = vmatprep.subr.bf16.mxu0 %v14357_v52 }
 0xa7f   :  { %v6691_v17 = vadd.f32 %v6690_v26, %v18093_v51  ;;  %8339 = vmatprep.mubr.bf16.mxu1 %v20329_v54  ;;  %8460 = vmatpush1.bf16.msra.mxu1 %v14343_v34 }
 0xa80   :  { %v6785_v59 = vpop.f32.mrf.mxu0  ;;  %v6692_v60 = vpop.f32.mrf.mxu1  ;;  %8461 = vmatprep.subr.bf16.mxu1 %v14350_v16  ;;  %v14353_v16 = vld [vmem:[#allocation37 + $0x5d0] ss:$20 sps:$4 sm:$0xff]  }
 0xa81   :  { %v18177_v20 = vadd.f32 %v6771_v7, %v6691_v17  ;;  %v6693_v33 = vadd.f32 %v6692_v60, %v18097_v48  ;;  %12794 = vmatpush3.bf16.msra.mxu0 %v14361_v62  ;;  %v14360_v48 = vld [vmem:[#allocation37 + $0x5ac] ss:$20 sps:$4 sm:$0xff]   ;;  %v14358_v60 = vld [vmem:[#allocation37 + $0x5a8] ss:$20 sps:$4 sm:$0xff]  }
 0xa82   :  { %v18180_v37 = vpop.f32.mrf.mxu0  ;;  %v6694_v52 = vpop.f32.mrf.mxu1  ;;  %12795 = vmatprep.subr.bf16.mxu0 %v14362_v10  ;;  %v14371_v10 = vld [vmem:[#allocation37 + $0x60] ss:$20 sps:$4 sm:$0xff]  }
 0xa83   :  { %20381 = vst [vmem:[#allocation155_spill] sm:$0xff] %v18180_v37  ;;  %v18182_v51 = vadd.f32 %v6773_v43, %v6693_v33  ;;  %v6695_v34 = vadd.f32 %v6694_v52, %v18107_v5  ;;  %8462 = vmatpush1.bf16.msra.mxu1 %v14348_v49  ;;  %v14372_v5 = vld [vmem:[#allocation37 + $0x178] ss:$20 sps:$4 sm:$0xff]  }
 0xa84   :  { %8431 = vmatmul.mubr.bf16.gmra.mxu0 %v20367_v63  ;;  %v6791_v26 = vpop.f32.mrf.mxu0  ;;  %v18186_v7 = vpop.f32.mrf.mxu1  ;;  %8463 = vmatprep.subr.bf16.mxu1 %v14355_v4  ;;  %v14365_v4 = vld [vmem:[#allocation37 + $0x584] ss:$20 sps:$4 sm:$0xff]  }
 0xa85   :  { %20382 = vst [vmem:[#allocation156_spill] sm:$0xff] %v18186_v7  ;;  %8440 = vmatprep.mubr.bf16.mxu0 %v20368_v42  ;;  %v18189_v62 = vadd.f32 %v6775_v6, %v6695_v34  ;;  %12796 = vmatpush3.bf16.msra.mxu0 %v14366_v41  ;;  %v14376_v37 = vld [vmem:[#allocation37 + $0x38] ss:$20 sps:$4 sm:$0xff]  }
 0xa86   :  { %v6793_v17 = vpop.f32.mrf.mxu0  ;;  %8340 = vmatmul.mubr.bf16.gmra.mxu1 %v20332_v31  ;;  %v6700_v43 = vpop.f32.mrf.mxu1  ;;  %12797 = vmatprep.subr.bf16.mxu0 %v14367_v35  ;;  %v14377_v35 = vld [vmem:[#allocation37 + $0x150] ss:$20 sps:$4 sm:$0xff]  }
 0xa87   :  { %v6701_v49 = vadd.f32 %v6700_v43, %v18119_v55  ;;  %8349 = vmatprep.mubr.bf16.mxu1 %v20333_v19  ;;  %8464 = vmatpush1.bf16.msra.mxu1 %v14353_v16  ;;  %v14363_v16 = vld [vmem:[#allocation37 + $0x580] ss:$20 sps:$4 sm:$0xff]  }
 0xa88   :  { %v6795_v33 = vpop.f32.mrf.mxu0  ;;  %v6702_v52 = vpop.f32.mrf.mxu1  ;;  %8465 = vmatprep.subr.bf16.mxu1 %v14360_v48 }
 0xa89   :  { %v18194_v6 = vadd.f32 %v6781_v46, %v6701_v49  ;;  %v6703_v41 = vadd.f32 %v6702_v52, %v18124_v44  ;;  %12798 = vmatpush3.bf16.msra.mxu0 %v14371_v10  ;;  %v14370_v44 = vld [vmem:[#allocation37 + $0x55c] ss:$20 sps:$4 sm:$0xff]   ;;  %v14368_v49 = vld [vmem:[#allocation37 + $0x558] ss:$20 sps:$4 sm:$0xff]   ;;  %v14375_v52 = vld [vmem:[#allocation37 + $0x534] ss:$20 sps:$4 sm:$0xff]  }
 0xa8a   :  { %v6796_v34 = vpop.f32.mrf.mxu0  ;;  %v6704_v7 = vpop.f32.mrf.mxu1  ;;  %12799 = vmatprep.subr.bf16.mxu0 %v14372_v5  ;;  %v14381_v5 = vld [vmem:[#allocation37 + $0x10] ss:$20 sps:$4 sm:$0xff]  }
 0xa8b   :  { %v18197_v40 = vadd.f32 %v6783_v28, %v6703_v41  ;;  %v6705_v55 = vadd.f32 %v6704_v7, %v18128_v15  ;;  %8466 = vmatpush1.bf16.msra.mxu1 %v14358_v60 }
 0xa8c   :  { %8441 = vmatmul.mubr.bf16.gmra.mxu0 %v20373_v23  ;;  %v12744_v48 = vpop.f32.mrf.mxu0  ;;  %v18201_v43 = vpop.f32.mrf.mxu1  ;;  %8467 = vmatprep.subr.bf16.mxu1 %v14365_v4 }
 0xa8d   :  { %20383 = vst [vmem:[#allocation157_spill] sm:$0xff] %v18201_v43  ;;  %8450 = vmatprep.mubr.bf16.mxu0 %v18121_v14  ;;  %v18204_v46 = vadd.f32 %v6785_v59, %v6705_v55  ;;  %12800 = vmatpush3.bf16.msra.mxu0 %v14376_v37 }
 0xa8e   :  { %v12745_v10 = vpop.f32.mrf.mxu0  ;;  %8350 = vmatmul.mubr.bf16.gmra.mxu1 %v20334_v50  ;;  %v6710_v28 = vpop.f32.mrf.mxu1  ;;  %12801 = vmatprep.subr.bf16.mxu0 %v14377_v35 }
 0xa8f   :  { %v12746_v15 = vadd.f32 %v12745_v10, %v12744_v48  ;;  %v6711_v7 = vadd.f32 %v6710_v28, %v18134_v21  ;;  %8359 = vmatprep.mubr.bf16.mxu1 %v20337_v1  ;;  %8468 = vmatpush1.bf16.msra.mxu1 %v14363_v16  ;;  %v14373_v21 = vld [vmem:[#allocation37 + $0x530] ss:$20 sps:$4 sm:$0xff]  }
 0xa90   :  { %v12747_v60 = vpop.f32.mrf.mxu0  ;;  %v6712_v33 = vpop.f32.mrf.mxu1  ;;  %8469 = vmatprep.subr.bf16.mxu1 %v14370_v44 }
 0xa91   :  { %v18209_v59 = vadd.f32 %v6791_v26, %v6711_v7  ;;  %v6713_v37 = vadd.f32 %v6712_v33, %v18138_v25  ;;  %12802 = vmatpush3.bf16.msra.mxu0 %v14381_v5  ;;  %v14380_v26 = vld [vmem:[#allocation37 + $0x50c] ss:$20 sps:$4 sm:$0xff]   ;;  %v14382_v5 = vld [vmem:[#allocation37 + $0x4e8] ss:$20 sps:$4 sm:$0xff]  }
 0xa92   :  { %v12748_v4 = vpop.f32.mrf.mxu0  ;;  %v6714_v41 = vpop.f32.mrf.mxu1  ;;  %13505 = vmatprep.subr.bf16.mxu0 %v20320_v47 }
 0xa93   :  { %v18213_v34 = vadd.f32 %v6793_v17, %v6713_v37  ;;  %8470 = vmatpush1.bf16.msra.mxu1 %v14368_v49  ;;  %v14378_v17 = vld [vmem:[#allocation37 + $0x508] ss:$20 sps:$4 sm:$0xff]  }
 0xa94   :  { %8451 = vmatmul.mubr.bf16.gmra.mxu0 %v18136_v27  ;;  %v12750_v35 = vpop.f32.mrf.mxu0  ;;  %v6715_v55 = vpop.f32.mrf.mxu1  ;;  %8471 = vmatprep.subr.bf16.mxu1 %v14375_v52  ;;  %v14383_v49 = vld [vmem:[#allocation37 + $0x628] ss:$20 sps:$4 sm:$0xff]   ;;  %v12749_v52 = vadd.f32 %v12748_v4, %v12747_v60 }
 0xa95   :  { %8572 = vmatprep.mubr.bf16.mxu0 %v20325_v2  ;;  %v14386_v55 = vld [vmem:[#allocation37 + $0x600] ss:$20 sps:$4 sm:$0xff]  }
 0xa96   :  { %v12751_v16 = vpop.f32.mrf.mxu0  ;;  %8360 = vmatmul.mubr.bf16.gmra.mxu1 %v20341_v11  ;;  %v12698_v25 = vpop.f32.mrf.mxu1 }
 0xa97   :  { %v12752_v48 = vadd.f32 %v12751_v16, %v12750_v35  ;;  %8369 = vmatprep.mubr.bf16.mxu1 %v18004_v57  ;;  %8472 = vmatpush1.bf16.msra.mxu1 %v14373_v21 }
 0xa98   :  { %v12753_v44 = vpop.f32.mrf.mxu0  ;;  %v12699_v10 = vpop.f32.mrf.mxu1  ;;  %8473 = vmatprep.subr.bf16.mxu1 %v14380_v26 }
 0xa99   :  { %v12700_v28 = vadd.f32 %v12699_v10, %v12698_v25 }
 0xa9a   :  { %v12754_v7 = vpop.f32.mrf.mxu0  ;;  %v12701_v33 = vpop.f32.mrf.mxu1 }
 0xa9b   :  { %8474 = vmatpush1.bf16.msra.mxu1 %v14378_v17  ;;  %v18220_v37 = vadd.f32 %v12746_v15, %v12700_v28  ;;  %v12755_v10 = vadd.f32 %v12754_v7, %v12753_v44 }
 0xa9c   :  { %8573 = vmatmul.mubr.bf16.vlgmr.msra.gmra.mxu0 %v20328_v32  ;;  %v12756_v2 = vpop.f32.mrf.mxu0  ;;  %v12702_v41 = vpop.f32.mrf.mxu1  ;;  %12833 = vmatprep.subr.bf16.mxu1 %v14382_v5  ;;  %v14384_v5 = vld [vmem:[#allocation37 + $0x3a8] ss:$20 sps:$4 sm:$0xff]  }
 0xa9d   :  { %8580 = vmatprep.mubr.bf16.mxu0 %v20329_v54  ;;  %v12703_v21 = vadd.f32 %v12702_v41, %v12701_v33  ;;  %13506 = vmatpush3.bf16.msra.mxu0 %v14383_v49  ;;  %v14389_v54 = vld [vmem:[#allocation37 + $0x5d8] ss:$20 sps:$4 sm:$0xff]  }
 0xa9e   :  { %v12757_v35 = vpop.f32.mrf.mxu0  ;;  %8370 = vmatmul.mubr.bf16.gmra.mxu1 %v18020_v38  ;;  %v12704_v26 = vpop.f32.mrf.mxu1  ;;  %13507 = vmatprep.subr.bf16.mxu0 %v20320_v47 }
 0xa9f   :  { %v12758_v16 = vadd.f32 %v12757_v35, %v12756_v2  ;;  %8491 = vmatprep.mubr.bf16.mxu1 %v20118_v29  ;;  %v18226_v60 = vadd.f32 %v12749_v52, %v12703_v21  ;;  %v14385_v52 = vld [vmem:[#allocation37 + $0x4c0] ss:$20 sps:$4 sm:$0xff]   ;;  %v14392_v21 = vld [vmem:[#allocation37 + $0x5b0] ss:$20 sps:$4 sm:$0xff]  }
 0xaa0   :  { %v12759_v32 = vpop.f32.mrf.mxu0  ;;  %v12705_v15 = vpop.f32.mrf.mxu1 }
 0xaa1   :  { %v12706_v4 = vadd.f32 %v12705_v15, %v12704_v26  ;;  %13508 = vmatpush3.bf16.msra.mxu0 %v14386_v55 }
 0xaa2   :  { %v12760_v25 = vpop.f32.mrf.mxu0  ;;  %v12707_v17 = vpop.f32.mrf.mxu1  ;;  %13509 = vmatprep.subr.bf16.mxu0 %v20320_v47 }
 0xaa3   :  { %v18230_v49 = vadd.f32 %v12752_v48, %v12706_v4  ;;  %v14395_v4 = vld [vmem:[#allocation37 + $0x588] ss:$20 sps:$4 sm:$0xff]  }
 0xaa4   :  { %8581 = vmatmul.mubr.bf16.gmra.mxu0 %v20332_v31  ;;  %v12762_v28 = vpop.f32.mrf.mxu0  ;;  %v12708_v33 = vpop.f32.mrf.mxu1  ;;  %v14387_v31 = vld [vmem:[#allocation37 + $0x380] ss:$20 sps:$4 sm:$0xff]  }
 0xaa5   :  { %8588 = vmatprep.mubr.bf16.mxu0 %v20333_v19  ;;  %v12709_v2 = vadd.f32 %v12708_v33, %v12707_v17  ;;  %13510 = vmatpush3.bf16.msra.mxu0 %v14389_v54  ;;  %v14388_v19 = vld [vmem:[#allocation37 + $0x498] ss:$20 sps:$4 sm:$0xff]   ;;  %v12761_v17 = vadd.f32 %v12760_v25, %v12759_v32 }
 0xaa6   :  { %v12763_v41 = vpop.f32.mrf.mxu0  ;;  %8492 = vmatmul.mubr.bf16.vlgmr.msra.gmra.mxu1 %v20347_v36  ;;  %v12710_v35 = vpop.f32.mrf.mxu1  ;;  %13511 = vmatprep.subr.bf16.mxu0 %v20320_v47 }
 0xaa7   :  { %v12764_v55 = vadd.f32 %v12763_v41, %v12762_v28  ;;  %8501 = vmatprep.mubr.bf16.mxu1 %v20118_v29  ;;  %12834 = vmatpush3.bf16.msra.mxu1 %v14384_v5  ;;  %v18236_v44 = vadd.f32 %v12755_v10, %v12709_v2  ;;  %v14390_v28 = vld [vmem:[#allocation37 + $0x358] ss:$20 sps:$4 sm:$0xff]  }
 0xaa8   :  { %v12765_v48 = vpop.f32.mrf.mxu0  ;;  %v12711_v7 = vpop.f32.mrf.mxu1  ;;  %12835 = vmatprep.subr.bf16.mxu1 %v14385_v52  ;;  %v14391_v52 = vld [vmem:[#allocation37 + $0x470] ss:$20 sps:$4 sm:$0xff]  }
 0xaa9   :  { %v12712_v26 = vadd.f32 %v12711_v7, %v12710_v35  ;;  %13512 = vmatpush3.bf16.msra.mxu0 %v14392_v21  ;;  %v14398_v21 = vld [vmem:[#allocation37 + $0x560] ss:$20 sps:$4 sm:$0xff]  }
 0xaaa   :  { %v12766_v15 = vpop.f32.mrf.mxu0  ;;  %v12713_v54 = vpop.f32.mrf.mxu1  ;;  %13513 = vmatprep.subr.bf16.mxu0 %v20320_v47 }
 0xaab   :  { %12836 = vmatpush3.bf16.msra.mxu1 %v14387_v31  ;;  %v18240_v33 = vadd.f32 %v12758_v16, %v12712_v26  ;;  %v14401_v26 = vld [vmem:[#allocation37 + $0x538] ss:$20 sps:$4 sm:$0xff]  }
 0xaac   :  { %8589 = vmatmul.mubr.bf16.gmra.mxu0 %v20334_v50  ;;  %v12768_v5 = vpop.f32.mrf.mxu0  ;;  %v12714_v10 = vpop.f32.mrf.mxu1  ;;  %12837 = vmatprep.subr.bf16.mxu1 %v14388_v19  ;;  %v14393_v50 = vld [vmem:[#allocation37 + $0x330] ss:$20 sps:$4 sm:$0xff]  }
 0xaad   :  { %8596 = vmatprep.mubr.bf16.mxu0 %v20337_v1  ;;  %v12715_v2 = vadd.f32 %v12714_v10, %v12713_v54  ;;  %13514 = vmatpush3.bf16.msra.mxu0 %v14395_v4  ;;  %v14394_v1 = vld [vmem:[#allocation37 + $0x448] ss:$20 sps:$4 sm:$0xff]   ;;  %v12767_v54 = vadd.f32 %v12766_v15, %v12765_v48 }
 0xaae   :  { %v12769_v41 = vpop.f32.mrf.mxu0  ;;  %8502 = vmatmul.mubr.bf16.gmra.mxu1 %v17571_v22  ;;  %v12716_v35 = vpop.f32.mrf.mxu1  ;;  %13515 = vmatprep.subr.bf16.mxu0 %v20320_v47  ;;  %v14408_v48 = vld [vmem:[#allocation40 + $0x39c] ss:$20 sps:$4 sm:$0xff]  }
 0xaaf   :  { %v12770_v32 = vadd.f32 %v12769_v41, %v12768_v5  ;;  %8511 = vmatprep.mubr.bf16.mxu1 %v20118_v29  ;;  %12838 = vmatpush3.bf16.msra.mxu1 %v14390_v28  ;;  %v18246_v25 = vadd.f32 %v12761_v17, %v12715_v2  ;;  %v14396_v5 = vld [vmem:[#allocation37 + $0x308] ss:$20 sps:$4 sm:$0xff]   ;;  %v14397_v17 = vld [vmem:[#allocation37 + $0x420] ss:$20 sps:$4 sm:$0xff]   ;;  %v14404_v2 = vld [vmem:[#allocation37 + $0x510] ss:$20 sps:$4 sm:$0xff]  }
 0xab0   :  { %v12771_v16 = vpop.f32.mrf.mxu0  ;;  %v12717_v31 = vpop.f32.mrf.mxu1  ;;  %12839 = vmatprep.subr.bf16.mxu1 %v14391_v52 }
 0xab1   :  { %v12718_v7 = vadd.f32 %v12717_v31, %v12716_v35  ;;  %13516 = vmatpush3.bf16.msra.mxu0 %v14398_v21  ;;  %v14400_v21 = vld [vmem:[#allocation37 + $0x3f8] ss:$20 sps:$4 sm:$0xff]  }
 0xab2   :  { %v12772_v19 = vpop.f32.mrf.mxu0  ;;  %v12719_v4 = vpop.f32.mrf.mxu1  ;;  %13517 = vmatprep.subr.bf16.mxu0 %v20320_v47 }
 0xab3   :  { %12840 = vmatpush3.bf16.msra.mxu1 %v14393_v50  ;;  %v18250_v28 = vadd.f32 %v12764_v55, %v12718_v7  ;;  %v14402_v50 = vld [vmem:[#allocation37 + $0x2b8] ss:$20 sps:$4 sm:$0xff]  }
 0xab4   :  { %8597 = vmatmul.mubr.bf16.gmra.mxu0 %v20341_v11  ;;  %v12720_v10 = vpop.f32.mrf.mxu1  ;;  %12841 = vmatprep.subr.bf16.mxu1 %v14394_v1  ;;  %v14399_v11 = vld [vmem:[#allocation37 + $0x2e0] ss:$20 sps:$4 sm:$0xff]   ;;  %v14403_v1 = vld [vmem:[#allocation37 + $0x3d0] ss:$20 sps:$4 sm:$0xff]  }
 0xab5   :  { %8604 = vmatprep.mubr.bf16.mxu0 %v18004_v57  ;;  %v12721_v52 = vadd.f32 %v12720_v10, %v12719_v4  ;;  %13518 = vmatpush3.bf16.msra.mxu0 %v14401_v26  ;;  %v14405_v26 = vld [vmem:[#allocation37 + $0x290] ss:$20 sps:$4 sm:$0xff]  }
 0xab6   :  { %8512 = vmatmul.mubr.bf16.gmra.mxu1 %v17605_v53  ;;  %v12722_v41 = vpop.f32.mrf.mxu1  ;;  %13519 = vmatprep.subr.bf16.mxu0 %v20320_v47  ;;  %v14411_v4 = vld [vmem:[#allocation40 + $0x11c] ss:$20 sps:$4 sm:$0xff]  }
 0xab7   :  { %8521 = vmatprep.mubr.bf16.mxu1 %v20118_v29  ;;  %12842 = vmatpush3.bf16.msra.mxu1 %v14396_v5  ;;  %v18256_v55 = vadd.f32 %v12767_v54, %v12721_v52  ;;  %v14414_v54 = vld [vmem:[#allocation40 + $0x374] ss:$20 sps:$4 sm:$0xff]   ;;  %v14420_v52 = vld [vmem:[#allocation40 + $0x34c] ss:$20 sps:$4 sm:$0xff]  }
 0xab8   :  { %v12723_v15 = vpop.f32.mrf.mxu1  ;;  %12843 = vmatprep.subr.bf16.mxu1 %v14397_v17 }
 0xab9   :  { %v12724_v57 = vadd.f32 %v12723_v15, %v12722_v41  ;;  %13520 = vmatpush3.bf16.msra.mxu0 %v14404_v2 }
 0xaba   :  { %v12725_v35 = vpop.f32.mrf.mxu1  ;;  %9902 = vmatprep.subr.bf16.mxu0 %v14408_v48  ;;  %v14426_v48 = vld [vmem:[#allocation40 + $0x324] ss:$20 sps:$4 sm:$0xff]  }
 0xabb   :  { %12844 = vmatpush3.bf16.msra.mxu1 %v14399_v11  ;;  %v18259_v16 = vadd.f32 %v12770_v32, %v12724_v57  ;;  %v14406_v32 = vld [vmem:[#allocation40 + $0x398] ss:$20 sps:$4 sm:$0xff]  }
 0xabc   :  { %8605 = vmatmul.mubr.bf16.gmra.mxu0 %v18020_v38  ;;  %v12726_v31 = vpop.f32.mrf.mxu1  ;;  %12845 = vmatprep.subr.bf16.mxu1 %v14400_v21  ;;  %v14409_v21 = vld [vmem:[#allocation40 + $0x118] ss:$20 sps:$4 sm:$0xff]  }
 0xabd   :  { %13521 = vmatprep.mubr.msk.bf16.mxu0 %vm15388_vm0, %v20320_v47 }
 0xabe   :  { %8522 = vmatmul.mubr.bf16.gmra.mxu1 %v17651_v45  ;;  %v6976_v7 = vpop.f32.mrf.mxu1 }
 0xabf   :  { %v18265_v19 = vadd.f32 %v6976_v7, %v18220_v37  ;;  %8531 = vmatprep.mubr.bf16.mxu1 %v20118_v29  ;;  %12846 = vmatpush3.bf16.msra.mxu1 %v14402_v50  ;;  %v14412_v37 = vld [vmem:[#allocation40 + $0x370] ss:$20 sps:$4 sm:$0xff]   ;;  %v14417_v50 = vld [vmem:[#allocation40 + $0xf4] ss:$20 sps:$4 sm:$0xff]  }
 0xac0   :  { %v13487_v38 = vpop.f32.mrf.mxu1  ;;  %12847 = vmatprep.subr.bf16.mxu1 %v14403_v1  ;;  %v14432_v1 = vld [vmem:[#allocation40 + $0x2fc] ss:$20 sps:$4 sm:$0xff]   ;;  %v20384_v7 = vld [vmem:[#allocation117_spill] sm:$0xff] }
 0xac2   :  { %v6979_v5 = vpop.f32.mrf.mxu1 }
 0xac3   :  { %v18269_v10 = vadd.f32 %v6979_v5, %v18226_v60  ;;  %12848 = vmatpush3.bf16.msra.mxu1 %v14405_v26 }
 0xac4   :  { %13522 = vmatmul.mubr.bf16.vlgmr.msra.gmra.mxu0 %v20347_v36  ;;  %v13488_v17 = vpop.f32.mrf.mxu1  ;;  %9821 = vmatprep.subr.bf16.mxu1 %v14411_v4  ;;  %v14418_v36 = vld [vmem:[#allocation40 + $0x348] ss:$20 sps:$4 sm:$0xff]   ;;  %v14423_v4 = vld [vmem:[#allocation40 + $0xcc] ss:$20 sps:$4 sm:$0xff]  }
 0xac5   :  { %9903 = vmatpush1.bf16.msra.mxu0 %v14406_v32  ;;  %13525 = vmatprep.mubr.msk.bf16.mxu0 %vm15388_vm0, %v20320_v47 }
 0xac6   :  { %9904 = vmatprep.subr.bf16.mxu0 %v14414_v54  ;;  %8532 = vmatmul.mubr.bf16.gmra.mxu1 %v18116_v12  ;;  %v6984_v2 = vpop.f32.mrf.mxu1  ;;  %v20385_v54 = vld [vmem:[#allocation127_spill] sm:$0xff] }
 0xac7   :  { %v18276_v41 = vadd.f32 %v6984_v2, %v18230_v49  ;;  %8644 = vmatprep.mubr.bf16.mxu1 %v20340_v39  ;;  %v14424_v39 = vld [vmem:[#allocation40 + $0x320] ss:$20 sps:$4 sm:$0xff]  }
 0xac8   :  { %v13491_v60 = vpop.f32.mrf.mxu1 }
 0xac9   :  { %9905 = vmatpush1.bf16.msra.mxu0 %v14412_v37  ;;  %v14438_v37 = vld [vmem:[#allocation40 + $0x2d4] ss:$20 sps:$4 sm:$0xff]  }
 0xaca   :  { %9906 = vmatprep.subr.bf16.mxu0 %v14420_v52  ;;  %v6987_v11 = vpop.f32.mrf.mxu1 }
 0xacb   :  { %v18280_v15 = vadd.f32 %v6987_v11, %v18236_v44 }
 0xacc   :  { %13526 = vmatmul.mubr.bf16.gmra.mxu0 %v17571_v22  ;;  %v8088_v57 = vpop.f32.mrf.mxu0  ;;  %v13492_v35 = vpop.f32.mrf.mxu1 }
 0xacd   :  { %9907 = vmatpush1.bf16.msra.mxu0 %v14418_v36  ;;  %v18284_v49 = vadd.f32 %v8088_v57, %v18025_v8  ;;  %13529 = vmatprep.mubr.msk.bf16.mxu0 %vm15388_vm0, %v20320_v47  ;;  %v14415_v8 = vld [vmem:[#allocation40 + $0xf0] ss:$20 sps:$4 sm:$0xff]   ;;  %v14444_v35 = vld [vmem:[#allocation40 + $0x2ac] ss:$20 sps:$4 sm:$0xff]  }
 0xace   :  { %v8090_v31 = vpop.f32.mrf.mxu0  ;;  %9908 = vmatprep.subr.bf16.mxu0 %v14426_v48  ;;  %8645 = vmatmul.mubr.bf16.vlgmr.msra.gmra.mxu1 %v20353_v58  ;;  %v6992_v44 = vpop.f32.mrf.mxu1  ;;  %v14430_v58 = vld [vmem:[#allocation40 + $0x2f8] ss:$20 sps:$4 sm:$0xff]  }
 0xacf   :  { %v18290_v26 = vadd.f32 %v8090_v31, %v20384_v7  ;;  %9822 = vmatpush1.bf16.msra.mxu1 %v14409_v21  ;;  %v18293_v22 = vadd.f32 %v6992_v44, %v18240_v33  ;;  %8652 = vmatprep.mubr.bf16.mxu1 %v20354_v0  ;;  %v14421_v0 = vld [vmem:[#allocation40 + $0xc8] ss:$20 sps:$4 sm:$0xff]   ;;  %v14429_v36 = vld [vmem:[#allocation40 + $0xa4] ss:$20 sps:$4 sm:$0xff]   ;;  %v14427_v31 = vld [vmem:[#allocation40 + $0xa0] ss:$20 sps:$4 sm:$0xff]  }
 0xad0   :  { %v8092_v38 = vpop.f32.mrf.mxu0  ;;  %v13495_v32 = vpop.f32.mrf.mxu1  ;;  %9823 = vmatprep.subr.bf16.mxu1 %v14417_v50  ;;  %v20387_v48 = vld [vmem:[#allocation145_spill] sm:$0xff]  ;;  %v14436_v21 = vld [vmem:[#allocation40 + $0x2d0] ss:$20 sps:$4 sm:$0xff]  }
 0xad1   :  { %9909 = vmatpush1.bf16.msra.mxu0 %v14424_v39  ;;  %v18297_v5 = vadd.f32 %v8092_v38, %v20385_v54  ;;  %v20388_v50 = vld [vmem:[#allocation129_spill] sm:$0xff]  ;;  %v14435_v7 = vld [vmem:[#allocation40 + $0x7c] ss:$20 sps:$4 sm:$0xff]  }
 0xad2   :  { %v18299_v17 = vpop.f32.mrf.mxu0  ;;  %9910 = vmatprep.subr.bf16.mxu0 %v14432_v1  ;;  %v6995_v52 = vpop.f32.mrf.mxu1 }
 0xad3   :  { %20386 = vst [vmem:[#allocation121_spill] sm:$0xff] %v18299_v17  ;;  %9824 = vmatpush1.bf16.msra.mxu1 %v14415_v8  ;;  %v18302_v33 = vadd.f32 %v6995_v52, %v18246_v25  ;;  %v20389_v8 = vld [vmem:[#allocation146_spill] sm:$0xff] }
 0xad4   :  { %13530 = vmatmul.mubr.bf16.gmra.mxu0 %v17605_v53  ;;  %v8098_v2 = vpop.f32.mrf.mxu0  ;;  %v13496_v60 = vpop.f32.mrf.mxu1  ;;  %9825 = vmatprep.subr.bf16.mxu1 %v14423_v4  ;;  %v14450_v4 = vld [vmem:[#allocation40 + $0x284] ss:$20 sps:$4 sm:$0xff]   ;;  %v14441_v52 = vld [vmem:[#allocation40 + $0x54] ss:$20 sps:$4 sm:$0xff]  }
 0xad5   :  { %9911 = vmatpush1.bf16.msra.mxu0 %v14430_v58  ;;  %v18306_v11 = vadd.f32 %v8098_v2, %v20387_v48  ;;  %13533 = vmatprep.mubr.msk.bf16.mxu0 %vm15388_vm0, %v20320_v47  ;;  %v14448_v60 = vld [vmem:[#allocation40 + $0x280] ss:$20 sps:$4 sm:$0xff]   ;;  %v14456_v48 = vld [vmem:[#allocation40 + $0x4dc] ss:$20 sps:$4 sm:$0xff]  }
 0xad6   :  { %v8100_v57 = vpop.f32.mrf.mxu0  ;;  %9912 = vmatprep.subr.bf16.mxu0 %v14438_v37  ;;  %8653 = vmatmul.mubr.bf16.gmra.mxu1 %v20360_v18  ;;  %v7000_v25 = vpop.f32.mrf.mxu1  ;;  %v14442_v18 = vld [vmem:[#allocation40 + $0x2a8] ss:$20 sps:$4 sm:$0xff]  }
 0xad7   :  { %v18312_v53 = vadd.f32 %v8100_v57, %v20388_v50  ;;  %9826 = vmatpush1.bf16.msra.mxu1 %v14421_v0  ;;  %v18315_v39 = vadd.f32 %v7000_v25, %v18250_v28  ;;  %8660 = vmatprep.mubr.bf16.mxu1 %v17573_v9  ;;  %v14433_v9 = vld [vmem:[#allocation40 + $0x78] ss:$20 sps:$4 sm:$0xff]  }
 0xad8   :  { %v8102_v1 = vpop.f32.mrf.mxu0  ;;  %v13499_v44 = vpop.f32.mrf.mxu1  ;;  %9827 = vmatprep.subr.bf16.mxu1 %v14429_v36  ;;  %v20391_v0 = vld [vmem:[#allocation119_spill] sm:$0xff] }
 0xad9   :  { %9913 = vmatpush1.bf16.msra.mxu0 %v14436_v21  ;;  %v18319_v38 = vadd.f32 %v8102_v1, %v20389_v8  ;;  %v20392_v21 = vld [vmem:[#allocation115_spill] sm:$0xff]  ;;  %v20393_v1 = vld [vmem:[#allocation137_spill] sm:$0xff] }
 0xada   :  { %v18321_v32 = vpop.f32.mrf.mxu0  ;;  %9914 = vmatprep.subr.bf16.mxu0 %v14444_v35  ;;  %v7003_v54 = vpop.f32.mrf.mxu1  ;;  %v14439_v35 = vld [vmem:[#allocation40 + $0x50] ss:$20 sps:$4 sm:$0xff]   ;;  %v14462_v8 = vld [vmem:[#allocation40 + $0x4b4] ss:$20 sps:$4 sm:$0xff]  }
 0xadb   :  { %20390 = vst [vmem:[#allocation158_spill] sm:$0xff] %v18321_v32  ;;  %9828 = vmatpush1.bf16.msra.mxu1 %v14427_v31  ;;  %v18324_v28 = vadd.f32 %v7003_v54, %v18256_v55  ;;  %v14447_v31 = vld [vmem:[#allocation40 + $0x2c] ss:$20 sps:$4 sm:$0xff]   ;;  %v14453_v54 = vld [vmem:[#allocation40 + $0x4] ss:$20 sps:$4 sm:$0xff]  }
 0xadc   :  { %13534 = vmatmul.mubr.bf16.gmra.mxu0 %v17651_v45  ;;  %v8108_v58 = vpop.f32.mrf.mxu0  ;;  %v13500_v37 = vpop.f32.mrf.mxu1  ;;  %9829 = vmatprep.subr.bf16.mxu1 %v14435_v7  ;;  %v14507_v32 = vld [vmem:[#allocation40 + $0xfc] ss:$20 sps:$4 sm:$0xff]  }
 0xadd   :  { %9915 = vmatpush1.bf16.msra.mxu0 %v14442_v18  ;;  %v18328_v2 = vadd.f32 %v8108_v58, %v20391_v0  ;;  %13537 = vmatprep.mubr.msk.bf16.mxu0 %vm15388_vm0, %v20320_v47  ;;  %v14460_v37 = vld [vmem:[#allocation40 + $0x4b0] ss:$20 sps:$4 sm:$0xff]  }
 0xade   :  { %v8110_v36 = vpop.f32.mrf.mxu0  ;;  %9916 = vmatprep.subr.bf16.mxu0 %v14450_v4  ;;  %8661 = vmatmul.mubr.bf16.gmra.mxu1 %v20367_v63  ;;  %v7008_v55 = vpop.f32.mrf.mxu1  ;;  %v14454_v63 = vld [vmem:[#allocation40 + $0x4d8] ss:$20 sps:$4 sm:$0xff]  }
 0xadf   :  { %v18334_v45 = vadd.f32 %v8110_v36, %v20392_v21  ;;  %9830 = vmatpush1.bf16.msra.mxu1 %v14433_v9  ;;  %v18337_v57 = vadd.f32 %v7008_v55, %v18259_v16  ;;  %8668 = vmatprep.mubr.bf16.mxu1 %v20368_v42  ;;  %v14445_v16 = vld [vmem:[#allocation40 + $0x28] ss:$20 sps:$4 sm:$0xff]   ;;  %v20397_v36 = vld [vmem:[#allocation134_spill] sm:$0xff] }
 0xae0   :  { %v8112_v25 = vpop.f32.mrf.mxu0  ;;  %v13503_v50 = vpop.f32.mrf.mxu1  ;;  %9831 = vmatprep.subr.bf16.mxu1 %v14441_v52  ;;  %v20395_v9 = vld [vmem:[#allocation91_spill] sm:$0xff] }
 0xae1   :  { %9917 = vmatpush1.bf16.msra.mxu0 %v14448_v60  ;;  %v18341_v44 = vadd.f32 %v8112_v25, %v20393_v1  ;;  %v20396_v52 = vld [vmem:[#allocation123_spill] sm:$0xff]  ;;  %v14468_v60 = vld [vmem:[#allocation40 + $0x48c] ss:$20 sps:$4 sm:$0xff]  }
 0xae2   :  { %v18343_v7 = vpop.f32.mrf.mxu0  ;;  %9918 = vmatprep.subr.bf16.mxu0 %v14456_v48  ;;  %v7011_v18 = vpop.f32.mrf.mxu1  ;;  %v14459_v21 = vld [vmem:[#allocation40 + $0x25c] ss:$20 sps:$4 sm:$0xff]   ;;  %v14474_v1 = vld [vmem:[#allocation40 + $0x464] ss:$20 sps:$4 sm:$0xff]  }
 0xae3   :  { %20394 = vst [vmem:[#allocation117_spill] sm:$0xff] %v18343_v7  ;;  %9832 = vmatpush1.bf16.msra.mxu1 %v14439_v35  ;;  %v20398_v35 = vld [vmem:[#allocation99_spill] sm:$0xff] }
 0xae4   :  { %13538 = vmatmul.mubr.bf16.gmra.mxu0 %v18116_v12  ;;  %v8118_v42 = vpop.f32.mrf.mxu0  ;;  %v13504_v4 = vpop.f32.mrf.mxu1  ;;  %9833 = vmatprep.subr.bf16.mxu1 %v14447_v31  ;;  %v14451_v12 = vld [vmem:[#allocation40] ss:$20 sps:$4 sm:$0xff]   ;;  %v14466_v50 = vld [vmem:[#allocation40 + $0x488] ss:$20 sps:$4 sm:$0xff]  }
 0xae5   :  { %9919 = vmatpush2.bf16.msra.mxu0 %v14454_v63  ;;  %v18347_v58 = vadd.f32 %v8118_v42, %v20395_v9  ;;  %9934 = vmatprep.mubr.bf16.mxu0 %v20396_v52  ;;  %v14480_v4 = vld [vmem:[#allocation40 + $0x43c] ss:$20 sps:$4 sm:$0xff]  }
 0xae6   :  { %v8120_v0 = vpop.f32.mrf.mxu0  ;;  %9920 = vmatprep.subr.bf16.mxu0 %v14462_v8  ;;  %8669 = vmatmul.mubr.bf16.gmra.mxu1 %v20373_v23  ;;  %v14457_v23 = vld [vmem:[#allocation40 + $0x258] ss:$20 sps:$4 sm:$0xff]   ;;  %v14465_v8 = vld [vmem:[#allocation40 + $0x234] ss:$20 sps:$4 sm:$0xff]  }
 0xae7   :  { %v18352_v48 = vadd.f32 %v8120_v0, %v20397_v36  ;;  %9834 = vmatpush1.bf16.msra.mxu1 %v14445_v16  ;;  %8676 = vmatprep.mubr.bf16.mxu1 %v18121_v14  ;;  %v20400_v14 = vld [vmem:[#allocation96_spill] sm:$0xff] }
 0xae8   :  { %v8122_v55 = vpop.f32.mrf.mxu0  ;;  %9835 = vmatprep.subr.bf16.mxu1 %v14453_v54  ;;  %v14472_v16 = vld [vmem:[#allocation40 + $0x460] ss:$20 sps:$4 sm:$0xff]   ;;  %v14463_v0 = vld [vmem:[#allocation40 + $0x230] ss:$20 sps:$4 sm:$0xff]  }
 0xae9   :  { %9921 = vmatpush2.bf16.msra.mxu0 %v14460_v37  ;;  %v18356_v25 = vadd.f32 %v8122_v55, %v20398_v35  ;;  %v20401_v54 = vld [vmem:[#allocation92_spill] sm:$0xff]  ;;  %v20402_v37 = vld [vmem:[#allocation89_spill] sm:$0xff] }
 0xaea   :  { %v18358_v31 = vpop.f32.mrf.mxu0  ;;  %9922 = vmatprep.subr.bf16.mxu0 %v14468_v60  ;;  %v14471_v36 = vld [vmem:[#allocation40 + $0x20c] ss:$20 sps:$4 sm:$0xff]   ;;  %v14469_v35 = vld [vmem:[#allocation40 + $0x208] ss:$20 sps:$4 sm:$0xff]  }
 0xaeb   :  { %20399 = vst [vmem:[#allocation127_spill] sm:$0xff] %v18358_v31  ;;  %9836 = vmatpush1.bf16.msra.mxu1 %v14451_v12  ;;  %v14478_v12 = vld [vmem:[#allocation40 + $0x438] ss:$20 sps:$4 sm:$0xff]  }
 0xaec   :  { %v8128_v63 = vpop.f32.mrf.mxu0  ;;  %9837 = vmatprep.subr.bf16.mxu1 %v14459_v21  ;;  %v14486_v21 = vld [vmem:[#allocation40 + $0x414] ss:$20 sps:$4 sm:$0xff]  }
 0xaed   :  { %9923 = vmatpush2.bf16.msra.mxu0 %v14466_v50  ;;  %v18361_v18 = vadd.f32 %v8128_v63, %v20400_v14  ;;  %v14475_v14 = vld [vmem:[#allocation40 + $0x1e0] ss:$20 sps:$4 sm:$0xff]  }
 0xaee   :  { %v8130_v42 = vpop.f32.mrf.mxu0  ;;  %9924 = vmatprep.subr.bf16.mxu0 %v14474_v1  ;;  %8677 = vmatmul.mubr.bf16.gmra.mxu1 %v18136_v27  ;;  %v14477_v27 = vld [vmem:[#allocation40 + $0x1e4] ss:$20 sps:$4 sm:$0xff]  }
 0xaef   :  { %v18365_v9 = vadd.f32 %v8130_v42, %v20401_v54  ;;  %9838 = vmatpush2.bf16.msra.mxu1 %v14457_v23  ;;  %9853 = vmatprep.mubr.bf16.mxu1 %v20402_v37  ;;  %v14484_v1 = vld [vmem:[#allocation40 + $0x410] ss:$20 sps:$4 sm:$0xff]   ;;  %v14492_v23 = vld [vmem:[#allocation40 + $0x3ec] ss:$20 sps:$4 sm:$0xff]  }
 0xaf0   :  { %v8132_v60 = vpop.f32.mrf.mxu0  ;;  %9839 = vmatprep.subr.bf16.mxu1 %v14465_v8  ;;  %v14483_v8 = vld [vmem:[#allocation40 + $0x1bc] ss:$20 sps:$4 sm:$0xff]  }
 0xaf1   :  { %9925 = vmatpush2.bf16.msra.mxu0 %v14472_v16  ;;  %v14490_v16 = vld [vmem:[#allocation40 + $0x3e8] ss:$20 sps:$4 sm:$0xff]  }
 0xaf2   :  { %v8133_v55 = vpop.f32.mrf.mxu0  ;;  %9926 = vmatprep.subr.bf16.mxu0 %v14480_v4  ;;  %v14498_v4 = vld [vmem:[#allocation40 + $0x3c4] ss:$20 sps:$4 sm:$0xff]  }
 0xaf3   :  { %9840 = vmatpush2.bf16.msra.mxu1 %v14463_v0  ;;  %v14481_v0 = vld [vmem:[#allocation40 + $0x1b8] ss:$20 sps:$4 sm:$0xff]  }
 0xaf4   :  { %v8250_v50 = vpop.f32.mrf.mxu0  ;;  %9841 = vmatprep.subr.bf16.mxu1 %v14471_v36  ;;  %v14489_v36 = vld [vmem:[#allocation40 + $0x194] ss:$20 sps:$4 sm:$0xff]  }
 0xaf5   :  { %9927 = vmatpush2.bf16.msra.mxu0 %v14478_v12  ;;  %v14496_v12 = vld [vmem:[#allocation40 + $0x3c0] ss:$20 sps:$4 sm:$0xff]  }
 0xaf6   :  { %v8252_v63 = vpop.f32.mrf.mxu0  ;;  %9928 = vmatprep.subr.bf16.mxu0 %v14486_v21  ;;  %v14504_v21 = vld [vmem:[#allocation40 + $0x124] ss:$20 sps:$4 sm:$0xff]  }
 0xaf7   :  { %9842 = vmatpush2.bf16.msra.mxu1 %v14469_v35 }
 0xaf8   :  { %v8254_v42 = vpop.f32.mrf.mxu0  ;;  %9843 = vmatprep.subr.bf16.mxu1 %v14477_v27 }
 0xaf9   :  { %9929 = vmatpush2.bf16.msra.mxu0 %v14484_v1  ;;  %v14487_v1 = vld [vmem:[#allocation40 + $0x190] ss:$20 sps:$4 sm:$0xff]  }
 0xafa   :  { %v18368_v54 = vpop.f32.mrf.mxu0  ;;  %9930 = vmatprep.subr.bf16.mxu0 %v14492_v23  ;;  %v14495_v23 = vld [vmem:[#allocation40 + $0x16c] ss:$20 sps:$4 sm:$0xff]  }
 0xafb   :  { %20403 = vst [vmem:[#allocation145_spill] sm:$0xff] %v18368_v54  ;;  %9844 = vmatpush2.bf16.msra.mxu1 %v14475_v14 }
 0xafc   :  { %v8260_v60 = vpop.f32.mrf.mxu0  ;;  %9845 = vmatprep.subr.bf16.mxu1 %v14483_v8 }
 0xafd   :  { %9931 = vmatpush2.bf16.msra.mxu0 %v14490_v16  ;;  %v14502_v16 = vld [vmem:[#allocation40 + $0x120] ss:$20 sps:$4 sm:$0xff]  }
 0xafe   :  { %v8262_v55 = vpop.f32.mrf.mxu0  ;;  %9932 = vmatprep.subr.bf16.mxu0 %v14498_v4  ;;  %v8169_v35 = vpop.f32.mrf.mxu1 }
 0xaff   :  { %v8170_v27 = vadd.f32 %v8169_v35, %v18284_v49  ;;  %9846 = vmatpush2.bf16.msra.mxu1 %v14481_v0  ;;  %v14493_v0 = vld [vmem:[#allocation40 + $0x168] ss:$20 sps:$4 sm:$0xff]  }
 0xb00   :  { %v8264_v31 = vpop.f32.mrf.mxu0  ;;  %v8171_v7 = vpop.f32.mrf.mxu1  ;;  %9847 = vmatprep.subr.bf16.mxu1 %v14489_v36  ;;  %v20407_v35 = vld [vmem:[#allocation149_spill] sm:$0xff] }
 0xb01   :  { %9933 = vmatpush2.bf16.msra.mxu0 %v14496_v12  ;;  %v18371_v14 = vadd.f32 %v8250_v50, %v8170_v27  ;;  %v8172_v8 = vadd.f32 %v8171_v7, %v18290_v26  ;;  %v14501_v50 = vld [vmem:[#allocation40 + $0x144] ss:$20 sps:$4 sm:$0xff]  }
 0xb02   :  { %v18374_v54 = vpop.f32.mrf.mxu0  ;;  %10064 = vmatprep.subr.bf16.mxu0 %v14504_v21  ;;  %v8173_v4 = vpop.f32.mrf.mxu1  ;;  %v20409_v26 = vld [vmem:[#allocation147_spill] sm:$0xff] }
 0xb03   :  { %20404 = vst [vmem:[#allocation129_spill] sm:$0xff] %v18371_v14  ;;  %20405 = vst [vmem:[#allocation146_spill] sm:$0xff] %v18374_v54  ;;  %v18376_v43 = vadd.f32 %v8252_v63, %v8172_v8  ;;  %v8174_v49 = vadd.f32 %v8173_v4, %v18297_v5  ;;  %9848 = vmatpush2.bf16.msra.mxu1 %v14487_v1  ;;  %v14505_v27 = vld [vmem:[#allocation40 + $0xf8] ss:$20 sps:$4 sm:$0xff]   ;;  %v14513_v8 = vld [vmem:[#allocation40 + $0xd4] ss:$20 sps:$4 sm:$0xff]  }
 0xb04   :  { %9935 = vmatmul.mubr.bf16.vlgmr.msra.gmra.mxu0 %v20407_v35  ;;  %v8270_v36 = vpop.f32.mrf.mxu0  ;;  %v18380_v12 = vpop.f32.mrf.mxu1  ;;  %9849 = vmatprep.subr.bf16.mxu1 %v14495_v23  ;;  %v14499_v1 = vld [vmem:[#allocation40 + $0x140] ss:$20 sps:$4 sm:$0xff]  }
 0xb05   :  { %20406 = vst [vmem:[#allocation119_spill] sm:$0xff] %v18376_v43  ;;  %20408 = vst [vmem:[#allocation115_spill] sm:$0xff] %v18380_v12  ;;  %9944 = vmatprep.mubr.bf16.mxu0 %v20409_v26  ;;  %v18383_v7 = vadd.f32 %v8254_v42, %v8174_v49  ;;  %10065 = vmatpush1.bf16.msra.mxu0 %v14502_v16  ;;  %v14510_v12 = vld [vmem:[#allocation40 + $0x61c] ss:$20 sps:$4 sm:$0xff]  }
 0xb06   :  { %v8272_v21 = vpop.f32.mrf.mxu0  ;;  %v8179_v63 = vpop.f32.mrf.mxu1  ;;  %10066 = vmatprep.subr.bf16.mxu0 %v14507_v32  ;;  %v14511_v16 = vld [vmem:[#allocation40 + $0xd0] ss:$20 sps:$4 sm:$0xff]   ;;  %v14519_v32 = vld [vmem:[#allocation40 + $0xac] ss:$20 sps:$4 sm:$0xff]  }
 0xb07   :  { %20410 = vst [vmem:[#allocation137_spill] sm:$0xff] %v18383_v7  ;;  %v8180_v5 = vadd.f32 %v8179_v63, %v18306_v11  ;;  %9850 = vmatpush2.bf16.msra.mxu1 %v14493_v0  ;;  %v20414_v0 = vld [vmem:[#allocation114_spill] sm:$0xff] }
 0xb08   :  { %v8274_v4 = vpop.f32.mrf.mxu0  ;;  %v8181_v54 = vpop.f32.mrf.mxu1  ;;  %9851 = vmatprep.subr.bf16.mxu1 %v14501_v50  ;;  %v14508_v50 = vld [vmem:[#allocation40 + $0x618] ss:$20 sps:$4 sm:$0xff]  }
 0xb09   :  { %v18386_v23 = vadd.f32 %v8260_v60, %v8180_v5  ;;  %v8182_v17 = vadd.f32 %v8181_v54, %v18312_v53  ;;  %10067 = vmatpush1.bf16.msra.mxu0 %v14505_v27  ;;  %v20416_v53 = vld [vmem:[#allocation93_spill] sm:$0xff] }
 0xb0a   :  { %v18389_v42 = vpop.f32.mrf.mxu0  ;;  %v8183_v49 = vpop.f32.mrf.mxu1  ;;  %10068 = vmatprep.subr.bf16.mxu0 %v14513_v8  ;;  %v14516_v54 = vld [vmem:[#allocation40 + $0x5f4] ss:$20 sps:$4 sm:$0xff]  }
 0xb0b   :  { %20411 = vst [vmem:[#allocation91_spill] sm:$0xff] %v18386_v23  ;;  %20412 = vst [vmem:[#allocation123_spill] sm:$0xff] %v18389_v42  ;;  %v18391_v7 = vadd.f32 %v8262_v55, %v8182_v17  ;;  %v8184_v11 = vadd.f32 %v8183_v49, %v18319_v38  ;;  %9852 = vmatpush2.bf16.msra.mxu1 %v14499_v1  ;;  %v14517_v5 = vld [vmem:[#allocation40 + $0xa8] ss:$20 sps:$4 sm:$0xff]   ;;  %v20418_v17 = vld [vmem:[#allocation148_spill] sm:$0xff] }
 0xb0c   :  { %9945 = vmatmul.mubr.bf16.gmra.mxu0 %v20414_v0  ;;  %v8280_v63 = vpop.f32.mrf.mxu0  ;;  %v18395_v60 = vpop.f32.mrf.mxu1  ;;  %9983 = vmatprep.subr.bf16.mxu1 %v14510_v12  ;;  %v14525_v38 = vld [vmem:[#allocation40 + $0x84] ss:$20 sps:$4 sm:$0xff]   ;;  %v14531_v23 = vld [vmem:[#allocation40 + $0x5c] ss:$20 sps:$4 sm:$0xff]  }
 0xb0d   :  { %20413 = vst [vmem:[#allocation134_spill] sm:$0xff] %v18391_v7  ;;  %20415 = vst [vmem:[#allocation99_spill] sm:$0xff] %v18395_v60  ;;  %9954 = vmatprep.mubr.bf16.mxu0 %v20416_v53  ;;  %v18398_v27 = vadd.f32 %v8264_v31, %v8184_v11  ;;  %10069 = vmatpush1.bf16.msra.mxu0 %v14511_v16  ;;  %v20419_v49 = vld [vmem:[#allocation112_spill] sm:$0xff] }
 0xb0e   :  { %v8282_v8 = vpop.f32.mrf.mxu0  ;;  %9854 = vmatmul.mubr.bf16.vlgmr.msra.gmra.mxu1 %v20418_v17  ;;  %v8189_v55 = vpop.f32.mrf.mxu1  ;;  %10070 = vmatprep.subr.bf16.mxu0 %v14519_v32  ;;  %v14514_v42 = vld [vmem:[#allocation40 + $0x5f0] ss:$20 sps:$4 sm:$0xff]   ;;  %v14522_v7 = vld [vmem:[#allocation40 + $0x5cc] ss:$20 sps:$4 sm:$0xff]  }
 0xb0f   :  { %20417 = vst [vmem:[#allocation96_spill] sm:$0xff] %v18398_v27  ;;  %v8190_v1 = vadd.f32 %v8189_v55, %v18328_v2  ;;  %9863 = vmatprep.mubr.bf16.mxu1 %v20419_v49  ;;  %9984 = vmatpush1.bf16.msra.mxu1 %v14508_v50  ;;  %v14523_v27 = vld [vmem:[#allocation40 + $0x80] ss:$20 sps:$4 sm:$0xff]  }
 0xb10   :  { %v8284_v12 = vpop.f32.mrf.mxu0  ;;  %v8191_v60 = vpop.f32.mrf.mxu1  ;;  %9985 = vmatprep.subr.bf16.mxu1 %v14516_v54  ;;  %v20423_v55 = vld [vmem:[#allocation118_spill] sm:$0xff]  ;;  %v14520_v54 = vld [vmem:[#allocation40 + $0x5c8] ss:$20 sps:$4 sm:$0xff]  }
 0xb11   :  { %v18403_v31 = vadd.f32 %v8270_v36, %v8190_v1  ;;  %v8192_v16 = vadd.f32 %v8191_v60, %v18334_v45  ;;  %10071 = vmatpush1.bf16.msra.mxu0 %v14517_v5  ;;  %v20424_v36 = vld [vmem:[#allocation132_spill] sm:$0xff]  ;;  %v20427_v5 = vld [vmem:[#allocation94_spill] sm:$0xff] }
 0xb12   :  { %v18406_v11 = vpop.f32.mrf.mxu0  ;;  %v8193_v32 = vpop.f32.mrf.mxu1  ;;  %10072 = vmatprep.subr.bf16.mxu0 %v14525_v38  ;;  %v20425_v1 = vrot.slane %v20424_v36, 6  ;;  %v14528_v38 = vld [vmem:[#allocation40 + $0x5a4] ss:$20 sps:$4 sm:$0xff]  }
 0xb13   :  { %20420 = vst [vmem:[#allocation92_spill] sm:$0xff] %v18403_v31  ;;  %20421 = vst [vmem:[#allocation149_spill] sm:$0xff] %v18406_v11  ;;  %v18408_v2 = vadd.f32 %v8272_v21, %v8192_v16  ;;  %v8194_v50 = vadd.f32 %v8193_v32, %v18341_v44  ;;  %9986 = vmatpush1.bf16.msra.mxu1 %v14514_v42  ;;  %v14529_v44 = vld [vmem:[#allocation40 + $0x58] ss:$20 sps:$4 sm:$0xff]   ;;  %v20429_v42 = vld [vmem:[#allocation90_spill] sm:$0xff] }
 0xb14   :  { %9955 = vmatmul.mubr.bf16.gmra.mxu0 %v20423_v55  ;;  %v8290_v43 = vpop.f32.mrf.mxu0  ;;  %v5175_v45 = vsel %vm1653_vm3, %v20425_v1, 0.0  ;;  %v18415_v60 = vpop.f32.mrf.mxu1  ;;  %9987 = vmatprep.subr.bf16.mxu1 %v14522_v7  ;;  %v14537_v32 = vld [vmem:[#allocation40 + $0x34] ss:$20 sps:$4 sm:$0xff]  }
 0xb15   :  { %20422 = vst [vmem:[#allocation147_spill] sm:$0xff] %v18408_v2  ;;  %20426 = vst [vmem:[#allocation114_spill] sm:$0xff] %v18415_v60  ;;  %9964 = vmatprep.mubr.bf16.mxu0 %v20427_v5  ;;  %v18418_v11 = vadd.f32 %v8274_v4, %v8194_v50  ;;  %10073 = vmatpush1.bf16.msra.mxu0 %v14523_v27  ;;  %v20430_v2 = vld [vmem:[#allocation102_spill] sm:$0xff] }
 0xb16   :  { %v8292_v21 = vpop.f32.mrf.mxu0  ;;  %9864 = vmatmul.mubr.bf16.gmra.mxu1 %v20429_v42  ;;  %v8199_v16 = vpop.f32.mrf.mxu1  ;;  %10074 = vmatprep.subr.bf16.mxu0 %v14531_v23  ;;  %v5220_v36 = vmul.f32 %v5175_v45, %v20430_v2  ;;  %v20431_v31 = vld [vmem:[#allocation122_spill] sm:$0xff] }
 0xb17   :  { %20428 = vst [vmem:[#allocation93_spill] sm:$0xff] %v18418_v11  ;;  %v8200_v1 = vadd.f32 %v8199_v16, %v18347_v58  ;;  %9873 = vmatprep.mubr.bf16.mxu1 %v20431_v31  ;;  %9988 = vmatpush1.bf16.msra.mxu1 %v14520_v54  ;;  %v14526_v7 = vld [vmem:[#allocation40 + $0x5a0] ss:$20 sps:$4 sm:$0xff]   ;;  %v14534_v4 = vld [vmem:[#allocation40 + $0x57c] ss:$20 sps:$4 sm:$0xff]   ;;  %v20434_v16 = vld [vmem:[#allocation141_spill] sm:$0xff] }
 0xb18   :  { %v8294_v60 = vpop.f32.mrf.mxu0  ;;  %v8201_v14 = vpop.f32.mrf.mxu1  ;;  %9989 = vmatprep.subr.bf16.mxu1 %v14528_v38  ;;  %v14535_v23 = vld [vmem:[#allocation40 + $0x30] ss:$20 sps:$4 sm:$0xff]   ;;  %v18427_v45 = vpack.c.bf16 %v5220_v36, %v5220_v36  ;;  %v14543_v58 = vld [vmem:[#allocation40 + $0xc] ss:$20 sps:$4 sm:$0xff]   ;;  %v20435_v5 = vrot.slane %v20434_v16, 6 }
 0xb19   :  { %v18424_v27 = vadd.f32 %v8280_v63, %v8200_v1  ;;  %v8202_v50 = vadd.f32 %v8201_v14, %v18352_v48  ;;  %10075 = vmatpush1.bf16.msra.mxu0 %v14529_v44  ;;  %v20437_v63 = vld [vmem:[#allocation97_spill] sm:$0xff] }
 0xb1a   :  { %v8295_v11 = vpop.f32.mrf.mxu0  ;;  %v8203_v47 = vpop.f32.mrf.mxu1  ;;  %10076 = vmatprep.subr.bf16.mxu0 %v14537_v32  ;;  %20433 = vst [vmem:[#allocation118_spill] sm:$0xff] %v18427_v45  ;;  %v5174_v54 = vsel %vm1653_vm3, %v20435_v5, 0.0  ;;  %v14532_v48 = vld [vmem:[#allocation40 + $0x578] ss:$20 sps:$4 sm:$0xff]   ;;  %v14541_v32 = vld [vmem:[#allocation40 + $0x8] ss:$20 sps:$4 sm:$0xff]  }
 0xb1b   :  { %20432 = vst [vmem:[#allocation148_spill] sm:$0xff] %v18424_v27  ;;  %v18432_v60 = vadd.f32 %v8282_v8, %v8202_v50  ;;  %v8204_v38 = vadd.f32 %v8203_v47, %v18356_v25  ;;  %9990 = vmatpush1.bf16.msra.mxu1 %v14526_v7  ;;  %v14540_v11 = vld [vmem:[#allocation40 + $0x554] ss:$20 sps:$4 sm:$0xff]   ;;  %v5219_v5 = vmul.f32 %v5174_v54, %v20430_v2  ;;  %v20440_v8 = vld [vmem:[#allocation140_spill] sm:$0xff]  ;;  %v20441_v47 = vld [vmem:[#allocation131_spill] sm:$0xff] }
 0xb1c   :  { %9965 = vmatmul.mubr.bf16.gmra.mxu0 %v20437_v63  ;;  %v18436_v14 = vpop.f32.mrf.mxu1  ;;  %9991 = vmatprep.subr.bf16.mxu1 %v14534_v4  ;;  %v20442_v25 = vrot.slane %v20441_v47, 6  ;;  %v14549_v7 = vld [vmem:[#allocation40 + $0x264] ss:$20 sps:$4 sm:$0xff]   ;;  %v20443_v50 = vld [vmem:[#allocation150_spill] sm:$0xff] }
 0xb1d   :  { %20436 = vst [vmem:[#allocation132_spill] sm:$0xff] %v18432_v60  ;;  %20438 = vst [vmem:[#allocation102_spill] sm:$0xff] %v18436_v14  ;;  %9974 = vmatprep.mubr.bf16.mxu0 %v18427_v45  ;;  %v18439_v44 = vadd.f32 %v8284_v12, %v8204_v38  ;;  %10077 = vmatpush1.bf16.msra.mxu0 %v14535_v23  ;;  %v14538_v12 = vld [vmem:[#allocation40 + $0x550] ss:$20 sps:$4 sm:$0xff]   ;;  %v14546_v23 = vld [vmem:[#allocation40 + $0x52c] ss:$20 sps:$4 sm:$0xff]   ;;  %v18452_v47 = vpack.c.bf16 %v5219_v5, %v5219_v5 }
 0xb1e   :  { %9874 = vmatmul.mubr.bf16.gmra.mxu1 %v20440_v8  ;;  %v8209_v36 = vpop.f32.mrf.mxu1  ;;  %v5173_v1 = vsel %vm1653_vm3, %v20442_v25, 0.0  ;;  %10078 = vmatprep.subr.bf16.mxu0 %v14543_v58  ;;  %v14547_v58 = vld [vmem:[#allocation40 + $0x260] ss:$20 sps:$4 sm:$0xff]   ;;  %v14585_v27 = vld [vmem:[#allocation40 + $0x304] ss:$20 sps:$4 sm:$0xff]  }
 0xb1f   :  { %20439 = vst [vmem:[#allocation141_spill] sm:$0xff] %v18439_v44  ;;  %v8210_v4 = vadd.f32 %v8209_v36, %v18361_v18  ;;  %9883 = vmatprep.mubr.bf16.mxu1 %v20443_v50  ;;  %9992 = vmatpush1.bf16.msra.mxu1 %v14532_v48  ;;  %v5218_v14 = vmul.f32 %v5173_v1, %v20430_v2  ;;  %20445 = vst [vmem:[#allocation131_spill] sm:$0xff] %v18452_v47  ;;  %v14555_v18 = vld [vmem:[#allocation40 + $0x23c] ss:$20 sps:$4 sm:$0xff]  }
 0xb20   :  { %v8211_v16 = vpop.f32.mrf.mxu1  ;;  %9993 = vmatprep.subr.bf16.mxu1 %v14540_v11  ;;  %v14544_v48 = vld [vmem:[#allocation40 + $0x528] ss:$20 sps:$4 sm:$0xff]  }
 0xb21   :  { %v18448_v38 = vadd.f32 %v8290_v43, %v8210_v4  ;;  %v8212_v54 = vadd.f32 %v8211_v16, %v18365_v9  ;;  %10079 = vmatpush1.bf16.msra.mxu0 %v14541_v32  ;;  %v14552_v43 = vld [vmem:[#allocation40 + $0x504] ss:$20 sps:$4 sm:$0xff]   ;;  %v18458_v9 = vpack.c.bf16 %v5218_v14, %v5218_v14  ;;  %v20449_v4 = vld [vmem:[#allocation126_spill] sm:$0xff] }
 0xb22   :  { %v8213_v25 = vpop.f32.mrf.mxu1  ;;  %10080 = vmatprep.subr.bf16.mxu0 %v14549_v7  ;;  %v20447_v32 = vld [vmem:[#allocation151_spill] sm:$0xff]  ;;  %v14556_v14 = vld [vmem:[#allocation40 + $0x210] ss:$20 sps:$4 sm:$0xff]  }
 0xb23   :  { %20444 = vst [vmem:[#allocation140_spill] sm:$0xff] %v18448_v38  ;;  %v18454_v36 = vadd.f32 %v8292_v21, %v8212_v54  ;;  %9994 = vmatpush1.bf16.msra.mxu1 %v14538_v12  ;;  %v20448_v5 = vrot.slane %v20447_v32, 6  ;;  %v14553_v7 = vld [vmem:[#allocation40 + $0x238] ss:$20 sps:$4 sm:$0xff]   ;;  %v14558_v21 = vld [vmem:[#allocation40 + $0x214] ss:$20 sps:$4 sm:$0xff]  }
 0xb24   :  { %9975 = vmatmul.mubr.bf16.gmra.mxu0 %v18452_v47  ;;  %v8214_v11 = vpop.f32.mrf.mxu1  ;;  %9995 = vmatprep.subr.bf16.mxu1 %v14546_v23  ;;  %v14550_v12 = vld [vmem:[#allocation40 + $0x500] ss:$20 sps:$4 sm:$0xff]   ;;  %v14561_v23 = vld [vmem:[#allocation40 + $0x3a4] ss:$20 sps:$4 sm:$0xff]  }
 0xb25   :  { %20446 = vst [vmem:[#allocation150_spill] sm:$0xff] %v18454_v36  ;;  %10096 = vmatprep.mubr.bf16.mxu0 %v20402_v37  ;;  %v5172_v1 = vsel %vm1653_vm3, %v20448_v5, 0.0  ;;  %10081 = vmatpush2.bf16.msra.mxu0 %v14547_v58  ;;  %v14564_v54 = vld [vmem:[#allocation40 + $0x1ec] ss:$20 sps:$4 sm:$0xff]   ;;  %v14562_v58 = vld [vmem:[#allocation40 + $0x1e8] ss:$20 sps:$4 sm:$0xff]  }
 0xb26   :  { %9884 = vmatmul.mubr.bf16.gmra.mxu1 %v20449_v4  ;;  %10082 = vmatprep.subr.bf16.mxu0 %v14555_v18  ;;  %v5217_v16 = vmul.f32 %v5172_v1, %v20430_v2  ;;  %v14570_v18 = vld [vmem:[#allocation40 + $0x1c4] ss:$20 sps:$4 sm:$0xff]   ;;  %v14576_v11 = vld [vmem:[#allocation40 + $0x19c] ss:$20 sps:$4 sm:$0xff]   ;;  %v14579_v38 = vld [vmem:[#allocation40 + $0x32c] ss:$20 sps:$4 sm:$0xff]  }
 0xb27   :  { %9893 = vmatprep.mubr.bf16.mxu1 %v18458_v9  ;;  %9996 = vmatpush1.bf16.msra.mxu1 %v14544_v48  ;;  %v14568_v48 = vld [vmem:[#allocation40 + $0x1c0] ss:$20 sps:$4 sm:$0xff]   ;;  %v14567_v5 = vld [vmem:[#allocation40 + $0x37c] ss:$20 sps:$4 sm:$0xff]  }
 0xb28   :  { %9997 = vmatprep.subr.bf16.mxu1 %v14552_v43  ;;  %v18466_v25 = vpack.c.bf16 %v5217_v16, %v5217_v16  ;;  %v14559_v43 = vld [vmem:[#allocation40 + $0x3a0] ss:$20 sps:$4 sm:$0xff]   ;;  %v14565_v16 = vld [vmem:[#allocation40 + $0x378] ss:$20 sps:$4 sm:$0xff]  }
 0xb29   :  { %10083 = vmatpush2.bf16.msra.mxu0 %v14553_v7  ;;  %v14574_v7 = vld [vmem:[#allocation40 + $0x198] ss:$20 sps:$4 sm:$0xff]   ;;  %v14601_v37 = vld [vmem:[#allocation40 + $0x620] ss:$20 sps:$4 sm:$0xff]  }
 0xb2a   :  { %10084 = vmatprep.subr.bf16.mxu0 %v14558_v21  ;;  %v20450_v21 = vld [vmem:[#allocation142_spill] sm:$0xff]  ;;  %v20452_v44 = vld [vmem:[#allocation139_spill] sm:$0xff] }
 0xb2b   :  { %9998 = vmatpush1.bf16.msra.mxu1 %v14550_v12  ;;  %v14582_v12 = vld [vmem:[#allocation40 + $0x174] ss:$20 sps:$4 sm:$0xff]  }
 0xb2c   :  { %10145 = vmatprep.subr.bf16.mxu1 %v14561_v23 }
 0xb2d   :  { %10085 = vmatpush2.bf16.msra.mxu0 %v14556_v14  ;;  %v14573_v14 = vld [vmem:[#allocation40 + $0x354] ss:$20 sps:$4 sm:$0xff]  }
 0xb2e   :  { %9894 = vmatmul.mubr.bf16.gmra.mxu1 %v18466_v25  ;;  %10086 = vmatprep.subr.bf16.mxu0 %v14564_v54 }
 0xb2f   :  { %10015 = vmatprep.mubr.bf16.mxu1 %v20118_v29 }
 0xb31   :  { %10087 = vmatpush2.bf16.msra.mxu0 %v14562_v58  ;;  %v14580_v58 = vld [vmem:[#allocation40 + $0x170] ss:$20 sps:$4 sm:$0xff]  }
 0xb32   :  { %10088 = vmatprep.subr.bf16.mxu0 %v14570_v18  ;;  %v14588_v18 = vld [vmem:[#allocation40 + $0x14c] ss:$20 sps:$4 sm:$0xff]  }
 0xb34   :  { %v8412_v32 = vpop.f32.mrf.mxu0 }
 0xb35   :  { %10089 = vmatpush2.bf16.msra.mxu0 %v14568_v48  ;;  %v14571_v48 = vld [vmem:[#allocation40 + $0x350] ss:$20 sps:$4 sm:$0xff]  }
 0xb36   :  { %v8414_v1 = vpop.f32.mrf.mxu0  ;;  %10016 = vmatmul.mubr.bf16.vlgmr.msra.gmra.mxu1 %v20450_v21  ;;  %10090 = vmatprep.subr.bf16.mxu0 %v14576_v11 }
 0xb37   :  { %10146 = vmatpush1.bf16.msra.mxu1 %v14559_v43  ;;  %10025 = vmatprep.mubr.bf16.mxu1 %v20118_v29  ;;  %v14586_v43 = vld [vmem:[#allocation40 + $0x148] ss:$20 sps:$4 sm:$0xff]  }
 0xb38   :  { %v8416_v23 = vpop.f32.mrf.mxu0  ;;  %10147 = vmatprep.subr.bf16.mxu1 %v14567_v5  ;;  %v14603_v5 = vld [vmem:[#allocation40 + $0x624] ss:$20 sps:$4 sm:$0xff]  }
 0xb39   :  { %10091 = vmatpush2.bf16.msra.mxu0 %v14574_v7 }
 0xb3a   :  { %v18472_v54 = vpop.f32.mrf.mxu0  ;;  %10092 = vmatprep.subr.bf16.mxu0 %v14582_v12 }
 0xb3b   :  { %20451 = vst [vmem:[#allocation151_spill] sm:$0xff] %v18472_v54  ;;  %10148 = vmatpush1.bf16.msra.mxu1 %v14565_v16  ;;  %v14577_v54 = vld [vmem:[#allocation40 + $0x328] ss:$20 sps:$4 sm:$0xff]  }
 0xb3c   :  { %v8422_v36 = vpop.f32.mrf.mxu0  ;;  %10149 = vmatprep.subr.bf16.mxu1 %v14573_v14 }
 0xb3d   :  { %10093 = vmatpush2.bf16.msra.mxu0 %v14580_v58 }
 0xb3e   :  { %v8424_v11 = vpop.f32.mrf.mxu0  ;;  %10026 = vmatmul.mubr.bf16.gmra.mxu1 %v20452_v44  ;;  %v8331_v60 = vpop.f32.mrf.mxu1  ;;  %10094 = vmatprep.subr.bf16.mxu0 %v14588_v18 }
 0xb3f   :  { %10150 = vmatpush1.bf16.msra.mxu1 %v14571_v48  ;;  %v8332_v7 = vadd.f32 %v8331_v60, %v18145_v24  ;;  %10035 = vmatprep.mubr.bf16.mxu1 %v20118_v29  ;;  %v14609_v48 = vld [vmem:[#allocation40 + $0x5fc] ss:$20 sps:$4 sm:$0xff]   ;;  %v14583_v60 = vld [vmem:[#allocation40 + $0x300] ss:$20 sps:$4 sm:$0xff]  }
 0xb40   :  { %v8426_v12 = vpop.f32.mrf.mxu0  ;;  %v8333_v16 = vpop.f32.mrf.mxu1  ;;  %10151 = vmatprep.subr.bf16.mxu1 %v14579_v38 }
 0xb41   :  { %v8334_v14 = vadd.f32 %v8333_v16, %v18150_v30  ;;  %10095 = vmatpush2.bf16.msra.mxu0 %v14586_v43  ;;  %v18480_v47 = vadd.f32 %v8412_v32, %v8332_v7  ;;  %v14591_v30 = vld [vmem:[#allocation40 + $0x2dc] ss:$20 sps:$4 sm:$0xff]   ;;  %v14607_v43 = vld [vmem:[#allocation40 + $0x5f8] ss:$20 sps:$4 sm:$0xff]  }
 0xb42   :  { %v18478_v58 = vpop.f32.mrf.mxu0  ;;  %v8335_v18 = vpop.f32.mrf.mxu1  ;;  %10226 = vmatprep.subr.bf16.mxu0 %v14603_v5 }
 0xb43   :  { %20453 = vst [vmem:[#allocation126_spill] sm:$0xff] %v18478_v58  ;;  %10152 = vmatpush1.bf16.msra.mxu1 %v14577_v54  ;;  %v8336_v24 = vadd.f32 %v8335_v18, %v18157_v3  ;;  %v18485_v63 = vadd.f32 %v8414_v1, %v8334_v14  ;;  %v20455_v3 = vld [vmem:[#allocation128_spill] sm:$0xff]  ;;  %v14615_v1 = vld [vmem:[#allocation40 + $0x5d4] ss:$20 sps:$4 sm:$0xff]  }
 0xb44   :  { %v18483_v45 = vpop.f32.mrf.mxu0  ;;  %v18487_v38 = vpop.f32.mrf.mxu1  ;;  %10153 = vmatprep.subr.bf16.mxu1 %v14585_v27  ;;  %10097 = vmatmul.mubr.bf16.vlgmr.msra.gmra.mxu0 %v20418_v17  ;;  %v14589_v27 = vld [vmem:[#allocation40 + $0x2d8] ss:$20 sps:$4 sm:$0xff]   ;;  %v14594_v18 = vld [vmem:[#allocation40 + $0x2b4] ss:$20 sps:$4 sm:$0xff]  }
 0xb45   :  { %20454 = vst [vmem:[#allocation142_spill] sm:$0xff] %v18487_v38  ;;  %10106 = vmatprep.mubr.bf16.mxu0 %v20419_v49  ;;  %10227 = vmatpush1.bf16.msra.mxu0 %v14601_v37  ;;  %v18493_v54 = vadd.f32 %v8416_v23, %v8336_v24  ;;  %v14613_v23 = vld [vmem:[#allocation40 + $0x5d0] ss:$20 sps:$4 sm:$0xff]  }
 0xb46   :  { %v18491_v32 = vpop.f32.mrf.mxu0  ;;  %10036 = vmatmul.mubr.bf16.gmra.mxu1 %v20455_v3  ;;  %v8341_v5 = vpop.f32.mrf.mxu1  ;;  %10228 = vmatprep.subr.bf16.mxu0 %v14609_v48 }
 0xb47   :  { %10154 = vmatpush1.bf16.msra.mxu1 %v14583_v60  ;;  %v8342_v7 = vadd.f32 %v8341_v5, %v18160_v13  ;;  %10045 = vmatprep.mubr.bf16.mxu1 %v20118_v29  ;;  %v14621_v60 = vld [vmem:[#allocation40 + $0x5ac] ss:$20 sps:$4 sm:$0xff]   ;;  %v14592_v5 = vld [vmem:[#allocation40 + $0x2b0] ss:$20 sps:$4 sm:$0xff]  }
 0xb48   :  { %v8436_v16 = vpop.f32.mrf.mxu0  ;;  %v8343_v14 = vpop.f32.mrf.mxu1  ;;  %10155 = vmatprep.subr.bf16.mxu1 %v14591_v30 }
 0xb49   :  { %v8344_v37 = vadd.f32 %v8343_v14, %v18165_v61  ;;  %10229 = vmatpush1.bf16.msra.mxu0 %v14607_v43  ;;  %v18501_v24 = vadd.f32 %v8422_v36, %v8342_v7  ;;  %v14597_v61 = vld [vmem:[#allocation40 + $0x28c] ss:$20 sps:$4 sm:$0xff]  }
 0xb4a   :  { %v18499_v58 = vpop.f32.mrf.mxu0  ;;  %v8345_v48 = vpop.f32.mrf.mxu1  ;;  %10230 = vmatprep.subr.bf16.mxu0 %v14615_v1  ;;  %v20458_v43 = vld [vmem:[#allocation144_spill] sm:$0xff] }
 0xb4b   :  { %20456 = vst [vmem:[#allocation139_spill] sm:$0xff] %v18499_v58  ;;  %10156 = vmatpush1.bf16.msra.mxu1 %v14589_v27  ;;  %v8346_v13 = vadd.f32 %v8345_v48, %v18172_v56  ;;  %v18506_v49 = vadd.f32 %v8424_v11, %v8344_v37  ;;  %v20459_v36 = vrot.slane %v20458_v43, 6  ;;  %v14619_v56 = vld [vmem:[#allocation40 + $0x5a8] ss:$20 sps:$4 sm:$0xff]   ;;  %v20460_v11 = vld [vmem:[#allocation98_spill] sm:$0xff] }
 0xb4c   :  { %v18504_v38 = vpop.f32.mrf.mxu0  ;;  %v18508_v30 = vpop.f32.mrf.mxu1  ;;  %10157 = vmatprep.subr.bf16.mxu1 %v14594_v18  ;;  %10107 = vmatmul.mubr.bf16.gmra.mxu0 %v20429_v42  ;;  %v14627_v18 = vld [vmem:[#allocation40 + $0x584] ss:$20 sps:$4 sm:$0xff]   ;;  %v14595_v48 = vld [vmem:[#allocation40 + $0x288] ss:$20 sps:$4 sm:$0xff]  }
 0xb4d   :  { %20457 = vst [vmem:[#allocation128_spill] sm:$0xff] %v18508_v30  ;;  %v5176_v7 = vsel %vm1653_vm3, %v20459_v36, 0.0  ;;  %10116 = vmatprep.mubr.bf16.mxu0 %v20431_v31  ;;  %10231 = vmatpush1.bf16.msra.mxu0 %v14613_v23  ;;  %v18517_v27 = vadd.f32 %v8426_v12, %v8346_v13  ;;  %v14600_v58 = vld [vmem:[#allocation40 + $0x4e4] ss:$20 sps:$4 sm:$0xff]   ;;  %v14625_v30 = vld [vmem:[#allocation40 + $0x580] ss:$20 sps:$4 sm:$0xff]  }
 0xb4e   :  { %v18515_v1 = vpop.f32.mrf.mxu0  ;;  %10046 = vmatmul.mubr.bf16.gmra.mxu1 %v20460_v11  ;;  %v8351_v14 = vpop.f32.mrf.mxu1  ;;  %10232 = vmatprep.subr.bf16.mxu0 %v14621_v60  ;;  %v5221_v23 = vmul.f32 %v5176_v7, %v20430_v2  ;;  %v14598_v31 = vld [vmem:[#allocation40 + $0x4e0] ss:$20 sps:$4 sm:$0xff]   ;;  %v14606_v7 = vld [vmem:[#allocation40 + $0x4bc] ss:$20 sps:$4 sm:$0xff]  }
 0xb4f   :  { %10158 = vmatpush1.bf16.msra.mxu1 %v14592_v5  ;;  %v8352_v37 = vadd.f32 %v8351_v14, %v18177_v20  ;;  %10055 = vmatprep.mubr.bf16.mxu1 %v20118_v29  ;;  %v14633_v20 = vld [vmem:[#allocation40 + $0x55c] ss:$20 sps:$4 sm:$0xff]  }
 0xb50   :  { %v8446_v43 = vpop.f32.mrf.mxu0  ;;  %v8353_v36 = vpop.f32.mrf.mxu1  ;;  %10159 = vmatprep.subr.bf16.mxu1 %v14597_v61 }
 0xb51   :  { %v8354_v12 = vadd.f32 %v8353_v36, %v18182_v51  ;;  %10233 = vmatpush1.bf16.msra.mxu0 %v14619_v56  ;;  %v18527_v60 = vadd.f32 %v18483_v45, %v8352_v37  ;;  %v18535_v51 = vpack.c.bf16 %v5221_v23, %v5221_v23  ;;  %v14631_v56 = vld [vmem:[#allocation40 + $0x558] ss:$20 sps:$4 sm:$0xff]   ;;  %v14612_v23 = vld [vmem:[#allocation40 + $0x494] ss:$20 sps:$4 sm:$0xff]  }
 0xb52   :  { %v18524_v13 = vpop.f32.mrf.mxu0  ;;  %v8355_v5 = vpop.f32.mrf.mxu1  ;;  %10234 = vmatprep.subr.bf16.mxu0 %v14627_v18  ;;  %v14604_v37 = vld [vmem:[#allocation40 + $0x4b8] ss:$20 sps:$4 sm:$0xff]  }
 0xb53   :  { %20461 = vst [vmem:[#allocation144_spill] sm:$0xff] %v18524_v13  ;;  %10160 = vmatpush1.bf16.msra.mxu1 %v14595_v48  ;;  %v8356_v14 = vadd.f32 %v8355_v5, %v18189_v62  ;;  %v18531_v42 = vadd.f32 %v18491_v32, %v8354_v12  ;;  %v14639_v32 = vld [vmem:[#allocation40 + $0x534] ss:$20 sps:$4 sm:$0xff]  }
 0xb54   :  { %v8452_v61 = vpop.f32.mrf.mxu0  ;;  %v18533_v2 = vpop.f32.mrf.mxu1  ;;  %10161 = vmatprep.subr.bf16.mxu1 %v14600_v58  ;;  %10117 = vmatmul.mubr.bf16.gmra.mxu0 %v20440_v8 }
 0xb55   :  { %10126 = vmatprep.mubr.bf16.mxu0 %v20443_v50  ;;  %10235 = vmatpush1.bf16.msra.mxu0 %v14625_v30  ;;  %v18539_v18 = vadd.f32 %v8436_v16, %v8356_v14  ;;  %v14637_v16 = vld [vmem:[#allocation40 + $0x530] ss:$20 sps:$4 sm:$0xff]  }
 0xb56   :  { %v8454_v45 = vpop.f32.mrf.mxu0  ;;  %10056 = vmatmul.mubr.bf16.gmra.mxu1 %v18535_v51  ;;  %v8361_v62 = vpop.f32.mrf.mxu1  ;;  %10236 = vmatprep.subr.bf16.mxu0 %v14633_v20  ;;  %v14610_v14 = vld [vmem:[#allocation40 + $0x490] ss:$20 sps:$4 sm:$0xff]  }
 0xb57   :  { %10162 = vmatpush2.bf16.msra.mxu1 %v14598_v31  ;;  %v8362_v58 = vadd.f32 %v8361_v62, %v18194_v6  ;;  %10177 = vmatprep.mubr.bf16.mxu1 %v20396_v52  ;;  %v14645_v31 = vld [vmem:[#allocation40 + $0x50c] ss:$20 sps:$4 sm:$0xff]  }
 0xb58   :  { %v8456_v48 = vpop.f32.mrf.mxu0  ;;  %v8363_v36 = vpop.f32.mrf.mxu1  ;;  %10163 = vmatprep.subr.bf16.mxu1 %v14606_v7 }
 0xb59   :  { %v8364_v30 = vadd.f32 %v8363_v36, %v18197_v40  ;;  %10237 = vmatpush1.bf16.msra.mxu0 %v14631_v56  ;;  %v18546_v5 = vadd.f32 %v18504_v38, %v8362_v58  ;;  %v14618_v40 = vld [vmem:[#allocation40 + $0x46c] ss:$20 sps:$4 sm:$0xff]   ;;  %v14643_v56 = vld [vmem:[#allocation40 + $0x508] ss:$20 sps:$4 sm:$0xff]  }
 0xb5a   :  { %v8457_v12 = vpop.f32.mrf.mxu0  ;;  %v8365_v20 = vpop.f32.mrf.mxu1  ;;  %10238 = vmatprep.subr.bf16.mxu0 %v14639_v32  ;;  %v14616_v36 = vld [vmem:[#allocation40 + $0x468] ss:$20 sps:$4 sm:$0xff]  }
 0xb5b   :  { %10164 = vmatpush2.bf16.msra.mxu1 %v14604_v37  ;;  %v8366_v6 = vadd.f32 %v8365_v20, %v18204_v46  ;;  %v18550_v48 = vadd.f32 %v18515_v1, %v8364_v30  ;;  %v14647_v37 = vld [vmem:[#allocation40 + $0x4e8] ss:$20 sps:$4 sm:$0xff]   ;;  %v14624_v12 = vld [vmem:[#allocation40 + $0x444] ss:$20 sps:$4 sm:$0xff]  }
 0xb5c   :  { %v12803_v62 = vpop.f32.mrf.mxu0  ;;  %v18552_v7 = vpop.f32.mrf.mxu1  ;;  %10165 = vmatprep.subr.bf16.mxu1 %v14612_v23  ;;  %10127 = vmatmul.mubr.bf16.gmra.mxu0 %v20449_v4 }
 0xb5d   :  { %20462 = vst [vmem:[#allocation98_spill] sm:$0xff] %v18552_v7  ;;  %10136 = vmatprep.mubr.bf16.mxu0 %v18458_v9  ;;  %10239 = vmatpush1.bf16.msra.mxu0 %v14637_v16  ;;  %v18556_v32 = vadd.f32 %v8446_v43, %v8366_v6 }
 0xb5e   :  { %v12804_v38 = vpop.f32.mrf.mxu0  ;;  %v8371_v58 = vpop.f32.mrf.mxu1  ;;  %10240 = vmatprep.subr.bf16.mxu0 %v14645_v31 }
 0xb5f   :  { %v12805_v46 = vadd.f32 %v12804_v38, %v12803_v62  ;;  %10166 = vmatpush2.bf16.msra.mxu1 %v14610_v14  ;;  %v8372_v1 = vadd.f32 %v8371_v58, %v18209_v59  ;;  %v14622_v14 = vld [vmem:[#allocation40 + $0x440] ss:$20 sps:$4 sm:$0xff]   ;;  %v14628_v58 = vld [vmem:[#allocation40 + $0x418] ss:$20 sps:$4 sm:$0xff]  }
 0xb60   :  { %v12806_v30 = vpop.f32.mrf.mxu0  ;;  %v8373_v23 = vpop.f32.mrf.mxu1  ;;  %10167 = vmatprep.subr.bf16.mxu1 %v14618_v40  ;;  %v14630_v40 = vld [vmem:[#allocation40 + $0x41c] ss:$20 sps:$4 sm:$0xff]  }
 0xb61   :  { %v18560_v20 = vadd.f32 %v12805_v46, %v18265_v19  ;;  %v8374_v16 = vadd.f32 %v8373_v23, %v18213_v34  ;;  %10241 = vmatpush1.bf16.msra.mxu0 %v14643_v56  ;;  %v18563_v43 = vadd.f32 %v8452_v61, %v8372_v1 }
 0xb62   :  { %v12807_v13 = vpop.f32.mrf.mxu0  ;;  %v8375_v6 = vpop.f32.mrf.mxu1  ;;  %12938 = vmatprep.subr.bf16.mxu0 %v14647_v37  ;;  %v14636_v37 = vld [vmem:[#allocation40 + $0x3f4] ss:$20 sps:$4 sm:$0xff]  }
 0xb63   :  { %v12808_v31 = vadd.f32 %v12807_v13, %v12806_v30  ;;  %10168 = vmatpush2.bf16.msra.mxu1 %v14616_v36  ;;  %v18565_v62 = vadd.f32 %v8454_v45, %v8374_v16  ;;  %v14649_v30 = vld [vmem:[#allocation40 + $0x3a8] ss:$20 sps:$4 sm:$0xff]   ;;  %v14651_v16 = vld [vmem:[#allocation40 + $0x4c0] ss:$20 sps:$4 sm:$0xff]   ;;  %v14634_v6 = vld [vmem:[#allocation40 + $0x3f0] ss:$20 sps:$4 sm:$0xff]  }
 0xb64   :  { %v12809_v59 = vpop.f32.mrf.mxu0  ;;  %v8376_v38 = vpop.f32.mrf.mxu1  ;;  %10169 = vmatprep.subr.bf16.mxu1 %v14624_v12  ;;  %10137 = vmatmul.mubr.bf16.gmra.mxu0 %v18466_v25 }
 0xb65   :  { %v18568_v19 = vadd.f32 %v12808_v31, %v18269_v10  ;;  %10258 = vmatprep.mubr.bf16.mxu0 %v20118_v29  ;;  %v14653_v38 = vld [vmem:[#allocation40 + $0x380] ss:$20 sps:$4 sm:$0xff]  }
 0xb66   :  { %v12810_v34 = vpop.f32.mrf.mxu0  ;;  %v8493_v61 = vpop.f32.mrf.mxu1 }
 0xb67   :  { %v12811_v56 = vadd.f32 %v12810_v34, %v12809_v59  ;;  %10170 = vmatpush2.bf16.msra.mxu1 %v14622_v14  ;;  %v18573_v13 = vadd.f32 %v8493_v61, %v18480_v47  ;;  %v14642_v59 = vld [vmem:[#allocation40 + $0x3cc] ss:$20 sps:$4 sm:$0xff]  }
 0xb68   :  { %v12812_v45 = vpop.f32.mrf.mxu0  ;;  %v8495_v46 = vpop.f32.mrf.mxu1  ;;  %10171 = vmatprep.subr.bf16.mxu1 %v14630_v40 }
 0xb69   :  { %v18576_v1 = vadd.f32 %v12811_v56, %v18276_v41  ;;  %v18579_v10 = vadd.f32 %v8495_v46, %v18485_v63  ;;  %v14640_v56 = vld [vmem:[#allocation40 + $0x3c8] ss:$20 sps:$4 sm:$0xff]  }
 0xb6a   :  { %v12813_v36 = vpop.f32.mrf.mxu0  ;;  %v8497_v23 = vpop.f32.mrf.mxu1  ;;  %v14646_v46 = vld [vmem:[#allocation40 + $0x268] ss:$20 sps:$4 sm:$0xff]  }
 0xb6b   :  { %v12814_v12 = vadd.f32 %v12813_v36, %v12812_v45  ;;  %10172 = vmatpush2.bf16.msra.mxu1 %v14628_v58  ;;  %v18582_v47 = vadd.f32 %v8497_v23, %v18493_v54  ;;  %v14655_v54 = vld [vmem:[#allocation40 + $0x498] ss:$20 sps:$4 sm:$0xff]  }
 0xb6c   :  { %v12815_v31 = vpop.f32.mrf.mxu0  ;;  %v18584_v14 = vpop.f32.mrf.mxu1  ;;  %10173 = vmatprep.subr.bf16.mxu1 %v14636_v37  ;;  %10259 = vmatmul.mubr.bf16.vlgmr.msra.gmra.mxu0 %v20450_v21 }
 0xb6d   :  { %20463 = vst [vmem:[#allocation160_spill] sm:$0xff] %v18584_v14  ;;  %v18587_v41 = vadd.f32 %v12814_v12, %v18280_v15  ;;  %10268 = vmatprep.mubr.bf16.mxu0 %v20118_v29  ;;  %12939 = vmatpush3.bf16.msra.mxu0 %v14649_v30  ;;  %v14657_v30 = vld [vmem:[#allocation40 + $0x358] ss:$20 sps:$4 sm:$0xff]  }
 0xb6e   :  { %v12816_v63 = vpop.f32.mrf.mxu0  ;;  %v8503_v40 = vpop.f32.mrf.mxu1  ;;  %12940 = vmatprep.subr.bf16.mxu0 %v14651_v16  ;;  %v14659_v16 = vld [vmem:[#allocation40 + $0x470] ss:$20 sps:$4 sm:$0xff]  }
 0xb6f   :  { %v12817_v34 = vadd.f32 %v12816_v63, %v12815_v31  ;;  %10174 = vmatpush2.bf16.msra.mxu1 %v14634_v6  ;;  %v18592_v61 = vadd.f32 %v8503_v40, %v18501_v24  ;;  %v14648_v31 = vld [vmem:[#allocation40 + $0x128] ss:$20 sps:$4 sm:$0xff]  }
 0xb70   :  { %v12818_v58 = vpop.f32.mrf.mxu0  ;;  %v8505_v45 = vpop.f32.mrf.mxu1  ;;  %10175 = vmatprep.subr.bf16.mxu1 %v14642_v59 }
 0xb71   :  { %v18595_v15 = vadd.f32 %v12817_v34, %v18293_v22  ;;  %v18598_v37 = vadd.f32 %v8505_v45, %v18506_v49  ;;  %12941 = vmatpush3.bf16.msra.mxu0 %v14653_v38  ;;  %v14650_v49 = vld [vmem:[#allocation40 + $0x240] ss:$20 sps:$4 sm:$0xff]   ;;  %v14661_v38 = vld [vmem:[#allocation40 + $0x330] ss:$20 sps:$4 sm:$0xff]   ;;  %v14663_v34 = vld [vmem:[#allocation40 + $0x448] ss:$20 sps:$4 sm:$0xff]  }
 0xb72   :  { %v12819_v36 = vpop.f32.mrf.mxu0  ;;  %v8507_v23 = vpop.f32.mrf.mxu1  ;;  %12942 = vmatprep.subr.bf16.mxu0 %v14655_v54 }
 0xb73   :  { %v12820_v12 = vadd.f32 %v12819_v36, %v12818_v58  ;;  %10176 = vmatpush2.bf16.msra.mxu1 %v14640_v56  ;;  %v18601_v24 = vadd.f32 %v8507_v23, %v18517_v27  ;;  %v14652_v56 = vld [vmem:[#allocation40 + $0x100] ss:$20 sps:$4 sm:$0xff]   ;;  %v14665_v23 = vld [vmem:[#allocation40 + $0x308] ss:$20 sps:$4 sm:$0xff]  }
 0xb74   :  { %v12821_v6 = vpop.f32.mrf.mxu0  ;;  %v18603_v59 = vpop.f32.mrf.mxu1  ;;  %10269 = vmatmul.mubr.bf16.gmra.mxu0 %v20452_v44  ;;  %12892 = vmatprep.subr.bf16.mxu1 %v14646_v46  ;;  %v14654_v46 = vld [vmem:[#allocation40 + $0x218] ss:$20 sps:$4 sm:$0xff]  }
 0xb75   :  { %20464 = vst [vmem:[#allocation161_spill] sm:$0xff] %v18603_v59  ;;  %v18606_v22 = vadd.f32 %v12820_v12, %v18302_v33  ;;  %10278 = vmatprep.mubr.bf16.mxu0 %v20118_v29  ;;  %12943 = vmatpush3.bf16.msra.mxu0 %v14657_v30  ;;  %v20470_v59 = vmov 0.0  }
 0xb76   :  { %v12822_v63 = vpop.f32.mrf.mxu0  ;;  %10178 = vmatmul.mubr.bf16.vlgmr.msra.gmra.mxu1 %v20407_v35  ;;  %v8513_v27 = vpop.f32.mrf.mxu1  ;;  %12944 = vmatprep.subr.bf16.mxu0 %v14659_v16 }
 0xb77   :  { %v12823_v40 = vadd.f32 %v12822_v63, %v12821_v6  ;;  %10187 = vmatprep.mubr.bf16.mxu1 %v20409_v26  ;;  %v18613_v33 = vadd.f32 %v8513_v27, %v18527_v60  ;;  %12893 = vmatpush3.bf16.msra.mxu1 %v14648_v31  ;;  %v14667_v60 = vld [vmem:[#allocation40 + $0x420] ss:$20 sps:$4 sm:$0xff]   ;;  %v14656_v63 = vld [vmem:[#allocation40 + $0xd8] ss:$20 sps:$4 sm:$0xff]  }
 0xb78   :  { %v12824_v54 = vpop.f32.mrf.mxu0  ;;  %v8515_v58 = vpop.f32.mrf.mxu1  ;;  %12894 = vmatprep.subr.bf16.mxu1 %v14650_v49  ;;  %v14669_v27 = vld [vmem:[#allocation40 + $0x2e0] ss:$20 sps:$4 sm:$0xff]  }
 0xb79   :  { %v18616_v45 = vadd.f32 %v12823_v40, %v18315_v39  ;;  %v18619_v36 = vadd.f32 %v8515_v58, %v18531_v42  ;;  %12945 = vmatpush3.bf16.msra.mxu0 %v14661_v38  ;;  %v14658_v42 = vld [vmem:[#allocation40 + $0x1f0] ss:$20 sps:$4 sm:$0xff]  }
 0xb7a   :  { %v12825_v30 = vpop.f32.mrf.mxu0  ;;  %v8517_v12 = vpop.f32.mrf.mxu1  ;;  %12946 = vmatprep.subr.bf16.mxu0 %v14663_v34  ;;  %v14671_v34 = vld [vmem:[#allocation40 + $0x3f8] ss:$20 sps:$4 sm:$0xff]  }
 0xb7b   :  { %v12826_v16 = vadd.f32 %v12825_v30, %v12824_v54  ;;  %v18622_v6 = vadd.f32 %v8517_v12, %v18539_v18  ;;  %12895 = vmatpush3.bf16.msra.mxu1 %v14652_v56  ;;  %v14660_v56 = vld [vmem:[#allocation40 + $0xb0] ss:$20 sps:$4 sm:$0xff]   ;;  %v14662_v30 = vld [vmem:[#allocation40 + $0x1c8] ss:$20 sps:$4 sm:$0xff]  }
 0xb7c   :  { %v12827_v31 = vpop.f32.mrf.mxu0  ;;  %v18624_v39 = vpop.f32.mrf.mxu1  ;;  %10279 = vmatmul.mubr.bf16.gmra.mxu0 %v20455_v3  ;;  %12896 = vmatprep.subr.bf16.mxu1 %v14654_v46 }
 0xb7d   :  { %20465 = vst [vmem:[#allocation162_spill] sm:$0xff] %v18624_v39  ;;  %v18627_v49 = vadd.f32 %v12826_v16, %v18324_v28  ;;  %10288 = vmatprep.mubr.bf16.mxu0 %v20118_v29  ;;  %12947 = vmatpush3.bf16.msra.mxu0 %v14665_v23  ;;  %v14673_v16 = vld [vmem:[#allocation40 + $0x2b8] ss:$20 sps:$4 sm:$0xff]  }
 0xb7e   :  { %v12828_v38 = vpop.f32.mrf.mxu0  ;;  %10188 = vmatmul.mubr.bf16.gmra.mxu1 %v20414_v0  ;;  %v8523_v18 = vpop.f32.mrf.mxu1  ;;  %12948 = vmatprep.subr.bf16.mxu0 %v14667_v60 }
 0xb7f   :  { %v12829_v40 = vadd.f32 %v12828_v38, %v12827_v31  ;;  %10197 = vmatprep.mubr.bf16.mxu1 %v20416_v53  ;;  %v18634_v28 = vadd.f32 %v8523_v18, %v18546_v5  ;;  %12897 = vmatpush3.bf16.msra.mxu1 %v14656_v63  ;;  %v14675_v31 = vld [vmem:[#allocation40 + $0x3d0] ss:$20 sps:$4 sm:$0xff]   ;;  %v14664_v38 = vld [vmem:[#allocation40 + $0x88] ss:$20 sps:$4 sm:$0xff]  }
 0xb80   :  { %v12830_v54 = vpop.f32.mrf.mxu0  ;;  %v8525_v58 = vpop.f32.mrf.mxu1  ;;  %12898 = vmatprep.subr.bf16.mxu1 %v14658_v42  ;;  %v14677_v42 = vld [vmem:[#allocation40 + $0x290] ss:$20 sps:$4 sm:$0xff]  }
 0xb81   :  { %v18637_v46 = vadd.f32 %v12829_v40, %v18337_v57  ;;  %v18640_v23 = vadd.f32 %v8525_v58, %v18550_v48  ;;  %12949 = vmatpush3.bf16.msra.mxu0 %v14669_v27  ;;  %v14666_v57 = vld [vmem:[#allocation40 + $0x1a0] ss:$20 sps:$4 sm:$0xff]  }
 0xb82   :  { %v12831_v12 = vpop.f32.mrf.mxu0  ;;  %v8527_v60 = vpop.f32.mrf.mxu1  ;;  %12950 = vmatprep.subr.bf16.mxu0 %v14671_v34  ;;  %v20467_v40 = vld [vmem:[#allocation94_spill] sm:$0xff] }
 0xb83   :  { %v18643_v5 = vadd.f32 %v8527_v60, %v18556_v32  ;;  %12899 = vmatpush3.bf16.msra.mxu1 %v14660_v56  ;;  %v14680_v32 = vld [vmem:[#allocation41 + $0x11c] ss:$20 sps:$4 sm:$0xff]   ;;  %v14668_v56 = vld [vmem:[#allocation40 + $0x60] ss:$20 sps:$4 sm:$0xff]  }
 0xb84   :  { %v8718_v63 = vpop.f32.mrf.mxu0  ;;  %v18645_v18 = vpop.f32.mrf.mxu1  ;;  %10289 = vmatmul.mubr.bf16.gmra.mxu0 %v20460_v11  ;;  %12900 = vmatprep.subr.bf16.mxu1 %v14662_v30  ;;  %v14670_v30 = vld [vmem:[#allocation40 + $0x178] ss:$20 sps:$4 sm:$0xff]  }
 0xb85   :  { %20466 = vst [vmem:[#allocation163_spill] sm:$0xff] %v18645_v18  ;;  %10298 = vmatprep.mubr.bf16.mxu0 %v20118_v29  ;;  %12951 = vmatpush3.bf16.msra.mxu0 %v14673_v16 }
 0xb86   :  { %v13523_v48 = vpop.f32.mrf.mxu0  ;;  %10198 = vmatmul.mubr.bf16.gmra.mxu1 %v20423_v55  ;;  %v8533_v27 = vpop.f32.mrf.mxu1  ;;  %12952 = vmatprep.subr.bf16.mxu0 %v14675_v31 }
 0xb87   :  { %10207 = vmatprep.mubr.bf16.mxu1 %v20467_v40  ;;  %v18652_v34 = vadd.f32 %v8533_v27, %v18563_v43  ;;  %12901 = vmatpush3.bf16.msra.mxu1 %v14664_v38  ;;  %v14672_v48 = vld [vmem:[#allocation40 + $0x38] ss:$20 sps:$4 sm:$0xff]   ;;  %v14674_v43 = vld [vmem:[#allocation40 + $0x150] ss:$20 sps:$4 sm:$0xff]  }
 0xb88   :  { %v8721_v54 = vpop.f32.mrf.mxu0  ;;  %v8535_v58 = vpop.f32.mrf.mxu1  ;;  %12902 = vmatprep.subr.bf16.mxu1 %v14666_v57  ;;  %v20468_v57 = vld [vmem:[#allocation97_spill] sm:$0xff] }
 0xb89   :  { %v18655_v12 = vadd.f32 %v8535_v58, %v18565_v62  ;;  %12953 = vmatpush3.bf16.msra.mxu0 %v14677_v42  ;;  %v20469_v62 = vld [vmem:[#allocation118_spill] sm:$0xff] }
 0xb8a   :  { %v13524_v16 = vpop.f32.mrf.mxu0  ;;  %v8537_v60 = vpop.f32.mrf.mxu1  ;;  %11020 = vmatprep.subr.bf16.mxu0 %v14680_v32  ;;  %v14676_v32 = vld [vmem:[#allocation40 + $0x10] ss:$20 sps:$4 sm:$0xff]  }
 0xb8b   :  { %12903 = vmatpush3.bf16.msra.mxu1 %v14668_v56  ;;  %v14678_v16 = vld [vmem:[#allocation41 + $0x118] ss:$20 sps:$4 sm:$0xff]  }
 0xb8c   :  { %v8726_v31 = vpop.f32.mrf.mxu0  ;;  %v8538_v18 = vpop.f32.mrf.mxu1  ;;  %10299 = vmatmul.mubr.bf16.gmra.mxu0 %v18535_v51  ;;  %12904 = vmatprep.subr.bf16.mxu1 %v14670_v30  ;;  %v14684_v30 = vld [vmem:[#allocation41 + $0xf4] ss:$20 sps:$4 sm:$0xff]  }
 0xb8d   :  { %10411 = vmatprep.mubr.bf16.mxu0 %v20396_v52 }
 0xb8e   :  { %v13527_v38 = vpop.f32.mrf.mxu0  ;;  %10208 = vmatmul.mubr.bf16.gmra.mxu1 %v20468_v57  ;;  %v12849_v27 = vpop.f32.mrf.mxu1 }
 0xb8f   :  { %10217 = vmatprep.mubr.bf16.mxu1 %v20469_v62  ;;  %12905 = vmatpush3.bf16.msra.mxu1 %v14672_v48 }
 0xb90   :  { %v18661_v42 = vpop.f32.mrf.mxu0  ;;  %v12850_v56 = vpop.f32.mrf.mxu1  ;;  %12906 = vmatprep.subr.bf16.mxu1 %v14674_v43  ;;  %v14682_v43 = vld [vmem:[#allocation41 + $0xf0] ss:$20 sps:$4 sm:$0xff]  }
 0xb91   :  { %v12851_v58 = vadd.f32 %v12850_v56, %v12849_v27  ;;  %v20472_v56 = vld [vmem:[#allocation131_spill] sm:$0xff] }
 0xb92   :  { %v13528_v18 = vpop.f32.mrf.mxu0  ;;  %v12852_v60 = vpop.f32.mrf.mxu1 }
 0xb93   :  { %v8647_v39 = vadd.f32 %v12851_v58, %v18560_v20  ;;  %12907 = vmatpush3.bf16.msra.mxu1 %v14676_v32  ;;  %v14688_v20 = vld [vmem:[#allocation41 + $0xcc] ss:$20 sps:$4 sm:$0xff]  }
 0xb94   :  { %v18664_v52 = vpop.f32.mrf.mxu0  ;;  %v12853_v38 = vpop.f32.mrf.mxu1  ;;  %10412 = vmatmul.mubr.bf16.vlgmr.msra.gmra.mxu0 %v20407_v35  ;;  %13541 = vmatprep.subr.bf16.mxu1 %v20470_v59  ;;  %v20473_v58 = vld [vmem:[#allocation89_spill] sm:$0xff] }
 0xb95   :  { %v12854_v48 = vadd.f32 %v12853_v38, %v12852_v60  ;;  %10419 = vmatprep.mubr.bf16.mxu0 %v20409_v26  ;;  %11021 = vmatpush1.bf16.msra.mxu0 %v14678_v16  ;;  %v18669_v27 = vadd.f32 %v8718_v63, %v8647_v39  ;;  %v14686_v26 = vld [vmem:[#allocation41 + $0xc8] ss:$20 sps:$4 sm:$0xff]   ;;  %v14692_v63 = vld [vmem:[#allocation41 + $0xa4] ss:$20 sps:$4 sm:$0xff]  }
 0xb96   :  { %v13531_v14 = vpop.f32.mrf.mxu0  ;;  %10218 = vmatmul.mubr.bf16.gmra.mxu1 %v20472_v56  ;;  %v12855_v18 = vpop.f32.mrf.mxu1  ;;  %11022 = vmatprep.subr.bf16.mxu0 %v14684_v30 }
 0xb97   :  { %20471 = vst [vmem:[#allocation94_spill] sm:$0xff] %v18669_v27  ;;  %v8650_v32 = vadd.f32 %v12854_v48, %v18568_v19  ;;  %10339 = vmatprep.mubr.bf16.mxu1 %v20473_v58  ;;  %v14681_v27 = vld [vmem:[#allocation40 + $0x628] ss:$20 sps:$4 sm:$0xff]  }
 0xb98   :  { %v18674_v35 = vpop.f32.mrf.mxu0  ;;  %v12856_v7 = vpop.f32.mrf.mxu1 }
 0xb99   :  { %v12857_v60 = vadd.f32 %v12856_v7, %v12855_v18  ;;  %11023 = vmatpush1.bf16.msra.mxu0 %v14682_v43  ;;  %v18676_v14 = vadd.f32 %v8721_v54, %v8650_v32  ;;  %v14690_v43 = vld [vmem:[#allocation41 + $0xa0] ss:$20 sps:$4 sm:$0xff]  }
 0xb9a   :  { %v13532_v38 = vpop.f32.mrf.mxu0  ;;  %v12858_v39 = vpop.f32.mrf.mxu1  ;;  %11024 = vmatprep.subr.bf16.mxu0 %v14688_v20  ;;  %v14696_v20 = vld [vmem:[#allocation41 + $0x7c] ss:$20 sps:$4 sm:$0xff]   ;;  %v20476_v32 = vld [vmem:[#allocation112_spill] sm:$0xff] }
 0xb9b   :  { %20474 = vst [vmem:[#allocation97_spill] sm:$0xff] %v18676_v14  ;;  %v8655_v16 = vadd.f32 %v12857_v60, %v18576_v1 }
 0xb9c   :  { %v18679_v30 = vpop.f32.mrf.mxu0  ;;  %v12859_v19 = vpop.f32.mrf.mxu1  ;;  %10420 = vmatmul.mubr.bf16.gmra.mxu0 %v20414_v0  ;;  %v14685_v0 = vld [vmem:[#allocation40 + $0x600] ss:$20 sps:$4 sm:$0xff]  }
 0xb9d   :  { %v12860_v48 = vadd.f32 %v12859_v19, %v12858_v39  ;;  %10427 = vmatprep.mubr.bf16.mxu0 %v20416_v53  ;;  %11025 = vmatpush1.bf16.msra.mxu0 %v14686_v26  ;;  %v18683_v18 = vadd.f32 %v8726_v31, %v8655_v16  ;;  %v14694_v31 = vld [vmem:[#allocation41 + $0x78] ss:$20 sps:$4 sm:$0xff]   ;;  %v14700_v39 = vld [vmem:[#allocation41 + $0x54] ss:$20 sps:$4 sm:$0xff]  }
 0xb9e   :  { %v13535_v7 = vpop.f32.mrf.mxu0  ;;  %10340 = vmatmul.mubr.bf16.vlgmr.msra.gmra.mxu1 %v20418_v17  ;;  %v12861_v54 = vpop.f32.mrf.mxu1  ;;  %11026 = vmatprep.subr.bf16.mxu0 %v14692_v63  ;;  %v14689_v63 = vld [vmem:[#allocation40 + $0x5d8] ss:$20 sps:$4 sm:$0xff]  }
 0xb9f   :  { %20475 = vst [vmem:[#allocation118_spill] sm:$0xff] %v18683_v18  ;;  %v8658_v1 = vadd.f32 %v12860_v48, %v18587_v41  ;;  %10347 = vmatprep.mubr.bf16.mxu1 %v20476_v32  ;;  %13542 = vmatpush3.bf16.msra.mxu1 %v14681_v27  ;;  %v14693_v32 = vld [vmem:[#allocation40 + $0x5b0] ss:$20 sps:$4 sm:$0xff]  }
 0xba0   :  { %v18688_v58 = vpop.f32.mrf.mxu0  ;;  %v12862_v60 = vpop.f32.mrf.mxu1  ;;  %13543 = vmatprep.subr.bf16.mxu1 %v20470_v59 }
 0xba1   :  { %v12863_v53 = vadd.f32 %v12862_v60, %v12861_v54  ;;  %11027 = vmatpush1.bf16.msra.mxu0 %v14690_v43  ;;  %v18692_v17 = vadd.f32 %v18661_v42, %v8658_v1  ;;  %v14698_v42 = vld [vmem:[#allocation41 + $0x50] ss:$20 sps:$4 sm:$0xff]   ;;  %v14704_v54 = vld [vmem:[#allocation41 + $0x2c] ss:$20 sps:$4 sm:$0xff]  }
 0xba2   :  { %v13536_v38 = vpop.f32.mrf.mxu0  ;;  %v12864_v26 = vpop.f32.mrf.mxu1  ;;  %11028 = vmatprep.subr.bf16.mxu0 %v14696_v20  ;;  %v20479_v43 = vld [vmem:[#allocation90_spill] sm:$0xff] }
 0xba3   :  { %20477 = vst [vmem:[#allocation131_spill] sm:$0xff] %v18692_v17  ;;  %v8663_v41 = vadd.f32 %v12863_v53, %v18595_v15  ;;  %13544 = vmatpush3.bf16.msra.mxu1 %v14685_v0  ;;  %v20480_v1 = vld [vmem:[#allocation122_spill] sm:$0xff] }
 0xba4   :  { %v8750_v27 = vpop.f32.mrf.mxu0  ;;  %v12865_v16 = vpop.f32.mrf.mxu1  ;;  %10428 = vmatmul.mubr.bf16.gmra.mxu0 %v20423_v55  ;;  %13545 = vmatprep.subr.bf16.mxu1 %v20470_v59 }
 0xba5   :  { %v12866_v19 = vadd.f32 %v12865_v16, %v12864_v26  ;;  %10435 = vmatprep.mubr.bf16.mxu0 %v20467_v40  ;;  %11029 = vmatpush1.bf16.msra.mxu0 %v14694_v31  ;;  %v18699_v7 = vadd.f32 %v18664_v52, %v8663_v41  ;;  %v14702_v52 = vld [vmem:[#allocation41 + $0x28] ss:$20 sps:$4 sm:$0xff]   ;;  %v14708_v31 = vld [vmem:[#allocation41 + $0x4] ss:$20 sps:$4 sm:$0xff]  }
 0xba6   :  { %v13539_v48 = vpop.f32.mrf.mxu0  ;;  %10348 = vmatmul.mubr.bf16.gmra.mxu1 %v20479_v43  ;;  %v12867_v15 = vpop.f32.mrf.mxu1  ;;  %11030 = vmatprep.subr.bf16.mxu0 %v14700_v39  ;;  %v14697_v26 = vld [vmem:[#allocation40 + $0x588] ss:$20 sps:$4 sm:$0xff]  }
 0xba7   :  { %20478 = vst [vmem:[#allocation89_spill] sm:$0xff] %v18699_v7  ;;  %v8666_v20 = vadd.f32 %v12866_v19, %v18606_v22  ;;  %10355 = vmatprep.mubr.bf16.mxu1 %v20480_v1  ;;  %13546 = vmatpush3.bf16.msra.mxu1 %v14689_v63  ;;  %v14706_v63 = vld [vmem:[#allocation41] ss:$20 sps:$4 sm:$0xff]   ;;  %v14713_v43 = vld [vmem:[#allocation41 + $0x128] ss:$20 sps:$4 sm:$0xff]  }
 0xba8   :  { %v8753_v55 = vpop.f32.mrf.mxu0  ;;  %v12868_v0 = vpop.f32.mrf.mxu1  ;;  %13547 = vmatprep.subr.bf16.mxu1 %v20470_v59 }
 0xba9   :  { %v12869_v40 = vadd.f32 %v12868_v0, %v12867_v15  ;;  %11031 = vmatpush1.bf16.msra.mxu0 %v14698_v42  ;;  %v18706_v53 = vadd.f32 %v18674_v35, %v8666_v20  ;;  %v14705_v42 = vld [vmem:[#allocation40 + $0x538] ss:$20 sps:$4 sm:$0xff]   ;;  %v14716_v20 = vld [vmem:[#allocation41 + $0xfc] ss:$20 sps:$4 sm:$0xff]   ;;  %v14720_v0 = vld [vmem:[#allocation41 + $0xd4] ss:$20 sps:$4 sm:$0xff]  }
 0xbaa   :  { %v13540_v60 = vpop.f32.mrf.mxu0  ;;  %v12870_v38 = vpop.f32.mrf.mxu1  ;;  %11032 = vmatprep.subr.bf16.mxu0 %v14704_v54  ;;  %v20485_v15 = vld [vmem:[#allocation103_spill] sm:$0xff]  ;;  %v20486_v54 = vld [vmem:[#allocation104_spill] sm:$0xff] }
 0xbab   :  { %20481 = vst [vmem:[#allocation112_spill] sm:$0xff] %v18706_v53  ;;  %v8671_v22 = vadd.f32 %v12869_v40, %v18616_v45  ;;  %13548 = vmatpush3.bf16.msra.mxu1 %v14693_v32  ;;  %v14725_v55 = vld [vmem:[#allocation41 + $0xb0] ss:$20 sps:$4 sm:$0xff]   ;;  %v14714_v32 = vld [vmem:[#allocation41 + $0xf8] ss:$20 sps:$4 sm:$0xff]  }
 0xbac   :  { %v12871_v39 = vpop.f32.mrf.mxu1  ;;  %10436 = vmatmul.mubr.bf16.gmra.mxu0 %v20468_v57  ;;  %13549 = vmatprep.subr.bf16.mxu1 %v20470_v59  ;;  %v14701_v57 = vld [vmem:[#allocation40 + $0x560] ss:$20 sps:$4 sm:$0xff]   ;;  %v14729_v60 = vld [vmem:[#allocation41 + $0x88] ss:$20 sps:$4 sm:$0xff]  }
 0xbad   :  { %v12872_v41 = vadd.f32 %v12871_v39, %v12870_v38  ;;  %10443 = vmatprep.mubr.bf16.mxu0 %v20469_v62  ;;  %11033 = vmatpush1.bf16.msra.mxu0 %v14702_v52  ;;  %v18713_v35 = vadd.f32 %v18679_v30, %v8671_v22  ;;  %v14718_v38 = vld [vmem:[#allocation41 + $0xd0] ss:$20 sps:$4 sm:$0xff]  }
 0xbae   :  { %10356 = vmatmul.mubr.bf16.gmra.mxu1 %v20440_v8  ;;  %v12873_v16 = vpop.f32.mrf.mxu1  ;;  %11034 = vmatprep.subr.bf16.mxu0 %v14708_v31  ;;  %v20487_v31 = vld [vmem:[#allocation105_spill] sm:$0xff] }
 0xbaf   :  { %20482 = vst [vmem:[#allocation90_spill] sm:$0xff] %v18713_v35  ;;  %v8674_v45 = vadd.f32 %v12872_v41, %v18627_v49  ;;  %10363 = vmatprep.mubr.bf16.mxu1 %v20443_v50  ;;  %13550 = vmatpush3.bf16.msra.mxu1 %v14697_v26  ;;  %v14733_v26 = vld [vmem:[#allocation41 + $0x60] ss:$20 sps:$4 sm:$0xff]  }
 0xbb0   :  { %v12874_v19 = vpop.f32.mrf.mxu1  ;;  %13551 = vmatprep.subr.bf16.mxu1 %v20470_v59 }
 0xbb1   :  { %v12875_v48 = vadd.f32 %v12874_v19, %v12873_v16  ;;  %11035 = vmatpush1.bf16.msra.mxu0 %v14706_v63  ;;  %v18720_v62 = vadd.f32 %v18688_v58, %v8674_v45  ;;  %v14709_v58 = vld [vmem:[#allocation40 + $0x510] ss:$20 sps:$4 sm:$0xff]   ;;  %v14722_v16 = vld [vmem:[#allocation41 + $0xa8] ss:$20 sps:$4 sm:$0xff]  }
 0xbb2   :  { %v12876_v30 = vpop.f32.mrf.mxu1  ;;  %13577 = vmatprep.subr.bf16.mxu0 %v20470_v59 }
 0xbb3   :  { %20483 = vst [vmem:[#allocation122_spill] sm:$0xff] %v18720_v62  ;;  %v8679_v8 = vadd.f32 %v12875_v48, %v18637_v46  ;;  %13552 = vmatpush3.bf16.msra.mxu1 %v14701_v57  ;;  %v14712_v46 = vld [vmem:[#allocation41 + $0x124] ss:$20 sps:$4 sm:$0xff]  }
 0xbb4   :  { %v12877_v49 = vpop.f32.mrf.mxu1  ;;  %10444 = vmatmul.mubr.bf16.gmra.mxu0 %v20472_v56  ;;  %13553 = vmatprep.subr.bf16.mxu1 %v20470_v59  ;;  %v14717_v56 = vld [vmem:[#allocation41 + $0x100] ss:$20 sps:$4 sm:$0xff]   ;;  %v14728_v57 = vld [vmem:[#allocation41 + $0x84] ss:$20 sps:$4 sm:$0xff]  }
 0xbb5   :  { %11052 = vmatprep.mubr.bf16.mxu0 %v20118_v29  ;;  %v18727_v50 = vadd.f32 %v8750_v27, %v8679_v8  ;;  %v14710_v27 = vld [vmem:[#allocation41 + $0x120] ss:$20 sps:$4 sm:$0xff]   ;;  %v14737_v30 = vld [vmem:[#allocation41 + $0x38] ss:$20 sps:$4 sm:$0xff]  }
 0xbb6   :  { %10364 = vmatmul.mubr.bf16.gmra.mxu1 %v20449_v4  ;;  %v14726_v49 = vld [vmem:[#allocation41 + $0x80] ss:$20 sps:$4 sm:$0xff]  }
 0xbb7   :  { %20484 = vst [vmem:[#allocation164_spill] sm:$0xff] %v18727_v50  ;;  %10371 = vmatprep.mubr.bf16.mxu1 %v18458_v9  ;;  %13554 = vmatpush3.bf16.msra.mxu1 %v14705_v42  ;;  %v14721_v9 = vld [vmem:[#allocation41 + $0xd8] ss:$20 sps:$4 sm:$0xff]  }
 0xbb8   :  { %13555 = vmatprep.subr.bf16.mxu1 %v20470_v59 }
 0xbbb   :  { %13556 = vmatpush3.bf16.msra.mxu1 %v14709_v58 }
 0xbbc   :  { %11053 = vmatmul.mubr.bf16.vlgmr.msra.gmra.mxu0 %v20485_v15  ;;  %11101 = vmatprep.subr.bf16.mxu1 %v14712_v46  ;;  %v20488_v46 = vld [vmem:[#allocation106_spill] sm:$0xff] }
 0xbbd   :  { %11062 = vmatprep.mubr.bf16.mxu0 %v20118_v29  ;;  %13578 = vmatpush3.bf16.msra.mxu0 %v14713_v43  ;;  %v14732_v43 = vld [vmem:[#allocation41 + $0x5c] ss:$20 sps:$4 sm:$0xff]  }
 0xbbe   :  { %10372 = vmatmul.mubr.bf16.gmra.mxu1 %v18466_v25  ;;  %13579 = vmatprep.subr.bf16.mxu0 %v20470_v59 }
 0xbbf   :  { %13557 = vmatprep.mubr.msk.bf16.mxu1 %vm15388_vm0, %v20470_v59 }
 0xbc1   :  { %13580 = vmatpush3.bf16.msra.mxu0 %v14717_v56 }
 0xbc2   :  { %13581 = vmatprep.subr.bf16.mxu0 %v20470_v59 }
 0xbc4   :  { %v9936_v4 = vpop.f32.mrf.mxu0  ;;  %11063 = vmatmul.mubr.bf16.gmra.mxu0 %v20486_v54 }
 0xbc5   :  { %11072 = vmatprep.mubr.bf16.mxu0 %v20118_v29  ;;  %13582 = vmatpush3.bf16.msra.mxu0 %v14721_v9 }
 0xbc6   :  { %v9938_v1 = vpop.f32.mrf.mxu0  ;;  %13558 = vmatmul.mubr.bf16.vlgmr.msra.gmra.mxu1 %v20450_v21  ;;  %13583 = vmatprep.subr.bf16.mxu0 %v20470_v59  ;;  %v14724_v21 = vld [vmem:[#allocation41 + $0xac] ss:$20 sps:$4 sm:$0xff]  }
 0xbc7   :  { %13561 = vmatprep.mubr.msk.bf16.mxu1 %vm15388_vm0, %v20470_v59  ;;  %11102 = vmatpush1.bf16.msra.mxu1 %v14710_v27 }
 0xbc8   :  { %v9940_v25 = vpop.f32.mrf.mxu0  ;;  %11103 = vmatprep.subr.bf16.mxu1 %v14716_v20 }
 0xbc9   :  { %13584 = vmatpush3.bf16.msra.mxu0 %v14725_v55  ;;  %v14730_v55 = vld [vmem:[#allocation41 + $0x58] ss:$20 sps:$4 sm:$0xff]  }
 0xbca   :  { %v9942_v40 = vpop.f32.mrf.mxu0  ;;  %13585 = vmatprep.subr.bf16.mxu0 %v20470_v59 }
 0xbcb   :  { %11104 = vmatpush1.bf16.msra.mxu1 %v14714_v32  ;;  %v14736_v32 = vld [vmem:[#allocation41 + $0x34] ss:$20 sps:$4 sm:$0xff]  }
 0xbcc   :  { %v9946_v52 = vpop.f32.mrf.mxu0  ;;  %11073 = vmatmul.mubr.bf16.gmra.mxu0 %v20487_v31  ;;  %11105 = vmatprep.subr.bf16.mxu1 %v14720_v0 }
 0xbcd   :  { %11082 = vmatprep.mubr.bf16.mxu0 %v20118_v29  ;;  %13586 = vmatpush3.bf16.msra.mxu0 %v14729_v60 }
 0xbce   :  { %v9948_v22 = vpop.f32.mrf.mxu0  ;;  %13562 = vmatmul.mubr.bf16.gmra.mxu1 %v20452_v44  ;;  %v9855_v39 = vpop.f32.mrf.mxu1  ;;  %13587 = vmatprep.subr.bf16.mxu0 %v20470_v59 }
 0xbcf   :  { %v18750_v41 = vadd.f32 %v9936_v4, %v9855_v39  ;;  %13565 = vmatprep.mubr.msk.bf16.mxu1 %vm15388_vm0, %v20470_v59  ;;  %11106 = vmatpush1.bf16.msra.mxu1 %v14718_v38  ;;  %v14741_v4 = vld [vmem:[#allocation41 + $0x10] ss:$20 sps:$4 sm:$0xff]  }
 0xbd0   :  { %v9950_v63 = vpop.f32.mrf.mxu0  ;;  %v9857_v45 = vpop.f32.mrf.mxu1  ;;  %11107 = vmatprep.subr.bf16.mxu1 %v14724_v21 }
 0xbd1   :  { %v18754_v19 = vadd.f32 %v9938_v1, %v9857_v45  ;;  %13588 = vmatpush3.bf16.msra.mxu0 %v14733_v26  ;;  %v14734_v26 = vld [vmem:[#allocation41 + $0x30] ss:$20 sps:$4 sm:$0xff]  }
 0xbd2   :  { %v9952_v48 = vpop.f32.mrf.mxu0  ;;  %v9859_v44 = vpop.f32.mrf.mxu1  ;;  %13589 = vmatprep.subr.bf16.mxu0 %v20470_v59 }
 0xbd3   :  { %v18757_v8 = vadd.f32 %v9940_v25, %v9859_v44  ;;  %11108 = vmatpush1.bf16.msra.mxu1 %v14722_v16  ;;  %v14740_v16 = vld [vmem:[#allocation41 + $0xc] ss:$20 sps:$4 sm:$0xff]   ;;  %v14738_v44 = vld [vmem:[#allocation41 + $0x8] ss:$20 sps:$4 sm:$0xff]  }
 0xbd4   :  { %v9956_v42 = vpop.f32.mrf.mxu0  ;;  %v9861_v58 = vpop.f32.mrf.mxu1  ;;  %11083 = vmatmul.mubr.bf16.gmra.mxu0 %v20488_v46  ;;  %11109 = vmatprep.subr.bf16.mxu1 %v14728_v57 }
 0xbd5   :  { %v18760_v56 = vadd.f32 %v9942_v40, %v9861_v58  ;;  %11092 = vmatprep.mubr.bf16.mxu0 %v20118_v29  ;;  %13590 = vmatpush3.bf16.msra.mxu0 %v14737_v30 }
 0xbd6   :  { %v9958_v9 = vpop.f32.mrf.mxu0  ;;  %13566 = vmatmul.mubr.bf16.gmra.mxu1 %v20455_v3  ;;  %v9865_v27 = vpop.f32.mrf.mxu1  ;;  %13591 = vmatprep.subr.bf16.mxu0 %v20470_v59  ;;  %v20489_v3 = vld [vmem:[#allocation107_spill] sm:$0xff] }
 0xbd7   :  { %v18765_v20 = vadd.f32 %v9946_v52, %v9865_v27  ;;  %13569 = vmatprep.mubr.msk.bf16.mxu1 %vm15388_vm0, %v20470_v59  ;;  %11110 = vmatpush1.bf16.msra.mxu1 %v14726_v49  ;;  %v18773_v38 = vpack.c.bf16 %v20489_v3, %v20489_v3 }
 0xbd8   :  { %v9960_v1 = vpop.f32.mrf.mxu0  ;;  %v9867_v25 = vpop.f32.mrf.mxu1  ;;  %11111 = vmatprep.subr.bf16.mxu1 %v14732_v43 }
 0xbd9   :  { %v18769_v0 = vadd.f32 %v9948_v22, %v9867_v25  ;;  %13592 = vmatpush3.bf16.msra.mxu0 %v14741_v4 }
 0xbda   :  { %v9962_v40 = vpop.f32.mrf.mxu0  ;;  %v9869_v60 = vpop.f32.mrf.mxu1 }
 0xbdb   :  { %v18775_v52 = vadd.f32 %v9950_v63, %v9869_v60  ;;  %11112 = vmatpush1.bf16.msra.mxu1 %v14730_v55 }
 0xbdc   :  { %v9966_v21 = vpop.f32.mrf.mxu0  ;;  %v9871_v39 = vpop.f32.mrf.mxu1  ;;  %11093 = vmatmul.mubr.bf16.gmra.mxu0 %v18773_v38  ;;  %11113 = vmatprep.subr.bf16.mxu1 %v14736_v32 }
 0xbdd   :  { %v18778_v45 = vadd.f32 %v9952_v48, %v9871_v39  ;;  %13593 = vmatprep.mubr.msk.bf16.mxu0 %vm15388_vm0, %v20470_v59 }
 0xbde   :  { %v9968_v22 = vpop.f32.mrf.mxu0  ;;  %13570 = vmatmul.mubr.bf16.gmra.mxu1 %v20460_v11  ;;  %v9875_v57 = vpop.f32.mrf.mxu1 }
 0xbdf   :  { %v18783_v30 = vadd.f32 %v9956_v42, %v9875_v57  ;;  %13573 = vmatprep.mubr.msk.bf16.mxu1 %vm15388_vm0, %v20470_v59  ;;  %11114 = vmatpush1.bf16.msra.mxu1 %v14734_v26 }
 0xbe0   :  { %v9970_v63 = vpop.f32.mrf.mxu0  ;;  %v9877_v49 = vpop.f32.mrf.mxu1  ;;  %11115 = vmatprep.subr.bf16.mxu1 %v14740_v16 }
 0xbe1   :  { %v18787_v58 = vadd.f32 %v9958_v9, %v9877_v49 }
 0xbe2   :  { %v9972_v48 = vpop.f32.mrf.mxu0  ;;  %v9879_v43 = vpop.f32.mrf.mxu1 }
 0xbe3   :  { %v18789_v4 = vadd.f32 %v9960_v1, %v9879_v43  ;;  %11116 = vmatpush1.bf16.msra.mxu1 %v14738_v44  ;;  %v20490_v43 = vld [vmem:[#allocation129_spill] sm:$0xff] }
 0xbe4   :  { %v9976_v27 = vpop.f32.mrf.mxu0  ;;  %v9881_v11 = vpop.f32.mrf.mxu1  ;;  %13594 = vmatmul.mubr.bf16.vlgmr.msra.gmra.mxu0 %v20485_v15 }
 0xbe5   :  { %v18792_v42 = vadd.f32 %v9962_v40, %v9881_v11  ;;  %13597 = vmatprep.mubr.msk.bf16.mxu0 %vm15388_vm0, %v20470_v59 }
 0xbe6   :  { %v9978_v55 = vpop.f32.mrf.mxu0  ;;  %13574 = vmatmul.mubr.bf16.gmra.mxu1 %v18535_v51  ;;  %v9885_v25 = vpop.f32.mrf.mxu1 }
 0xbe7   :  { %v18797_v9 = vadd.f32 %v9966_v21, %v9885_v25  ;;  %11133 = vmatprep.mubr.bf16.mxu1 %v20118_v29  ;;  %v20491_v25 = vld [vmem:[#allocation119_spill] sm:$0xff] }
 0xbe8   :  { %v9980_v1 = vpop.f32.mrf.mxu0  ;;  %v9887_v32 = vpop.f32.mrf.mxu1 }
 0xbe9   :  { %v18800_v60 = vadd.f32 %v9968_v22, %v9887_v32 }
 0xbea   :  { %v9981_v3 = vpop.f32.mrf.mxu0  ;;  %v9889_v26 = vpop.f32.mrf.mxu1 }
 0xbeb   :  { %v18802_v39 = vadd.f32 %v9970_v63, %v9889_v26 }
 0xbec   :  { %v9891_v40 = vpop.f32.mrf.mxu1  ;;  %13598 = vmatmul.mubr.bf16.gmra.mxu0 %v20486_v54 }
 0xbed   :  { %v18805_v16 = vadd.f32 %v9972_v48, %v9891_v40  ;;  %13601 = vmatprep.mubr.msk.bf16.mxu0 %vm15388_vm0, %v20470_v59 }
 0xbee   :  { %11134 = vmatmul.mubr.bf16.vlgmr.msra.gmra.mxu1 %v20485_v15  ;;  %v9895_v51 = vpop.f32.mrf.mxu1 }
 0xbef   :  { %v18810_v21 = vadd.f32 %v9976_v27, %v9895_v51  ;;  %11143 = vmatprep.mubr.bf16.mxu1 %v20118_v29  ;;  %v20493_v51 = vld [vmem:[#allocation91_spill] sm:$0xff] }
 0xbf0   :  { %v9897_v22 = vpop.f32.mrf.mxu1 }
 0xbf1   :  { %v18813_v57 = vadd.f32 %v9978_v55, %v9897_v22 }
 0xbf2   :  { %v9899_v63 = vpop.f32.mrf.mxu1 }
 0xbf4   :  { %v9900_v44 = vpop.f32.mrf.mxu1  ;;  %13602 = vmatmul.mubr.bf16.gmra.mxu0 %v20487_v31 }
 0xbf5   :  { %13605 = vmatprep.mubr.msk.bf16.mxu0 %vm15388_vm0, %v20470_v59 }
 0xbf6   :  { %11144 = vmatmul.mubr.bf16.gmra.mxu1 %v20486_v54  ;;  %v10017_v49 = vpop.f32.mrf.mxu1  ;;  %v20492_v54 = vld [vmem:[#allocation137_spill] sm:$0xff] }
 0xbf7   :  { %v10018_v15 = vadd.f32 %v10017_v49, %v18750_v41  ;;  %11153 = vmatprep.mubr.bf16.mxu1 %v20118_v29  ;;  %v20494_v49 = vld [vmem:[#allocation134_spill] sm:$0xff] }
 0xbf8   :  { %v10019_v48 = vpop.f32.mrf.mxu1 }
 0xbf9   :  { %v18822_v27 = vadd.f32 %v10018_v15, %v20490_v43  ;;  %v10020_v11 = vadd.f32 %v10019_v48, %v18754_v19 }
 0xbfa   :  { %v10021_v55 = vpop.f32.mrf.mxu1 }
 0xbfb   :  { %v18826_v1 = vadd.f32 %v10020_v11, %v20491_v25  ;;  %v10022_v32 = vadd.f32 %v10021_v55, %v18757_v8 }
 0xbfc   :  { %v10023_v3 = vpop.f32.mrf.mxu1  ;;  %13606 = vmatmul.mubr.bf16.gmra.mxu0 %v20488_v46 }
 0xbfd   :  { %v18831_v26 = vadd.f32 %v10022_v32, %v20492_v54  ;;  %v18834_v41 = vadd.f32 %v10023_v3, %v18760_v56  ;;  %13609 = vmatprep.mubr.msk.bf16.mxu0 %vm15388_vm0, %v20470_v59  ;;  %v20496_v32 = vld [vmem:[#allocation92_spill] sm:$0xff] }
 0xbfe   :  { %11154 = vmatmul.mubr.bf16.gmra.mxu1 %v20487_v31  ;;  %v10027_v19 = vpop.f32.mrf.mxu1  ;;  %v20495_v31 = vld [vmem:[#allocation96_spill] sm:$0xff] }
 0xbff   :  { %v10028_v40 = vadd.f32 %v10027_v19, %v18765_v20  ;;  %11163 = vmatprep.mubr.bf16.mxu1 %v20118_v29 }
 0xc00   :  { %v10029_v8 = vpop.f32.mrf.mxu1 }
 0xc01   :  { %v18842_v22 = vadd.f32 %v10028_v40, %v20493_v51  ;;  %v10030_v63 = vadd.f32 %v10029_v8, %v18769_v0 }
 0xc02   :  { %v10031_v44 = vpop.f32.mrf.mxu1 }
 0xc03   :  { %v18846_v56 = vadd.f32 %v10030_v63, %v20494_v49  ;;  %v10032_v15 = vadd.f32 %v10031_v44, %v18775_v52 }
 0xc04   :  { %v10033_v59 = vpop.f32.mrf.mxu1  ;;  %v18849_v48 = vpop.f32.mrf.mxu0  ;;  %13610 = vmatmul.mubr.bf16.gmra.mxu0 %v18773_v38 }
 0xc05   :  { %v18853_v20 = vadd.f32 %v10032_v15, %v20495_v31  ;;  %v18856_v43 = vadd.f32 %v10033_v59, %v18778_v45  ;;  %v20498_v45 = vld [vmem:[#allocation147_spill] sm:$0xff] }
 0xc06   :  { %11164 = vmatmul.mubr.bf16.gmra.mxu1 %v20488_v46  ;;  %v10037_v0 = vpop.f32.mrf.mxu1  ;;  %v10100_v11 = vpop.f32.mrf.mxu0 }
 0xc07   :  { %v10038_v55 = vadd.f32 %v10037_v0, %v18783_v30  ;;  %11173 = vmatprep.mubr.bf16.mxu1 %v20118_v29  ;;  %v20500_v30 = vld [vmem:[#allocation93_spill] sm:$0xff]  ;;  %v20502_v0 = vld [vmem:[#allocation148_spill] sm:$0xff] }
 0xc08   :  { %v10039_v52 = vpop.f32.mrf.mxu1  ;;  %v10102_v25 = vpop.f32.mrf.mxu0 }
 0xc09   :  { %v18862_v3 = vadd.f32 %v10038_v55, %v20496_v32  ;;  %v10040_v54 = vadd.f32 %v10039_v52, %v18787_v58 }
 0xc0a   :  { %v10041_v19 = vpop.f32.mrf.mxu1  ;;  %v18865_v40 = vpop.f32.mrf.mxu0 }
 0xc0b   :  { %20497 = vst [vmem:[#allocation103_spill] sm:$0xff] %v18862_v3  ;;  %v18868_v8 = vadd.f32 %v10040_v54, %v20498_v45  ;;  %v10042_v46 = vadd.f32 %v10041_v19, %v18789_v4  ;;  %v20504_v54 = vld [vmem:[#allocation132_spill] sm:$0xff] }
 0xc0c   :  { %v10043_v51 = vpop.f32.mrf.mxu1  ;;  %v18871_v63 = vpop.f32.mrf.mxu0 }
 0xc0d   :  { %20499 = vst [vmem:[#allocation104_spill] sm:$0xff] %v18868_v8  ;;  %v18874_v29 = vadd.f32 %v10042_v46, %v20500_v30  ;;  %v18877_v44 = vadd.f32 %v10043_v51, %v18792_v42 }
 0xc0e   :  { %11174 = vmatmul.mubr.bf16.gmra.mxu1 %v18773_v38  ;;  %v10047_v58 = vpop.f32.mrf.mxu1  ;;  %v10110_v49 = vpop.f32.mrf.mxu0 }
 0xc0f   :  { %20501 = vst [vmem:[#allocation105_spill] sm:$0xff] %v18874_v29  ;;  %v10048_v15 = vadd.f32 %v10047_v58, %v18797_v9  ;;  %v20506_v9 = vld [vmem:[#allocation141_spill] sm:$0xff] }
 0xc10   :  { %v10049_v59 = vpop.f32.mrf.mxu1  ;;  %v18881_v31 = vpop.f32.mrf.mxu0 }
 0xc11   :  { %v18884_v4 = vadd.f32 %v10048_v15, %v20502_v0  ;;  %v10050_v55 = vadd.f32 %v10049_v59, %v18800_v60  ;;  %v20509_v0 = vld [vmem:[#allocation140_spill] sm:$0xff] }
 0xc12   :  { %v10051_v52 = vpop.f32.mrf.mxu1  ;;  %v18887_v32 = vpop.f32.mrf.mxu0 }
 0xc13   :  { %20503 = vst [vmem:[#allocation106_spill] sm:$0xff] %v18884_v4  ;;  %v18890_v42 = vadd.f32 %v10050_v55, %v20504_v54  ;;  %v10052_v38 = vadd.f32 %v10051_v52, %v18802_v39 }
 0xc14   :  { %v10053_v19 = vpop.f32.mrf.mxu1  ;;  %v18893_v45 = vpop.f32.mrf.mxu0 }
 0xc15   :  { %20505 = vst [vmem:[#allocation107_spill] sm:$0xff] %v18890_v42  ;;  %v18896_v46 = vadd.f32 %v10052_v38, %v20506_v9  ;;  %v18899_v51 = vadd.f32 %v10053_v19, %v18805_v16  ;;  %v20511_v38 = vld [vmem:[#allocation150_spill] sm:$0xff] }
 0xc16   :  { %v10057_v30 = vpop.f32.mrf.mxu1  ;;  %v18901_v58 = vpop.f32.mrf.mxu0 }
 0xc17   :  { %20507 = vst [vmem:[#allocation129_spill] sm:$0xff] %v18896_v46  ;;  %20508 = vst [vmem:[#allocation119_spill] sm:$0xff] %v18899_v51  ;;  %v10058_v60 = vadd.f32 %v10057_v30, %v18810_v21 }
 0xc18   :  { %v10059_v15 = vpop.f32.mrf.mxu1  ;;  %v18904_v59 = vpop.f32.mrf.mxu0 }
 0xc19   :  { %v18907_v55 = vadd.f32 %v10058_v60, %v20509_v0  ;;  %v10060_v39 = vadd.f32 %v10059_v15, %v18813_v57 }
 0xc1a   :  { %v10061_v52 = vpop.f32.mrf.mxu1  ;;  %v18910_v54 = vpop.f32.mrf.mxu0 }
 0xc1b   :  { %20510 = vst [vmem:[#allocation137_spill] sm:$0xff] %v18907_v55  ;;  %v18913_v9 = vadd.f32 %v10060_v39, %v20511_v38 }
 0xc1c   :  { %v10062_v16 = vpop.f32.mrf.mxu1  ;;  %v18915_v19 = vpop.f32.mrf.mxu0 }
 0xc1d   :  { %20512 = vst [vmem:[#allocation91_spill] sm:$0xff] %v18913_v9 }
 0xc1e   :  { %v18917_v50 = vpop.f32.mrf.mxu0 }
 0xc20   :  { %v18919_v21 = vpop.f32.mrf.mxu0 }
 0xc22   :  { %v18921_v30 = vpop.f32.mrf.mxu0 }
 0xc24   :  { %v18923_v62 = vpop.f32.mrf.mxu0 }
 0xc26   :  { %v18925_v60 = vpop.f32.mrf.mxu0 }
 0xc28   :  { %v10142_v57 = vpop.f32.mrf.mxu0 }
 0xc2a   :  { %v10143_v15 = vpop.f32.mrf.mxu0 }
 0xc2c   :  { %v10260_v0 = vpop.f32.mrf.mxu0 }
 0xc2e   :  { %v10262_v52 = vpop.f32.mrf.mxu0 }
 0xc30   :  { %v10264_v35 = vpop.f32.mrf.mxu0 }
 0xc32   :  { %v10266_v39 = vpop.f32.mrf.mxu0 }
 0xc34   :  { %v10270_v38 = vpop.f32.mrf.mxu0 }
 0xc36   :  { %v10179_v16 = vpop.f32.mrf.mxu1  ;;  %v10272_v53 = vpop.f32.mrf.mxu0 }
 0xc37   :  { %v10180_v7 = vadd.f32 %v10179_v16, %v18849_v48 }
 0xc38   :  { %v10181_v17 = vpop.f32.mrf.mxu1  ;;  %v10274_v18 = vpop.f32.mrf.mxu0 }
 0xc39   :  { %v10261_v14 = vadd.f32 %v10260_v0, %v10180_v7  ;;  %v10182_v9 = vadd.f32 %v10181_v17, %v10100_v11 }
 0xc3a   :  { %v10183_v55 = vpop.f32.mrf.mxu1  ;;  %v10276_v46 = vpop.f32.mrf.mxu0 }
 0xc3b   :  { %v18929_v42 = vadd.f32 %v10261_v14, %v18573_v13  ;;  %v10263_v57 = vadd.f32 %v10262_v52, %v10182_v9  ;;  %v10184_v15 = vadd.f32 %v10183_v55, %v10102_v25 }
 0xc3c   :  { %v10185_v4 = vpop.f32.mrf.mxu1  ;;  %v10280_v29 = vpop.f32.mrf.mxu0 }
 0xc3d   :  { %v18932_v8 = vadd.f32 %v10263_v57, %v18579_v10  ;;  %v10265_v3 = vadd.f32 %v10264_v35, %v10184_v15  ;;  %v10186_v51 = vadd.f32 %v10185_v4, %v18865_v40 }
 0xc3e   :  { %v10189_v48 = vpop.f32.mrf.mxu1  ;;  %v10282_v16 = vpop.f32.mrf.mxu0 }
 0xc3f   :  { %v18936_v7 = vadd.f32 %v10265_v3, %v18582_v47  ;;  %v18938_v17 = vadd.f32 %v10266_v39, %v10186_v51  ;;  %v10190_v13 = vadd.f32 %v10189_v48, %v18871_v63 }
 0xc40   :  { %v10191_v14 = vpop.f32.mrf.mxu1  ;;  %v10284_v11 = vpop.f32.mrf.mxu0 }
 0xc41   :  { %v10192_v25 = vadd.f32 %v10191_v14, %v10110_v49  ;;  %v10271_v55 = vadd.f32 %v10270_v38, %v10190_v13 }
 0xc42   :  { %v10193_v9 = vpop.f32.mrf.mxu1  ;;  %v10286_v0 = vpop.f32.mrf.mxu0 }
 0xc43   :  { %v10273_v10 = vadd.f32 %v10272_v53, %v10192_v25  ;;  %v10194_v35 = vadd.f32 %v10193_v9, %v18881_v31  ;;  %v18943_v40 = vadd.f32 %v10271_v55, %v18592_v61 }
 0xc44   :  { %v10195_v4 = vpop.f32.mrf.mxu1  ;;  %v10290_v52 = vpop.f32.mrf.mxu0 }
 0xc45   :  { %v18946_v47 = vadd.f32 %v10273_v10, %v18598_v37  ;;  %v10275_v3 = vadd.f32 %v10274_v18, %v10194_v35  ;;  %v10196_v63 = vadd.f32 %v10195_v4, %v18887_v32 }
 0xc46   :  { %v10199_v51 = vpop.f32.mrf.mxu1  ;;  %v10292_v39 = vpop.f32.mrf.mxu0 }
 0xc47   :  { %v18950_v49 = vadd.f32 %v10275_v3, %v18601_v24  ;;  %v18952_v38 = vadd.f32 %v10276_v46, %v10196_v63  ;;  %v10200_v53 = vadd.f32 %v10199_v51, %v18893_v45 }
 0xc48   :  { %v10201_v31 = vpop.f32.mrf.mxu1  ;;  %v10294_v61 = vpop.f32.mrf.mxu0 }
 0xc49   :  { %20513 = vst [vmem:[#allocation134_spill] sm:$0xff] %v18952_v38  ;;  %v10281_v57 = vadd.f32 %v10280_v29, %v10200_v53  ;;  %v10202_v15 = vadd.f32 %v10201_v31, %v18901_v58 }
 0xc4a   :  { %v10203_v48 = vpop.f32.mrf.mxu1  ;;  %v10296_v37 = vpop.f32.mrf.mxu0 }
 0xc4b   :  { %v18957_v18 = vadd.f32 %v10281_v57, %v18613_v33  ;;  %v10204_v32 = vadd.f32 %v10203_v48, %v18904_v59  ;;  %v10283_v13 = vadd.f32 %v10282_v16, %v10202_v15  ;;  %v20521_v57 = vld [vmem:[#allocation101_spill] sm:$0xff] }
 0xc4c   :  { %v10205_v14 = vpop.f32.mrf.mxu1  ;;  %v10300_v24 = vpop.f32.mrf.mxu0 }
 0xc4d   :  { %20514 = vst [vmem:[#allocation96_spill] sm:$0xff] %v18957_v18  ;;  %v10285_v25 = vadd.f32 %v10284_v11, %v10204_v32  ;;  %v10206_v46 = vadd.f32 %v10205_v14, %v18910_v54  ;;  %v18962_v45 = vadd.f32 %v10283_v13, %v18619_v36  ;;  %v20524_v32 = vld [vmem:[#allocation86_spill] sm:$0xff]  ;;  %v20525_v13 = vld [vmem:[#allocation87_spill] sm:$0xff] }
 0xc4e   :  { %v10209_v55 = vpop.f32.mrf.mxu1  ;;  %v10302_v29 = vpop.f32.mrf.mxu0 }
 0xc4f   :  { %20515 = vst [vmem:[#allocation92_spill] sm:$0xff] %v18962_v45  ;;  %v18965_v58 = vadd.f32 %v10285_v25, %v18622_v6  ;;  %v18967_v9 = vadd.f32 %v10286_v0, %v10206_v46  ;;  %v10210_v33 = vadd.f32 %v10209_v55, %v18915_v19  ;;  %v20527_v25 = vld [vmem:[#allocation120_spill] sm:$0xff]  ;;  %v20529_v55 = vld [vmem:[#allocation125_spill] sm:$0xff] }
 0xc50   :  { %v10211_v10 = vpop.f32.mrf.mxu1  ;;  %v10304_v59 = vpop.f32.mrf.mxu0 }
 0xc51   :  { %20516 = vst [vmem:[#allocation147_spill] sm:$0xff] %v18965_v58  ;;  %20517 = vst [vmem:[#allocation93_spill] sm:$0xff] %v18967_v9  ;;  %v10291_v16 = vadd.f32 %v10290_v52, %v10210_v33  ;;  %v10212_v35 = vadd.f32 %v10211_v10, %v18917_v50  ;;  %v20530_v10 = vld [vmem:[#allocation130_spill] sm:$0xff]  ;;  %v20588_v58 = vld [vmem:[#allocation119_spill] sm:$0xff] }
 0xc52   :  { %v10213_v11 = vpop.f32.mrf.mxu1  ;;  %v10305_v4 = vpop.f32.mrf.mxu0 }
 0xc53   :  { %v18972_v54 = vadd.f32 %v10291_v16, %v18634_v28  ;;  %v10293_v36 = vadd.f32 %v10292_v39, %v10212_v35  ;;  %v10214_v3 = vadd.f32 %v10213_v11, %v18919_v21  ;;  %v20522_v28 = vld [vmem:[#allocation152_spill] sm:$0xff]  ;;  %v20531_v35 = vld [vmem:[#allocation113_spill] sm:$0xff] }
 0xc54   :  { %v10215_v63 = vpop.f32.mrf.mxu1  ;;  %v12954_v6 = vpop.f32.mrf.mxu0  ;;  %v6434_v15 = vadd.f32 %v20522_v28, %v20521_v57  ;;  %v20539_v57 = vld [vmem:[#allocation121_spill] sm:$0xff] }
 0xc55   :  { %20518 = vst [vmem:[#allocation148_spill] sm:$0xff] %v18972_v54  ;;  %v18976_v0 = vadd.f32 %v10293_v36, %v18640_v23  ;;  %v10216_v19 = vadd.f32 %v10215_v63, %v18921_v30  ;;  %v10295_v51 = vadd.f32 %v10294_v61, %v10214_v3  ;;  %v6444_v30 = vadd.f32 %v20525_v13, %v20524_v32  ;;  %v20541_v32 = vld [vmem:[#allocation143_spill] sm:$0xff]  ;;  %v20542_v13 = vld [vmem:[#allocation100_spill] sm:$0xff] }
 0xc56   :  { %v10219_v53 = vpop.f32.mrf.mxu1  ;;  %v12955_v52 = vpop.f32.mrf.mxu0  ;;  %v6515_v59 = vadd.f32 %v20530_v10, %v6434_v15  ;;  %v20547_v10 = vld [vmem:[#allocation158_spill] sm:$0xff] }
 0xc57   :  { %20519 = vst [vmem:[#allocation132_spill] sm:$0xff] %v18976_v0  ;;  %v18979_v31 = vadd.f32 %v10296_v37, %v10216_v19  ;;  %v10220_v50 = vadd.f32 %v10219_v53, %v18923_v62  ;;  %v18985_v39 = vadd.f32 %v10295_v51, %v18643_v5  ;;  %v18987_v48 = vadd.f32 %v12955_v52, %v12954_v6  ;;  %v20526_v37 = vld [vmem:[#allocation88_spill] sm:$0xff]  ;;  %v20535_v6 = vld [vmem:[#allocation95_spill] sm:$0xff]  ;;  %v20537_v53 = vld [vmem:[#allocation154_spill] sm:$0xff] }
 0xc58   :  { %v10221_v21 = vpop.f32.mrf.mxu1  ;;  %v12957_v23 = vpop.f32.mrf.mxu0  ;;  %v6454_v46 = vadd.f32 %v20527_v25, %v20526_v37  ;;  %v20528_v62 = vld [vmem:[#allocation116_spill] sm:$0xff]  ;;  %v6525_v11 = vadd.f32 %v20531_v35, %v6444_v30  ;;  %v20536_v19 = vld [vmem:[#allocation159_spill] sm:$0xff]  ;;  %v8095_v28 = vadd.f32 %v20539_v57, %v6515_v59  ;;  %v20544_v30 = vld [vmem:[#allocation157_spill] sm:$0xff] }
 0xc59   :  { %20520 = vst [vmem:[#allocation141_spill] sm:$0xff] %v18979_v31  ;;  %20523 = vst [vmem:[#allocation140_spill] sm:$0xff] %v18985_v39  ;;  %v10301_v61 = vadd.f32 %v10300_v24, %v10220_v50  ;;  %v10222_v14 = vadd.f32 %v10221_v21, %v18925_v60  ;;  %v6464_v33 = vadd.f32 %v20529_v55, %v20528_v62  ;;  %v20533_v24 = vld [vmem:[#allocation133_spill] sm:$0xff]  ;;  %v20534_v60 = vld [vmem:[#allocation135_spill] sm:$0xff] }
 0xc5a   :  { %v10223_v5 = vpop.f32.mrf.mxu1  ;;  %v12958_v16 = vpop.f32.mrf.mxu0  ;;  %v6677_v63 = vadd.f32 %v20534_v60, %v20533_v24  ;;  %v6687_v51 = vadd.f32 %v20536_v19, %v20535_v6  ;;  %v20538_v52 = vld [vmem:[#allocation156_spill] sm:$0xff]  ;;  %v20546_v37 = vld [vmem:[#allocation115_spill] sm:$0xff]  ;;  %v8105_v59 = vadd.f32 %v20547_v10, %v6525_v11  ;;  %v20552_v6 = vld [vmem:[#allocation138_spill] sm:$0xff] }
 0xc5b   :  { %v18999_v4 = vadd.f32 %v10301_v61, %v18652_v34  ;;  %v10303_v36 = vadd.f32 %v10302_v29, %v10222_v14  ;;  %v19001_v3 = vadd.f32 %v12958_v16, %v12957_v23  ;;  %v6697_v50 = vadd.f32 %v20538_v52, %v20537_v53  ;;  %v20543_v23 = vld [vmem:[#allocation153_spill] sm:$0xff]  ;;  %v20549_v35 = vld [vmem:[#allocation127_spill] sm:$0xff] }
 0xc5c   :  { %v10224_v15 = vpop.f32.mrf.mxu1  ;;  %v12960_v21 = vpop.f32.mrf.mxu0  ;;  %v6535_v34 = vadd.f32 %v20541_v32, %v6454_v46  ;;  %v6545_v29 = vadd.f32 %v20542_v13, %v6464_v33  ;;  %v6707_v61 = vadd.f32 %v20544_v30, %v20543_v23  ;;  %v8176_v25 = vadd.f32 %v20546_v37, %v8095_v28  ;;  %v20548_v5 = vld [vmem:[#allocation117_spill] sm:$0xff]  ;;  %v19029_v53 = vld [vmem:[%s20540_s12] sm:$0x1f] }
 0xc5d   :  { %20532 = vst [vmem:[#allocation150_spill] sm:$0xff] %v18999_v4  ;;  %v19015_v14 = vadd.f32 %v10303_v36, %v18655_v12  ;;  %v20551_v33 = vld [vmem:[#allocation85_spill] sm:$0xff]  ;;  %v6768_v19 = vadd.f32 %v20552_v6, %v6687_v51  ;;  %v20554_v12 = vld [vmem:[#allocation136_spill] sm:$0xff]  ;;  %v20555_v28 = vld [vmem:[#allocation155_spill] sm:$0xff] }
 0xc5e   :  { %v19018_v62 = vpop.f32.mrf.mxu1  ;;  %v12961_v55 = vpop.f32.mrf.mxu0  ;;  %v8115_v16 = vadd.f32 %v20548_v5, %v6535_v34  ;;  %v8125_v24 = vadd.f32 %v20549_v35, %v6545_v29  ;;  %v6758_v60 = vadd.f32 %v20551_v33, %v6677_v63  ;;  %v6778_v36 = vadd.f32 %v20554_v12, %v6697_v50  ;;  %v20556_v15 = vld [vmem:[#allocation99_spill] sm:$0xff]  ;;  %v20557_v34 = vld [vmem:[#allocation114_spill] sm:$0xff]  ;;  %v20559_v23 = vld [vmem:[#allocation145_spill] sm:$0xff] }
 0xc5f   :  { %20545 = vst [vmem:[#allocation101_spill] sm:$0xff] %v19015_v14  ;;  %v19023_v46 = vadd.f32 %v12961_v55, %v12960_v21  ;;  %v6788_v11 = vadd.f32 %v20555_v28, %v6707_v61  ;;  %v8186_v32 = vadd.f32 %v20556_v15, %v8105_v59  ;;  %v20558_v21 = vld [vmem:[#allocation102_spill] sm:$0xff]  ;;  %v8257_v63 = vadd.f32 %v20559_v23, %v8176_v25  ;;  %v20561_v51 = vld [vmem:[#allocation128_spill] sm:$0xff]  ;;  %v20568_v28 = vld [vmem:[#allocation123_spill] sm:$0xff] }
 0xc60   :  { %v19031_v52 = vpop.f32.mrf.mxu1  ;;  %v12963_v57 = vpop.f32.mrf.mxu0  ;;  %v8196_v13 = vadd.f32 %v20557_v34, %v8115_v16  ;;  %v8206_v29 = vadd.f32 %v20558_v21, %v8125_v24  ;;  %v20560_v30 = vld [vmem:[#allocation142_spill] sm:$0xff]  ;;  %v8348_v55 = vadd.f32 %v20561_v51, %v6768_v19  ;;  %v8358_v50 = vadd.f32 %v18533_v2, %v6778_v36  ;;  %v20562_v61 = vld [vmem:[#allocation108_spill] sm:$0xff]  ;;  %v20569_v34 = vld [vmem:[#allocation149_spill] sm:$0xff] }
 0xc61   :  { %20550 = vst [vmem:[#allocation152_spill] sm:$0xff] %v19023_v46  ;;  %v8338_v37 = vadd.f32 %v20560_v30, %v6758_v60  ;;  %v19044_v35 = vld [vmem:[%s20553_s26] sm:$0x1f]  ;;  %v19048_v59 = vrot.slane %v19029_v53, %v20562_v61  ;;  %v10529_v6 = vadd.f32 %v18834_v41, %v8257_v63 }
 0xc62   :  { %v19041_v10 = vpop.f32.mrf.mxu1  ;;  %v12964_v5 = vpop.f32.mrf.mxu0  ;;  %v20563_v16 = vld [vmem:[#allocation110_spill] sm:$0xff]  ;;  %v8277_v15 = vadd.f32 %v20568_v28, %v8196_v13  ;;  %v8287_v21 = vadd.f32 %v20569_v34, %v8206_v29  ;;  %v20570_v23 = vld [vmem:[#allocation151_spill] sm:$0xff] }
 0xc63   :  { %v19052_v24 = vrot.slane %v19029_v53, %v20563_v16  ;;  %v19054_v25 = vadd.f32 %v12964_v5, %v12963_v57  ;;  %v20565_v33 = vld [vmem:[#allocation98_spill] sm:$0xff]  ;;  %v8419_v30 = vadd.f32 %v20570_v23, %v8338_v37  ;;  %v20572_v57 = vld [vmem:[#allocation139_spill] sm:$0xff]  ;;  %v19078_v29 = vrot.slane %v19044_v35, %v20563_v16  ;;  %v20575_v23 = vld [vmem:[#allocation160_spill] sm:$0xff] }
 0xc64   :  { %v8368_v60 = vadd.f32 %v20565_v33, %v6788_v11  ;;  %v19058_v2 = vpop.f32.mrf.mxu1  ;;  %v12966_v19 = vpop.f32.mrf.mxu0  ;;  %v20567_v12 = vld [vmem:[#allocation146_spill] sm:$0xff]  ;;  %v8439_v5 = vadd.f32 %v20572_v57, %v8358_v50  ;;  %v19068_v11 = vrot.slane %v19044_v35, %v20562_v61  ;;  %v20574_v50 = vld [vmem:[#allocation144_spill] sm:$0xff]  ;;  %v10559_v9 = vadd.f32 %v20588_v58, %v8287_v21  ;;  %v20592_v21 = vld [vmem:[#allocation103_spill] sm:$0xff] }
 0xc65   :  { %20564 = vst [vmem:[#allocation86_spill] sm:$0xff] %v19054_v25  ;;  %v8267_v36 = vadd.f32 %v20567_v12, %v8186_v32  ;;  %v20571_v51 = vld [vmem:[#allocation126_spill] sm:$0xff]  ;;  %v10594_v32 = vadd.f32 %v19048_v59, %v18822_v27  ;;  %v10595_v13 = vadd.f32 %v19052_v24, %v18826_v1  ;;  %v10599_v12 = vadd.f32 %v19048_v59, %v18831_v26 }
 0xc66   :  { %v8429_v14 = vadd.f32 %v20571_v51, %v8348_v55  ;;  %v19070_v41 = vpop.f32.mrf.mxu1  ;;  %v12967_v63 = vpop.f32.mrf.mxu0  ;;  %v19083_v55 = vld [vmem:[%s20566_s29] sm:$0x1f]  ;;  %v8449_v33 = vadd.f32 %v20574_v50, %v8368_v60  ;;  %v10600_v28 = vadd.f32 %v19052_v24, %v10529_v6  ;;  %v10604_v27 = vadd.f32 %v19048_v59, %v18842_v22  ;;  %v20582_v50 = vld [vmem:[#allocation109_spill] sm:$0xff] }
 0xc67   :  { %v19080_v37 = vadd.f32 %v12967_v63, %v12966_v19  ;;  %v19094_v51 = vadd.f32 %v20575_v23, %v8419_v30  ;;  %v20576_v19 = vld [vmem:[#allocation161_spill] sm:$0xff]  ;;  %v20578_v63 = vld [vmem:[#allocation162_spill] sm:$0xff]  ;;  %v10605_v26 = vadd.f32 %v19052_v24, %v18846_v56  ;;  %v20580_v60 = vld [vmem:[#allocation163_spill] sm:$0xff]  ;;  %v10539_v22 = vadd.f32 %v18856_v43, %v8267_v36 }
 0xc68   :  { %v19091_v34 = vpop.f32.mrf.mxu1  ;;  %v12969_v1 = vpop.f32.mrf.mxu0  ;;  %v19097_v57 = vadd.f32 %v20576_v19, %v8429_v14  ;;  %v19100_v4 = vadd.f32 %v20578_v63, %v8439_v5  ;;  %v19105_v6 = vadd.f32 %v20580_v60, %v8449_v33  ;;  %v19110_v39 = vrot.slane %v19029_v53, %v20582_v50 }
 0xc69   :  { %20573 = vst [vmem:[#allocation87_spill] sm:$0xff] %v19080_v37  ;;  %v19116_v14 = vrot.slane %v19083_v55, %v20562_v61  ;;  %v10665_v5 = vmul.f32 %v19068_v11, %v10594_v32  ;;  %v10666_v56 = vmul.f32 %v19078_v29, %v10595_v13  ;;  %v19124_v43 = vrot.slane %v19083_v55, %v20563_v16  ;;  %v20597_v37 = vld [vmem:[#allocation105_spill] sm:$0xff] }
 0xc6a   :  { %20577 = vst [vmem:[#allocation88_spill] sm:$0xff] %v19097_v57  ;;  %20579 = vst [vmem:[#allocation120_spill] sm:$0xff] %v19100_v4  ;;  %v19112_v30 = vpop.f32.mrf.mxu1  ;;  %v12970_v23 = vpop.f32.mrf.mxu0  ;;  %v10670_v36 = vmul.f32 %v19068_v11, %v10599_v12  ;;  %v10671_v33 = vmul.f32 %v19078_v29, %v10600_v28  ;;  %v10675_v63 = vmul.f32 %v19068_v11, %v10604_v27 }
 0xc6b   :  { %20581 = vst [vmem:[#allocation116_spill] sm:$0xff] %v19105_v6  ;;  %20583 = vst [vmem:[#allocation125_spill] sm:$0xff] %v19112_v30  ;;  %v19120_v19 = vadd.f32 %v12970_v23, %v12969_v1  ;;  %v10609_v60 = vadd.f32 %v19048_v59, %v18853_v20  ;;  %v10676_v13 = vmul.f32 %v19078_v29, %v10605_v26  ;;  %v20586_v23 = vld [vmem:[#allocation111_spill] sm:$0xff] }
 0xc6c   :  { %v19131_v31 = vpop.f32.mrf.mxu1  ;;  %v12972_v32 = vpop.f32.mrf.mxu0  ;;  %v19136_v1 = vrot.slane %v19044_v35, %v20582_v50  ;;  %v19140_v6 = vrot.slane %v19029_v53, %v20586_v23  ;;  %v19144_v12 = vrot.slane %v19044_v35, %v20586_v23  ;;  %v10610_v28 = vadd.f32 %v19052_v24, %v10539_v22 }
 0xc6d   :  { %20584 = vst [vmem:[#allocation130_spill] sm:$0xff] %v19120_v19  ;;  %20585 = vst [vmem:[#allocation113_spill] sm:$0xff] %v19131_v31  ;;  %v10549_v20 = vadd.f32 %v18877_v44, %v8277_v15  ;;  %v19152_v26 = vrot.slane %v19083_v55, %v20582_v50  ;;  %v19156_v54 = vrot.slane %v19083_v55, %v20586_v23  ;;  %v19199_v31 = vld [vmem:[%s15599_s14] sm:$0x1f] }
 0xc6e   :  { %v19148_v27 = vpop.f32.mrf.mxu1  ;;  %v12973_v0 = vpop.f32.mrf.mxu0  ;;  %v19162_v45 = vadd.f32 %v19116_v14, %v10665_v5  ;;  %v19165_v44 = vadd.f32 %v19124_v43, %v10666_v56  ;;  %v10680_v15 = vmul.f32 %v19068_v11, %v10609_v60  ;;  %v19171_v18 = vadd.f32 %v19116_v14, %v10670_v36  ;;  %v20593_v56 = vld [vmem:[#allocation104_spill] sm:$0xff] }
 0xc6f   :  { %20587 = vst [vmem:[#allocation133_spill] sm:$0xff] %v19148_v27  ;;  %v19159_v4 = vadd.f32 %v12973_v0, %v12972_v32  ;;  %v19174_v58 = vadd.f32 %v19124_v43, %v10671_v33  ;;  %v19177_v0 = vadd.f32 %v19116_v14, %v10675_v63  ;;  %v10614_v5 = vadd.f32 %v19048_v59, %v20592_v21  ;;  %v20594_v32 = vld [vmem:[#allocation124_spill] sm:$0xff] }
 0xc70   :  { %v19168_v22 = vpop.f32.mrf.mxu1  ;;  %v12975_v19 = vpop.f32.mrf.mxu0  ;;  %v10615_v60 = vadd.f32 %v19052_v24, %v20593_v56  ;;  %v19188_v36 = vadd.f32 %v19124_v43, %v10676_v13  ;;  %v10681_v33 = vmul.f32 %v19078_v29, %v10610_v28  ;;  %v10619_v63 = vadd.f32 %v19048_v59, %v20597_v37 }
 0xc71   :  { %20589 = vst [vmem:[#allocation135_spill] sm:$0xff] %v19159_v4  ;;  %20590 = vst [vmem:[#allocation95_spill] sm:$0xff] %v19168_v22  ;;  %v19185_v4 = vrot.slane %v19029_v53, %v20594_v32  ;;  %v10620_v25 = vadd.f32 %v19052_v24, %v10549_v20  ;;  %v20598_v22 = vld [vmem:[#allocation106_spill] sm:$0xff]  ;;  %v10630_v37 = vadd.f32 %v19052_v24, %v10559_v9 }
 0xc72   :  { %20591 = vst [vmem:[#allocation159_spill] sm:$0xff] %v19177_v0  ;;  %20596 = vst [vmem:[#allocation156_spill] sm:$0xff] %v19188_v36  ;;  %v10624_v21 = vadd.f32 %v19048_v59, %v20598_v22  ;;  %v19196_v27 = vpop.f32.mrf.mxu1  ;;  %v12976_v56 = vpop.f32.mrf.mxu0  ;;  %v19202_v53 = vld [vmem:[%s15604_s3] sm:$0x1f]  ;;  %v20601_v36 = vld [vmem:[#allocation129_spill] sm:$0xff]  ;;  %v10685_v9 = vmul.f32 %v19068_v11, %v10614_v5  ;;  %s15390_s3 = smov [#allocation43]  }
 0xc73   :  { %20595 = vst [vmem:[#allocation154_spill] sm:$0xff] %v19185_v4  ;;  %20599 = vst [vmem:[#allocation121_spill] sm:$0xff] %v19196_v27  ;;  %v20600_v4 = vld [vmem:[#allocation107_spill] sm:$0xff]  ;;  %v10629_v28 = vadd.f32 %v19048_v59, %v20601_v36  ;;  %v19209_v30 = vadd.f32 %v12976_v56, %v12975_v19  ;;  %v20603_v22 = vld [vmem:[#allocation137_spill] sm:$0xff]  ;;  %v19225_v36 = vadd.f32 %v19116_v14, %v10680_v15  ;;  %s11536_s14 = sshll.u32 %s15390_s3, 4  ;;  %s11537_s14 = int_to_ptr.vmem [resolvable:$true] %s11536_s14 }
 0xc74   :  { %v10625_v13 = vadd.f32 %v19052_v24, %v20600_v4  ;;  %v19212_v20 = vld [vmem:[%s15609_s6] sm:$0x1f]  ;;  %v10634_v27 = vadd.f32 %v19048_v59, %v20603_v22  ;;  %v19218_v38 = vpop.f32.mrf.mxu1  ;;  %v12978_v57 = vpop.f32.mrf.mxu0  ;;  %v19222_v4 = vrot.slane %v19044_v35, %v20594_v32  ;;  %v10686_v19 = vmul.f32 %v19078_v29, %v10615_v60  ;;  %s15262_s6 = scalar_lea.vmem %s11537_s14, 5760  ;;  %p15267_p5 = scmp.lt.s32.totalorder %s11537_s14, %s11537_s14 }
 0xc75   :  { %20602 = vst [vmem:[#allocation143_spill] sm:$0xff] %v19209_v30  ;;  %v20604_v0 = vld [vmem:[#allocation91_spill] sm:$0xff]  ;;  %20605 = vst [vmem:[#allocation100_spill] sm:$0xff] %v19218_v38  ;;  %v19231_v59 = vrot.slane %v19199_v31, %v20562_v61  ;;  %v10691_v35 = vmul.f32 %v19078_v29, %v10620_v25  ;;  %v10695_v56 = vmul.f32 %v19068_v11, %v10624_v21  ;;  %p15263_p4 = scmp.ne.s32.totalorder %s11537_s14, %s15262_s6  ;;  %p15268_p6 = scmp.lt.s32.totalorder %s15262_s6, %s15262_s6 }
 0xc76   :  { %v10635_v46 = vadd.f32 %v19052_v24, %v20604_v0  ;;  %20606 = vst [vmem:[#allocation153_spill] sm:$0xff] %v19222_v4  ;;  %20607 = vst [vmem:[#allocation157_spill] sm:$0xff] %v19225_v36  ;;  %v19235_v24 = vrot.slane %v19202_v53, %v20562_v61  ;;  %v10690_v0 = vmul.f32 %v19068_v11, %v10619_v63  ;;  %v19240_v15 = vpop.f32.mrf.mxu1  ;;  %v12979_v22 = vpop.f32.mrf.mxu0 }
 0xc77   :  { %20608 = vst [vmem:[#allocation115_spill] sm:$0xff] %v19240_v15  ;;  %v19244_v5 = vrot.slane %v19212_v20, %v20562_v61  ;;  %v10696_v60 = vmul.f32 %v19078_v29, %v10625_v13  ;;  %v10700_v4 = vmul.f32 %v19068_v11, %v10629_v28  ;;  %v10701_v30 = vmul.f32 %v19078_v29, %v10630_v37  ;;  %p15269_p7 = por %p15268_p6, %p15267_p5 }
 0xc78   :  { %v19249_v38 = vadd.f32 %v12979_v22, %v12978_v57  ;;  %v10705_v63 = vmul.f32 %v19068_v11, %v10634_v27  ;;  %v10706_v25 = vmul.f32 %v19078_v29, %v10635_v46  ;;  %v19253_v21 = vpop.f32.mrf.mxu1  ;;  %v12981_v15 = vpop.f32.mrf.mxu0  ;;  %v19257_v36 = vrot.slane %v19199_v31, %v20563_v16 }
 0xc79   :  { %v19261_v61 = vrot.slane %v19202_v53, %v20563_v16  ;;  %v19265_v13 = vrot.slane %v19212_v20, %v20563_v16  ;;  %v19268_v57 = vadd.f32 %v19124_v43, %v10681_v33  ;;  %v19271_v46 = vadd.f32 %v19116_v14, %v10685_v9  ;;  %p15270_p8 = pnand %p15269_p7, %p15263_p4 }
 0xc7a   :  { %v19274_v11 = vadd.f32 %v19124_v43, %v10686_v19  ;;  %v10596_v29 = vadd.f32 %v19110_v39, %v18929_v42  ;;  %v10531_v27 = vadd.f32 %v18938_v17, %v19094_v51  ;;  %v19280_v28 = vpop.f32.mrf.mxu1  ;;  %v12982_v37 = vpop.f32.mrf.mxu0  ;;  %v19283_v16 = vadd.f32 %v19116_v14, %v10690_v0 }
 0xc7b   :  { %v19286_v33 = vadd.f32 %v19124_v43, %v10691_v35  ;;  %v19289_v9 = vadd.f32 %v19116_v14, %v10695_v56  ;;  %v19292_v19 = vadd.f32 %v19124_v43, %v10696_v60  ;;  %v19295_v42 = vadd.f32 %v19116_v14, %v10700_v4 }
 0xc7c   :  { %v19298_v17 = vadd.f32 %v19124_v43, %v10701_v30  ;;  %v10597_v51 = vadd.f32 %v19140_v6, %v18932_v8  ;;  %v10601_v0 = vadd.f32 %v19110_v39, %v18936_v7  ;;  %v19304_v35 = vpop.f32.mrf.mxu1  ;;  %v11054_v15 = vpop.f32.mrf.mxu0  ;;  %v19307_v56 = vadd.f32 %v19116_v14, %v10705_v63 }
 0xc7d   :  { %v19310_v22 = vadd.f32 %v19124_v43, %v10706_v25  ;;  %v11055_v4 = vadd.f32 %v11054_v15, %v19231_v59  ;;  %v19315_v30 = vrot.slane %v19199_v31, %v20582_v50  ;;  %v19319_v8 = vrot.slane %v19202_v53, %v20582_v50 }
 0xc7e   :  { %v19323_v7 = vrot.slane %v19212_v20, %v20582_v50  ;;  %v10667_v14 = vmul.f32 %v19136_v1, %v10596_v29  ;;  %v10602_v60 = vadd.f32 %v19140_v6, %v10531_v27  ;;  %v19327_v43 = vpop.f32.mrf.mxu1  ;;  %v11056_v63 = vpop.f32.mrf.mxu0  ;;  %v19331_v25 = vrot.slane %v19083_v55, %v20594_v32 }
 0xc7f   :  { %20609 = vst [vmem:[#allocation158_spill] sm:$0xff] %v19315_v30  ;;  %20610 = vst [vmem:[#allocation117_spill] sm:$0xff] %v19319_v8  ;;  %v19335_v37 = vrot.slane %v19199_v31, %v20594_v32  ;;  %v11280_v15 = vmul.f32 %v19235_v24, %v11055_v4  ;;  %v11057_v50 = vadd.f32 %v11056_v63, %v19257_v36 }
 0xc80   :  { %20611 = vst [vmem:[#allocation127_spill] sm:$0xff] %v19323_v7  ;;  %20612 = vst [vmem:[#allocation85_spill] sm:$0xff] %v19331_v25  ;;  %v19341_v29 = vrot.slane %v19202_v53, %v20594_v32  ;;  %v19345_v27 = vrot.slane %v19212_v20, %v20594_v32  ;;  %v10668_v7 = vmul.f32 %v19144_v12, %v10597_v51  ;;  %v19351_v30 = vpop.f32.mrf.mxu1  ;;  %v11058_v4 = vpop.f32.mrf.mxu0 }
 0xc81   :  { %v10672_v55 = vmul.f32 %v19136_v1, %v10601_v0  ;;  %v12910_v8 = vadd.f32 %v19031_v52, %v19018_v62  ;;  %v19355_v63 = vrot.slane %v19199_v31, %v20586_v23  ;;  %v11351_v25 = vadd.f32 %v19244_v5, %v11280_v15 }
 0xc82   :  { %20613 = vst [vmem:[#allocation138_spill] sm:$0xff] %v19341_v29  ;;  %20614 = vst [vmem:[#allocation136_spill] sm:$0xff] %v19345_v27  ;;  %v11281_v29 = vmul.f32 %v19261_v61, %v11057_v50  ;;  %v11059_v32 = vadd.f32 %v11058_v4, %v19231_v59  ;;  %v19362_v51 = vrot.slane %v19202_v53, %v20586_v23  ;;  %v12935_v52 = vpop.f32.mrf.mxu1  ;;  %v11060_v27 = vpop.f32.mrf.mxu0 }
 0xc83   :  { %v10673_v0 = vmul.f32 %v19144_v12, %v10602_v60  ;;  %v10606_v62 = vadd.f32 %v19110_v39, %v18943_v40  ;;  %v19368_v31 = vadd.f32 %v19152_v26, %v10667_v14  ;;  %v19372_v15 = vrot.slane %v19212_v20, %v20586_v23 }
 0xc84   :  { %20615 = vst [vmem:[#allocation155_spill] sm:$0xff] %v19362_v51  ;;  %v11396_v50 = vadd.f32 %v11351_v25, %v19162_v45  ;;  %v11352_v4 = vadd.f32 %v19265_v13, %v11281_v29  ;;  %v11285_v53 = vmul.f32 %v19235_v24, %v11059_v32  ;;  %v11061_v60 = vadd.f32 %v11060_v27, %v19257_v36  ;;  %v12936_v52 = vpop.f32.mrf.mxu1  ;;  %v11064_v14 = vpop.f32.mrf.mxu0 }
 0xc85   :  { %20616 = vst [vmem:[#allocation99_spill] sm:$0xff] %v19368_v31  ;;  %v12913_v40 = vadd.f32 %v19058_v2, %v19041_v10  ;;  %v10414_v51 = vadd.f32 %v18987_v48, %v12910_v8  ;;  %v19382_v31 = vadd.f32 %v19156_v54, %v10668_v7  ;;  %v19385_v23 = vadd.f32 %v19152_v26, %v10672_v55 }
 0xc86   :  { %v11441_v45 = vmax.f32 %v11396_v50, 0.0  ;;  %v11397_v20 = vadd.f32 %v11352_v4, %v19165_v44  ;;  %v11356_v25 = vadd.f32 %v19244_v5, %v11285_v53  ;;  %v11286_v29 = vmul.f32 %v19261_v61, %v11061_v60  ;;  %v10485_v48 = vpop.f32.mrf.mxu1  ;;  %v11066_v8 = vpop.f32.mrf.mxu0 }
 0xc87   :  { %20617 = vst [vmem:[#allocation114_spill] sm:$0xff] %v19385_v23  ;;  %v10677_v27 = vmul.f32 %v19136_v1, %v10606_v62  ;;  %v10607_v10 = vadd.f32 %v19140_v6, %v18946_v47  ;;  %v11065_v2 = vadd.f32 %v11064_v14, %v19231_v59  ;;  %v19395_v7 = vadd.f32 %v19156_v54, %v10673_v0  ;;  %v20619_v0 = vld [vmem:[#allocation94_spill] sm:$0xff]  ;;  %v20626_v23 = vld [vmem:[#allocation97_spill] sm:$0xff] }
 0xc88   :  { %v10486_v55 = vadd.f32 %v10485_v48, %v10414_v51  ;;  %11486 = vst [vmem:[#allocation43] sm:$0xff] %v11441_v45  ;;  %v11442_v32 = vmax.f32 %v11397_v20, 0.0  ;;  %v11401_v44 = vadd.f32 %v11356_v25, %v19171_v18  ;;  %v11357_v50 = vadd.f32 %v19265_v13, %v11286_v29  ;;  %v13559_v4 = vpop.f32.mrf.mxu1  ;;  %v11068_v52 = vpop.f32.mrf.mxu0  ;;  %v20620_v29 = vld [vmem:[#allocation88_spill] sm:$0xff]  ;;  %v20621_v48 = vld [vmem:[#allocation134_spill] sm:$0xff] }
 0xc89   :  { %20618 = vst [vmem:[#allocation102_spill] sm:$0xff] %v19395_v7  ;;  %v12916_v62 = vadd.f32 %v19091_v34, %v19070_v41  ;;  %v10417_v47 = vadd.f32 %v19001_v3, %v12913_v40  ;;  %v11290_v53 = vmul.f32 %v19235_v24, %v11065_v2  ;;  %v11067_v60 = vadd.f32 %v11066_v8, %v19257_v36 }
 0xc8a   :  { %v19405_v14 = vadd.f32 %v10486_v55, %v20619_v0  ;;  %11487 = vst [vmem:[#allocation43 + $0x8] sm:$0xff] %v11442_v32  ;;  %v11446_v51 = vmax.f32 %v11401_v44, 0.0  ;;  %v11402_v18 = vadd.f32 %v11357_v50, %v19174_v58  ;;  %v11069_v45 = vadd.f32 %v11068_v52, %v19231_v59  ;;  %v10488_v3 = vpop.f32.mrf.mxu1  ;;  %v11070_v25 = vpop.f32.mrf.mxu0  ;;  %v20622_v44 = vld [vmem:[#allocation152_spill] sm:$0xff]  ;;  %v20623_v50 = vld [vmem:[#allocation159_spill] sm:$0xff]  ;;  %v20625_v0 = vld [vmem:[#allocation113_spill] sm:$0xff] }
 0xc8b   :  { %v10678_v20 = vmul.f32 %v19144_v12, %v10607_v10  ;;  %v10611_v41 = vadd.f32 %v19110_v39, %v18950_v49  ;;  %v11361_v34 = vadd.f32 %v19244_v5, %v11290_v53  ;;  %v11291_v40 = vmul.f32 %v19261_v61, %v11067_v60  ;;  %v20624_v60 = vld [vmem:[#allocation125_spill] sm:$0xff] }
 0xc8c   :  { %v10541_v2 = vadd.f32 %v20621_v48, %v20620_v29  ;;  %v10489_v8 = vadd.f32 %v10488_v3, %v10417_v47  ;;  %11491 = vst [vmem:[#allocation43 + $0x28] sm:$0xff] %v11446_v51  ;;  %v11447_v55 = vmax.f32 %v11402_v18, 0.0  ;;  %v11295_v58 = vmul.f32 %v19235_v24, %v11069_v45  ;;  %v13560_v32 = vpop.f32.mrf.mxu1  ;;  %v11074_v52 = vpop.f32.mrf.mxu0  ;;  %v20627_v45 = vld [vmem:[#allocation156_spill] sm:$0xff] }
 0xc8d   :  { %v10422_v10 = vadd.f32 %v20622_v44, %v12916_v62  ;;  %v11406_v4 = vadd.f32 %v11361_v34, %v20623_v50  ;;  %v11362_v49 = vadd.f32 %v19265_v13, %v11291_v40  ;;  %v11071_v53 = vadd.f32 %v11070_v25, %v19257_v36  ;;  %v20629_v32 = vld [vmem:[#allocation133_spill] sm:$0xff]  ;;  %v20630_v44 = vld [vmem:[#allocation95_spill] sm:$0xff] }
 0xc8e   :  { %v12919_v7 = vadd.f32 %v20625_v0, %v20624_v60  ;;  %v19424_v29 = vadd.f32 %v10489_v8, %v20626_v23  ;;  %11492 = vst [vmem:[#allocation43 + $0x30] sm:$0xff] %v11447_v55  ;;  %v11366_v47 = vadd.f32 %v19244_v5, %v11295_v58  ;;  %v11075_v51 = vadd.f32 %v11074_v52, %v19231_v59  ;;  %v10493_v18 = vpop.f32.mrf.mxu1  ;;  %v11076_v40 = vpop.f32.mrf.mxu0  ;;  %v20628_v8 = vld [vmem:[#allocation157_spill] sm:$0xff]  ;;  %v20631_v60 = vld [vmem:[#allocation118_spill] sm:$0xff] }
 0xc8f   :  { %v11451_v62 = vmax.f32 %v11406_v4, 0.0  ;;  %v11407_v3 = vadd.f32 %v11362_v49, %v20627_v45  ;;  %v11296_v34 = vmul.f32 %v19261_v61, %v11071_v53  ;;  %v19431_v25 = vadd.f32 %v19152_v26, %v10677_v27 }
 0xc90   :  { %v19434_v48 = vmul.f32 %v19136_v1, %v10611_v41  ;;  %v10494_v23 = vadd.f32 %v10493_v18, %v10422_v10  ;;  %v11411_v55 = vadd.f32 %v11366_v47, %v20628_v8  ;;  %v11300_v58 = vmul.f32 %v19235_v24, %v11075_v51  ;;  %v13563_v4 = vpop.f32.mrf.mxu1  ;;  %v11078_v27 = vpop.f32.mrf.mxu0  ;;  %v20632_v41 = vld [vmem:[#allocation86_spill] sm:$0xff] }
 0xc91   :  { %v12922_v50 = vadd.f32 %v20630_v44, %v20629_v32  ;;  %11496 = vst [vmem:[#allocation43 + $0x50] sm:$0xff] %v11451_v62  ;;  %v11452_v49 = vmax.f32 %v11407_v3, 0.0  ;;  %v11367_v53 = vadd.f32 %v19265_v13, %v11296_v34  ;;  %v11077_v52 = vadd.f32 %v11076_v40, %v19257_v36  ;;  %v20633_v32 = vld [vmem:[#allocation87_spill] sm:$0xff] }
 0xc92   :  { %v19443_v0 = vadd.f32 %v10494_v23, %v20631_v60  ;;  %v10425_v10 = vadd.f32 %v20632_v41, %v12919_v7  ;;  %v11456_v18 = vmax.f32 %v11411_v55, 0.0  ;;  %v11371_v47 = vadd.f32 %v19244_v5, %v11300_v58  ;;  %v10496_v45 = vpop.f32.mrf.mxu1  ;;  %v11080_v40 = vpop.f32.mrf.mxu0  ;;  %v20636_v60 = vld [vmem:[#allocation131_spill] sm:$0xff] }
 0xc93   :  { %v10612_v51 = vadd.f32 %v19140_v6, %v10541_v2  ;;  %11497 = vst [vmem:[#allocation43 + $0x58] sm:$0xff] %v11452_v49  ;;  %v11412_v62 = vadd.f32 %v11367_v53, %v19268_v57  ;;  %v11301_v3 = vmul.f32 %v19261_v61, %v11077_v52  ;;  %v11079_v34 = vadd.f32 %v11078_v27, %v19231_v59  ;;  %v20634_v53 = vld [vmem:[#allocation121_spill] sm:$0xff]  ;;  %v20635_v52 = vld [vmem:[#allocation100_spill] sm:$0xff] }
 0xc94   :  { %v10497_v8 = vadd.f32 %v10496_v45, %v10425_v10  ;;  %11501 = vst [vmem:[#allocation43 + $0x78] sm:$0xff] %v11456_v18  ;;  %v11416_v23 = vadd.f32 %v11371_v47, %v19271_v46  ;;  %v11081_v7 = vadd.f32 %v11080_v40, %v19257_v36  ;;  %v19454_v55 = vadd.f32 %v19156_v54, %v10678_v20  ;;  %v13564_v58 = vpop.f32.mrf.mxu1  ;;  %v11084_v49 = vpop.f32.mrf.mxu0 }
 0xc95   :  { %v11457_v2 = vmax.f32 %v11412_v62, 0.0  ;;  %v10430_v44 = vadd.f32 %v20633_v32, %v12922_v50  ;;  %v11372_v57 = vadd.f32 %v19265_v13, %v11301_v3  ;;  %v11305_v4 = vmul.f32 %v19235_v24, %v11079_v34  ;;  %v20637_v3 = vld [vmem:[#allocation96_spill] sm:$0xff] }
 0xc96   :  { %v12925_v27 = vadd.f32 %v20635_v52, %v20634_v53  ;;  %v19462_v41 = vadd.f32 %v10497_v8, %v20636_v60  ;;  %v11461_v46 = vmax.f32 %v11416_v23, 0.0  ;;  %v11306_v10 = vmul.f32 %v19261_v61, %v11081_v7  ;;  %v10501_v18 = vpop.f32.mrf.mxu1  ;;  %v11086_v62 = vpop.f32.mrf.mxu0  ;;  %v20640_v53 = vld [vmem:[#allocation130_spill] sm:$0xff] }
 0xc97   :  { %v19466_v20 = vmul.f32 %v19144_v12, %v10612_v51  ;;  %11502 = vst [vmem:[#allocation43 + $0x80] sm:$0xff] %v11457_v2  ;;  %v11417_v50 = vadd.f32 %v11372_v57, %v19274_v11  ;;  %v11376_v47 = vadd.f32 %v19244_v5, %v11305_v4  ;;  %v11085_v45 = vadd.f32 %v11084_v49, %v19231_v59  ;;  %v20638_v51 = vld [vmem:[#allocation115_spill] sm:$0xff]  ;;  %v20639_v4 = vld [vmem:[#allocation89_spill] sm:$0xff] }
 0xc98   :  { %v10616_v34 = vadd.f32 %v19110_v39, %v20637_v3  ;;  %v10502_v40 = vadd.f32 %v10501_v18, %v10430_v44  ;;  %11506 = vst [vmem:[#allocation43 + $0xa0] sm:$0xff] %v11461_v46  ;;  %v11377_v8 = vadd.f32 %v19265_v13, %v11306_v10  ;;  %v11087_v23 = vadd.f32 %v11086_v62, %v19257_v36  ;;  %v13567_v58 = vpop.f32.mrf.mxu1  ;;  %v11088_v57 = vpop.f32.mrf.mxu0 }
 0xc99   :  { %v12928_v7 = vadd.f32 %v19253_v21, %v20638_v51  ;;  %v11462_v2 = vmax.f32 %v11417_v50, 0.0  ;;  %v11421_v11 = vadd.f32 %v11376_v47, %v19283_v16  ;;  %v11310_v32 = vmul.f32 %v19235_v24, %v11085_v45  ;;  %v20641_v47 = vld [vmem:[#allocation92_spill] sm:$0xff] }
 0xc9a   :  { %v19480_v49 = vadd.f32 %v10502_v40, %v20639_v4  ;;  %v10433_v44 = vadd.f32 %v20640_v53, %v12925_v27  ;;  %v11422_v52 = vadd.f32 %v11377_v8, %v19286_v33  ;;  %v11311_v60 = vmul.f32 %v19261_v61, %v11087_v23  ;;  %v10504_v46 = vpop.f32.mrf.mxu1  ;;  %v11090_v16 = vpop.f32.mrf.mxu0  ;;  %v20642_v40 = vld [vmem:[#allocation135_spill] sm:$0xff]  ;;  %v20644_v53 = vld [vmem:[#allocation120_spill] sm:$0xff] }
 0xc9b   :  { %11507 = vst [vmem:[#allocation43 + $0xa8] sm:$0xff] %v11462_v2  ;;  %v11466_v10 = vmax.f32 %v11421_v11, 0.0  ;;  %v11381_v21 = vadd.f32 %v19244_v5, %v11310_v32  ;;  %v11089_v18 = vadd.f32 %v11088_v57, %v19231_v59  ;;  %v19489_v50 = vadd.f32 %v19152_v26, %v19434_v48  ;;  %v20643_v11 = vld [vmem:[#allocation112_spill] sm:$0xff] }
 0xc9c   :  { %v10617_v45 = vadd.f32 %v19140_v6, %v20641_v47  ;;  %v10505_v27 = vadd.f32 %v10504_v46, %v10433_v44  ;;  %v11467_v62 = vmax.f32 %v11422_v52, 0.0  ;;  %v11382_v33 = vadd.f32 %v19265_v13, %v11311_v60  ;;  %v13568_v3 = vpop.f32.mrf.mxu1  ;;  %v11094_v2 = vpop.f32.mrf.mxu0 }
 0xc9d   :  { %11511 = vst [vmem:[#allocation43 + $0xc8] sm:$0xff] %v11466_v10  ;;  %v10438_v8 = vadd.f32 %v20642_v40, %v12928_v7  ;;  %v11426_v23 = vadd.f32 %v11381_v21, %v19289_v9  ;;  %v11315_v51 = vmul.f32 %v19235_v24, %v11089_v18  ;;  %v11091_v58 = vadd.f32 %v11090_v16, %v19257_v36  ;;  %v20645_v7 = vld [vmem:[#allocation93_spill] sm:$0xff]  ;;  %v20647_v40 = vld [vmem:[#allocation90_spill] sm:$0xff] }
 0xc9e   :  { %v12931_v48 = vadd.f32 %v19304_v35, %v19280_v28  ;;  %v19501_v32 = vadd.f32 %v10505_v27, %v20643_v11  ;;  %11512 = vst [vmem:[#allocation43 + $0xd0] sm:$0xff] %v11467_v62  ;;  %v11427_v57 = vadd.f32 %v11382_v33, %v19292_v19  ;;  %v11095_v4 = vadd.f32 %v11094_v2, %v19231_v59  ;;  %v10509_v9 = vpop.f32.mrf.mxu1  ;;  %v11096_v10 = vpop.f32.mrf.mxu0  ;;  %v20646_v19 = vld [vmem:[#allocation154_spill] sm:$0xff] }
 0xc9f   :  { %v10551_v44 = vadd.f32 %v20645_v7, %v20644_v53  ;;  %v11471_v52 = vmax.f32 %v11426_v23, 0.0  ;;  %v11386_v60 = vadd.f32 %v19244_v5, %v11315_v51  ;;  %v11316_v46 = vmul.f32 %v19261_v61, %v11091_v58 }
 0xca0   :  { %v12934_v28 = vadd.f32 %v19351_v30, %v19327_v43  ;;  %v10510_v35 = vadd.f32 %v10509_v9, %v10438_v8  ;;  %v11472_v21 = vmax.f32 %v11427_v57, 0.0  ;;  %v11320_v18 = vmul.f32 %v19235_v24, %v11095_v4  ;;  %v13571_v16 = vpop.f32.mrf.mxu1  ;;  %v11098_v33 = vpop.f32.mrf.mxu0  ;;  %v20648_v43 = vld [vmem:[#allocation143_spill] sm:$0xff] }
 0xca1   :  { %v10598_v59 = vadd.f32 %v20646_v19, %v19405_v14  ;;  %11516 = vst [vmem:[#allocation43 + $0xf0] sm:$0xff] %v11471_v52  ;;  %v11431_v47 = vadd.f32 %v11386_v60, %v19295_v42  ;;  %v11387_v27 = vadd.f32 %v19265_v13, %v11316_v46  ;;  %v11097_v62 = vadd.f32 %v11096_v10, %v19257_v36  ;;  %v20649_v14 = vld [vmem:[#allocation147_spill] sm:$0xff]  ;;  %v20651_v60 = vld [vmem:[#allocation122_spill] sm:$0xff]  ;;  %v20652_v10 = vld [vmem:[#allocation148_spill] sm:$0xff] }
 0xca2   :  { %v10687_v3 = vmul.f32 %v19136_v1, %v10616_v34  ;;  %v19519_v30 = vadd.f32 %v10510_v35, %v20647_v40  ;;  %11517 = vst [vmem:[#allocation43 + $0xf8] sm:$0xff] %v11472_v21  ;;  %v10441_v24 = vadd.f32 %v20648_v43, %v12931_v48  ;;  %v11391_v8 = vadd.f32 %v19244_v5, %v11320_v18  ;;  %v10512_v51 = vpop.f32.mrf.mxu1  ;;  %v11099_v2 = vpop.f32.mrf.mxu0  ;;  %v20650_v48 = vld [vmem:[#allocation153_spill] sm:$0xff] }
 0xca3   :  { %v10621_v23 = vadd.f32 %v19110_v39, %v20649_v14  ;;  %v11476_v42 = vmax.f32 %v11431_v47, 0.0  ;;  %v11432_v58 = vadd.f32 %v11387_v27, %v19298_v17  ;;  %v11321_v36 = vmul.f32 %v19261_v61, %v11097_v62 }
 0xca4   :  { %v10688_v34 = vmul.f32 %v19144_v12, %v10617_v45  ;;  %v10622_v11 = vadd.f32 %v19140_v6, %v10551_v44  ;;  %v10513_v57 = vadd.f32 %v10512_v51, %v10441_v24  ;;  %v11436_v4 = vadd.f32 %v11391_v8, %v19307_v56  ;;  %v13572_v5 = vpop.f32.mrf.mxu1  ;;  %v11216_v17 = vpop.f32.mrf.mxu0  ;;  %v20655_v8 = vld [vmem:[#allocation164_spill] sm:$0xff] }
 0xca5   :  { %v10669_v53 = vmul.f32 %v20650_v48, %v10598_v59  ;;  %11521 = vst [vmem:[#allocation43 + $0x118] sm:$0xff] %v11476_v42  ;;  %v11477_v7 = vmax.f32 %v11432_v58, 0.0  ;;  %v10446_v9 = vadd.f32 %v19249_v38, %v12934_v28  ;;  %v11392_v52 = vadd.f32 %v19265_v13, %v11321_v36  ;;  %v20653_v59 = vld [vmem:[#allocation138_spill] sm:$0xff] }
 0xca6   :  { %v10603_v61 = vadd.f32 %v20646_v19, %v19424_v29  ;;  %v19536_v45 = vadd.f32 %v10513_v57, %v20651_v60  ;;  %v11481_v44 = vmax.f32 %v11436_v4, 0.0  ;;  %v11217_v46 = vadd.f32 %v11216_v17, %v19335_v37  ;;  %v10517_v21 = vpop.f32.mrf.mxu1  ;;  %v13595_v13 = vpop.f32.mrf.mxu0  ;;  %v20658_v57 = vld [vmem:[#allocation116_spill] sm:$0xff]  ;;  %v20659_v4 = vld [vmem:[#allocation141_spill] sm:$0xff] }
 0xca7   :  { %v10692_v56 = vmul.f32 %v19136_v1, %v10621_v23  ;;  %v10626_v35 = vadd.f32 %v19110_v39, %v20652_v10  ;;  %11522 = vst [vmem:[#allocation43 + $0x120] sm:$0xff] %v11477_v7  ;;  %v11437_v38 = vadd.f32 %v11392_v52, %v19310_v22  ;;  %v19545_v28 = vadd.f32 %v19156_v54, %v19466_v20  ;;  %v20654_v22 = vld [vmem:[#allocation85_spill] sm:$0xff]  ;;  %v20656_v23 = vld [vmem:[#allocation136_spill] sm:$0xff] }
 0xca8   :  { %v10693_v29 = vmul.f32 %v19144_v12, %v10622_v11  ;;  %v10518_v18 = vadd.f32 %v10517_v21, %v10446_v9  ;;  %11526 = vst [vmem:[#allocation43 + $0x140] sm:$0xff] %v11481_v44  ;;  %v11284_v16 = vmul.f32 %v20653_v59, %v11217_v46  ;;  %v19550_v47 = vadd.f32 %v19152_v26, %v10687_v3  ;;  %v13575_v62 = vpop.f32.mrf.mxu1  ;;  %v11219_v43 = vpop.f32.mrf.mxu0  ;;  %v20660_v52 = vld [vmem:[#allocation140_spill] sm:$0xff] }
 0xca9   :  { %v10608_v27 = vadd.f32 %v20646_v19, %v19443_v0  ;;  %v11482_v33 = vmax.f32 %v11437_v38, 0.0  ;;  %v10740_v40 = vadd.f32 %v20654_v22, %v10669_v53  ;;  %v19556_v20 = vadd.f32 %v19156_v54, %v10688_v34  ;;  %v20657_v0 = vld [vmem:[#allocation132_spill] sm:$0xff] }
 0xcaa   :  { %v10674_v24 = vmul.f32 %v20650_v48, %v10603_v61  ;;  %v19560_v14 = vadd.f32 %v10518_v18, %v20655_v8  ;;  %v11355_v51 = vadd.f32 %v20656_v23, %v11284_v16  ;;  %v11220_v3 = vadd.f32 %v11219_v43, %v19335_v37  ;;  %v10520_v2 = vpop.f32.mrf.mxu1  ;;  %v13596_v34 = vpop.f32.mrf.mxu0 }
 0xcab   :  { %v10697_v42 = vmul.f32 %v19136_v1, %v10626_v35  ;;  %v10627_v58 = vadd.f32 %v19140_v6, %v20657_v0  ;;  %v10613_v36 = vadd.f32 %v20646_v19, %v19462_v41  ;;  %11527 = vst [vmem:[#allocation43 + $0x148] sm:$0xff] %v11482_v33  ;;  %v19570_v11 = vadd.f32 %v19152_v26, %v10692_v56 }
 0xcac   :  { %v10561_v53 = vadd.f32 %v20659_v4, %v20658_v57  ;;  %v11400_v5 = vadd.f32 %v11355_v51, %v10740_v40  ;;  %v11289_v7 = vmul.f32 %v20653_v59, %v11220_v3  ;;  %v19576_v9 = vadd.f32 %v19156_v54, %v10693_v29  ;;  %v13576_v44 = vpop.f32.mrf.mxu1  ;;  %v11224_v46 = vpop.f32.mrf.mxu0 }
 0xcad   :  { %v10631_v17 = vadd.f32 %v19110_v39, %v20660_v52  ;;  %v10679_v41 = vmul.f32 %v20650_v48, %v10608_v27  ;;  %v10618_v61 = vadd.f32 %v20646_v19, %v19480_v49  ;;  %v10623_v60 = vadd.f32 %v20646_v19, %v19501_v32  ;;  %v20661_v27 = vld [vmem:[#allocation158_spill] sm:$0xff]  ;;  %v20663_v52 = vld [vmem:[#allocation127_spill] sm:$0xff] }
 0xcae   :  { %v11445_v56 = vmax.f32 %v11400_v5, 0.0  ;;  %v10745_v10 = vadd.f32 %v20654_v22, %v10674_v24  ;;  %v11360_v35 = vadd.f32 %v20656_v23, %v11289_v7  ;;  %v11225_v21 = vadd.f32 %v11224_v46, %v19335_v37  ;;  %v11135_v49 = vpop.f32.mrf.mxu1  ;;  %v13599_v18 = vpop.f32.mrf.mxu0 }
 0xcaf   :  { %v10698_v38 = vmul.f32 %v19144_v12, %v10627_v58  ;;  %v10684_v13 = vmul.f32 %v20650_v48, %v10613_v36  ;;  %v10628_v29 = vadd.f32 %v20646_v19, %v19519_v30  ;;  %v19593_v32 = vadd.f32 %v19152_v26, %v10697_v42  ;;  %v20662_v42 = vld [vmem:[#allocation117_spill] sm:$0xff] }
 0xcb0   :  { %v19596_v16 = vadd.f32 %v19140_v6, %v10561_v53  ;;  %v11136_v62 = vadd.f32 %v11135_v49, %v20661_v27  ;;  %11490 = vst [vmem:[#allocation43 + $0x20] sm:$0xff] %v11445_v56  ;;  %v11405_v33 = vadd.f32 %v11360_v35, %v10745_v10  ;;  %v11294_v40 = vmul.f32 %v20653_v59, %v11225_v21  ;;  %v11137_v8 = vpop.f32.mrf.mxu1  ;;  %v11227_v3 = vpop.f32.mrf.mxu0 }
 0xcb1   :  { %v19601_v43 = vmul.f32 %v19136_v1, %v10631_v17  ;;  %v10689_v24 = vmul.f32 %v20650_v48, %v10618_v61  ;;  %v10694_v30 = vmul.f32 %v20650_v48, %v10623_v60  ;;  %v10750_v51 = vadd.f32 %v20654_v22, %v10679_v41  ;;  %v20664_v41 = vld [vmem:[#allocation155_spill] sm:$0xff] }
 0xcb2   :  { %v11282_v0 = vmul.f32 %v20662_v42, %v11136_v62  ;;  %v11138_v58 = vadd.f32 %v11137_v8, %v19355_v63  ;;  %v11450_v36 = vmax.f32 %v11405_v33, 0.0  ;;  %v11365_v2 = vadd.f32 %v20656_v23, %v11294_v40  ;;  %v11139_v57 = vpop.f32.mrf.mxu1  ;;  %v13600_v5 = vpop.f32.mrf.mxu0 }
 0xcb3   :  { %v10699_v34 = vmul.f32 %v20650_v48, %v10628_v29  ;;  %v10755_v4 = vadd.f32 %v20654_v22, %v10684_v13  ;;  %v11228_v53 = vadd.f32 %v11227_v3, %v19335_v37  ;;  %v19613_v7 = vadd.f32 %v19156_v54, %v10698_v38  ;;  %v20665_v13 = vld [vmem:[#allocation99_spill] sm:$0xff] }
 0xcb4   :  { %v11353_v17 = vadd.f32 %v20663_v52, %v11282_v0  ;;  %v11283_v61 = vmul.f32 %v20664_v41, %v11138_v58  ;;  %v11140_v60 = vadd.f32 %v11139_v57, %v20661_v27  ;;  %11495 = vst [vmem:[#allocation43 + $0x48] sm:$0xff] %v11450_v36  ;;  %v11410_v44 = vadd.f32 %v11365_v2, %v10750_v51  ;;  %v11141_v56 = vpop.f32.mrf.mxu1  ;;  %v11232_v21 = vpop.f32.mrf.mxu0 }
 0xcb5   :  { %v10633_v46 = vadd.f32 %v20646_v19, %v19536_v45  ;;  %v11299_v10 = vmul.f32 %v20653_v59, %v11228_v53  ;;  %v10760_v35 = vadd.f32 %v20654_v22, %v10689_v24  ;;  %v19623_v38 = vadd.f32 %v20654_v22, %v10694_v30 }
 0xcb6   :  { %v11398_v29 = vadd.f32 %v11353_v17, %v20665_v13  ;;  %v11354_v49 = vadd.f32 %v19372_v15, %v11283_v61  ;;  %v11287_v18 = vmul.f32 %v20662_v42, %v11140_v60  ;;  %v11142_v62 = vadd.f32 %v11141_v56, %v19355_v63  ;;  %v11145_v33 = vpop.f32.mrf.mxu1  ;;  %v13603_v51 = vpop.f32.mrf.mxu0  ;;  %v20666_v61 = vld [vmem:[#allocation114_spill] sm:$0xff] }
 0xcb7   :  { %v11455_v40 = vmax.f32 %v11410_v44, 0.0  ;;  %v11370_v45 = vadd.f32 %v20656_v23, %v11299_v10  ;;  %v11233_v8 = vadd.f32 %v11232_v21, %v19335_v37  ;;  %v19632_v24 = vadd.f32 %v20654_v22, %v10699_v34 }
 0xcb8   :  { %v11443_v30 = vmax.f32 %v11398_v29, 0.0  ;;  %v11399_v3 = vadd.f32 %v11354_v49, %v19382_v31  ;;  %v11358_v0 = vadd.f32 %v20663_v52, %v11287_v18  ;;  %v11288_v58 = vmul.f32 %v20664_v41, %v11142_v62  ;;  %v11147_v57 = vpop.f32.mrf.mxu1  ;;  %v11235_v17 = vpop.f32.mrf.mxu0  ;;  %v20667_v49 = vld [vmem:[#allocation102_spill] sm:$0xff] }
 0xcb9   :  { %v10704_v36 = vmul.f32 %v20650_v48, %v10633_v46  ;;  %v11146_v2 = vadd.f32 %v11145_v33, %v20661_v27  ;;  %11500 = vst [vmem:[#allocation43 + $0x70] sm:$0xff] %v11455_v40  ;;  %v11415_v53 = vadd.f32 %v11370_v45, %v10755_v4  ;;  %v11304_v5 = vmul.f32 %v20653_v59, %v11233_v8 }
 0xcba   :  { %11488 = vst [vmem:[#allocation43 + $0x10] sm:$0xff] %v11443_v30  ;;  %v11444_v34 = vmax.f32 %v11399_v3, 0.0  ;;  %v11403_v60 = vadd.f32 %v11358_v0, %v20666_v61  ;;  %v11359_v31 = vadd.f32 %v19372_v15, %v11288_v58  ;;  %v11148_v44 = vadd.f32 %v11147_v57, %v19355_v63  ;;  %v11149_v10 = vpop.f32.mrf.mxu1  ;;  %v13604_v4 = vpop.f32.mrf.mxu0 }
 0xcbb   :  { %v11292_v56 = vmul.f32 %v20662_v42, %v11146_v2  ;;  %v11460_v46 = vmax.f32 %v11415_v53, 0.0  ;;  %v11375_v21 = vadd.f32 %v20656_v23, %v11304_v5  ;;  %v11236_v13 = vadd.f32 %v11235_v17, %v19335_v37 }
 0xcbc   :  { %11489 = vst [vmem:[#allocation43 + $0x18] sm:$0xff] %v11444_v34  ;;  %v11448_v29 = vmax.f32 %v11403_v60, 0.0  ;;  %v11404_v18 = vadd.f32 %v11359_v31, %v20667_v49  ;;  %v11293_v62 = vmul.f32 %v20664_v41, %v11148_v44  ;;  %v11150_v33 = vadd.f32 %v11149_v10, %v20661_v27  ;;  %v11151_v8 = vpop.f32.mrf.mxu1  ;;  %v11240_v3 = vpop.f32.mrf.mxu0 }
 0xcbd   :  { %v10638_v40 = vadd.f32 %v20646_v19, %v19560_v14  ;;  %v11363_v45 = vadd.f32 %v20663_v52, %v11292_v56  ;;  %11505 = vst [vmem:[#allocation43 + $0x98] sm:$0xff] %v11460_v46  ;;  %v11420_v51 = vadd.f32 %v11375_v21, %v10760_v35  ;;  %v11309_v30 = vmul.f32 %v20653_v59, %v11236_v13 }
 0xcbe   :  { %11493 = vst [vmem:[#allocation43 + $0x38] sm:$0xff] %v11448_v29  ;;  %v11449_v0 = vmax.f32 %v11404_v18, 0.0  ;;  %v11364_v58 = vadd.f32 %v19372_v15, %v11293_v62  ;;  %v11297_v2 = vmul.f32 %v20662_v42, %v11150_v33  ;;  %v11152_v57 = vadd.f32 %v11151_v8, %v19355_v63  ;;  %v11155_v5 = vpop.f32.mrf.mxu1  ;;  %v13607_v35 = vpop.f32.mrf.mxu0 }
 0xcbf   :  { %v11408_v53 = vadd.f32 %v11363_v45, %v19431_v25  ;;  %v11465_v19 = vmax.f32 %v11420_v51, 0.0  ;;  %v11380_v14 = vadd.f32 %v20656_v23, %v11309_v30  ;;  %v11241_v17 = vadd.f32 %v11240_v3, %v19335_v37 }
 0xcc0   :  { %11494 = vst [vmem:[#allocation43 + $0x40] sm:$0xff] %v11449_v0  ;;  %v11409_v34 = vadd.f32 %v11364_v58, %v19454_v55  ;;  %v11368_v61 = vadd.f32 %v20663_v52, %v11297_v2  ;;  %v11298_v60 = vmul.f32 %v20664_v41, %v11152_v57  ;;  %v11156_v31 = vadd.f32 %v11155_v5, %v20661_v27  ;;  %v11157_v56 = vpop.f32.mrf.mxu1  ;;  %v11243_v21 = vpop.f32.mrf.mxu0 }
 0xcc1   :  { %v11453_v44 = vmax.f32 %v11408_v53, 0.0  ;;  %11510 = vst [vmem:[#allocation43 + $0xc0] sm:$0xff] %v11465_v19  ;;  %v11425_v25 = vadd.f32 %v11380_v14, %v19623_v38  ;;  %v11314_v10 = vmul.f32 %v20653_v59, %v11241_v17  ;;  %v10775_v46 = vadd.f32 %v20654_v22, %v10704_v36 }
 0xcc2   :  { %v11454_v13 = vmax.f32 %v11409_v34, 0.0  ;;  %v11413_v4 = vadd.f32 %v11368_v61, %v19489_v50  ;;  %v11369_v55 = vadd.f32 %v19372_v15, %v11298_v60  ;;  %v11302_v29 = vmul.f32 %v20662_v42, %v11156_v31  ;;  %v11159_v18 = vpop.f32.mrf.mxu1  ;;  %v13608_v45 = vpop.f32.mrf.mxu0  ;;  %v20668_v31 = vld [vmem:[#allocation150_spill] sm:$0xff] }
 0xcc3   :  { %11498 = vst [vmem:[#allocation43 + $0x60] sm:$0xff] %v11453_v44  ;;  %v11158_v49 = vadd.f32 %v11157_v56, %v19355_v63  ;;  %v11470_v62 = vmax.f32 %v11425_v25, 0.0  ;;  %v11385_v33 = vadd.f32 %v20656_v23, %v11314_v10  ;;  %v11244_v38 = vadd.f32 %v11243_v21, %v19335_v37 }
 0xcc4   :  { %11499 = vst [vmem:[#allocation43 + $0x68] sm:$0xff] %v11454_v13  ;;  %v11458_v36 = vmax.f32 %v11413_v4, 0.0  ;;  %v11414_v8 = vadd.f32 %v11369_v55, %v19545_v28  ;;  %v11373_v50 = vadd.f32 %v20663_v52, %v11302_v29  ;;  %v11160_v51 = vadd.f32 %v11159_v18, %v20661_v27  ;;  %v11161_v0 = vpop.f32.mrf.mxu1  ;;  %v11248_v57 = vpop.f32.mrf.mxu0 }
 0xcc5   :  { %v10709_v30 = vmul.f32 %v20650_v48, %v10638_v40  ;;  %v11303_v3 = vmul.f32 %v20664_v41, %v11158_v49  ;;  %11515 = vst [vmem:[#allocation43 + $0xe8] sm:$0xff] %v11470_v62  ;;  %v11430_v58 = vadd.f32 %v11385_v33, %v19632_v24  ;;  %v11319_v2 = vmul.f32 %v20653_v59, %v11244_v38 }
 0xcc6   :  { %11503 = vst [vmem:[#allocation43 + $0x88] sm:$0xff] %v11458_v36  ;;  %v11459_v53 = vmax.f32 %v11414_v8, 0.0  ;;  %v11418_v5 = vadd.f32 %v11373_v50, %v19550_v47  ;;  %v11307_v28 = vmul.f32 %v20662_v42, %v11160_v51  ;;  %v11162_v19 = vadd.f32 %v11161_v0, %v19355_v63  ;;  %v11165_v48 = vpop.f32.mrf.mxu1  ;;  %v13611_v24 = vpop.f32.mrf.mxu0  ;;  %v20669_v36 = vld [vmem:[#allocation101_spill] sm:$0xff] }
 0xcc7   :  { %v11374_v14 = vadd.f32 %v19372_v15, %v11303_v3  ;;  %v11475_v40 = vmax.f32 %v11430_v58, 0.0  ;;  %v11390_v17 = vadd.f32 %v20656_v23, %v11319_v2  ;;  %v11249_v35 = vadd.f32 %v11248_v57, %v19335_v37 }
 0xcc8   :  { %11504 = vst [vmem:[#allocation43 + $0x90] sm:$0xff] %v11459_v53  ;;  %v11463_v34 = vmax.f32 %v11418_v5, 0.0  ;;  %v11378_v61 = vadd.f32 %v20663_v52, %v11307_v28  ;;  %v11308_v60 = vmul.f32 %v20664_v41, %v11162_v19  ;;  %v11166_v47 = vadd.f32 %v11165_v48, %v20661_v27  ;;  %v11167_v25 = vpop.f32.mrf.mxu1  ;;  %v11251_v37 = vpop.f32.mrf.mxu0 }
 0xcc9   :  { %v10636_v44 = vadd.f32 %v19110_v39, %v20668_v31  ;;  %v11419_v56 = vadd.f32 %v11374_v14, %v19556_v20  ;;  %11520 = vst [vmem:[#allocation43 + $0x110] sm:$0xff] %v11475_v40  ;;  %v11435_v10 = vadd.f32 %v11390_v17, %v10775_v46  ;;  %v11324_v21 = vmul.f32 %v20653_v59, %v11249_v35 }
 0xcca   :  { %11508 = vst [vmem:[#allocation43 + $0xb0] sm:$0xff] %v11463_v34  ;;  %v11423_v13 = vadd.f32 %v11378_v61, %v19570_v11  ;;  %v11379_v4 = vadd.f32 %v19372_v15, %v11308_v60  ;;  %v11312_v55 = vmul.f32 %v20662_v42, %v11166_v47  ;;  %v11168_v29 = vadd.f32 %v11167_v25, %v19355_v63  ;;  %v11169_v18 = vpop.f32.mrf.mxu1  ;;  %v13612_v46 = vpop.f32.mrf.mxu0 }
 0xccb   :  { %v11464_v49 = vmax.f32 %v11419_v56, 0.0  ;;  %v11480_v39 = vmax.f32 %v11435_v10, 0.0  ;;  %v10780_v20 = vadd.f32 %v20654_v22, %v10709_v30  ;;  %v11395_v62 = vadd.f32 %v20656_v23, %v11324_v21 }
 0xccc   :  { %v11468_v33 = vmax.f32 %v11423_v13, 0.0  ;;  %v11424_v59 = vadd.f32 %v11379_v4, %v19576_v9  ;;  %v11383_v38 = vadd.f32 %v20663_v52, %v11312_v55  ;;  %v11313_v11 = vmul.f32 %v20664_v41, %v11168_v29  ;;  %v11171_v22 = vpop.f32.mrf.mxu1 }
 0xccd   :  { %v10703_v45 = vmul.f32 %v19144_v12, %v19596_v16  ;;  %v10637_v8 = vadd.f32 %v19140_v6, %v20669_v36  ;;  %11509 = vst [vmem:[#allocation43 + $0xb8] sm:$0xff] %v11464_v49  ;;  %v11170_v50 = vadd.f32 %v11169_v18, %v20661_v27  ;;  %11525 = vst [vmem:[#allocation43 + $0x138] sm:$0xff] %v11480_v39 }
 0xcce   :  { %v11440_v23 = vadd.f32 %v11395_v62, %v10780_v20  ;;  %11513 = vst [vmem:[#allocation43 + $0xd8] sm:$0xff] %v11468_v33  ;;  %v11469_v51 = vmax.f32 %v11424_v59, 0.0  ;;  %v11428_v9 = vadd.f32 %v11383_v38, %v19593_v32  ;;  %v11384_v30 = vadd.f32 %v19372_v15, %v11313_v11  ;;  %v11175_v58 = vpop.f32.mrf.mxu1 }
 0xccf   :  { %v11172_v3 = vadd.f32 %v11171_v22, %v19355_v63  ;;  %v10707_v0 = vmul.f32 %v19136_v1, %v10636_v44  ;;  %v11317_v16 = vmul.f32 %v20662_v42, %v11170_v50  ;;  %v11176_v5 = vadd.f32 %v11175_v58, %v20661_v27 }
 0xcd0   :  { %v11485_v6 = vmax.f32 %v11440_v23, 0.0  ;;  %11514 = vst [vmem:[#allocation43 + $0xe0] sm:$0xff] %v11469_v51  ;;  %v11473_v2 = vmax.f32 %v11428_v9, 0.0  ;;  %v11429_v57 = vadd.f32 %v11384_v30, %v19613_v7  ;;  %v10708_v32 = vmul.f32 %v19144_v12, %v10637_v8  ;;  %v11177_v14 = vpop.f32.mrf.mxu1 }
 0xcd1   :  { %v11318_v53 = vmul.f32 %v20664_v41, %v11172_v3  ;;  %v10773_v28 = vadd.f32 %v19152_v26, %v19601_v43  ;;  %v11388_v19 = vadd.f32 %v20663_v52, %v11317_v16  ;;  %v10774_v1 = vadd.f32 %v19156_v54, %v10703_v45 }
 0xcd2   :  { %11530 = vst [vmem:[#allocation43 + $0x160] sm:$0xff] %v11485_v6  ;;  %11518 = vst [vmem:[#allocation43 + $0x100] sm:$0xff] %v11473_v2  ;;  %v11474_v48 = vmax.f32 %v11429_v57, 0.0  ;;  %v11322_v7 = vmul.f32 %v20662_v42, %v11176_v5  ;;  %v11178_v17 = vadd.f32 %v11177_v14, %v19355_v63  ;;  %v11179_v35 = vpop.f32.mrf.mxu1  ;;  %v10778_v43 = vadd.f32 %v19152_v26, %v10707_v0 }
 0xcd3   :  { %v11389_v40 = vadd.f32 %v19372_v15, %v11318_v53  ;;  %v11433_v27 = vadd.f32 %v11388_v19, %v10773_v28  ;;  %v10779_v44 = vadd.f32 %v19156_v54, %v10708_v32 }
 0xcd4   :  { %11519 = vst [vmem:[#allocation43 + $0x108] sm:$0xff] %v11474_v48  ;;  %v11393_v24 = vadd.f32 %v20663_v52, %v11322_v7  ;;  %v11323_v34 = vmul.f32 %v20664_v41, %v11178_v17  ;;  %v11180_v60 = vpop.f32.mrf.mxu1 }
 0xcd5   :  { %v11434_v12 = vadd.f32 %v11389_v40, %v10774_v1  ;;  %v11478_v61 = vmax.f32 %v11433_v27, 0.0 }
 0xcd6   :  { %v11438_v31 = vadd.f32 %v11393_v24, %v10778_v43  ;;  %v11394_v42 = vadd.f32 %v19372_v15, %v11323_v34 }
 0xcd7   :  { %v11479_v47 = vmax.f32 %v11434_v12, 0.0  ;;  %11523 = vst [vmem:[#allocation43 + $0x128] sm:$0xff] %v11478_v61 }
 0xcd8   :  { %v11483_v63 = vmax.f32 %v11438_v31, 0.0  ;;  %v11439_v56 = vadd.f32 %v11394_v42, %v10779_v44 }
 0xcd9   :  { %11524 = vst [vmem:[#allocation43 + $0x130] sm:$0xff] %v11479_v47 }
 0xcda   :  { %11528 = vst [vmem:[#allocation43 + $0x150] sm:$0xff] %v11483_v63  ;;  %v11484_v26 = vmax.f32 %v11439_v56, 0.0 }
 0xcdc   :  { %11529 = vst [vmem:[#allocation43 + $0x158] sm:$0xff] %v11484_v26 }
 0xcdd   :  { %15273 = shalt.err (!%p15270_p8)
}
 0xcde   :  { %11542 = dma.vmem_to_hbm [thread:$0]  %s11537_s14, 5760, %s15614_s20, [#allocation4], %s15357_s1, %s15357_s1, %s15358_s2  }
 0xcdf   :  { %15310 = dma.done.wait [#allocation4], 5760  }
 0xce0   :  { %15311 = vsyncadd [#allocation4], 4294961536 }
 0xce1   :  { %11546 = vsyncpa [#allocation3], 1 }
 0xce2   :  { %11547 = vsyncpa [#allocation6], 1 }
 0xce3   :  { %11548 = vsyncpa [#allocation9], 1 }
 0xce4   :  { %11549 = vsyncpa [#allocation12], 1 }
 0xce5   :  { %11550 = vsyncpa [#allocation15], 1 }
 0xce6   :  { %11551 = vsyncpa [#allocation18], 1 }
 0xce7   :  { %11552 = vsyncpa [#allocation21], 1 }
 0xce8   :  { %11553 = vsyncpa [#allocation24], 1 }
 0xce9   :  { %11554 = vsyncpa [#allocation27], 1 }
 0xcea   :  { %11555 = vsyncpa [#allocation30], 1 }
 0xceb   :  { %11556 = vsyncpa [#allocation33], 1 }
 0xcec   :  { %11557 = vsyncpa [#allocation36], 1 }
 0xced   :  { %11558 = vsyncpa [#allocation39], 1 }
 0xcee   :  { %11559 = vsyncpa [#allocation42], 1 }
 0xcef   :  { %11560 = vsyncpa [#allocation4], 1 }

</bundles_post_ra>
